<compile_context>
chip_gen: v7x
topology: tpu7x:2x2x1
jax: 0.10.0
libtpu: 0.0.40
codegen_flags: <defaults>
</compile_context>

<pallas_src>
import functools
import math

import numpy as np
import jax
import jax.numpy as jnp
from jax.experimental import pallas as pl
from jax.experimental.pallas import tpu as pltpu

# ----------------------------- config ---------------------------------------
D_MODEL = 32
DIM_FF = 64
N_HEAD = 4
N_LAYERS = 2          # cfg.MODEL.ENCODER_MULTI_LAYERS
NUM_JOINTS = 8
TRANS_SIZE = (4, 4)   # (h, w) after pooling
HEATMAP_SIZE = (8, 8)
C_IN = 4              # channels fed to the (stubbed) singleformer
LN_EPS = 1e-5
BN_EPS = 1e-5
MASK_NEG = -1e30      # additive key-padding mask value (safe, no -inf arithmetic)
MXU_DTYPE = jnp.bfloat16

HW = HEATMAP_SIZE[0] * HEATMAP_SIZE[1]    # 64  pixels at heatmap resolution
TW = TRANS_SIZE[0] * TRANS_SIZE[1]        # 16  pixels at transformer resolution


# ======================= small helpers =======================================

def _const_spec(shape):
    """BlockSpec for an array that is the same (whole array) for every grid step."""
    zeros = (0,) * len(shape)
    return pl.BlockSpec(shape, lambda *_: zeros)


def _layernorm(y, g, b):
    mu = jnp.mean(y, axis=-1, keepdims=True)
    var = jnp.mean((y - mu) ** 2, axis=-1, keepdims=True)
    return (y - mu) * jax.lax.rsqrt(var + LN_EPS) * g + b


def _maxpool_3x3_s2(f, H, W):
    """3x3 / stride 2 / pad 1 max-pool of a flattened (H*W, C) spatial map.

    Row-major spatial layout (r = i*W + j).  Row stage works on whole (W, C)
    slabs; the column stage is done on a lane-dense (W, Ho*C) slab."""
    Ho, Wo = H // 2, W // 2
    C = f.shape[-1]
    rows = [f[W * i:W * (i + 1)] for i in range(H)]            # each (W, C)
    rm = []
    for oi in range(Ho):
        taps = [rows[i] for i in (2 * oi - 1, 2 * oi, 2 * oi + 1) if 0 <= i < H]
        m = taps[0]
        for t in taps[1:]:
            m = jnp.maximum(m, t)
        rm.append(m)
    RM = jnp.concatenate(rm, axis=-1)                          # (W, Ho*C), lane-dense
    cm = []
    for oj in range(Wo):
        taps = [RM[j:j + 1] for j in (2 * oj - 1, 2 * oj, 2 * oj + 1) if 0 <= j < W]
        m = taps[0]
        for t in taps[1:]:
            m = jnp.maximum(m, t)
        cm.append(m)
    CM = jnp.concatenate(cm, axis=0)                           # (Wo, Ho*C)
    # back to flattened (Ho*Wo, C), row = oi*Wo + oj
    return jnp.concatenate([CM[:, oi * C:(oi + 1) * C] for oi in range(Ho)], axis=0)


def _make_tap_selection():
    """Per-frame constant 0/1 matrices:
       G[t] (HW, hw) : nearest-2x upsample composed with the t-th zero-padded
                       3x3 shift (for the first conv of the UpConv block)
       S[t] (HW, HW) : the t-th zero-padded 3x3 shift at heatmap resolution."""
    H, W = HEATMAP_SIZE
    h, w = TRANS_SIZE
    U = np.zeros((H * W, h * w), np.float32)
    for i in range(H):
        for j in range(W):
            U[i * W + j, (i // 2) * w + (j // 2)] = 1.0        # nearest, scale 2
    S = np.zeros((9, H * W, H * W), np.float32)
    for dy in range(3):
        for dx in range(3):
            t = dy * 3 + dx
            for i in range(H):
                for j in range(W):
                    si, sj = i + dy - 1, j + dx - 1
                    if 0 <= si < H and 0 <= sj < W:
                        S[t, i * W + j, si * W + sj] = 1.0
    G = np.einsum('trc,cd->trd', S, U)                         # (9, HW, hw)
    return G, S


_G9_NP, _S9_NP = _make_tap_selection()


# ======================= the fused Pallas kernel =============================

def interformer_kernel(x_ref, mask_ref,
                       sfw_ref, sfb_ref,
                       wqkv_ref, bqkv_ref, wo_ref, bo_ref,
                       w1_ref, b1_ref, w2_ref, b2_ref, ln_ref,
                       gsel_ref, ssel_ref, m1_ref, bmap1_ref, m2_ref, bsh2_ref,
                       wft_ref, bft_ref,
                       o_ref, *, n_pad):
    """One grid step == one batch item (all N padded frames processed together)."""
    H, Wd = HEATMAP_SIZE
    N = n_pad
    d = D_MODEL
    hd = d // N_HEAD

    # ---------------- singleformer stub: 1x1 conv + bias + ReLU ----------------
    x = x_ref[0]                                               # (N*HW, C_IN) f32
    f = jnp.dot(x.astype(MXU_DTYPE), sfw_ref[...],
                preferred_element_type=jnp.float32) + sfb_ref[...]
    f = jnp.maximum(f, 0.0)                                    # (N*HW, d) == single_res

    # ---------------- 3x3/s2/p1 max-pool per frame -> encoder tokens -----------
    pooled = []
    for n in range(N):                                         # static unroll, N small
        pooled.append(_maxpool_3x3_s2(f[n * HW:(n + 1) * HW, :], H, Wd))
    tok = jnp.concatenate(pooled, axis=0)                      # (S = N*TW, d)

    # ---------------- transformer encoder (post-norm, eval/no dropout) ---------
    addmask = mask_ref[0]                                      # (1, S) additive key mask
    xt = tok
    for l in range(N_LAYERS):                                  # static unroll
        # packed QKV: one matmul; 1/sqrt(hd) already folded into the Q columns
        qkv = jnp.dot(xt.astype(MXU_DTYPE), wqkv_ref[l],
                      preferred_element_type=jnp.float32) + bqkv_ref[l]   # (S, 3d)
        heads = []
        for h in range(N_HEAD):                                # static lane-offset slices
            qh = qkv[:, h * hd:(h + 1) * hd].astype(MXU_DTYPE)
            kh = qkv[:, d + h * hd:d + (h + 1) * hd].astype(MXU_DTYPE)
            vh = qkv[:, 2 * d + h * hd:2 * d + (h + 1) * hd].astype(MXU_DTYPE)
            s = jnp.einsum('qc,kc->qk', qh, kh,
                           preferred_element_type=jnp.float32)            # (S, S)
            s = s + addmask
            s = s - jnp.max(s, axis=-1, keepdims=True)
            p = jnp.exp(s)
            p = p * pl.reciprocal(jnp.sum(p, axis=-1, keepdims=True), approx=True)
            heads.append(jnp.dot(p.astype(MXU_DTYPE), vh,
                                 preferred_element_type=jnp.float32))     # (S, hd)
        # packed output projection: heads concatenated on lanes, one matmul
        attn = jnp.dot(jnp.concatenate(heads, axis=-1).astype(MXU_DTYPE), wo_ref[l],
                       preferred_element_type=jnp.float32) + bo_ref[l]    # (S, d)

        ln = ln_ref[l]                                         # (4, d): g1, b1, g2, b2
        y = _layernorm(xt + attn, ln[0:1], ln[1:2])
        mid = jnp.maximum(
            jnp.dot(y.astype(MXU_DTYPE), w1_ref[l],
                    preferred_element_type=jnp.float32) + b1_ref[l], 0.0)
        ffo = jnp.dot(mid.astype(MXU_DTYPE), w2_ref[l],
                      preferred_element_type=jnp.float32) + b2_ref[l]
        xt = _layernorm(y + ffo, ln[2:3], ln[3:4])
    # xt: (S, d) encoded tokens (frame-major, spatial row-major)

    # ---------------- UpConv tail (fuse 1x1+BN, nearest 2x, two 3x3+BN+ReLU) ---
    # accumulate form:  h = sum_t Sel_t @ (x @ M_t), Sel block-diagonal over frames
    x4 = xt.astype(MXU_DTYPE)                                  # (S, d)
    acc1 = bmap1_ref[...]                                      # (N*HW, d) folded bias map
    for t in range(9):
        at = jnp.dot(x4, m1_ref[t], preferred_element_type=jnp.float32)          # (S, d)
        acc1 = acc1 + jnp.dot(gsel_ref[t], at.astype(MXU_DTYPE),
                              preferred_element_type=jnp.float32)                # (N*HW, d)
    h1 = jnp.maximum(acc1, 0.0).astype(MXU_DTYPE)

    acc2 = jnp.zeros((N * HW, d), jnp.float32)
    for t in range(9):
        bt = jnp.dot(h1, m2_ref[t], preferred_element_type=jnp.float32)          # (N*HW, d)
        acc2 = acc2 + jnp.dot(ssel_ref[t], bt.astype(MXU_DTYPE),
                              preferred_element_type=jnp.float32)
    h2 = jnp.maximum(acc2 + bsh2_ref[...], 0.0)                # (N*HW, d)

    # residual with single_res (DOMAIN_TRANS=False), final 1x1 joint head emitted
    # TRANSPOSED so the store is lane-dense (J sublanes x N*HW lanes).
    r = h2 + f                                                 # (N*HW, d)
    o_t = jnp.einsum('jc,mc->jm', wft_ref[...], r.astype(MXU_DTYPE),
                     preferred_element_type=jnp.float32) + bft_ref[...]   # (J, N*HW)
    o_ref[0] = o_t


# ======================= parameter construction ==============================

def init_params(key):
    def u(k, shape, s=0.1):
        return jax.random.uniform(k, shape, jnp.float32, -s, s)

    ks = iter(jax.random.split(key, 16))
    hd = D_MODEL // N_HEAD
    p = {}

    # TODO(synk): external `singleformer` backbone stubbed as 1x1 conv + ReLU.
    p['sf_w'] = u(next(ks), (C_IN, D_MODEL)).astype(MXU_DTYPE)
    p['sf_b'] = u(next(ks), (1, D_MODEL))

    # transformer encoder, weights stacked over layers; attention score scale
    # 1/sqrt(hd) folded into the Q columns of the packed QKV projection.
    wqkv = u(next(ks), (N_LAYERS, D_MODEL, 3 * D_MODEL))
    bqkv = u(next(ks), (N_LAYERS, 1, 3 * D_MODEL))
    qs = 1.0 / math.sqrt(hd)
    wqkv = wqkv.at[:, :, :D_MODEL].multiply(qs)
    bqkv = bqkv.at[:, :, :D_MODEL].multiply(qs)
    p['wqkv'] = wqkv.astype(MXU_DTYPE)
    p['bqkv'] = bqkv
    p['wo'] = u(next(ks), (N_LAYERS, D_MODEL, D_MODEL)).astype(MXU_DTYPE)
    p['bo'] = u(next(ks), (N_LAYERS, 1, D_MODEL))
    p['w1'] = u(next(ks), (N_LAYERS, D_MODEL, DIM_FF)).astype(MXU_DTYPE)
    p['b1'] = u(next(ks), (N_LAYERS, 1, DIM_FF))
    p['w2'] = u(next(ks), (N_LAYERS, DIM_FF, D_MODEL)).astype(MXU_DTYPE)
    p['b2'] = u(next(ks), (N_LAYERS, 1, D_MODEL))
    p['ln'] = jnp.tile(jnp.concatenate(
        [jnp.ones((1, 1, D_MODEL)), jnp.zeros((1, 1, D_MODEL)),
         jnp.ones((1, 1, D_MODEL)), jnp.zeros((1, 1, D_MODEL))], axis=1),
        (N_LAYERS, 1, 1))

    # ---- UpConv tail (eval-mode BN).  Fold:  fuse-1x1-conv, BN0, BN1, BN2 into
    # the per-tap 3x3 weight blocks + a constant (HW, d) bias map for conv1.
    gamma = jnp.ones((3, D_MODEL))
    beta = jnp.zeros((3, D_MODEL))
    mean = jnp.zeros((3, D_MODEL))
    var = jnp.ones((3, D_MODEL))
    bn_s = gamma * jax.lax.rsqrt(var + BN_EPS)
    bn_b = beta - mean * bn_s
    wf = u(next(ks), (D_MODEL, D_MODEL))                  # fuse 1x1 conv (no bias)
    w1t = u(next(ks), (9, D_MODEL, D_MODEL), 0.05)        # double_conv[0] taps
    w2t = u(next(ks), (9, D_MODEL, D_MODEL), 0.05)        # double_conv[1] taps
    wf_s = wf * bn_s[0][None, :]
    p['M1'] = (jnp.einsum('cd,tde->tce', wf_s, w1t)
               * bn_s[1][None, None, :]).astype(MXU_DTYPE)              # (9, d, d)
    inb = jnp.asarray(_G9_NP.sum(axis=2))                               # (9, HW) tap in-bounds
    bias_t = jnp.einsum('c,tcd->td', bn_b[0], w1t)                      # (9, d)  BN0 shift -> conv1
    p['conv1_bias_map'] = (jnp.einsum('th,td->hd', inb, bias_t)
                           * bn_s[1][None, :] + bn_b[1][None, :])       # (HW, d)
    p['M2'] = (w2t * bn_s[2][None, None, :]).astype(MXU_DTYPE)          # (9, d, d)
    p['bn2_shift'] = bn_b[2][None, :]                                   # (1, d)

    # final 1x1 conv (FINAL_CONV_KERNEL=1 -> padding 0) with bias, stored
    # transposed for the lane-dense output store.
    fw = u(next(ks), (D_MODEL, NUM_JOINTS))
    fb = u(next(ks), (1, NUM_JOINTS))
    p['final_wT'] = jnp.transpose(fw).astype(MXU_DTYPE)                 # (J, d)
    p['final_bT'] = jnp.transpose(fb)                                   # (J, 1)
    return p


# ======================= InterFormer forward =================================

@functools.partial(jax.jit, static_argnames=("length",))
def interformer_forward(x_nchw, params, length):
    """x_nchw: (sum(length), C_IN, H, W) with (H, W) = HEATMAP_SIZE.
    length: static tuple of per-sequence frame counts.  Returns (T, J, H, W)."""
    bs = len(length)
    N = max(length)
    T = sum(length)
    H, W = HEATMAP_SIZE
    S = N * TW
    J = NUM_JOINTS

    # NCHW -> flattened NHWC rows (r = i*W + j)
    x = jnp.transpose(x_nchw, (0, 2, 3, 1)).astype(jnp.float32).reshape(T, HW, C_IN)

    # ---- padding_tensor / get_mask: trace-time-static index arithmetic ----
    offs = np.cumsum([0] + list(length))[:-1]
    pad_idx = np.zeros((bs, N), np.int32)
    valid = np.zeros((bs, N), np.float32)
    for b, n in enumerate(length):
        pad_idx[b, :n] = offs[b] + np.arange(n)
        valid[b, :n] = 1.0
    xpad = x[jnp.asarray(pad_idx.reshape(-1))] * jnp.asarray(valid.reshape(-1, 1, 1))
    xpad = xpad.reshape(bs, N * HW, C_IN)                                 # (bs, N*HW, C_IN)

    tok_valid = np.repeat(valid, TW, axis=1)                              # (bs, S)
    addmask = jnp.asarray(
        np.where(tok_valid > 0, 0.0, MASK_NEG).astype(np.float32)[:, None, :])  # (bs, 1, S)

    # block-diagonal (over the N padded frames) one-hot selection matrices so the
    # tail's per-tap matmuls cover all frames of a batch item at once (M = N*HW).
    eyeN = np.eye(N, dtype=np.float32)
    gbig = jnp.asarray(np.stack([np.kron(eyeN, _G9_NP[t]) for t in range(9)]), MXU_DTYPE)
    sbig = jnp.asarray(np.stack([np.kron(eyeN, _S9_NP[t]) for t in range(9)]), MXU_DTYPE)
    bmap1 = jnp.tile(params['conv1_bias_map'], (N, 1))                    # (N*HW, d)

    weights = [params['sf_w'], params['sf_b'],
               params['wqkv'], params['bqkv'], params['wo'], params['bo'],
               params['w1'], params['b1'], params['w2'], params['b2'], params['ln'],
               gbig, sbig, params['M1'], bmap1, params['M2'], params['bn2_shift'],
               params['final_wT'], params['final_bT']]

    in_specs = [pl.BlockSpec((1, N * HW, C_IN), lambda b: (b, 0, 0)),
                pl.BlockSpec((1, 1, S), lambda b: (b, 0, 0))]
    in_specs += [_const_spec(w.shape) for w in weights]

    out = pl.pallas_call(
        functools.partial(interformer_kernel, n_pad=N),
        grid=(bs,),
        in_specs=in_specs,
        out_specs=pl.BlockSpec((1, J, N * HW), lambda b: (b, 0, 0)),
        out_shape=jax.ShapeDtypeStruct((bs, J, N * HW), jnp.float32),
        compiler_params=pltpu.CompilerParams(dimension_semantics=("parallel",)),
    )(xpad, addmask, *weights)

    # ---- get_valid_output + back to NCHW (wrapper-side layout plumbing) ----
    out = out.reshape(bs, J, N, HW).transpose(0, 2, 1, 3).reshape(bs * N, J, H, W)
    valid_idx = np.asarray([b * N + n for b in range(bs) for n in range(length[b])],
                           np.int32)
    return out[jnp.asarray(valid_idx)]                                    # (T, J, H, W)


# ======================= main ================================================

if __name__ == "__main__":
    key = jax.random.PRNGKey(0)
    k_param, k_x = jax.random.split(key)

    length = (3, 2)                       # frame count per batch item (static)
    total = sum(length)
    x = jax.random.normal(k_x, (total, C_IN, HEATMAP_SIZE[0], HEATMAP_SIZE[1]),
                          dtype=jnp.float32)

    params = init_params(k_param)

    out = interformer_forward(x, params, length)
    out = jax.block_until_ready(out)

    assert out.shape == (total, NUM_JOINTS, HEATMAP_SIZE[0], HEATMAP_SIZE[1]), out.shape
    assert bool(jnp.all(jnp.isfinite(out)))
    print("KERNEL_OK")
</pallas_src>

<mosaic_0001>
module attributes {stable_mosaic.version = 11 : i64} {
  func.func @interformer_kernel(%arg0: i32, %arg1: memref<1x192x4xf32, #tpu.memory_space<vmem>>, %arg2: memref<1x1x48xf32, #tpu.memory_space<vmem>>, %arg3: memref<4x32xbf16, #tpu.memory_space<vmem>>, %arg4: memref<1x32xf32, #tpu.memory_space<vmem>>, %arg5: memref<2x32x96xbf16, #tpu.memory_space<vmem>>, %arg6: memref<2x1x96xf32, #tpu.memory_space<vmem>>, %arg7: memref<2x32x32xbf16, #tpu.memory_space<vmem>>, %arg8: memref<2x1x32xf32, #tpu.memory_space<vmem>>, %arg9: memref<2x32x64xbf16, #tpu.memory_space<vmem>>, %arg10: memref<2x1x64xf32, #tpu.memory_space<vmem>>, %arg11: memref<2x64x32xbf16, #tpu.memory_space<vmem>>, %arg12: memref<2x1x32xf32, #tpu.memory_space<vmem>>, %arg13: memref<2x4x32xf32, #tpu.memory_space<vmem>>, %arg14: memref<9x192x48xbf16, #tpu.memory_space<vmem>>, %arg15: memref<9x192x192xbf16, #tpu.memory_space<vmem>>, %arg16: memref<9x32x32xbf16, #tpu.memory_space<vmem>>, %arg17: memref<192x32xf32, #tpu.memory_space<vmem>>, %arg18: memref<9x32x32xbf16, #tpu.memory_space<vmem>>, %arg19: memref<1x32xf32, #tpu.memory_space<vmem>>, %arg20: memref<8x32xbf16, #tpu.memory_space<vmem>>, %arg21: memref<8x1xf32, #tpu.memory_space<vmem>>, %arg22: memref<1x8x192xf32, #tpu.memory_space<vmem>>) attributes {dimension_semantics = [#tpu.dimension_semantics<parallel>], iteration_bounds = array<i64: 2>, scalar_prefetch = 0 : i64, scratch_operands = 0 : i64, tpu.core_type = #tpu.core_type<tc>, window_params = [{transform_indices = @transform_0, window_bounds = array<i64: 1, 192, 4>}, {transform_indices = @transform_1, window_bounds = array<i64: 1, 1, 48>}, {pipeline_mode = #tpu.pipeline_mode<synchronous>, transform_indices = @transform_2, window_bounds = array<i64: 4, 32>}, {pipeline_mode = #tpu.pipeline_mode<synchronous>, transform_indices = @transform_3, window_bounds = array<i64: 1, 32>}, {pipeline_mode = #tpu.pipeline_mode<synchronous>, transform_indices = @transform_4, window_bounds = array<i64: 2, 32, 96>}, {pipeline_mode = #tpu.pipeline_mode<synchronous>, transform_indices = @transform_5, window_bounds = array<i64: 2, 1, 96>}, {pipeline_mode = #tpu.pipeline_mode<synchronous>, transform_indices = @transform_6, window_bounds = array<i64: 2, 32, 32>}, {pipeline_mode = #tpu.pipeline_mode<synchronous>, transform_indices = @transform_7, window_bounds = array<i64: 2, 1, 32>}, {pipeline_mode = #tpu.pipeline_mode<synchronous>, transform_indices = @transform_8, window_bounds = array<i64: 2, 32, 64>}, {pipeline_mode = #tpu.pipeline_mode<synchronous>, transform_indices = @transform_9, window_bounds = array<i64: 2, 1, 64>}, {pipeline_mode = #tpu.pipeline_mode<synchronous>, transform_indices = @transform_10, window_bounds = array<i64: 2, 64, 32>}, {pipeline_mode = #tpu.pipeline_mode<synchronous>, transform_indices = @transform_11, window_bounds = array<i64: 2, 1, 32>}, {pipeline_mode = #tpu.pipeline_mode<synchronous>, transform_indices = @transform_12, window_bounds = array<i64: 2, 4, 32>}, {pipeline_mode = #tpu.pipeline_mode<synchronous>, transform_indices = @transform_13, window_bounds = array<i64: 9, 192, 48>}, {pipeline_mode = #tpu.pipeline_mode<synchronous>, transform_indices = @transform_14, window_bounds = array<i64: 9, 192, 192>}, {pipeline_mode = #tpu.pipeline_mode<synchronous>, transform_indices = @transform_15, window_bounds = array<i64: 9, 32, 32>}, {pipeline_mode = #tpu.pipeline_mode<synchronous>, transform_indices = @transform_16, window_bounds = array<i64: 192, 32>}, {pipeline_mode = #tpu.pipeline_mode<synchronous>, transform_indices = @transform_17, window_bounds = array<i64: 9, 32, 32>}, {pipeline_mode = #tpu.pipeline_mode<synchronous>, transform_indices = @transform_18, window_bounds = array<i64: 1, 32>}, {pipeline_mode = #tpu.pipeline_mode<synchronous>, transform_indices = @transform_19, window_bounds = array<i64: 8, 32>}, {pipeline_mode = #tpu.pipeline_mode<synchronous>, transform_indices = @transform_20, window_bounds = array<i64: 8, 1>}, {transform_indices = @transform_21, window_bounds = array<i64: 1, 8, 192>}]} {
    %c0 = arith.constant 0 : index
    %c0_0 = arith.constant 0 : index
    %c0_1 = arith.constant 0 : index
    %0 = vector.load %arg1[%c0, %c0_0, %c0_1] : memref<1x192x4xf32, #tpu.memory_space<vmem>>, vector<1x192x4xf32>
    %1 = vector.shape_cast %0 : vector<1x192x4xf32> to vector<192x4xf32>
    %2 = arith.truncf %1 : vector<192x4xf32> to vector<192x4xbf16>
    %c0_2 = arith.constant 0 : index
    %c0_3 = arith.constant 0 : index
    %3 = vector.load %arg3[%c0_2, %c0_3] : memref<4x32xbf16, #tpu.memory_space<vmem>>, vector<4x32xbf16>
    %cst = arith.constant dense<0.000000e+00> : vector<192x32xf32>
    %4 = tpu.matmul %2, %3, %cst {dimension_numbers = #tpu.dot_dimension_numbers<[1], [0], [0], [1], [0, 0, 1, 1], [], []>} : vector<192x4xbf16>, vector<4x32xbf16>, vector<192x32xf32> -> vector<192x32xf32>
    %c0_4 = arith.constant 0 : index
    %c0_5 = arith.constant 0 : index
    %5 = vector.load %arg4[%c0_4, %c0_5] : memref<1x32xf32, #tpu.memory_space<vmem>>, vector<1x32xf32>
    %6 = vector.broadcast %5 : vector<1x32xf32> to vector<192x32xf32>
    %7 = arith.addf %4, %6 : vector<192x32xf32>
    %cst_6 = arith.constant 0.000000e+00 : f32
    %8 = vector.broadcast %cst_6 : f32 to vector<192x32xf32>
    %9 = arith.maximumf %7, %8 : vector<192x32xf32>
    %10 = vector.extract_strided_slice %9 {offsets = [0, 0], sizes = [64, 32], strides = [1, 1]} : vector<192x32xf32> to vector<64x32xf32>
    %11 = vector.extract_strided_slice %10 {offsets = [0, 0], sizes = [8, 32], strides = [1, 1]} : vector<64x32xf32> to vector<8x32xf32>
    %12 = vector.extract_strided_slice %10 {offsets = [8, 0], sizes = [8, 32], strides = [1, 1]} : vector<64x32xf32> to vector<8x32xf32>
    %13 = vector.extract_strided_slice %10 {offsets = [16, 0], sizes = [8, 32], strides = [1, 1]} : vector<64x32xf32> to vector<8x32xf32>
    %14 = vector.extract_strided_slice %10 {offsets = [24, 0], sizes = [8, 32], strides = [1, 1]} : vector<64x32xf32> to vector<8x32xf32>
    %15 = vector.extract_strided_slice %10 {offsets = [32, 0], sizes = [8, 32], strides = [1, 1]} : vector<64x32xf32> to vector<8x32xf32>
    %16 = vector.extract_strided_slice %10 {offsets = [40, 0], sizes = [8, 32], strides = [1, 1]} : vector<64x32xf32> to vector<8x32xf32>
    %17 = vector.extract_strided_slice %10 {offsets = [48, 0], sizes = [8, 32], strides = [1, 1]} : vector<64x32xf32> to vector<8x32xf32>
    %18 = vector.extract_strided_slice %10 {offsets = [56, 0], sizes = [8, 32], strides = [1, 1]} : vector<64x32xf32> to vector<8x32xf32>
    %19 = arith.maximumf %11, %12 : vector<8x32xf32>
    %20 = arith.maximumf %12, %13 : vector<8x32xf32>
    %21 = arith.maximumf %20, %14 : vector<8x32xf32>
    %22 = arith.maximumf %14, %15 : vector<8x32xf32>
    %23 = arith.maximumf %22, %16 : vector<8x32xf32>
    %24 = arith.maximumf %16, %17 : vector<8x32xf32>
    %25 = arith.maximumf %24, %18 : vector<8x32xf32>
    %26 = tpu.concatenate %19, %21, %23, %25 in 1 : vector<8x32xf32>, vector<8x32xf32>, vector<8x32xf32>, vector<8x32xf32> -> vector<8x128xf32>
    %27 = vector.extract_strided_slice %26 {offsets = [0, 0], sizes = [1, 128], strides = [1, 1]} : vector<8x128xf32> to vector<1x128xf32>
    %28 = vector.extract_strided_slice %26 {offsets = [1, 0], sizes = [1, 128], strides = [1, 1]} : vector<8x128xf32> to vector<1x128xf32>
    %29 = arith.maximumf %27, %28 : vector<1x128xf32>
    %30 = vector.extract_strided_slice %26 {offsets = [1, 0], sizes = [1, 128], strides = [1, 1]} : vector<8x128xf32> to vector<1x128xf32>
    %31 = vector.extract_strided_slice %26 {offsets = [2, 0], sizes = [1, 128], strides = [1, 1]} : vector<8x128xf32> to vector<1x128xf32>
    %32 = vector.extract_strided_slice %26 {offsets = [3, 0], sizes = [1, 128], strides = [1, 1]} : vector<8x128xf32> to vector<1x128xf32>
    %33 = arith.maximumf %30, %31 : vector<1x128xf32>
    %34 = arith.maximumf %33, %32 : vector<1x128xf32>
    %35 = vector.extract_strided_slice %26 {offsets = [3, 0], sizes = [1, 128], strides = [1, 1]} : vector<8x128xf32> to vector<1x128xf32>
    %36 = vector.extract_strided_slice %26 {offsets = [4, 0], sizes = [1, 128], strides = [1, 1]} : vector<8x128xf32> to vector<1x128xf32>
    %37 = vector.extract_strided_slice %26 {offsets = [5, 0], sizes = [1, 128], strides = [1, 1]} : vector<8x128xf32> to vector<1x128xf32>
    %38 = arith.maximumf %35, %36 : vector<1x128xf32>
    %39 = arith.maximumf %38, %37 : vector<1x128xf32>
    %40 = vector.extract_strided_slice %26 {offsets = [5, 0], sizes = [1, 128], strides = [1, 1]} : vector<8x128xf32> to vector<1x128xf32>
    %41 = vector.extract_strided_slice %26 {offsets = [6, 0], sizes = [1, 128], strides = [1, 1]} : vector<8x128xf32> to vector<1x128xf32>
    %42 = vector.extract_strided_slice %26 {offsets = [7, 0], sizes = [1, 128], strides = [1, 1]} : vector<8x128xf32> to vector<1x128xf32>
    %43 = arith.maximumf %40, %41 : vector<1x128xf32>
    %44 = arith.maximumf %43, %42 : vector<1x128xf32>
    %45 = tpu.concatenate %29, %34, %39, %44 in 0 : vector<1x128xf32>, vector<1x128xf32>, vector<1x128xf32>, vector<1x128xf32> -> vector<4x128xf32>
    %46 = vector.extract_strided_slice %45 {offsets = [0, 0], sizes = [4, 32], strides = [1, 1]} : vector<4x128xf32> to vector<4x32xf32>
    %47 = vector.extract_strided_slice %45 {offsets = [0, 32], sizes = [4, 32], strides = [1, 1]} : vector<4x128xf32> to vector<4x32xf32>
    %48 = vector.extract_strided_slice %45 {offsets = [0, 64], sizes = [4, 32], strides = [1, 1]} : vector<4x128xf32> to vector<4x32xf32>
    %49 = vector.extract_strided_slice %45 {offsets = [0, 96], sizes = [4, 32], strides = [1, 1]} : vector<4x128xf32> to vector<4x32xf32>
    %50 = tpu.concatenate %46, %47, %48, %49 in 0 : vector<4x32xf32>, vector<4x32xf32>, vector<4x32xf32>, vector<4x32xf32> -> vector<16x32xf32>
    %51 = vector.extract_strided_slice %9 {offsets = [64, 0], sizes = [64, 32], strides = [1, 1]} : vector<192x32xf32> to vector<64x32xf32>
    %52 = vector.extract_strided_slice %51 {offsets = [0, 0], sizes = [8, 32], strides = [1, 1]} : vector<64x32xf32> to vector<8x32xf32>
    %53 = vector.extract_strided_slice %51 {offsets = [8, 0], sizes = [8, 32], strides = [1, 1]} : vector<64x32xf32> to vector<8x32xf32>
    %54 = vector.extract_strided_slice %51 {offsets = [16, 0], sizes = [8, 32], strides = [1, 1]} : vector<64x32xf32> to vector<8x32xf32>
    %55 = vector.extract_strided_slice %51 {offsets = [24, 0], sizes = [8, 32], strides = [1, 1]} : vector<64x32xf32> to vector<8x32xf32>
    %56 = vector.extract_strided_slice %51 {offsets = [32, 0], sizes = [8, 32], strides = [1, 1]} : vector<64x32xf32> to vector<8x32xf32>
    %57 = vector.extract_strided_slice %51 {offsets = [40, 0], sizes = [8, 32], strides = [1, 1]} : vector<64x32xf32> to vector<8x32xf32>
    %58 = vector.extract_strided_slice %51 {offsets = [48, 0], sizes = [8, 32], strides = [1, 1]} : vector<64x32xf32> to vector<8x32xf32>
    %59 = vector.extract_strided_slice %51 {offsets = [56, 0], sizes = [8, 32], strides = [1, 1]} : vector<64x32xf32> to vector<8x32xf32>
    %60 = arith.maximumf %52, %53 : vector<8x32xf32>
    %61 = arith.maximumf %53, %54 : vector<8x32xf32>
    %62 = arith.maximumf %61, %55 : vector<8x32xf32>
    %63 = arith.maximumf %55, %56 : vector<8x32xf32>
    %64 = arith.maximumf %63, %57 : vector<8x32xf32>
    %65 = arith.maximumf %57, %58 : vector<8x32xf32>
    %66 = arith.maximumf %65, %59 : vector<8x32xf32>
    %67 = tpu.concatenate %60, %62, %64, %66 in 1 : vector<8x32xf32>, vector<8x32xf32>, vector<8x32xf32>, vector<8x32xf32> -> vector<8x128xf32>
    %68 = vector.extract_strided_slice %67 {offsets = [0, 0], sizes = [1, 128], strides = [1, 1]} : vector<8x128xf32> to vector<1x128xf32>
    %69 = vector.extract_strided_slice %67 {offsets = [1, 0], sizes = [1, 128], strides = [1, 1]} : vector<8x128xf32> to vector<1x128xf32>
    %70 = arith.maximumf %68, %69 : vector<1x128xf32>
    %71 = vector.extract_strided_slice %67 {offsets = [1, 0], sizes = [1, 128], strides = [1, 1]} : vector<8x128xf32> to vector<1x128xf32>
    %72 = vector.extract_strided_slice %67 {offsets = [2, 0], sizes = [1, 128], strides = [1, 1]} : vector<8x128xf32> to vector<1x128xf32>
    %73 = vector.extract_strided_slice %67 {offsets = [3, 0], sizes = [1, 128], strides = [1, 1]} : vector<8x128xf32> to vector<1x128xf32>
    %74 = arith.maximumf %71, %72 : vector<1x128xf32>
    %75 = arith.maximumf %74, %73 : vector<1x128xf32>
    %76 = vector.extract_strided_slice %67 {offsets = [3, 0], sizes = [1, 128], strides = [1, 1]} : vector<8x128xf32> to vector<1x128xf32>
    %77 = vector.extract_strided_slice %67 {offsets = [4, 0], sizes = [1, 128], strides = [1, 1]} : vector<8x128xf32> to vector<1x128xf32>
    %78 = vector.extract_strided_slice %67 {offsets = [5, 0], sizes = [1, 128], strides = [1, 1]} : vector<8x128xf32> to vector<1x128xf32>
    %79 = arith.maximumf %76, %77 : vector<1x128xf32>
    %80 = arith.maximumf %79, %78 : vector<1x128xf32>
    %81 = vector.extract_strided_slice %67 {offsets = [5, 0], sizes = [1, 128], strides = [1, 1]} : vector<8x128xf32> to vector<1x128xf32>
    %82 = vector.extract_strided_slice %67 {offsets = [6, 0], sizes = [1, 128], strides = [1, 1]} : vector<8x128xf32> to vector<1x128xf32>
    %83 = vector.extract_strided_slice %67 {offsets = [7, 0], sizes = [1, 128], strides = [1, 1]} : vector<8x128xf32> to vector<1x128xf32>
    %84 = arith.maximumf %81, %82 : vector<1x128xf32>
    %85 = arith.maximumf %84, %83 : vector<1x128xf32>
    %86 = tpu.concatenate %70, %75, %80, %85 in 0 : vector<1x128xf32>, vector<1x128xf32>, vector<1x128xf32>, vector<1x128xf32> -> vector<4x128xf32>
    %87 = vector.extract_strided_slice %86 {offsets = [0, 0], sizes = [4, 32], strides = [1, 1]} : vector<4x128xf32> to vector<4x32xf32>
    %88 = vector.extract_strided_slice %86 {offsets = [0, 32], sizes = [4, 32], strides = [1, 1]} : vector<4x128xf32> to vector<4x32xf32>
    %89 = vector.extract_strided_slice %86 {offsets = [0, 64], sizes = [4, 32], strides = [1, 1]} : vector<4x128xf32> to vector<4x32xf32>
    %90 = vector.extract_strided_slice %86 {offsets = [0, 96], sizes = [4, 32], strides = [1, 1]} : vector<4x128xf32> to vector<4x32xf32>
    %91 = tpu.concatenate %87, %88, %89, %90 in 0 : vector<4x32xf32>, vector<4x32xf32>, vector<4x32xf32>, vector<4x32xf32> -> vector<16x32xf32>
    %92 = vector.extract_strided_slice %9 {offsets = [128, 0], sizes = [64, 32], strides = [1, 1]} : vector<192x32xf32> to vector<64x32xf32>
    %93 = vector.extract_strided_slice %92 {offsets = [0, 0], sizes = [8, 32], strides = [1, 1]} : vector<64x32xf32> to vector<8x32xf32>
    %94 = vector.extract_strided_slice %92 {offsets = [8, 0], sizes = [8, 32], strides = [1, 1]} : vector<64x32xf32> to vector<8x32xf32>
    %95 = vector.extract_strided_slice %92 {offsets = [16, 0], sizes = [8, 32], strides = [1, 1]} : vector<64x32xf32> to vector<8x32xf32>
    %96 = vector.extract_strided_slice %92 {offsets = [24, 0], sizes = [8, 32], strides = [1, 1]} : vector<64x32xf32> to vector<8x32xf32>
    %97 = vector.extract_strided_slice %92 {offsets = [32, 0], sizes = [8, 32], strides = [1, 1]} : vector<64x32xf32> to vector<8x32xf32>
    %98 = vector.extract_strided_slice %92 {offsets = [40, 0], sizes = [8, 32], strides = [1, 1]} : vector<64x32xf32> to vector<8x32xf32>
    %99 = vector.extract_strided_slice %92 {offsets = [48, 0], sizes = [8, 32], strides = [1, 1]} : vector<64x32xf32> to vector<8x32xf32>
    %100 = vector.extract_strided_slice %92 {offsets = [56, 0], sizes = [8, 32], strides = [1, 1]} : vector<64x32xf32> to vector<8x32xf32>
    %101 = arith.maximumf %93, %94 : vector<8x32xf32>
    %102 = arith.maximumf %94, %95 : vector<8x32xf32>
    %103 = arith.maximumf %102, %96 : vector<8x32xf32>
    %104 = arith.maximumf %96, %97 : vector<8x32xf32>
    %105 = arith.maximumf %104, %98 : vector<8x32xf32>
    %106 = arith.maximumf %98, %99 : vector<8x32xf32>
    %107 = arith.maximumf %106, %100 : vector<8x32xf32>
    %108 = tpu.concatenate %101, %103, %105, %107 in 1 : vector<8x32xf32>, vector<8x32xf32>, vector<8x32xf32>, vector<8x32xf32> -> vector<8x128xf32>
    %109 = vector.extract_strided_slice %108 {offsets = [0, 0], sizes = [1, 128], strides = [1, 1]} : vector<8x128xf32> to vector<1x128xf32>
    %110 = vector.extract_strided_slice %108 {offsets = [1, 0], sizes = [1, 128], strides = [1, 1]} : vector<8x128xf32> to vector<1x128xf32>
    %111 = arith.maximumf %109, %110 : vector<1x128xf32>
    %112 = vector.extract_strided_slice %108 {offsets = [1, 0], sizes = [1, 128], strides = [1, 1]} : vector<8x128xf32> to vector<1x128xf32>
    %113 = vector.extract_strided_slice %108 {offsets = [2, 0], sizes = [1, 128], strides = [1, 1]} : vector<8x128xf32> to vector<1x128xf32>
    %114 = vector.extract_strided_slice %108 {offsets = [3, 0], sizes = [1, 128], strides = [1, 1]} : vector<8x128xf32> to vector<1x128xf32>
    %115 = arith.maximumf %112, %113 : vector<1x128xf32>
    %116 = arith.maximumf %115, %114 : vector<1x128xf32>
    %117 = vector.extract_strided_slice %108 {offsets = [3, 0], sizes = [1, 128], strides = [1, 1]} : vector<8x128xf32> to vector<1x128xf32>
    %118 = vector.extract_strided_slice %108 {offsets = [4, 0], sizes = [1, 128], strides = [1, 1]} : vector<8x128xf32> to vector<1x128xf32>
    %119 = vector.extract_strided_slice %108 {offsets = [5, 0], sizes = [1, 128], strides = [1, 1]} : vector<8x128xf32> to vector<1x128xf32>
    %120 = arith.maximumf %117, %118 : vector<1x128xf32>
    %121 = arith.maximumf %120, %119 : vector<1x128xf32>
    %122 = vector.extract_strided_slice %108 {offsets = [5, 0], sizes = [1, 128], strides = [1, 1]} : vector<8x128xf32> to vector<1x128xf32>
    %123 = vector.extract_strided_slice %108 {offsets = [6, 0], sizes = [1, 128], strides = [1, 1]} : vector<8x128xf32> to vector<1x128xf32>
    %124 = vector.extract_strided_slice %108 {offsets = [7, 0], sizes = [1, 128], strides = [1, 1]} : vector<8x128xf32> to vector<1x128xf32>
    %125 = arith.maximumf %122, %123 : vector<1x128xf32>
    %126 = arith.maximumf %125, %124 : vector<1x128xf32>
    %127 = tpu.concatenate %111, %116, %121, %126 in 0 : vector<1x128xf32>, vector<1x128xf32>, vector<1x128xf32>, vector<1x128xf32> -> vector<4x128xf32>
    %128 = vector.extract_strided_slice %127 {offsets = [0, 0], sizes = [4, 32], strides = [1, 1]} : vector<4x128xf32> to vector<4x32xf32>
    %129 = vector.extract_strided_slice %127 {offsets = [0, 32], sizes = [4, 32], strides = [1, 1]} : vector<4x128xf32> to vector<4x32xf32>
    %130 = vector.extract_strided_slice %127 {offsets = [0, 64], sizes = [4, 32], strides = [1, 1]} : vector<4x128xf32> to vector<4x32xf32>
    %131 = vector.extract_strided_slice %127 {offsets = [0, 96], sizes = [4, 32], strides = [1, 1]} : vector<4x128xf32> to vector<4x32xf32>
    %132 = tpu.concatenate %128, %129, %130, %131 in 0 : vector<4x32xf32>, vector<4x32xf32>, vector<4x32xf32>, vector<4x32xf32> -> vector<16x32xf32>
    %133 = tpu.concatenate %50, %91, %132 in 0 : vector<16x32xf32>, vector<16x32xf32>, vector<16x32xf32> -> vector<48x32xf32>
    %c0_7 = arith.constant 0 : index
    %c0_8 = arith.constant 0 : index
    %c0_9 = arith.constant 0 : index
    %134 = vector.load %arg2[%c0_7, %c0_8, %c0_9] : memref<1x1x48xf32, #tpu.memory_space<vmem>>, vector<1x1x48xf32>
    %135 = vector.shape_cast %134 : vector<1x1x48xf32> to vector<1x48xf32>
    %136 = arith.truncf %133 : vector<48x32xf32> to vector<48x32xbf16>
    %c0_10 = arith.constant 0 : index
    %c0_11 = arith.constant 0 : index
    %c0_12 = arith.constant 0 : index
    %137 = vector.load %arg5[%c0_10, %c0_11, %c0_12] : memref<2x32x96xbf16, #tpu.memory_space<vmem>>, vector<1x32x96xbf16>
    %138 = vector.shape_cast %137 : vector<1x32x96xbf16> to vector<32x96xbf16>
    %cst_13 = arith.constant dense<0.000000e+00> : vector<48x96xf32>
    %139 = tpu.matmul %136, %138, %cst_13 {dimension_numbers = #tpu.dot_dimension_numbers<[1], [0], [0], [1], [0, 0, 1, 1], [], []>} : vector<48x32xbf16>, vector<32x96xbf16>, vector<48x96xf32> -> vector<48x96xf32>
    %c0_14 = arith.constant 0 : index
    %c0_15 = arith.constant 0 : index
    %c0_16 = arith.constant 0 : index
    %140 = vector.load %arg6[%c0_14, %c0_15, %c0_16] : memref<2x1x96xf32, #tpu.memory_space<vmem>>, vector<1x1x96xf32>
    %141 = vector.shape_cast %140 : vector<1x1x96xf32> to vector<1x96xf32>
    %142 = vector.broadcast %141 : vector<1x96xf32> to vector<48x96xf32>
    %143 = arith.addf %139, %142 : vector<48x96xf32>
    %144 = vector.extract_strided_slice %143 {offsets = [0, 0], sizes = [48, 8], strides = [1, 1]} : vector<48x96xf32> to vector<48x8xf32>
    %145 = arith.truncf %144 : vector<48x8xf32> to vector<48x8xbf16>
    %146 = vector.extract_strided_slice %143 {offsets = [0, 32], sizes = [48, 8], strides = [1, 1]} : vector<48x96xf32> to vector<48x8xf32>
    %147 = arith.truncf %146 : vector<48x8xf32> to vector<48x8xbf16>
    %148 = vector.extract_strided_slice %143 {offsets = [0, 64], sizes = [48, 8], strides = [1, 1]} : vector<48x96xf32> to vector<48x8xf32>
    %149 = arith.truncf %148 : vector<48x8xf32> to vector<48x8xbf16>
    "tpu.trace_start"() <{level = 10 : i32, message = "qc,kc->qk"}> : () -> ()
    %cst_17 = arith.constant dense<0.000000e+00> : vector<48x48xf32>
    %150 = tpu.matmul %145, %147, %cst_17 {dimension_numbers = #tpu.dot_dimension_numbers<[1], [1], [0], [0], [0, 0, 1, 0], [], []>} : vector<48x8xbf16>, vector<48x8xbf16>, vector<48x48xf32> -> vector<48x48xf32>
    "tpu.trace_stop"() : () -> ()
    %151 = vector.broadcast %135 : vector<1x48xf32> to vector<48x48xf32>
    %152 = arith.addf %150, %151 : vector<48x48xf32>
    %cst_18 = arith.constant dense<0xFF800000> : vector<48xf32>
    %153 = vector.multi_reduction <maximumf>, %152, %cst_18 [1] : vector<48x48xf32> to vector<48xf32>
    %154 = vector.shape_cast %153 : vector<48xf32> to vector<48x1xf32>
    %155 = vector.broadcast %154 : vector<48x1xf32> to vector<48x48xf32>
    %156 = arith.subf %152, %155 : vector<48x48xf32>
    %157 = math.exp %156 : vector<48x48xf32>
    %cst_19 = arith.constant dense<0.000000e+00> : vector<48xf32>
    %158 = vector.multi_reduction <add>, %157, %cst_19 [1] : vector<48x48xf32> to vector<48xf32>
    %159 = vector.shape_cast %158 : vector<48xf32> to vector<48x1xf32>
    %160 = tpu.reciprocal %159 {approx = true} : vector<48x1xf32> -> vector<48x1xf32>
    %161 = vector.broadcast %160 : vector<48x1xf32> to vector<48x48xf32>
    %162 = arith.mulf %157, %161 : vector<48x48xf32>
    %163 = arith.truncf %162 : vector<48x48xf32> to vector<48x48xbf16>
    %cst_20 = arith.constant dense<0.000000e+00> : vector<48x8xf32>
    %164 = tpu.matmul %163, %149, %cst_20 {dimension_numbers = #tpu.dot_dimension_numbers<[1], [0], [0], [1], [0, 0, 1, 1], [], []>} : vector<48x48xbf16>, vector<48x8xbf16>, vector<48x8xf32> -> vector<48x8xf32>
    %165 = vector.extract_strided_slice %143 {offsets = [0, 8], sizes = [48, 8], strides = [1, 1]} : vector<48x96xf32> to vector<48x8xf32>
    %166 = arith.truncf %165 : vector<48x8xf32> to vector<48x8xbf16>
    %167 = vector.extract_strided_slice %143 {offsets = [0, 40], sizes = [48, 8], strides = [1, 1]} : vector<48x96xf32> to vector<48x8xf32>
    %168 = arith.truncf %167 : vector<48x8xf32> to vector<48x8xbf16>
    %169 = vector.extract_strided_slice %143 {offsets = [0, 72], sizes = [48, 8], strides = [1, 1]} : vector<48x96xf32> to vector<48x8xf32>
    %170 = arith.truncf %169 : vector<48x8xf32> to vector<48x8xbf16>
    "tpu.trace_start"() <{level = 10 : i32, message = "qc,kc->qk"}> : () -> ()
    %cst_21 = arith.constant dense<0.000000e+00> : vector<48x48xf32>
    %171 = tpu.matmul %166, %168, %cst_21 {dimension_numbers = #tpu.dot_dimension_numbers<[1], [1], [0], [0], [0, 0, 1, 0], [], []>} : vector<48x8xbf16>, vector<48x8xbf16>, vector<48x48xf32> -> vector<48x48xf32>
    "tpu.trace_stop"() : () -> ()
    %172 = vector.broadcast %135 : vector<1x48xf32> to vector<48x48xf32>
    %173 = arith.addf %171, %172 : vector<48x48xf32>
    %cst_22 = arith.constant dense<0xFF800000> : vector<48xf32>
    %174 = vector.multi_reduction <maximumf>, %173, %cst_22 [1] : vector<48x48xf32> to vector<48xf32>
    %175 = vector.shape_cast %174 : vector<48xf32> to vector<48x1xf32>
    %176 = vector.broadcast %175 : vector<48x1xf32> to vector<48x48xf32>
    %177 = arith.subf %173, %176 : vector<48x48xf32>
    %178 = math.exp %177 : vector<48x48xf32>
    %cst_23 = arith.constant dense<0.000000e+00> : vector<48xf32>
    %179 = vector.multi_reduction <add>, %178, %cst_23 [1] : vector<48x48xf32> to vector<48xf32>
    %180 = vector.shape_cast %179 : vector<48xf32> to vector<48x1xf32>
    %181 = tpu.reciprocal %180 {approx = true} : vector<48x1xf32> -> vector<48x1xf32>
    %182 = vector.broadcast %181 : vector<48x1xf32> to vector<48x48xf32>
    %183 = arith.mulf %178, %182 : vector<48x48xf32>
    %184 = arith.truncf %183 : vector<48x48xf32> to vector<48x48xbf16>
    %cst_24 = arith.constant dense<0.000000e+00> : vector<48x8xf32>
    %185 = tpu.matmul %184, %170, %cst_24 {dimension_numbers = #tpu.dot_dimension_numbers<[1], [0], [0], [1], [0, 0, 1, 1], [], []>} : vector<48x48xbf16>, vector<48x8xbf16>, vector<48x8xf32> -> vector<48x8xf32>
    %186 = vector.extract_strided_slice %143 {offsets = [0, 16], sizes = [48, 8], strides = [1, 1]} : vector<48x96xf32> to vector<48x8xf32>
    %187 = arith.truncf %186 : vector<48x8xf32> to vector<48x8xbf16>
    %188 = vector.extract_strided_slice %143 {offsets = [0, 48], sizes = [48, 8], strides = [1, 1]} : vector<48x96xf32> to vector<48x8xf32>
    %189 = arith.truncf %188 : vector<48x8xf32> to vector<48x8xbf16>
    %190 = vector.extract_strided_slice %143 {offsets = [0, 80], sizes = [48, 8], strides = [1, 1]} : vector<48x96xf32> to vector<48x8xf32>
    %191 = arith.truncf %190 : vector<48x8xf32> to vector<48x8xbf16>
    "tpu.trace_start"() <{level = 10 : i32, message = "qc,kc->qk"}> : () -> ()
    %cst_25 = arith.constant dense<0.000000e+00> : vector<48x48xf32>
    %192 = tpu.matmul %187, %189, %cst_25 {dimension_numbers = #tpu.dot_dimension_numbers<[1], [1], [0], [0], [0, 0, 1, 0], [], []>} : vector<48x8xbf16>, vector<48x8xbf16>, vector<48x48xf32> -> vector<48x48xf32>
    "tpu.trace_stop"() : () -> ()
    %193 = vector.broadcast %135 : vector<1x48xf32> to vector<48x48xf32>
    %194 = arith.addf %192, %193 : vector<48x48xf32>
    %cst_26 = arith.constant dense<0xFF800000> : vector<48xf32>
    %195 = vector.multi_reduction <maximumf>, %194, %cst_26 [1] : vector<48x48xf32> to vector<48xf32>
    %196 = vector.shape_cast %195 : vector<48xf32> to vector<48x1xf32>
    %197 = vector.broadcast %196 : vector<48x1xf32> to vector<48x48xf32>
    %198 = arith.subf %194, %197 : vector<48x48xf32>
    %199 = math.exp %198 : vector<48x48xf32>
    %cst_27 = arith.constant dense<0.000000e+00> : vector<48xf32>
    %200 = vector.multi_reduction <add>, %199, %cst_27 [1] : vector<48x48xf32> to vector<48xf32>
    %201 = vector.shape_cast %200 : vector<48xf32> to vector<48x1xf32>
    %202 = tpu.reciprocal %201 {approx = true} : vector<48x1xf32> -> vector<48x1xf32>
    %203 = vector.broadcast %202 : vector<48x1xf32> to vector<48x48xf32>
    %204 = arith.mulf %199, %203 : vector<48x48xf32>
    %205 = arith.truncf %204 : vector<48x48xf32> to vector<48x48xbf16>
    %cst_28 = arith.constant dense<0.000000e+00> : vector<48x8xf32>
    %206 = tpu.matmul %205, %191, %cst_28 {dimension_numbers = #tpu.dot_dimension_numbers<[1], [0], [0], [1], [0, 0, 1, 1], [], []>} : vector<48x48xbf16>, vector<48x8xbf16>, vector<48x8xf32> -> vector<48x8xf32>
    %207 = vector.extract_strided_slice %143 {offsets = [0, 24], sizes = [48, 8], strides = [1, 1]} : vector<48x96xf32> to vector<48x8xf32>
    %208 = arith.truncf %207 : vector<48x8xf32> to vector<48x8xbf16>
    %209 = vector.extract_strided_slice %143 {offsets = [0, 56], sizes = [48, 8], strides = [1, 1]} : vector<48x96xf32> to vector<48x8xf32>
    %210 = arith.truncf %209 : vector<48x8xf32> to vector<48x8xbf16>
    %211 = vector.extract_strided_slice %143 {offsets = [0, 88], sizes = [48, 8], strides = [1, 1]} : vector<48x96xf32> to vector<48x8xf32>
    %212 = arith.truncf %211 : vector<48x8xf32> to vector<48x8xbf16>
    "tpu.trace_start"() <{level = 10 : i32, message = "qc,kc->qk"}> : () -> ()
    %cst_29 = arith.constant dense<0.000000e+00> : vector<48x48xf32>
    %213 = tpu.matmul %208, %210, %cst_29 {dimension_numbers = #tpu.dot_dimension_numbers<[1], [1], [0], [0], [0, 0, 1, 0], [], []>} : vector<48x8xbf16>, vector<48x8xbf16>, vector<48x48xf32> -> vector<48x48xf32>
    "tpu.trace_stop"() : () -> ()
    %214 = vector.broadcast %135 : vector<1x48xf32> to vector<48x48xf32>
    %215 = arith.addf %213, %214 : vector<48x48xf32>
    %cst_30 = arith.constant dense<0xFF800000> : vector<48xf32>
    %216 = vector.multi_reduction <maximumf>, %215, %cst_30 [1] : vector<48x48xf32> to vector<48xf32>
    %217 = vector.shape_cast %216 : vector<48xf32> to vector<48x1xf32>
    %218 = vector.broadcast %217 : vector<48x1xf32> to vector<48x48xf32>
    %219 = arith.subf %215, %218 : vector<48x48xf32>
    %220 = math.exp %219 : vector<48x48xf32>
    %cst_31 = arith.constant dense<0.000000e+00> : vector<48xf32>
    %221 = vector.multi_reduction <add>, %220, %cst_31 [1] : vector<48x48xf32> to vector<48xf32>
    %222 = vector.shape_cast %221 : vector<48xf32> to vector<48x1xf32>
    %223 = tpu.reciprocal %222 {approx = true} : vector<48x1xf32> -> vector<48x1xf32>
    %224 = vector.broadcast %223 : vector<48x1xf32> to vector<48x48xf32>
    %225 = arith.mulf %220, %224 : vector<48x48xf32>
    %226 = arith.truncf %225 : vector<48x48xf32> to vector<48x48xbf16>
    %cst_32 = arith.constant dense<0.000000e+00> : vector<48x8xf32>
    %227 = tpu.matmul %226, %212, %cst_32 {dimension_numbers = #tpu.dot_dimension_numbers<[1], [0], [0], [1], [0, 0, 1, 1], [], []>} : vector<48x48xbf16>, vector<48x8xbf16>, vector<48x8xf32> -> vector<48x8xf32>
    %228 = tpu.concatenate %164, %185, %206, %227 in 1 : vector<48x8xf32>, vector<48x8xf32>, vector<48x8xf32>, vector<48x8xf32> -> vector<48x32xf32>
    %229 = arith.truncf %228 : vector<48x32xf32> to vector<48x32xbf16>
    %c0_33 = arith.constant 0 : index
    %c0_34 = arith.constant 0 : index
    %c0_35 = arith.constant 0 : index
    %230 = vector.load %arg7[%c0_33, %c0_34, %c0_35] : memref<2x32x32xbf16, #tpu.memory_space<vmem>>, vector<1x32x32xbf16>
    %231 = vector.shape_cast %230 : vector<1x32x32xbf16> to vector<32x32xbf16>
    %cst_36 = arith.constant dense<0.000000e+00> : vector<48x32xf32>
    %232 = tpu.matmul %229, %231, %cst_36 {dimension_numbers = #tpu.dot_dimension_numbers<[1], [0], [0], [1], [0, 0, 1, 1], [], []>} : vector<48x32xbf16>, vector<32x32xbf16>, vector<48x32xf32> -> vector<48x32xf32>
    %c0_37 = arith.constant 0 : index
    %c0_38 = arith.constant 0 : index
    %c0_39 = arith.constant 0 : index
    %233 = vector.load %arg8[%c0_37, %c0_38, %c0_39] : memref<2x1x32xf32, #tpu.memory_space<vmem>>, vector<1x1x32xf32>
    %234 = vector.shape_cast %233 : vector<1x1x32xf32> to vector<1x32xf32>
    %235 = vector.broadcast %234 : vector<1x32xf32> to vector<48x32xf32>
    %236 = arith.addf %232, %235 : vector<48x32xf32>
    %c0_40 = arith.constant 0 : index
    %c0_41 = arith.constant 0 : index
    %c0_42 = arith.constant 0 : index
    %237 = vector.load %arg13[%c0_40, %c0_41, %c0_42] : memref<2x4x32xf32, #tpu.memory_space<vmem>>, vector<1x4x32xf32>
    %238 = vector.shape_cast %237 : vector<1x4x32xf32> to vector<4x32xf32>
    %239 = arith.addf %133, %236 : vector<48x32xf32>
    %240 = vector.extract_strided_slice %238 {offsets = [0, 0], sizes = [1, 32], strides = [1, 1]} : vector<4x32xf32> to vector<1x32xf32>
    %241 = vector.extract_strided_slice %238 {offsets = [1, 0], sizes = [1, 32], strides = [1, 1]} : vector<4x32xf32> to vector<1x32xf32>
    %cst_43 = arith.constant dense<0.000000e+00> : vector<48xf32>
    %242 = vector.multi_reduction <add>, %239, %cst_43 [1] : vector<48x32xf32> to vector<48xf32>
    %243 = vector.shape_cast %242 : vector<48xf32> to vector<48x1xf32>
    %cst_44 = arith.constant 3.200000e+01 : f32
    %244 = vector.broadcast %cst_44 : f32 to vector<48x1xf32>
    %245 = arith.divf %243, %244 : vector<48x1xf32>
    %246 = vector.broadcast %245 : vector<48x1xf32> to vector<48x32xf32>
    %247 = arith.subf %239, %246 : vector<48x32xf32>
    %248 = arith.mulf %247, %247 : vector<48x32xf32>
    %cst_45 = arith.constant dense<0.000000e+00> : vector<48xf32>
    %249 = vector.multi_reduction <add>, %248, %cst_45 [1] : vector<48x32xf32> to vector<48xf32>
    %250 = vector.shape_cast %249 : vector<48xf32> to vector<48x1xf32>
    %cst_46 = arith.constant 3.200000e+01 : f32
    %251 = vector.broadcast %cst_46 : f32 to vector<48x1xf32>
    %252 = arith.divf %250, %251 : vector<48x1xf32>
    %253 = vector.broadcast %245 : vector<48x1xf32> to vector<48x32xf32>
    %254 = arith.subf %239, %253 : vector<48x32xf32>
    %cst_47 = arith.constant 9.99999974E-6 : f32
    %255 = vector.broadcast %cst_47 : f32 to vector<48x1xf32>
    %256 = arith.addf %252, %255 : vector<48x1xf32>
    %257 = math.rsqrt %256 : vector<48x1xf32>
    %258 = vector.broadcast %257 : vector<48x1xf32> to vector<48x32xf32>
    %259 = arith.mulf %254, %258 : vector<48x32xf32>
    %260 = vector.broadcast %240 : vector<1x32xf32> to vector<48x32xf32>
    %261 = arith.mulf %259, %260 : vector<48x32xf32>
    %262 = vector.broadcast %241 : vector<1x32xf32> to vector<48x32xf32>
    %263 = arith.addf %261, %262 : vector<48x32xf32>
    %264 = arith.truncf %263 : vector<48x32xf32> to vector<48x32xbf16>
    %c0_48 = arith.constant 0 : index
    %c0_49 = arith.constant 0 : index
    %c0_50 = arith.constant 0 : index
    %265 = vector.load %arg9[%c0_48, %c0_49, %c0_50] : memref<2x32x64xbf16, #tpu.memory_space<vmem>>, vector<1x32x64xbf16>
    %266 = vector.shape_cast %265 : vector<1x32x64xbf16> to vector<32x64xbf16>
    %cst_51 = arith.constant dense<0.000000e+00> : vector<48x64xf32>
    %267 = tpu.matmul %264, %266, %cst_51 {dimension_numbers = #tpu.dot_dimension_numbers<[1], [0], [0], [1], [0, 0, 1, 1], [], []>} : vector<48x32xbf16>, vector<32x64xbf16>, vector<48x64xf32> -> vector<48x64xf32>
    %c0_52 = arith.constant 0 : index
    %c0_53 = arith.constant 0 : index
    %c0_54 = arith.constant 0 : index
    %268 = vector.load %arg10[%c0_52, %c0_53, %c0_54] : memref<2x1x64xf32, #tpu.memory_space<vmem>>, vector<1x1x64xf32>
    %269 = vector.shape_cast %268 : vector<1x1x64xf32> to vector<1x64xf32>
    %270 = vector.broadcast %269 : vector<1x64xf32> to vector<48x64xf32>
    %271 = arith.addf %267, %270 : vector<48x64xf32>
    %cst_55 = arith.constant 0.000000e+00 : f32
    %272 = vector.broadcast %cst_55 : f32 to vector<48x64xf32>
    %273 = arith.maximumf %271, %272 : vector<48x64xf32>
    %274 = arith.truncf %273 : vector<48x64xf32> to vector<48x64xbf16>
    %c0_56 = arith.constant 0 : index
    %c0_57 = arith.constant 0 : index
    %c0_58 = arith.constant 0 : index
    %275 = vector.load %arg11[%c0_56, %c0_57, %c0_58] : memref<2x64x32xbf16, #tpu.memory_space<vmem>>, vector<1x64x32xbf16>
    %276 = vector.shape_cast %275 : vector<1x64x32xbf16> to vector<64x32xbf16>
    %cst_59 = arith.constant dense<0.000000e+00> : vector<48x32xf32>
    %277 = tpu.matmul %274, %276, %cst_59 {dimension_numbers = #tpu.dot_dimension_numbers<[1], [0], [0], [1], [0, 0, 1, 1], [], []>} : vector<48x64xbf16>, vector<64x32xbf16>, vector<48x32xf32> -> vector<48x32xf32>
    %c0_60 = arith.constant 0 : index
    %c0_61 = arith.constant 0 : index
    %c0_62 = arith.constant 0 : index
    %278 = vector.load %arg12[%c0_60, %c0_61, %c0_62] : memref<2x1x32xf32, #tpu.memory_space<vmem>>, vector<1x1x32xf32>
    %279 = vector.shape_cast %278 : vector<1x1x32xf32> to vector<1x32xf32>
    %280 = vector.broadcast %279 : vector<1x32xf32> to vector<48x32xf32>
    %281 = arith.addf %277, %280 : vector<48x32xf32>
    %282 = arith.addf %263, %281 : vector<48x32xf32>
    %283 = vector.extract_strided_slice %238 {offsets = [2, 0], sizes = [1, 32], strides = [1, 1]} : vector<4x32xf32> to vector<1x32xf32>
    %284 = vector.extract_strided_slice %238 {offsets = [3, 0], sizes = [1, 32], strides = [1, 1]} : vector<4x32xf32> to vector<1x32xf32>
    %cst_63 = arith.constant dense<0.000000e+00> : vector<48xf32>
    %285 = vector.multi_reduction <add>, %282, %cst_63 [1] : vector<48x32xf32> to vector<48xf32>
    %286 = vector.shape_cast %285 : vector<48xf32> to vector<48x1xf32>
    %cst_64 = arith.constant 3.200000e+01 : f32
    %287 = vector.broadcast %cst_64 : f32 to vector<48x1xf32>
    %288 = arith.divf %286, %287 : vector<48x1xf32>
    %289 = vector.broadcast %288 : vector<48x1xf32> to vector<48x32xf32>
    %290 = arith.subf %282, %289 : vector<48x32xf32>
    %291 = arith.mulf %290, %290 : vector<48x32xf32>
    %cst_65 = arith.constant dense<0.000000e+00> : vector<48xf32>
    %292 = vector.multi_reduction <add>, %291, %cst_65 [1] : vector<48x32xf32> to vector<48xf32>
    %293 = vector.shape_cast %292 : vector<48xf32> to vector<48x1xf32>
    %cst_66 = arith.constant 3.200000e+01 : f32
    %294 = vector.broadcast %cst_66 : f32 to vector<48x1xf32>
    %295 = arith.divf %293, %294 : vector<48x1xf32>
    %296 = vector.broadcast %288 : vector<48x1xf32> to vector<48x32xf32>
    %297 = arith.subf %282, %296 : vector<48x32xf32>
    %cst_67 = arith.constant 9.99999974E-6 : f32
    %298 = vector.broadcast %cst_67 : f32 to vector<48x1xf32>
    %299 = arith.addf %295, %298 : vector<48x1xf32>
    %300 = math.rsqrt %299 : vector<48x1xf32>
    %301 = vector.broadcast %300 : vector<48x1xf32> to vector<48x32xf32>
    %302 = arith.mulf %297, %301 : vector<48x32xf32>
    %303 = vector.broadcast %283 : vector<1x32xf32> to vector<48x32xf32>
    %304 = arith.mulf %302, %303 : vector<48x32xf32>
    %305 = vector.broadcast %284 : vector<1x32xf32> to vector<48x32xf32>
    %306 = arith.addf %304, %305 : vector<48x32xf32>
    %307 = arith.truncf %306 : vector<48x32xf32> to vector<48x32xbf16>
    %c1 = arith.constant 1 : index
    %c0_68 = arith.constant 0 : index
    %c0_69 = arith.constant 0 : index
    %308 = vector.load %arg5[%c1, %c0_68, %c0_69] : memref<2x32x96xbf16, #tpu.memory_space<vmem>>, vector<1x32x96xbf16>
    %309 = vector.shape_cast %308 : vector<1x32x96xbf16> to vector<32x96xbf16>
    %cst_70 = arith.constant dense<0.000000e+00> : vector<48x96xf32>
    %310 = tpu.matmul %307, %309, %cst_70 {dimension_numbers = #tpu.dot_dimension_numbers<[1], [0], [0], [1], [0, 0, 1, 1], [], []>} : vector<48x32xbf16>, vector<32x96xbf16>, vector<48x96xf32> -> vector<48x96xf32>
    %c1_71 = arith.constant 1 : index
    %c0_72 = arith.constant 0 : index
    %c0_73 = arith.constant 0 : index
    %311 = vector.load %arg6[%c1_71, %c0_72, %c0_73] : memref<2x1x96xf32, #tpu.memory_space<vmem>>, vector<1x1x96xf32>
    %312 = vector.shape_cast %311 : vector<1x1x96xf32> to vector<1x96xf32>
    %313 = vector.broadcast %312 : vector<1x96xf32> to vector<48x96xf32>
    %314 = arith.addf %310, %313 : vector<48x96xf32>
    %315 = vector.extract_strided_slice %314 {offsets = [0, 0], sizes = [48, 8], strides = [1, 1]} : vector<48x96xf32> to vector<48x8xf32>
    %316 = arith.truncf %315 : vector<48x8xf32> to vector<48x8xbf16>
    %317 = vector.extract_strided_slice %314 {offsets = [0, 32], sizes = [48, 8], strides = [1, 1]} : vector<48x96xf32> to vector<48x8xf32>
    %318 = arith.truncf %317 : vector<48x8xf32> to vector<48x8xbf16>
    %319 = vector.extract_strided_slice %314 {offsets = [0, 64], sizes = [48, 8], strides = [1, 1]} : vector<48x96xf32> to vector<48x8xf32>
    %320 = arith.truncf %319 : vector<48x8xf32> to vector<48x8xbf16>
    "tpu.trace_start"() <{level = 10 : i32, message = "qc,kc->qk"}> : () -> ()
    %cst_74 = arith.constant dense<0.000000e+00> : vector<48x48xf32>
    %321 = tpu.matmul %316, %318, %cst_74 {dimension_numbers = #tpu.dot_dimension_numbers<[1], [1], [0], [0], [0, 0, 1, 0], [], []>} : vector<48x8xbf16>, vector<48x8xbf16>, vector<48x48xf32> -> vector<48x48xf32>
    "tpu.trace_stop"() : () -> ()
    %322 = vector.broadcast %135 : vector<1x48xf32> to vector<48x48xf32>
    %323 = arith.addf %321, %322 : vector<48x48xf32>
    %cst_75 = arith.constant dense<0xFF800000> : vector<48xf32>
    %324 = vector.multi_reduction <maximumf>, %323, %cst_75 [1] : vector<48x48xf32> to vector<48xf32>
    %325 = vector.shape_cast %324 : vector<48xf32> to vector<48x1xf32>
    %326 = vector.broadcast %325 : vector<48x1xf32> to vector<48x48xf32>
    %327 = arith.subf %323, %326 : vector<48x48xf32>
    %328 = math.exp %327 : vector<48x48xf32>
    %cst_76 = arith.constant dense<0.000000e+00> : vector<48xf32>
    %329 = vector.multi_reduction <add>, %328, %cst_76 [1] : vector<48x48xf32> to vector<48xf32>
    %330 = vector.shape_cast %329 : vector<48xf32> to vector<48x1xf32>
    %331 = tpu.reciprocal %330 {approx = true} : vector<48x1xf32> -> vector<48x1xf32>
    %332 = vector.broadcast %331 : vector<48x1xf32> to vector<48x48xf32>
    %333 = arith.mulf %328, %332 : vector<48x48xf32>
    %334 = arith.truncf %333 : vector<48x48xf32> to vector<48x48xbf16>
    %cst_77 = arith.constant dense<0.000000e+00> : vector<48x8xf32>
    %335 = tpu.matmul %334, %320, %cst_77 {dimension_numbers = #tpu.dot_dimension_numbers<[1], [0], [0], [1], [0, 0, 1, 1], [], []>} : vector<48x48xbf16>, vector<48x8xbf16>, vector<48x8xf32> -> vector<48x8xf32>
    %336 = vector.extract_strided_slice %314 {offsets = [0, 8], sizes = [48, 8], strides = [1, 1]} : vector<48x96xf32> to vector<48x8xf32>
    %337 = arith.truncf %336 : vector<48x8xf32> to vector<48x8xbf16>
    %338 = vector.extract_strided_slice %314 {offsets = [0, 40], sizes = [48, 8], strides = [1, 1]} : vector<48x96xf32> to vector<48x8xf32>
    %339 = arith.truncf %338 : vector<48x8xf32> to vector<48x8xbf16>
    %340 = vector.extract_strided_slice %314 {offsets = [0, 72], sizes = [48, 8], strides = [1, 1]} : vector<48x96xf32> to vector<48x8xf32>
    %341 = arith.truncf %340 : vector<48x8xf32> to vector<48x8xbf16>
    "tpu.trace_start"() <{level = 10 : i32, message = "qc,kc->qk"}> : () -> ()
    %cst_78 = arith.constant dense<0.000000e+00> : vector<48x48xf32>
    %342 = tpu.matmul %337, %339, %cst_78 {dimension_numbers = #tpu.dot_dimension_numbers<[1], [1], [0], [0], [0, 0, 1, 0], [], []>} : vector<48x8xbf16>, vector<48x8xbf16>, vector<48x48xf32> -> vector<48x48xf32>
    "tpu.trace_stop"() : () -> ()
    %343 = vector.broadcast %135 : vector<1x48xf32> to vector<48x48xf32>
    %344 = arith.addf %342, %343 : vector<48x48xf32>
    %cst_79 = arith.constant dense<0xFF800000> : vector<48xf32>
    %345 = vector.multi_reduction <maximumf>, %344, %cst_79 [1] : vector<48x48xf32> to vector<48xf32>
    %346 = vector.shape_cast %345 : vector<48xf32> to vector<48x1xf32>
    %347 = vector.broadcast %346 : vector<48x1xf32> to vector<48x48xf32>
    %348 = arith.subf %344, %347 : vector<48x48xf32>
    %349 = math.exp %348 : vector<48x48xf32>
    %cst_80 = arith.constant dense<0.000000e+00> : vector<48xf32>
    %350 = vector.multi_reduction <add>, %349, %cst_80 [1] : vector<48x48xf32> to vector<48xf32>
    %351 = vector.shape_cast %350 : vector<48xf32> to vector<48x1xf32>
    %352 = tpu.reciprocal %351 {approx = true} : vector<48x1xf32> -> vector<48x1xf32>
    %353 = vector.broadcast %352 : vector<48x1xf32> to vector<48x48xf32>
    %354 = arith.mulf %349, %353 : vector<48x48xf32>
    %355 = arith.truncf %354 : vector<48x48xf32> to vector<48x48xbf16>
    %cst_81 = arith.constant dense<0.000000e+00> : vector<48x8xf32>
    %356 = tpu.matmul %355, %341, %cst_81 {dimension_numbers = #tpu.dot_dimension_numbers<[1], [0], [0], [1], [0, 0, 1, 1], [], []>} : vector<48x48xbf16>, vector<48x8xbf16>, vector<48x8xf32> -> vector<48x8xf32>
    %357 = vector.extract_strided_slice %314 {offsets = [0, 16], sizes = [48, 8], strides = [1, 1]} : vector<48x96xf32> to vector<48x8xf32>
    %358 = arith.truncf %357 : vector<48x8xf32> to vector<48x8xbf16>
    %359 = vector.extract_strided_slice %314 {offsets = [0, 48], sizes = [48, 8], strides = [1, 1]} : vector<48x96xf32> to vector<48x8xf32>
    %360 = arith.truncf %359 : vector<48x8xf32> to vector<48x8xbf16>
    %361 = vector.extract_strided_slice %314 {offsets = [0, 80], sizes = [48, 8], strides = [1, 1]} : vector<48x96xf32> to vector<48x8xf32>
    %362 = arith.truncf %361 : vector<48x8xf32> to vector<48x8xbf16>
    "tpu.trace_start"() <{level = 10 : i32, message = "qc,kc->qk"}> : () -> ()
    %cst_82 = arith.constant dense<0.000000e+00> : vector<48x48xf32>
    %363 = tpu.matmul %358, %360, %cst_82 {dimension_numbers = #tpu.dot_dimension_numbers<[1], [1], [0], [0], [0, 0, 1, 0], [], []>} : vector<48x8xbf16>, vector<48x8xbf16>, vector<48x48xf32> -> vector<48x48xf32>
    "tpu.trace_stop"() : () -> ()
    %364 = vector.broadcast %135 : vector<1x48xf32> to vector<48x48xf32>
    %365 = arith.addf %363, %364 : vector<48x48xf32>
    %cst_83 = arith.constant dense<0xFF800000> : vector<48xf32>
    %366 = vector.multi_reduction <maximumf>, %365, %cst_83 [1] : vector<48x48xf32> to vector<48xf32>
    %367 = vector.shape_cast %366 : vector<48xf32> to vector<48x1xf32>
    %368 = vector.broadcast %367 : vector<48x1xf32> to vector<48x48xf32>
    %369 = arith.subf %365, %368 : vector<48x48xf32>
    %370 = math.exp %369 : vector<48x48xf32>
    %cst_84 = arith.constant dense<0.000000e+00> : vector<48xf32>
    %371 = vector.multi_reduction <add>, %370, %cst_84 [1] : vector<48x48xf32> to vector<48xf32>
    %372 = vector.shape_cast %371 : vector<48xf32> to vector<48x1xf32>
    %373 = tpu.reciprocal %372 {approx = true} : vector<48x1xf32> -> vector<48x1xf32>
    %374 = vector.broadcast %373 : vector<48x1xf32> to vector<48x48xf32>
    %375 = arith.mulf %370, %374 : vector<48x48xf32>
    %376 = arith.truncf %375 : vector<48x48xf32> to vector<48x48xbf16>
    %cst_85 = arith.constant dense<0.000000e+00> : vector<48x8xf32>
    %377 = tpu.matmul %376, %362, %cst_85 {dimension_numbers = #tpu.dot_dimension_numbers<[1], [0], [0], [1], [0, 0, 1, 1], [], []>} : vector<48x48xbf16>, vector<48x8xbf16>, vector<48x8xf32> -> vector<48x8xf32>
    %378 = vector.extract_strided_slice %314 {offsets = [0, 24], sizes = [48, 8], strides = [1, 1]} : vector<48x96xf32> to vector<48x8xf32>
    %379 = arith.truncf %378 : vector<48x8xf32> to vector<48x8xbf16>
    %380 = vector.extract_strided_slice %314 {offsets = [0, 56], sizes = [48, 8], strides = [1, 1]} : vector<48x96xf32> to vector<48x8xf32>
    %381 = arith.truncf %380 : vector<48x8xf32> to vector<48x8xbf16>
    %382 = vector.extract_strided_slice %314 {offsets = [0, 88], sizes = [48, 8], strides = [1, 1]} : vector<48x96xf32> to vector<48x8xf32>
    %383 = arith.truncf %382 : vector<48x8xf32> to vector<48x8xbf16>
    "tpu.trace_start"() <{level = 10 : i32, message = "qc,kc->qk"}> : () -> ()
    %cst_86 = arith.constant dense<0.000000e+00> : vector<48x48xf32>
    %384 = tpu.matmul %379, %381, %cst_86 {dimension_numbers = #tpu.dot_dimension_numbers<[1], [1], [0], [0], [0, 0, 1, 0], [], []>} : vector<48x8xbf16>, vector<48x8xbf16>, vector<48x48xf32> -> vector<48x48xf32>
    "tpu.trace_stop"() : () -> ()
    %385 = vector.broadcast %135 : vector<1x48xf32> to vector<48x48xf32>
    %386 = arith.addf %384, %385 : vector<48x48xf32>
    %cst_87 = arith.constant dense<0xFF800000> : vector<48xf32>
    %387 = vector.multi_reduction <maximumf>, %386, %cst_87 [1] : vector<48x48xf32> to vector<48xf32>
    %388 = vector.shape_cast %387 : vector<48xf32> to vector<48x1xf32>
    %389 = vector.broadcast %388 : vector<48x1xf32> to vector<48x48xf32>
    %390 = arith.subf %386, %389 : vector<48x48xf32>
    %391 = math.exp %390 : vector<48x48xf32>
    %cst_88 = arith.constant dense<0.000000e+00> : vector<48xf32>
    %392 = vector.multi_reduction <add>, %391, %cst_88 [1] : vector<48x48xf32> to vector<48xf32>
    %393 = vector.shape_cast %392 : vector<48xf32> to vector<48x1xf32>
    %394 = tpu.reciprocal %393 {approx = true} : vector<48x1xf32> -> vector<48x1xf32>
    %395 = vector.broadcast %394 : vector<48x1xf32> to vector<48x48xf32>
    %396 = arith.mulf %391, %395 : vector<48x48xf32>
    %397 = arith.truncf %396 : vector<48x48xf32> to vector<48x48xbf16>
    %cst_89 = arith.constant dense<0.000000e+00> : vector<48x8xf32>
    %398 = tpu.matmul %397, %383, %cst_89 {dimension_numbers = #tpu.dot_dimension_numbers<[1], [0], [0], [1], [0, 0, 1, 1], [], []>} : vector<48x48xbf16>, vector<48x8xbf16>, vector<48x8xf32> -> vector<48x8xf32>
    %399 = tpu.concatenate %335, %356, %377, %398 in 1 : vector<48x8xf32>, vector<48x8xf32>, vector<48x8xf32>, vector<48x8xf32> -> vector<48x32xf32>
    %400 = arith.truncf %399 : vector<48x32xf32> to vector<48x32xbf16>
    %c1_90 = arith.constant 1 : index
    %c0_91 = arith.constant 0 : index
    %c0_92 = arith.constant 0 : index
    %401 = vector.load %arg7[%c1_90, %c0_91, %c0_92] : memref<2x32x32xbf16, #tpu.memory_space<vmem>>, vector<1x32x32xbf16>
    %402 = vector.shape_cast %401 : vector<1x32x32xbf16> to vector<32x32xbf16>
    %cst_93 = arith.constant dense<0.000000e+00> : vector<48x32xf32>
    %403 = tpu.matmul %400, %402, %cst_93 {dimension_numbers = #tpu.dot_dimension_numbers<[1], [0], [0], [1], [0, 0, 1, 1], [], []>} : vector<48x32xbf16>, vector<32x32xbf16>, vector<48x32xf32> -> vector<48x32xf32>
    %c1_94 = arith.constant 1 : index
    %c0_95 = arith.constant 0 : index
    %c0_96 = arith.constant 0 : index
    %404 = vector.load %arg8[%c1_94, %c0_95, %c0_96] : memref<2x1x32xf32, #tpu.memory_space<vmem>>, vector<1x1x32xf32>
    %405 = vector.shape_cast %404 : vector<1x1x32xf32> to vector<1x32xf32>
    %406 = vector.broadcast %405 : vector<1x32xf32> to vector<48x32xf32>
    %407 = arith.addf %403, %406 : vector<48x32xf32>
    %c1_97 = arith.constant 1 : index
    %c0_98 = arith.constant 0 : index
    %c0_99 = arith.constant 0 : index
    %408 = vector.load %arg13[%c1_97, %c0_98, %c0_99] : memref<2x4x32xf32, #tpu.memory_space<vmem>>, vector<1x4x32xf32>
    %409 = vector.shape_cast %408 : vector<1x4x32xf32> to vector<4x32xf32>
    %410 = arith.addf %306, %407 : vector<48x32xf32>
    %411 = vector.extract_strided_slice %409 {offsets = [0, 0], sizes = [1, 32], strides = [1, 1]} : vector<4x32xf32> to vector<1x32xf32>
    %412 = vector.extract_strided_slice %409 {offsets = [1, 0], sizes = [1, 32], strides = [1, 1]} : vector<4x32xf32> to vector<1x32xf32>
    %cst_100 = arith.constant dense<0.000000e+00> : vector<48xf32>
    %413 = vector.multi_reduction <add>, %410, %cst_100 [1] : vector<48x32xf32> to vector<48xf32>
    %414 = vector.shape_cast %413 : vector<48xf32> to vector<48x1xf32>
    %cst_101 = arith.constant 3.200000e+01 : f32
    %415 = vector.broadcast %cst_101 : f32 to vector<48x1xf32>
    %416 = arith.divf %414, %415 : vector<48x1xf32>
    %417 = vector.broadcast %416 : vector<48x1xf32> to vector<48x32xf32>
    %418 = arith.subf %410, %417 : vector<48x32xf32>
    %419 = arith.mulf %418, %418 : vector<48x32xf32>
    %cst_102 = arith.constant dense<0.000000e+00> : vector<48xf32>
    %420 = vector.multi_reduction <add>, %419, %cst_102 [1] : vector<48x32xf32> to vector<48xf32>
    %421 = vector.shape_cast %420 : vector<48xf32> to vector<48x1xf32>
    %cst_103 = arith.constant 3.200000e+01 : f32
    %422 = vector.broadcast %cst_103 : f32 to vector<48x1xf32>
    %423 = arith.divf %421, %422 : vector<48x1xf32>
    %424 = vector.broadcast %416 : vector<48x1xf32> to vector<48x32xf32>
    %425 = arith.subf %410, %424 : vector<48x32xf32>
    %cst_104 = arith.constant 9.99999974E-6 : f32
    %426 = vector.broadcast %cst_104 : f32 to vector<48x1xf32>
    %427 = arith.addf %423, %426 : vector<48x1xf32>
    %428 = math.rsqrt %427 : vector<48x1xf32>
    %429 = vector.broadcast %428 : vector<48x1xf32> to vector<48x32xf32>
    %430 = arith.mulf %425, %429 : vector<48x32xf32>
    %431 = vector.broadcast %411 : vector<1x32xf32> to vector<48x32xf32>
    %432 = arith.mulf %430, %431 : vector<48x32xf32>
    %433 = vector.broadcast %412 : vector<1x32xf32> to vector<48x32xf32>
    %434 = arith.addf %432, %433 : vector<48x32xf32>
    %435 = arith.truncf %434 : vector<48x32xf32> to vector<48x32xbf16>
    %c1_105 = arith.constant 1 : index
    %c0_106 = arith.constant 0 : index
    %c0_107 = arith.constant 0 : index
    %436 = vector.load %arg9[%c1_105, %c0_106, %c0_107] : memref<2x32x64xbf16, #tpu.memory_space<vmem>>, vector<1x32x64xbf16>
    %437 = vector.shape_cast %436 : vector<1x32x64xbf16> to vector<32x64xbf16>
    %cst_108 = arith.constant dense<0.000000e+00> : vector<48x64xf32>
    %438 = tpu.matmul %435, %437, %cst_108 {dimension_numbers = #tpu.dot_dimension_numbers<[1], [0], [0], [1], [0, 0, 1, 1], [], []>} : vector<48x32xbf16>, vector<32x64xbf16>, vector<48x64xf32> -> vector<48x64xf32>
    %c1_109 = arith.constant 1 : index
    %c0_110 = arith.constant 0 : index
    %c0_111 = arith.constant 0 : index
    %439 = vector.load %arg10[%c1_109, %c0_110, %c0_111] : memref<2x1x64xf32, #tpu.memory_space<vmem>>, vector<1x1x64xf32>
    %440 = vector.shape_cast %439 : vector<1x1x64xf32> to vector<1x64xf32>
    %441 = vector.broadcast %440 : vector<1x64xf32> to vector<48x64xf32>
    %442 = arith.addf %438, %441 : vector<48x64xf32>
    %cst_112 = arith.constant 0.000000e+00 : f32
    %443 = vector.broadcast %cst_112 : f32 to vector<48x64xf32>
    %444 = arith.maximumf %442, %443 : vector<48x64xf32>
    %445 = arith.truncf %444 : vector<48x64xf32> to vector<48x64xbf16>
    %c1_113 = arith.constant 1 : index
    %c0_114 = arith.constant 0 : index
    %c0_115 = arith.constant 0 : index
    %446 = vector.load %arg11[%c1_113, %c0_114, %c0_115] : memref<2x64x32xbf16, #tpu.memory_space<vmem>>, vector<1x64x32xbf16>
    %447 = vector.shape_cast %446 : vector<1x64x32xbf16> to vector<64x32xbf16>
    %cst_116 = arith.constant dense<0.000000e+00> : vector<48x32xf32>
    %448 = tpu.matmul %445, %447, %cst_116 {dimension_numbers = #tpu.dot_dimension_numbers<[1], [0], [0], [1], [0, 0, 1, 1], [], []>} : vector<48x64xbf16>, vector<64x32xbf16>, vector<48x32xf32> -> vector<48x32xf32>
    %c1_117 = arith.constant 1 : index
    %c0_118 = arith.constant 0 : index
    %c0_119 = arith.constant 0 : index
    %449 = vector.load %arg12[%c1_117, %c0_118, %c0_119] : memref<2x1x32xf32, #tpu.memory_space<vmem>>, vector<1x1x32xf32>
    %450 = vector.shape_cast %449 : vector<1x1x32xf32> to vector<1x32xf32>
    %451 = vector.broadcast %450 : vector<1x32xf32> to vector<48x32xf32>
    %452 = arith.addf %448, %451 : vector<48x32xf32>
    %453 = arith.addf %434, %452 : vector<48x32xf32>
    %454 = vector.extract_strided_slice %409 {offsets = [2, 0], sizes = [1, 32], strides = [1, 1]} : vector<4x32xf32> to vector<1x32xf32>
    %455 = vector.extract_strided_slice %409 {offsets = [3, 0], sizes = [1, 32], strides = [1, 1]} : vector<4x32xf32> to vector<1x32xf32>
    %cst_120 = arith.constant dense<0.000000e+00> : vector<48xf32>
    %456 = vector.multi_reduction <add>, %453, %cst_120 [1] : vector<48x32xf32> to vector<48xf32>
    %457 = vector.shape_cast %456 : vector<48xf32> to vector<48x1xf32>
    %cst_121 = arith.constant 3.200000e+01 : f32
    %458 = vector.broadcast %cst_121 : f32 to vector<48x1xf32>
    %459 = arith.divf %457, %458 : vector<48x1xf32>
    %460 = vector.broadcast %459 : vector<48x1xf32> to vector<48x32xf32>
    %461 = arith.subf %453, %460 : vector<48x32xf32>
    %462 = arith.mulf %461, %461 : vector<48x32xf32>
    %cst_122 = arith.constant dense<0.000000e+00> : vector<48xf32>
    %463 = vector.multi_reduction <add>, %462, %cst_122 [1] : vector<48x32xf32> to vector<48xf32>
    %464 = vector.shape_cast %463 : vector<48xf32> to vector<48x1xf32>
    %cst_123 = arith.constant 3.200000e+01 : f32
    %465 = vector.broadcast %cst_123 : f32 to vector<48x1xf32>
    %466 = arith.divf %464, %465 : vector<48x1xf32>
    %467 = vector.broadcast %459 : vector<48x1xf32> to vector<48x32xf32>
    %468 = arith.subf %453, %467 : vector<48x32xf32>
    %cst_124 = arith.constant 9.99999974E-6 : f32
    %469 = vector.broadcast %cst_124 : f32 to vector<48x1xf32>
    %470 = arith.addf %466, %469 : vector<48x1xf32>
    %471 = math.rsqrt %470 : vector<48x1xf32>
    %472 = vector.broadcast %471 : vector<48x1xf32> to vector<48x32xf32>
    %473 = arith.mulf %468, %472 : vector<48x32xf32>
    %474 = vector.broadcast %454 : vector<1x32xf32> to vector<48x32xf32>
    %475 = arith.mulf %473, %474 : vector<48x32xf32>
    %476 = vector.broadcast %455 : vector<1x32xf32> to vector<48x32xf32>
    %477 = arith.addf %475, %476 : vector<48x32xf32>
    %478 = arith.truncf %477 : vector<48x32xf32> to vector<48x32xbf16>
    %c0_125 = arith.constant 0 : index
    %c0_126 = arith.constant 0 : index
    %479 = vector.load %arg17[%c0_125, %c0_126] : memref<192x32xf32, #tpu.memory_space<vmem>>, vector<192x32xf32>
    %c0_127 = arith.constant 0 : index
    %c0_128 = arith.constant 0 : index
    %c0_129 = arith.constant 0 : index
    %480 = vector.load %arg16[%c0_127, %c0_128, %c0_129] : memref<9x32x32xbf16, #tpu.memory_space<vmem>>, vector<1x32x32xbf16>
    %481 = vector.shape_cast %480 : vector<1x32x32xbf16> to vector<32x32xbf16>
    %cst_130 = arith.constant dense<0.000000e+00> : vector<48x32xf32>
    %482 = tpu.matmul %478, %481, %cst_130 {dimension_numbers = #tpu.dot_dimension_numbers<[1], [0], [0], [1], [0, 0, 1, 1], [], []>} : vector<48x32xbf16>, vector<32x32xbf16>, vector<48x32xf32> -> vector<48x32xf32>
    %c0_131 = arith.constant 0 : index
    %c0_132 = arith.constant 0 : index
    %c0_133 = arith.constant 0 : index
    %483 = vector.load %arg14[%c0_131, %c0_132, %c0_133] : memref<9x192x48xbf16, #tpu.memory_space<vmem>>, vector<1x192x48xbf16>
    %484 = vector.shape_cast %483 : vector<1x192x48xbf16> to vector<192x48xbf16>
    %485 = arith.truncf %482 : vector<48x32xf32> to vector<48x32xbf16>
    %cst_134 = arith.constant dense<0.000000e+00> : vector<192x32xf32>
    %486 = tpu.matmul %484, %485, %cst_134 {dimension_numbers = #tpu.dot_dimension_numbers<[1], [0], [0], [1], [0, 0, 1, 1], [], []>} : vector<192x48xbf16>, vector<48x32xbf16>, vector<192x32xf32> -> vector<192x32xf32>
    %487 = arith.addf %479, %486 : vector<192x32xf32>
    %c1_135 = arith.constant 1 : index
    %c0_136 = arith.constant 0 : index
    %c0_137 = arith.constant 0 : index
    %488 = vector.load %arg16[%c1_135, %c0_136, %c0_137] : memref<9x32x32xbf16, #tpu.memory_space<vmem>>, vector<1x32x32xbf16>
    %489 = vector.shape_cast %488 : vector<1x32x32xbf16> to vector<32x32xbf16>
    %cst_138 = arith.constant dense<0.000000e+00> : vector<48x32xf32>
    %490 = tpu.matmul %478, %489, %cst_138 {dimension_numbers = #tpu.dot_dimension_numbers<[1], [0], [0], [1], [0, 0, 1, 1], [], []>} : vector<48x32xbf16>, vector<32x32xbf16>, vector<48x32xf32> -> vector<48x32xf32>
    %c1_139 = arith.constant 1 : index
    %c0_140 = arith.constant 0 : index
    %c0_141 = arith.constant 0 : index
    %491 = vector.load %arg14[%c1_139, %c0_140, %c0_141] : memref<9x192x48xbf16, #tpu.memory_space<vmem>>, vector<1x192x48xbf16>
    %492 = vector.shape_cast %491 : vector<1x192x48xbf16> to vector<192x48xbf16>
    %493 = arith.truncf %490 : vector<48x32xf32> to vector<48x32xbf16>
    %cst_142 = arith.constant dense<0.000000e+00> : vector<192x32xf32>
    %494 = tpu.matmul %492, %493, %cst_142 {dimension_numbers = #tpu.dot_dimension_numbers<[1], [0], [0], [1], [0, 0, 1, 1], [], []>} : vector<192x48xbf16>, vector<48x32xbf16>, vector<192x32xf32> -> vector<192x32xf32>
    %495 = arith.addf %487, %494 : vector<192x32xf32>
    %c2 = arith.constant 2 : index
    %c0_143 = arith.constant 0 : index
    %c0_144 = arith.constant 0 : index
    %496 = vector.load %arg16[%c2, %c0_143, %c0_144] : memref<9x32x32xbf16, #tpu.memory_space<vmem>>, vector<1x32x32xbf16>
    %497 = vector.shape_cast %496 : vector<1x32x32xbf16> to vector<32x32xbf16>
    %cst_145 = arith.constant dense<0.000000e+00> : vector<48x32xf32>
    %498 = tpu.matmul %478, %497, %cst_145 {dimension_numbers = #tpu.dot_dimension_numbers<[1], [0], [0], [1], [0, 0, 1, 1], [], []>} : vector<48x32xbf16>, vector<32x32xbf16>, vector<48x32xf32> -> vector<48x32xf32>
    %c2_146 = arith.constant 2 : index
    %c0_147 = arith.constant 0 : index
    %c0_148 = arith.constant 0 : index
    %499 = vector.load %arg14[%c2_146, %c0_147, %c0_148] : memref<9x192x48xbf16, #tpu.memory_space<vmem>>, vector<1x192x48xbf16>
    %500 = vector.shape_cast %499 : vector<1x192x48xbf16> to vector<192x48xbf16>
    %501 = arith.truncf %498 : vector<48x32xf32> to vector<48x32xbf16>
    %cst_149 = arith.constant dense<0.000000e+00> : vector<192x32xf32>
    %502 = tpu.matmul %500, %501, %cst_149 {dimension_numbers = #tpu.dot_dimension_numbers<[1], [0], [0], [1], [0, 0, 1, 1], [], []>} : vector<192x48xbf16>, vector<48x32xbf16>, vector<192x32xf32> -> vector<192x32xf32>
    %503 = arith.addf %495, %502 : vector<192x32xf32>
    %c3 = arith.constant 3 : index
    %c0_150 = arith.constant 0 : index
    %c0_151 = arith.constant 0 : index
    %504 = vector.load %arg16[%c3, %c0_150, %c0_151] : memref<9x32x32xbf16, #tpu.memory_space<vmem>>, vector<1x32x32xbf16>
    %505 = vector.shape_cast %504 : vector<1x32x32xbf16> to vector<32x32xbf16>
    %cst_152 = arith.constant dense<0.000000e+00> : vector<48x32xf32>
    %506 = tpu.matmul %478, %505, %cst_152 {dimension_numbers = #tpu.dot_dimension_numbers<[1], [0], [0], [1], [0, 0, 1, 1], [], []>} : vector<48x32xbf16>, vector<32x32xbf16>, vector<48x32xf32> -> vector<48x32xf32>
    %c3_153 = arith.constant 3 : index
    %c0_154 = arith.constant 0 : index
    %c0_155 = arith.constant 0 : index
    %507 = vector.load %arg14[%c3_153, %c0_154, %c0_155] : memref<9x192x48xbf16, #tpu.memory_space<vmem>>, vector<1x192x48xbf16>
    %508 = vector.shape_cast %507 : vector<1x192x48xbf16> to vector<192x48xbf16>
    %509 = arith.truncf %506 : vector<48x32xf32> to vector<48x32xbf16>
    %cst_156 = arith.constant dense<0.000000e+00> : vector<192x32xf32>
    %510 = tpu.matmul %508, %509, %cst_156 {dimension_numbers = #tpu.dot_dimension_numbers<[1], [0], [0], [1], [0, 0, 1, 1], [], []>} : vector<192x48xbf16>, vector<48x32xbf16>, vector<192x32xf32> -> vector<192x32xf32>
    %511 = arith.addf %503, %510 : vector<192x32xf32>
    %c4 = arith.constant 4 : index
    %c0_157 = arith.constant 0 : index
    %c0_158 = arith.constant 0 : index
    %512 = vector.load %arg16[%c4, %c0_157, %c0_158] : memref<9x32x32xbf16, #tpu.memory_space<vmem>>, vector<1x32x32xbf16>
    %513 = vector.shape_cast %512 : vector<1x32x32xbf16> to vector<32x32xbf16>
    %cst_159 = arith.constant dense<0.000000e+00> : vector<48x32xf32>
    %514 = tpu.matmul %478, %513, %cst_159 {dimension_numbers = #tpu.dot_dimension_numbers<[1], [0], [0], [1], [0, 0, 1, 1], [], []>} : vector<48x32xbf16>, vector<32x32xbf16>, vector<48x32xf32> -> vector<48x32xf32>
    %c4_160 = arith.constant 4 : index
    %c0_161 = arith.constant 0 : index
    %c0_162 = arith.constant 0 : index
    %515 = vector.load %arg14[%c4_160, %c0_161, %c0_162] : memref<9x192x48xbf16, #tpu.memory_space<vmem>>, vector<1x192x48xbf16>
    %516 = vector.shape_cast %515 : vector<1x192x48xbf16> to vector<192x48xbf16>
    %517 = arith.truncf %514 : vector<48x32xf32> to vector<48x32xbf16>
    %cst_163 = arith.constant dense<0.000000e+00> : vector<192x32xf32>
    %518 = tpu.matmul %516, %517, %cst_163 {dimension_numbers = #tpu.dot_dimension_numbers<[1], [0], [0], [1], [0, 0, 1, 1], [], []>} : vector<192x48xbf16>, vector<48x32xbf16>, vector<192x32xf32> -> vector<192x32xf32>
    %519 = arith.addf %511, %518 : vector<192x32xf32>
    %c5 = arith.constant 5 : index
    %c0_164 = arith.constant 0 : index
    %c0_165 = arith.constant 0 : index
    %520 = vector.load %arg16[%c5, %c0_164, %c0_165] : memref<9x32x32xbf16, #tpu.memory_space<vmem>>, vector<1x32x32xbf16>
    %521 = vector.shape_cast %520 : vector<1x32x32xbf16> to vector<32x32xbf16>
    %cst_166 = arith.constant dense<0.000000e+00> : vector<48x32xf32>
    %522 = tpu.matmul %478, %521, %cst_166 {dimension_numbers = #tpu.dot_dimension_numbers<[1], [0], [0], [1], [0, 0, 1, 1], [], []>} : vector<48x32xbf16>, vector<32x32xbf16>, vector<48x32xf32> -> vector<48x32xf32>
    %c5_167 = arith.constant 5 : index
    %c0_168 = arith.constant 0 : index
    %c0_169 = arith.constant 0 : index
    %523 = vector.load %arg14[%c5_167, %c0_168, %c0_169] : memref<9x192x48xbf16, #tpu.memory_space<vmem>>, vector<1x192x48xbf16>
    %524 = vector.shape_cast %523 : vector<1x192x48xbf16> to vector<192x48xbf16>
    %525 = arith.truncf %522 : vector<48x32xf32> to vector<48x32xbf16>
    %cst_170 = arith.constant dense<0.000000e+00> : vector<192x32xf32>
    %526 = tpu.matmul %524, %525, %cst_170 {dimension_numbers = #tpu.dot_dimension_numbers<[1], [0], [0], [1], [0, 0, 1, 1], [], []>} : vector<192x48xbf16>, vector<48x32xbf16>, vector<192x32xf32> -> vector<192x32xf32>
    %527 = arith.addf %519, %526 : vector<192x32xf32>
    %c6 = arith.constant 6 : index
    %c0_171 = arith.constant 0 : index
    %c0_172 = arith.constant 0 : index
    %528 = vector.load %arg16[%c6, %c0_171, %c0_172] : memref<9x32x32xbf16, #tpu.memory_space<vmem>>, vector<1x32x32xbf16>
    %529 = vector.shape_cast %528 : vector<1x32x32xbf16> to vector<32x32xbf16>
    %cst_173 = arith.constant dense<0.000000e+00> : vector<48x32xf32>
    %530 = tpu.matmul %478, %529, %cst_173 {dimension_numbers = #tpu.dot_dimension_numbers<[1], [0], [0], [1], [0, 0, 1, 1], [], []>} : vector<48x32xbf16>, vector<32x32xbf16>, vector<48x32xf32> -> vector<48x32xf32>
    %c6_174 = arith.constant 6 : index
    %c0_175 = arith.constant 0 : index
    %c0_176 = arith.constant 0 : index
    %531 = vector.load %arg14[%c6_174, %c0_175, %c0_176] : memref<9x192x48xbf16, #tpu.memory_space<vmem>>, vector<1x192x48xbf16>
    %532 = vector.shape_cast %531 : vector<1x192x48xbf16> to vector<192x48xbf16>
    %533 = arith.truncf %530 : vector<48x32xf32> to vector<48x32xbf16>
    %cst_177 = arith.constant dense<0.000000e+00> : vector<192x32xf32>
    %534 = tpu.matmul %532, %533, %cst_177 {dimension_numbers = #tpu.dot_dimension_numbers<[1], [0], [0], [1], [0, 0, 1, 1], [], []>} : vector<192x48xbf16>, vector<48x32xbf16>, vector<192x32xf32> -> vector<192x32xf32>
    %535 = arith.addf %527, %534 : vector<192x32xf32>
    %c7 = arith.constant 7 : index
    %c0_178 = arith.constant 0 : index
    %c0_179 = arith.constant 0 : index
    %536 = vector.load %arg16[%c7, %c0_178, %c0_179] : memref<9x32x32xbf16, #tpu.memory_space<vmem>>, vector<1x32x32xbf16>
    %537 = vector.shape_cast %536 : vector<1x32x32xbf16> to vector<32x32xbf16>
    %cst_180 = arith.constant dense<0.000000e+00> : vector<48x32xf32>
    %538 = tpu.matmul %478, %537, %cst_180 {dimension_numbers = #tpu.dot_dimension_numbers<[1], [0], [0], [1], [0, 0, 1, 1], [], []>} : vector<48x32xbf16>, vector<32x32xbf16>, vector<48x32xf32> -> vector<48x32xf32>
    %c7_181 = arith.constant 7 : index
    %c0_182 = arith.constant 0 : index
    %c0_183 = arith.constant 0 : index
    %539 = vector.load %arg14[%c7_181, %c0_182, %c0_183] : memref<9x192x48xbf16, #tpu.memory_space<vmem>>, vector<1x192x48xbf16>
    %540 = vector.shape_cast %539 : vector<1x192x48xbf16> to vector<192x48xbf16>
    %541 = arith.truncf %538 : vector<48x32xf32> to vector<48x32xbf16>
    %cst_184 = arith.constant dense<0.000000e+00> : vector<192x32xf32>
    %542 = tpu.matmul %540, %541, %cst_184 {dimension_numbers = #tpu.dot_dimension_numbers<[1], [0], [0], [1], [0, 0, 1, 1], [], []>} : vector<192x48xbf16>, vector<48x32xbf16>, vector<192x32xf32> -> vector<192x32xf32>
    %543 = arith.addf %535, %542 : vector<192x32xf32>
    %c8 = arith.constant 8 : index
    %c0_185 = arith.constant 0 : index
    %c0_186 = arith.constant 0 : index
    %544 = vector.load %arg16[%c8, %c0_185, %c0_186] : memref<9x32x32xbf16, #tpu.memory_space<vmem>>, vector<1x32x32xbf16>
    %545 = vector.shape_cast %544 : vector<1x32x32xbf16> to vector<32x32xbf16>
    %cst_187 = arith.constant dense<0.000000e+00> : vector<48x32xf32>
    %546 = tpu.matmul %478, %545, %cst_187 {dimension_numbers = #tpu.dot_dimension_numbers<[1], [0], [0], [1], [0, 0, 1, 1], [], []>} : vector<48x32xbf16>, vector<32x32xbf16>, vector<48x32xf32> -> vector<48x32xf32>
    %c8_188 = arith.constant 8 : index
    %c0_189 = arith.constant 0 : index
    %c0_190 = arith.constant 0 : index
    %547 = vector.load %arg14[%c8_188, %c0_189, %c0_190] : memref<9x192x48xbf16, #tpu.memory_space<vmem>>, vector<1x192x48xbf16>
    %548 = vector.shape_cast %547 : vector<1x192x48xbf16> to vector<192x48xbf16>
    %549 = arith.truncf %546 : vector<48x32xf32> to vector<48x32xbf16>
    %cst_191 = arith.constant dense<0.000000e+00> : vector<192x32xf32>
    %550 = tpu.matmul %548, %549, %cst_191 {dimension_numbers = #tpu.dot_dimension_numbers<[1], [0], [0], [1], [0, 0, 1, 1], [], []>} : vector<192x48xbf16>, vector<48x32xbf16>, vector<192x32xf32> -> vector<192x32xf32>
    %551 = arith.addf %543, %550 : vector<192x32xf32>
    %cst_192 = arith.constant 0.000000e+00 : f32
    %552 = vector.broadcast %cst_192 : f32 to vector<192x32xf32>
    %553 = arith.maximumf %551, %552 : vector<192x32xf32>
    %554 = arith.truncf %553 : vector<192x32xf32> to vector<192x32xbf16>
    %cst_193 = arith.constant 0.000000e+00 : f32
    %555 = vector.broadcast %cst_193 : f32 to vector<192x32xf32>
    %c0_194 = arith.constant 0 : index
    %c0_195 = arith.constant 0 : index
    %c0_196 = arith.constant 0 : index
    %556 = vector.load %arg18[%c0_194, %c0_195, %c0_196] : memref<9x32x32xbf16, #tpu.memory_space<vmem>>, vector<1x32x32xbf16>
    %557 = vector.shape_cast %556 : vector<1x32x32xbf16> to vector<32x32xbf16>
    %cst_197 = arith.constant dense<0.000000e+00> : vector<192x32xf32>
    %558 = tpu.matmul %554, %557, %cst_197 {dimension_numbers = #tpu.dot_dimension_numbers<[1], [0], [0], [1], [0, 0, 1, 1], [], []>} : vector<192x32xbf16>, vector<32x32xbf16>, vector<192x32xf32> -> vector<192x32xf32>
    %c0_198 = arith.constant 0 : index
    %c0_199 = arith.constant 0 : index
    %c0_200 = arith.constant 0 : index
    %559 = vector.load %arg15[%c0_198, %c0_199, %c0_200] : memref<9x192x192xbf16, #tpu.memory_space<vmem>>, vector<1x192x192xbf16>
    %560 = vector.shape_cast %559 : vector<1x192x192xbf16> to vector<192x192xbf16>
    %561 = arith.truncf %558 : vector<192x32xf32> to vector<192x32xbf16>
    %cst_201 = arith.constant dense<0.000000e+00> : vector<192x32xf32>
    %562 = tpu.matmul %560, %561, %cst_201 {dimension_numbers = #tpu.dot_dimension_numbers<[1], [0], [0], [1], [0, 0, 1, 1], [], []>} : vector<192x192xbf16>, vector<192x32xbf16>, vector<192x32xf32> -> vector<192x32xf32>
    %563 = arith.addf %555, %562 : vector<192x32xf32>
    %c1_202 = arith.constant 1 : index
    %c0_203 = arith.constant 0 : index
    %c0_204 = arith.constant 0 : index
    %564 = vector.load %arg18[%c1_202, %c0_203, %c0_204] : memref<9x32x32xbf16, #tpu.memory_space<vmem>>, vector<1x32x32xbf16>
    %565 = vector.shape_cast %564 : vector<1x32x32xbf16> to vector<32x32xbf16>
    %cst_205 = arith.constant dense<0.000000e+00> : vector<192x32xf32>
    %566 = tpu.matmul %554, %565, %cst_205 {dimension_numbers = #tpu.dot_dimension_numbers<[1], [0], [0], [1], [0, 0, 1, 1], [], []>} : vector<192x32xbf16>, vector<32x32xbf16>, vector<192x32xf32> -> vector<192x32xf32>
    %c1_206 = arith.constant 1 : index
    %c0_207 = arith.constant 0 : index
    %c0_208 = arith.constant 0 : index
    %567 = vector.load %arg15[%c1_206, %c0_207, %c0_208] : memref<9x192x192xbf16, #tpu.memory_space<vmem>>, vector<1x192x192xbf16>
    %568 = vector.shape_cast %567 : vector<1x192x192xbf16> to vector<192x192xbf16>
    %569 = arith.truncf %566 : vector<192x32xf32> to vector<192x32xbf16>
    %cst_209 = arith.constant dense<0.000000e+00> : vector<192x32xf32>
    %570 = tpu.matmul %568, %569, %cst_209 {dimension_numbers = #tpu.dot_dimension_numbers<[1], [0], [0], [1], [0, 0, 1, 1], [], []>} : vector<192x192xbf16>, vector<192x32xbf16>, vector<192x32xf32> -> vector<192x32xf32>
    %571 = arith.addf %563, %570 : vector<192x32xf32>
    %c2_210 = arith.constant 2 : index
    %c0_211 = arith.constant 0 : index
    %c0_212 = arith.constant 0 : index
    %572 = vector.load %arg18[%c2_210, %c0_211, %c0_212] : memref<9x32x32xbf16, #tpu.memory_space<vmem>>, vector<1x32x32xbf16>
    %573 = vector.shape_cast %572 : vector<1x32x32xbf16> to vector<32x32xbf16>
    %cst_213 = arith.constant dense<0.000000e+00> : vector<192x32xf32>
    %574 = tpu.matmul %554, %573, %cst_213 {dimension_numbers = #tpu.dot_dimension_numbers<[1], [0], [0], [1], [0, 0, 1, 1], [], []>} : vector<192x32xbf16>, vector<32x32xbf16>, vector<192x32xf32> -> vector<192x32xf32>
    %c2_214 = arith.constant 2 : index
    %c0_215 = arith.constant 0 : index
    %c0_216 = arith.constant 0 : index
    %575 = vector.load %arg15[%c2_214, %c0_215, %c0_216] : memref<9x192x192xbf16, #tpu.memory_space<vmem>>, vector<1x192x192xbf16>
    %576 = vector.shape_cast %575 : vector<1x192x192xbf16> to vector<192x192xbf16>
    %577 = arith.truncf %574 : vector<192x32xf32> to vector<192x32xbf16>
    %cst_217 = arith.constant dense<0.000000e+00> : vector<192x32xf32>
    %578 = tpu.matmul %576, %577, %cst_217 {dimension_numbers = #tpu.dot_dimension_numbers<[1], [0], [0], [1], [0, 0, 1, 1], [], []>} : vector<192x192xbf16>, vector<192x32xbf16>, vector<192x32xf32> -> vector<192x32xf32>
    %579 = arith.addf %571, %578 : vector<192x32xf32>
    %c3_218 = arith.constant 3 : index
    %c0_219 = arith.constant 0 : index
    %c0_220 = arith.constant 0 : index
    %580 = vector.load %arg18[%c3_218, %c0_219, %c0_220] : memref<9x32x32xbf16, #tpu.memory_space<vmem>>, vector<1x32x32xbf16>
    %581 = vector.shape_cast %580 : vector<1x32x32xbf16> to vector<32x32xbf16>
    %cst_221 = arith.constant dense<0.000000e+00> : vector<192x32xf32>
    %582 = tpu.matmul %554, %581, %cst_221 {dimension_numbers = #tpu.dot_dimension_numbers<[1], [0], [0], [1], [0, 0, 1, 1], [], []>} : vector<192x32xbf16>, vector<32x32xbf16>, vector<192x32xf32> -> vector<192x32xf32>
    %c3_222 = arith.constant 3 : index
    %c0_223 = arith.constant 0 : index
    %c0_224 = arith.constant 0 : index
    %583 = vector.load %arg15[%c3_222, %c0_223, %c0_224] : memref<9x192x192xbf16, #tpu.memory_space<vmem>>, vector<1x192x192xbf16>
    %584 = vector.shape_cast %583 : vector<1x192x192xbf16> to vector<192x192xbf16>
    %585 = arith.truncf %582 : vector<192x32xf32> to vector<192x32xbf16>
    %cst_225 = arith.constant dense<0.000000e+00> : vector<192x32xf32>
    %586 = tpu.matmul %584, %585, %cst_225 {dimension_numbers = #tpu.dot_dimension_numbers<[1], [0], [0], [1], [0, 0, 1, 1], [], []>} : vector<192x192xbf16>, vector<192x32xbf16>, vector<192x32xf32> -> vector<192x32xf32>
    %587 = arith.addf %579, %586 : vector<192x32xf32>
    %c4_226 = arith.constant 4 : index
    %c0_227 = arith.constant 0 : index
    %c0_228 = arith.constant 0 : index
    %588 = vector.load %arg18[%c4_226, %c0_227, %c0_228] : memref<9x32x32xbf16, #tpu.memory_space<vmem>>, vector<1x32x32xbf16>
    %589 = vector.shape_cast %588 : vector<1x32x32xbf16> to vector<32x32xbf16>
    %cst_229 = arith.constant dense<0.000000e+00> : vector<192x32xf32>
    %590 = tpu.matmul %554, %589, %cst_229 {dimension_numbers = #tpu.dot_dimension_numbers<[1], [0], [0], [1], [0, 0, 1, 1], [], []>} : vector<192x32xbf16>, vector<32x32xbf16>, vector<192x32xf32> -> vector<192x32xf32>
    %c4_230 = arith.constant 4 : index
    %c0_231 = arith.constant 0 : index
    %c0_232 = arith.constant 0 : index
    %591 = vector.load %arg15[%c4_230, %c0_231, %c0_232] : memref<9x192x192xbf16, #tpu.memory_space<vmem>>, vector<1x192x192xbf16>
    %592 = vector.shape_cast %591 : vector<1x192x192xbf16> to vector<192x192xbf16>
    %593 = arith.truncf %590 : vector<192x32xf32> to vector<192x32xbf16>
    %cst_233 = arith.constant dense<0.000000e+00> : vector<192x32xf32>
    %594 = tpu.matmul %592, %593, %cst_233 {dimension_numbers = #tpu.dot_dimension_numbers<[1], [0], [0], [1], [0, 0, 1, 1], [], []>} : vector<192x192xbf16>, vector<192x32xbf16>, vector<192x32xf32> -> vector<192x32xf32>
    %595 = arith.addf %587, %594 : vector<192x32xf32>
    %c5_234 = arith.constant 5 : index
    %c0_235 = arith.constant 0 : index
    %c0_236 = arith.constant 0 : index
    %596 = vector.load %arg18[%c5_234, %c0_235, %c0_236] : memref<9x32x32xbf16, #tpu.memory_space<vmem>>, vector<1x32x32xbf16>
    %597 = vector.shape_cast %596 : vector<1x32x32xbf16> to vector<32x32xbf16>
    %cst_237 = arith.constant dense<0.000000e+00> : vector<192x32xf32>
    %598 = tpu.matmul %554, %597, %cst_237 {dimension_numbers = #tpu.dot_dimension_numbers<[1], [0], [0], [1], [0, 0, 1, 1], [], []>} : vector<192x32xbf16>, vector<32x32xbf16>, vector<192x32xf32> -> vector<192x32xf32>
    %c5_238 = arith.constant 5 : index
    %c0_239 = arith.constant 0 : index
    %c0_240 = arith.constant 0 : index
    %599 = vector.load %arg15[%c5_238, %c0_239, %c0_240] : memref<9x192x192xbf16, #tpu.memory_space<vmem>>, vector<1x192x192xbf16>
    %600 = vector.shape_cast %599 : vector<1x192x192xbf16> to vector<192x192xbf16>
    %601 = arith.truncf %598 : vector<192x32xf32> to vector<192x32xbf16>
    %cst_241 = arith.constant dense<0.000000e+00> : vector<192x32xf32>
    %602 = tpu.matmul %600, %601, %cst_241 {dimension_numbers = #tpu.dot_dimension_numbers<[1], [0], [0], [1], [0, 0, 1, 1], [], []>} : vector<192x192xbf16>, vector<192x32xbf16>, vector<192x32xf32> -> vector<192x32xf32>
    %603 = arith.addf %595, %602 : vector<192x32xf32>
    %c6_242 = arith.constant 6 : index
    %c0_243 = arith.constant 0 : index
    %c0_244 = arith.constant 0 : index
    %604 = vector.load %arg18[%c6_242, %c0_243, %c0_244] : memref<9x32x32xbf16, #tpu.memory_space<vmem>>, vector<1x32x32xbf16>
    %605 = vector.shape_cast %604 : vector<1x32x32xbf16> to vector<32x32xbf16>
    %cst_245 = arith.constant dense<0.000000e+00> : vector<192x32xf32>
    %606 = tpu.matmul %554, %605, %cst_245 {dimension_numbers = #tpu.dot_dimension_numbers<[1], [0], [0], [1], [0, 0, 1, 1], [], []>} : vector<192x32xbf16>, vector<32x32xbf16>, vector<192x32xf32> -> vector<192x32xf32>
    %c6_246 = arith.constant 6 : index
    %c0_247 = arith.constant 0 : index
    %c0_248 = arith.constant 0 : index
    %607 = vector.load %arg15[%c6_246, %c0_247, %c0_248] : memref<9x192x192xbf16, #tpu.memory_space<vmem>>, vector<1x192x192xbf16>
    %608 = vector.shape_cast %607 : vector<1x192x192xbf16> to vector<192x192xbf16>
    %609 = arith.truncf %606 : vector<192x32xf32> to vector<192x32xbf16>
    %cst_249 = arith.constant dense<0.000000e+00> : vector<192x32xf32>
    %610 = tpu.matmul %608, %609, %cst_249 {dimension_numbers = #tpu.dot_dimension_numbers<[1], [0], [0], [1], [0, 0, 1, 1], [], []>} : vector<192x192xbf16>, vector<192x32xbf16>, vector<192x32xf32> -> vector<192x32xf32>
    %611 = arith.addf %603, %610 : vector<192x32xf32>
    %c7_250 = arith.constant 7 : index
    %c0_251 = arith.constant 0 : index
    %c0_252 = arith.constant 0 : index
    %612 = vector.load %arg18[%c7_250, %c0_251, %c0_252] : memref<9x32x32xbf16, #tpu.memory_space<vmem>>, vector<1x32x32xbf16>
    %613 = vector.shape_cast %612 : vector<1x32x32xbf16> to vector<32x32xbf16>
    %cst_253 = arith.constant dense<0.000000e+00> : vector<192x32xf32>
    %614 = tpu.matmul %554, %613, %cst_253 {dimension_numbers = #tpu.dot_dimension_numbers<[1], [0], [0], [1], [0, 0, 1, 1], [], []>} : vector<192x32xbf16>, vector<32x32xbf16>, vector<192x32xf32> -> vector<192x32xf32>
    %c7_254 = arith.constant 7 : index
    %c0_255 = arith.constant 0 : index
    %c0_256 = arith.constant 0 : index
    %615 = vector.load %arg15[%c7_254, %c0_255, %c0_256] : memref<9x192x192xbf16, #tpu.memory_space<vmem>>, vector<1x192x192xbf16>
    %616 = vector.shape_cast %615 : vector<1x192x192xbf16> to vector<192x192xbf16>
    %617 = arith.truncf %614 : vector<192x32xf32> to vector<192x32xbf16>
    %cst_257 = arith.constant dense<0.000000e+00> : vector<192x32xf32>
    %618 = tpu.matmul %616, %617, %cst_257 {dimension_numbers = #tpu.dot_dimension_numbers<[1], [0], [0], [1], [0, 0, 1, 1], [], []>} : vector<192x192xbf16>, vector<192x32xbf16>, vector<192x32xf32> -> vector<192x32xf32>
    %619 = arith.addf %611, %618 : vector<192x32xf32>
    %c8_258 = arith.constant 8 : index
    %c0_259 = arith.constant 0 : index
    %c0_260 = arith.constant 0 : index
    %620 = vector.load %arg18[%c8_258, %c0_259, %c0_260] : memref<9x32x32xbf16, #tpu.memory_space<vmem>>, vector<1x32x32xbf16>
    %621 = vector.shape_cast %620 : vector<1x32x32xbf16> to vector<32x32xbf16>
    %cst_261 = arith.constant dense<0.000000e+00> : vector<192x32xf32>
    %622 = tpu.matmul %554, %621, %cst_261 {dimension_numbers = #tpu.dot_dimension_numbers<[1], [0], [0], [1], [0, 0, 1, 1], [], []>} : vector<192x32xbf16>, vector<32x32xbf16>, vector<192x32xf32> -> vector<192x32xf32>
    %c8_262 = arith.constant 8 : index
    %c0_263 = arith.constant 0 : index
    %c0_264 = arith.constant 0 : index
    %623 = vector.load %arg15[%c8_262, %c0_263, %c0_264] : memref<9x192x192xbf16, #tpu.memory_space<vmem>>, vector<1x192x192xbf16>
    %624 = vector.shape_cast %623 : vector<1x192x192xbf16> to vector<192x192xbf16>
    %625 = arith.truncf %622 : vector<192x32xf32> to vector<192x32xbf16>
    %cst_265 = arith.constant dense<0.000000e+00> : vector<192x32xf32>
    %626 = tpu.matmul %624, %625, %cst_265 {dimension_numbers = #tpu.dot_dimension_numbers<[1], [0], [0], [1], [0, 0, 1, 1], [], []>} : vector<192x192xbf16>, vector<192x32xbf16>, vector<192x32xf32> -> vector<192x32xf32>
    %627 = arith.addf %619, %626 : vector<192x32xf32>
    %c0_266 = arith.constant 0 : index
    %c0_267 = arith.constant 0 : index
    %628 = vector.load %arg19[%c0_266, %c0_267] : memref<1x32xf32, #tpu.memory_space<vmem>>, vector<1x32xf32>
    %629 = vector.broadcast %628 : vector<1x32xf32> to vector<192x32xf32>
    %630 = arith.addf %627, %629 : vector<192x32xf32>
    %cst_268 = arith.constant 0.000000e+00 : f32
    %631 = vector.broadcast %cst_268 : f32 to vector<192x32xf32>
    %632 = arith.maximumf %630, %631 : vector<192x32xf32>
    %633 = arith.addf %632, %9 : vector<192x32xf32>
    %c0_269 = arith.constant 0 : index
    %c0_270 = arith.constant 0 : index
    %634 = vector.load %arg20[%c0_269, %c0_270] : memref<8x32xbf16, #tpu.memory_space<vmem>>, vector<8x32xbf16>
    %635 = arith.truncf %633 : vector<192x32xf32> to vector<192x32xbf16>
    "tpu.trace_start"() <{level = 10 : i32, message = "jc,mc->jm"}> : () -> ()
    %cst_271 = arith.constant dense<0.000000e+00> : vector<8x192xf32>
    %636 = tpu.matmul %634, %635, %cst_271 {dimension_numbers = #tpu.dot_dimension_numbers<[1], [1], [0], [0], [0, 0, 1, 0], [], []>} : vector<8x32xbf16>, vector<192x32xbf16>, vector<8x192xf32> -> vector<8x192xf32>
    "tpu.trace_stop"() : () -> ()
    %c0_272 = arith.constant 0 : index
    %c0_273 = arith.constant 0 : index
    %637 = vector.load %arg21[%c0_272, %c0_273] : memref<8x1xf32, #tpu.memory_space<vmem>>, vector<8x1xf32>
    %638 = vector.broadcast %637 : vector<8x1xf32> to vector<8x192xf32>
    %639 = arith.addf %636, %638 : vector<8x192xf32>
    %c0_274 = arith.constant 0 : index
    %c0_275 = arith.constant 0 : index
    %c0_276 = arith.constant 0 : index
    %640 = vector.load %arg22[%c0_274, %c0_275, %c0_276] : memref<1x8x192xf32, #tpu.memory_space<vmem>>, vector<1x8x192xf32>
    %641 = vector.shape_cast %640 : vector<1x8x192xf32> to vector<8x192xf32>
    %642 = vector.shape_cast %639 : vector<8x192xf32> to vector<1x8x192xf32>
    tpu.vector_store %arg22[%c0_274, %c0_275, %c0_276], %642 {strides = array<i32>} : memref<1x8x192xf32, #tpu.memory_space<vmem>>, vector<1x8x192xf32>,
    return
  }
  func.func @transform_0(%arg0: i32) -> (i32, i32, i32) {
    %c0_i32 = arith.constant 0 : i32
    %c0_i32_0 = arith.constant 0 : i32
    %c0_i32_1 = arith.constant 0 : i32
    return %arg0, %c0_i32, %c0_i32_0 : i32, i32, i32
  }
  func.func @transform_1(%arg0: i32) -> (i32, i32, i32) {
    %c0_i32 = arith.constant 0 : i32
    %c0_i32_0 = arith.constant 0 : i32
    %c0_i32_1 = arith.constant 0 : i32
    return %arg0, %c0_i32, %c0_i32_0 : i32, i32, i32
  }
  func.func @transform_2(%arg0: i32) -> (i32, i32) {
    %c0_i32 = arith.constant 0 : i32
    %c0_i32_0 = arith.constant 0 : i32
    %c0_i32_1 = arith.constant 0 : i32
    return %c0_i32, %c0_i32_0 : i32, i32
  }
  func.func @transform_3(%arg0: i32) -> (i32, i32) {
    %c0_i32 = arith.constant 0 : i32
    %c0_i32_0 = arith.constant 0 : i32
    %c0_i32_1 = arith.constant 0 : i32
    return %c0_i32, %c0_i32_0 : i32, i32
  }
  func.func @transform_4(%arg0: i32) -> (i32, i32, i32) {
    %c0_i32 = arith.constant 0 : i32
    %c0_i32_0 = arith.constant 0 : i32
    %c0_i32_1 = arith.constant 0 : i32
    %c0_i32_2 = arith.constant 0 : i32
    return %c0_i32, %c0_i32_0, %c0_i32_1 : i32, i32, i32
  }
  func.func @transform_5(%arg0: i32) -> (i32, i32, i32) {
    %c0_i32 = arith.constant 0 : i32
    %c0_i32_0 = arith.constant 0 : i32
    %c0_i32_1 = arith.constant 0 : i32
    %c0_i32_2 = arith.constant 0 : i32
    return %c0_i32, %c0_i32_0, %c0_i32_1 : i32, i32, i32
  }
  func.func @transform_6(%arg0: i32) -> (i32, i32, i32) {
    %c0_i32 = arith.constant 0 : i32
    %c0_i32_0 = arith.constant 0 : i32
    %c0_i32_1 = arith.constant 0 : i32
    %c0_i32_2 = arith.constant 0 : i32
    return %c0_i32, %c0_i32_0, %c0_i32_1 : i32, i32, i32
  }
  func.func @transform_7(%arg0: i32) -> (i32, i32, i32) {
    %c0_i32 = arith.constant 0 : i32
    %c0_i32_0 = arith.constant 0 : i32
    %c0_i32_1 = arith.constant 0 : i32
    %c0_i32_2 = arith.constant 0 : i32
    return %c0_i32, %c0_i32_0, %c0_i32_1 : i32, i32, i32
  }
  func.func @transform_8(%arg0: i32) -> (i32, i32, i32) {
    %c0_i32 = arith.constant 0 : i32
    %c0_i32_0 = arith.constant 0 : i32
    %c0_i32_1 = arith.constant 0 : i32
    %c0_i32_2 = arith.constant 0 : i32
    return %c0_i32, %c0_i32_0, %c0_i32_1 : i32, i32, i32
  }
  func.func @transform_9(%arg0: i32) -> (i32, i32, i32) {
    %c0_i32 = arith.constant 0 : i32
    %c0_i32_0 = arith.constant 0 : i32
    %c0_i32_1 = arith.constant 0 : i32
    %c0_i32_2 = arith.constant 0 : i32
    return %c0_i32, %c0_i32_0, %c0_i32_1 : i32, i32, i32
  }
  func.func @transform_10(%arg0: i32) -> (i32, i32, i32) {
    %c0_i32 = arith.constant 0 : i32
    %c0_i32_0 = arith.constant 0 : i32
    %c0_i32_1 = arith.constant 0 : i32
    %c0_i32_2 = arith.constant 0 : i32
    return %c0_i32, %c0_i32_0, %c0_i32_1 : i32, i32, i32
  }
  func.func @transform_11(%arg0: i32) -> (i32, i32, i32) {
    %c0_i32 = arith.constant 0 : i32
    %c0_i32_0 = arith.constant 0 : i32
    %c0_i32_1 = arith.constant 0 : i32
    %c0_i32_2 = arith.constant 0 : i32
    return %c0_i32, %c0_i32_0, %c0_i32_1 : i32, i32, i32
  }
  func.func @transform_12(%arg0: i32) -> (i32, i32, i32) {
    %c0_i32 = arith.constant 0 : i32
    %c0_i32_0 = arith.constant 0 : i32
    %c0_i32_1 = arith.constant 0 : i32
    %c0_i32_2 = arith.constant 0 : i32
    return %c0_i32, %c0_i32_0, %c0_i32_1 : i32, i32, i32
  }
  func.func @transform_13(%arg0: i32) -> (i32, i32, i32) {
    %c0_i32 = arith.constant 0 : i32
    %c0_i32_0 = arith.constant 0 : i32
    %c0_i32_1 = arith.constant 0 : i32
    %c0_i32_2 = arith.constant 0 : i32
    return %c0_i32, %c0_i32_0, %c0_i32_1 : i32, i32, i32
  }
  func.func @transform_14(%arg0: i32) -> (i32, i32, i32) {
    %c0_i32 = arith.constant 0 : i32
    %c0_i32_0 = arith.constant 0 : i32
    %c0_i32_1 = arith.constant 0 : i32
    %c0_i32_2 = arith.constant 0 : i32
    return %c0_i32, %c0_i32_0, %c0_i32_1 : i32, i32, i32
  }
  func.func @transform_15(%arg0: i32) -> (i32, i32, i32) {
    %c0_i32 = arith.constant 0 : i32
    %c0_i32_0 = arith.constant 0 : i32
    %c0_i32_1 = arith.constant 0 : i32
    %c0_i32_2 = arith.constant 0 : i32
    return %c0_i32, %c0_i32_0, %c0_i32_1 : i32, i32, i32
  }
  func.func @transform_16(%arg0: i32) -> (i32, i32) {
    %c0_i32 = arith.constant 0 : i32
    %c0_i32_0 = arith.constant 0 : i32
    %c0_i32_1 = arith.constant 0 : i32
    return %c0_i32, %c0_i32_0 : i32, i32
  }
  func.func @transform_17(%arg0: i32) -> (i32, i32, i32) {
    %c0_i32 = arith.constant 0 : i32
    %c0_i32_0 = arith.constant 0 : i32
    %c0_i32_1 = arith.constant 0 : i32
    %c0_i32_2 = arith.constant 0 : i32
    return %c0_i32, %c0_i32_0, %c0_i32_1 : i32, i32, i32
  }
  func.func @transform_18(%arg0: i32) -> (i32, i32) {
    %c0_i32 = arith.constant 0 : i32
    %c0_i32_0 = arith.constant 0 : i32
    %c0_i32_1 = arith.constant 0 : i32
    return %c0_i32, %c0_i32_0 : i32, i32
  }
  func.func @transform_19(%arg0: i32) -> (i32, i32) {
    %c0_i32 = arith.constant 0 : i32
    %c0_i32_0 = arith.constant 0 : i32
    %c0_i32_1 = arith.constant 0 : i32
    return %c0_i32, %c0_i32_0 : i32, i32
  }
  func.func @transform_20(%arg0: i32) -> (i32, i32) {
    %c0_i32 = arith.constant 0 : i32
    %c0_i32_0 = arith.constant 0 : i32
    %c0_i32_1 = arith.constant 0 : i32
    return %c0_i32, %c0_i32_0 : i32, i32
  }
  func.func @transform_21(%arg0: i32) -> (i32, i32, i32) {
    %c0_i32 = arith.constant 0 : i32
    %c0_i32_0 = arith.constant 0 : i32
    %c0_i32_1 = arith.constant 0 : i32
    return %arg0, %c0_i32, %c0_i32_0 : i32, i32, i32
  }
}

</mosaic_0001>

<bundles_post_ra>
// kernel: interformer_forward.1
= control target key start
LH: loop header
LB: loop body
LE: loop exit
PB: predicated region body
PF: predicated region fallthrough
CT: control target
= control target key end

     0   :  { %s20630_s0 = inlined_call_operand.vmem [shape: f32[2,192,4], index: 0, kind: input, shape index: {}]   ;;  %s20631_s1 = inlined_call_operand.vmem [shape: f32[2,1,48], index: 1, kind: input, shape index: {}]   ;;  %s20632_s2 = inlined_call_operand.vmem [shape: bf16[4,32], index: 2, kind: input, shape index: {}]   ;;  %s20633_s3 = inlined_call_operand.vmem [shape: f32[1,32], index: 3, kind: input, shape index: {}]   ;;  %s20634_s4 = inlined_call_operand.vmem [shape: bf16[2,32,96], index: 4, kind: input, shape index: {}]   ;;  %s20635_s5 = inlined_call_operand.vmem [shape: f32[2,1,96], index: 5, kind: input, shape index: {}]   ;;  %s20636_s6 = inlined_call_operand.vmem [shape: bf16[2,32,32], index: 6, kind: input, shape index: {}]   ;;  %s20637_s7 = inlined_call_operand.vmem [shape: f32[2,1,32], index: 7, kind: input, shape index: {}]   ;;  %s20638_s8 = inlined_call_operand.vmem [shape: bf16[2,32,64], index: 8, kind: input, shape index: {}]   ;;  %s20639_s9 = inlined_call_operand.vmem [shape: f32[2,1,64], index: 9, kind: input, shape index: {}]   ;;  %s20640_s10 = inlined_call_operand.vmem [shape: bf16[2,64,32], index: 10, kind: input, shape index: {}]   ;;  %s20641_s11 = inlined_call_operand.vmem [shape: f32[2,1,32], index: 11, kind: input, shape index: {}]   ;;  %s20642_s12 = inlined_call_operand.vmem [shape: f32[2,4,32], index: 12, kind: input, shape index: {}]   ;;  %s20643_s13 = inlined_call_operand.vmem [shape: bf16[9,192,48], index: 13, kind: input, shape index: {}]   ;;  %s20644_s14 = inlined_call_operand.vmem [shape: bf16[9,192,192], index: 14, kind: input, shape index: {}]   ;;  %s20645_s15 = inlined_call_operand.vmem [shape: bf16[9,32,32], index: 15, kind: input, shape index: {}]   ;;  %s20646_s16 = inlined_call_operand.vmem [shape: f32[192,32], index: 16, kind: input, shape index: {}]   ;;  %s20647_s17 = inlined_call_operand.vmem [shape: bf16[9,32,32], index: 17, kind: input, shape index: {}]   ;;  %s20648_s18 = inlined_call_operand.vmem [shape: f32[1,32], index: 18, kind: input, shape index: {}]   ;;  %s20649_s19 = inlined_call_operand.vmem [shape: bf16[8,32], index: 19, kind: input, shape index: {}]   ;;  %s20650_s20 = inlined_call_operand.vmem [shape: f32[8,1], index: 20, kind: input, shape index: {}]   ;;  %s20651_s21 = inlined_call_operand.vmem [shape: f32[2,8,192], index: 21, kind: output, shape index: {}]  }
   0x1   :  { %20757 = sst [smem:[#allocation37_spill]] %s20630_s0 }
   0x2   :  { %20758 = sst [smem:[#allocation38_spill]] %s20631_s1 }
   0x3   :  { %20759 = sst [smem:[#allocation39_spill]] %s20632_s2  ;;  %s16185_s2 = smov 0  }
   0x4   :  { %20760 = sst [smem:[#allocation40_spill]] %s20633_s3 }
   0x5   :  { %20761 = sst [smem:[#allocation41_spill]] %s20634_s4 }
   0x6   :  { %20762 = sst [smem:[#allocation42_spill]] %s20635_s5 }
   0x7 LB: > { %s12092_s25 = sadd.s32 4294967295, %s16055_s2   ;;  %p12096_p0 = scmp.ge.s32.totalorder %s16055_s2, 1  ;;  %s16055_s2 = sphi %s16185_s2, %s31_s2  }
   0x8   : > { %p595_p1 = scmp.lt.s32.totalorder %s16055_s2, 3 }
   0xa   : > { %p596_p2 = pnand %p12096_p0, %p595_p1 }
   0xc   : > { %599 = sbr.rel (%p596_p2) target bundleno = 8886 (0x22b6), region = 104 }
  0x13   : > { %s20763_s3 = sld [smem:[#allocation39_spill]]  ;;  %vm753_vm0 = vcmask 1041408   ;;  %p658_p3 = scmp.lt.s32.totalorder %s12092_s25, 1  ;;  %vm716_vm1 = vcmask 31744   ;;  %vm929_vm2 = vcmask 261120   ;;  %vm931_vm3 = vcmask 523264  }
  0x14   : > { %s20764_s4 = sld [smem:[#allocation37_spill]]  ;;  %s20765_s23 = sld [smem:[#allocation40_spill]]  ;;  %vm933_vm4 = vcmask 785408   ;;  %vm947_vm5 = vcmask 1040384   ;;  %vm16061_vm6 = vmmov 0   ;;  %vm950_vm7 = vcmask 1042432  }
  0x15   : > { %s20901_s25 = smov (!%p658_p3, %s12092_s25), 1  ;;  %s16057_s1 = smov 32   ;;  %vm963_vm8 = vcmask 1043456   ;;  %vm1177_vm9 = vcmask 64512   ;;  %vm1253_vm10 = vcmask 392192   ;;  %vm2169_vm11 = vcmask 130048  }
  0x16   : > { %s15201_s28 = smul.u32 192, %s20901_s25  ;;  %s20657_s24 = smov 64   ;;  %vm2176_vm12 = vcmask 195584  }
  0x17   : > { %s16059_s26 = smov 96   ;;  %s20791_s5 = sld [smem:[#allocation42_spill]] }
  0x18   : > { %s16062_s22 = smov 88   ;;  %s20659_s27 = smov 72  }
  0x19   : > { %v708_v0 = vld [vmem:[%s20763_s3] sm:$0x3]  ;;  %s20702_s3 = smov 112   ;;  %s20692_s29 = smov 104  }
  0x1a   : > { %15200 = vmatprep.subr.msk.bf16.mxu0 %vm753_vm0, %v708_v0  ;;  %v755_v1 = vsel %vm753_vm0, %v708_v0, 0  ;;  %s16204_s30 = scalar_lea.vmem %s20764_s4, %s15201_s28  ;;  %v16245_v38 = vld [vmem:[%s20765_s23] ss:$0 sm:$0xff]  ;;  %s20790_s28 = sld [smem:[#allocation41_spill]] }
  0x1b   : > { %13863 = vmatpush3.bf16.msra.mxu0 %v755_v1  ;;  %v672_v2 = vld [vmem:[%s16204_s30] sm:$0xff]  ;;  %v673_v3 = vld [vmem:[%s16204_s30 + $0x8] sm:$0xff]  ;;  %v674_v4 = vld [vmem:[%s16204_s30 + $0x10] sm:$0xff]  ;;  %s20694_s23 = smov 80   ;;  %s20690_s0 = smov 56  }
  0x1c   : > { %v696_v5 = vpack.c.bf16 %v673_v3, %v672_v2  ;;  %v675_v6 = vld [vmem:[%s16204_s30 + $0x18] sm:$0xff]  ;;  %v676_v7 = vld [vmem:[%s16204_s30 + $0x20] sm:$0xff]  ;;  %v677_v8 = vld [vmem:[%s16204_s30 + $0x28] sm:$0xff]  ;;  %s20686_s4 = smov 40  }
  0x1d   : > { %v697_v9 = vpack.c.bf16 %v675_v6, %v674_v4  ;;  %v698_v10 = vpack.c.bf16 %v677_v8, %v676_v7  ;;  %v678_v11 = vld [vmem:[%s16204_s30 + $0x30] sm:$0xff]  ;;  %v679_v12 = vld [vmem:[%s16204_s30 + $0x38] sm:$0xff]  ;;  %v680_v13 = vld [vmem:[%s16204_s30 + $0x40] sm:$0xff] }
  0x1e   : > { %13864 = vmatprep.mubr.msk.bf16.mxu0 %vm716_vm1, %v696_v5  ;;  %v681_v14 = vld [vmem:[%s16204_s30 + $0x48] sm:$0xff]  ;;  %v699_v15 = vpack.c.bf16 %v679_v12, %v678_v11  ;;  %v682_v17 = vld [vmem:[%s16204_s30 + $0x50] sm:$0xff]  ;;  %v683_v18 = vld [vmem:[%s16204_s30 + $0x58] sm:$0xff] }
  0x1f   : > { %13865 = vmatmul.mubr.msk.bf16.vlgmr.msra.gmra.mrb[0].mxu0 %vm716_vm1, %v697_v9  ;;  %v700_v16 = vpack.c.bf16 %v681_v14, %v680_v13  ;;  %v684_v19 = vld [vmem:[%s16204_s30 + $0x60] sm:$0xff]  ;;  %v685_v20 = vld [vmem:[%s16204_s30 + $0x68] sm:$0xff]  ;;  %v701_v21 = vpack.c.bf16 %v683_v18, %v682_v17  ;;  %v686_v23 = vld [vmem:[%s16204_s30 + $0x70] sm:$0xff] }
  0x20   : > { %13868 = vmatprep.mubr.msk.bf16.mxu0 %vm716_vm1, %v698_v10  ;;  %v702_v22 = vpack.c.bf16 %v685_v20, %v684_v19  ;;  %v687_v24 = vld [vmem:[%s16204_s30 + $0x78] sm:$0xff]  ;;  %v688_v25 = vld [vmem:[%s16204_s30 + $0x80] sm:$0xff]  ;;  %v689_v26 = vld [vmem:[%s16204_s30 + $0x88] sm:$0xff] }
  0x21   : > { %v703_v27 = vpack.c.bf16 %v687_v24, %v686_v23  ;;  %v704_v28 = vpack.c.bf16 %v689_v26, %v688_v25  ;;  %v690_v29 = vld [vmem:[%s16204_s30 + $0x90] sm:$0xff]  ;;  %v691_v30 = vld [vmem:[%s16204_s30 + $0x98] sm:$0xff]  ;;  %v692_v31 = vld [vmem:[%s16204_s30 + $0xa0] sm:$0xff] }
  0x22   : > { %v693_v32 = vld [vmem:[%s16204_s30 + $0xa8] sm:$0xff]  ;;  %v705_v33 = vpack.c.bf16 %v691_v30, %v690_v29  ;;  %v694_v35 = vld [vmem:[%s16204_s30 + $0xb0] sm:$0xff]  ;;  %v695_v36 = vld [vmem:[%s16204_s30 + $0xb8] sm:$0xff]  ;;  %s20700_s30 = smov 8  }
  0x23   : > { %v706_v34 = vpack.c.bf16 %v693_v32, %v692_v31  ;;  %v707_v37 = vpack.c.bf16 %v695_v36, %v694_v35 }
  0x27   : > { %13869 = vmatmul.mubr.msk.bf16.gmra.mrb[4].mxu0 %vm716_vm1, %v699_v15 }
  0x28   : > { %13872 = vmatprep.mubr.msk.bf16.mxu0 %vm716_vm1, %v700_v16 }
  0x2f   : > { %13873 = vmatmul.mubr.msk.bf16.gmra.mrb[8].mxu0 %vm716_vm1, %v701_v21 }
  0x30   : > { %13876 = vmatprep.mubr.msk.bf16.mxu0 %vm716_vm1, %v702_v22 }
  0x37   : > { %13877 = vmatmul.mubr.msk.bf16.gmra.mrb[12].mxu0 %vm716_vm1, %v703_v27 }
  0x38   : > { %13880 = vmatprep.mubr.msk.bf16.mxu0 %vm716_vm1, %v704_v28 }
  0x3f   : > { %13881 = vmatmul.mubr.msk.bf16.gmra.mrb[16].mxu0 %vm716_vm1, %v705_v33 }
  0x40   : > { %13884 = vmatprep.mubr.msk.bf16.mxu0 %vm716_vm1, %v706_v34 }
  0x47   : > { %13885 = vmatmul.mubr.msk.bf16.gmra.mrb[20].mxu0 %vm716_vm1, %v707_v37 }
  0xf2   : > { %v13866_v39 = vpop.f32.mrb[0].mxu0 }
  0xf3   : > { %v791_v40 = vpop.f32.mrb[1].mxu0  ;;  %v16248_v41 = vadd.f32 %v13866_v39, %v16245_v38 }
  0xf4   : > { %v16251_v42 = vadd.f32 %v16245_v38, %v791_v40  ;;  %v13867_v43 = vpop.f32.mrb[2].mxu0 }
  0xf5   : > { %20766 = vst [vmem:[#allocation2_spill] sm:$0xff] %v16248_v41  ;;  %v794_v44 = vpop.f32.mrb[3].mxu0  ;;  %v803_v45 = vadd.f32 %v13867_v43, %v16245_v38  ;;  %v20671_v47 = vmax.f32 %v16248_v41, 0.0 }
  0xf6   : > { %20767 = vst [vmem:[#allocation3_spill] sm:$0xff] %v16251_v42  ;;  %v795_v46 = vadd.f32 %v16245_v38, %v794_v44 }
  0xf7   : > { %v16258_v49 = vmax.f32 %v803_v45, 0.0 }
  0xf8   : > { %v16256_v48 = vmax.f32 %v795_v46, 0.0 }
  0xf9   : > { %20769 = vst [vmem:[#allocation5_spill] sm:$0xff] %v16258_v49 }
  0xfa   : > { %20768 = vst [vmem:[#allocation4_spill] sm:$0xff] %v16256_v48  ;;  %v13870_v50 = vpop.f32.mrb[4].mxu0  ;;  %v911_v51 = vmax.f32 %v16256_v48, %v20671_v47 }
  0xfb   : > { %v807_v52 = vpop.f32.mrb[5].mxu0  ;;  %v16264_v53 = vadd.f32 %v13870_v50, %v16245_v38 }
  0xfc   : > { %v16267_v54 = vadd.f32 %v16245_v38, %v807_v52  ;;  %v13871_v55 = vpop.f32.mrb[6].mxu0  ;;  %v912_v56 = vmax.f32 %v911_v51, %v16258_v49 }
  0xfd   : > { %20770 = vst [vmem:[#allocation6_spill] sm:$0xff] %v16264_v53  ;;  %v810_v57 = vpop.f32.mrb[7].mxu0  ;;  %v16272_v59 = vadd.f32 %v13871_v55, %v16245_v38  ;;  %v20669_v61 = vmax.f32 %v16264_v53, 0.0 }
  0xfe   : > { %20771 = vst [vmem:[#allocation7_spill] sm:$0xff] %v16267_v54  ;;  %v20670_v58 = vmax.f32 %v16267_v54, 0.0  ;;  %v811_v60 = vadd.f32 %v16245_v38, %v810_v57  ;;  %918 = vrot.lane.b32.xlu0 %v912_v56, %s16057_s1 }
  0xff   : > { %20772 = vst [vmem:[#allocation8_spill] sm:$0xff] %v16272_v59  ;;  %v20668_v2 = vmax.f32 %v16272_v59, 0.0 }
 0x100   : > { %v16277_v62 = vmax.f32 %v811_v60, 0.0  ;;  %v913_v63 = vmax.f32 %v16258_v49, %v20670_v58 }
 0x102   : > { %20773 = vst [vmem:[#allocation9_spill] sm:$0xff] %v16277_v62  ;;  %v13874_v0 = vpop.f32.mrb[8].mxu0  ;;  %v914_v1 = vmax.f32 %v913_v63, %v16277_v62  ;;  %v915_v3 = vmax.f32 %v16277_v62, %v20669_v61 }
 0x103   : > { %v823_v4 = vpop.f32.mrb[9].mxu0  ;;  %v16288_v5 = vadd.f32 %v13874_v0, %v16245_v38 }
 0x104   : > { %v16291_v6 = vadd.f32 %v16245_v38, %v823_v4  ;;  %v13875_v7 = vpop.f32.mrb[10].mxu0  ;;  %922 = vrot.lane.b32.xlu0 %v914_v1, %s20657_s24  ;;  %v916_v8 = vmax.f32 %v915_v3, %v20668_v2 }
 0x105   : > { %20774 = vst [vmem:[#allocation10_spill] sm:$0xff] %v16288_v5  ;;  %v826_v9 = vpop.f32.mrb[11].mxu0  ;;  %v835_v10 = vadd.f32 %v13875_v7, %v16245_v38  ;;  %v20666_v12 = vmax.f32 %v16288_v5, 0.0 }
 0x106   : > { %20775 = vst [vmem:[#allocation11_spill] sm:$0xff] %v16291_v6  ;;  %v827_v11 = vadd.f32 %v16245_v38, %v826_v9  ;;  %926 = vrot.lane.b32.xlu1 %v916_v8, %s16059_s26 }
 0x107   : > { %v16302_v14 = vmax.f32 %v835_v10, 0.0 }
 0x108   : > { %v16300_v13 = vmax.f32 %v827_v11, 0.0 }
 0x109   : > { %20777 = vst [vmem:[#allocation13_spill] sm:$0xff] %v16302_v14 }
 0x10a   : > { %20776 = vst [vmem:[#allocation12_spill] sm:$0xff] %v16300_v13  ;;  %v13878_v15 = vpop.f32.mrb[12].mxu0  ;;  %v967_v16 = vmax.f32 %v16300_v13, %v20666_v12 }
 0x10b   : > { %v839_v17 = vpop.f32.mrb[13].mxu0  ;;  %v16308_v18 = vadd.f32 %v13878_v15, %v16245_v38  ;;  %v20672_v15 = vmax.f32 %v16251_v42, 0.0 }
 0x10c   : > { %v16311_v19 = vadd.f32 %v16245_v38, %v839_v17  ;;  %v13879_v20 = vpop.f32.mrb[14].mxu0  ;;  %v968_v21 = vmax.f32 %v967_v16, %v16302_v14 }
 0x10d   : > { %20778 = vst [vmem:[#allocation14_spill] sm:$0xff] %v16308_v18  ;;  %v842_v22 = vpop.f32.mrb[15].mxu0  ;;  %v16316_v24 = vadd.f32 %v13879_v20, %v16245_v38  ;;  %v20664_v26 = vmax.f32 %v16308_v18, 0.0  ;;  %v910_v17 = vmax.f32 %v20672_v15, %v16256_v48 }
 0x10e   : > { %20779 = vst [vmem:[#allocation15_spill] sm:$0xff] %v16311_v19  ;;  %v20665_v23 = vmax.f32 %v16311_v19, 0.0  ;;  %v843_v25 = vadd.f32 %v16245_v38, %v842_v22  ;;  %974 = vrot.lane.b32.xlu1 %v968_v21, %s16057_s1 }
 0x10f   : > { %20780 = vst [vmem:[#allocation16_spill] sm:$0xff] %v16316_v24  ;;  %v20663_v29 = vmax.f32 %v16316_v24, 0.0 }
 0x110   : > { %v16321_v27 = vmax.f32 %v843_v25, 0.0  ;;  %v969_v28 = vmax.f32 %v16302_v14, %v20665_v23  ;;  %v20673_v25 = vmov 0.0  }
 0x111   : > { %13888 = vmatprep.subr.bf16.mxu1 %v20673_v25  ;;  %13922 = vmatprep.subr.bf16.mxu0 %v20673_v25 }
 0x112   : > { %20781 = vst [vmem:[#allocation17_spill] sm:$0xff] %v16321_v27  ;;  %v13882_v30 = vpop.f32.mrb[16].mxu0  ;;  %v970_v31 = vmax.f32 %v969_v28, %v16321_v27  ;;  %v971_v32 = vmax.f32 %v16321_v27, %v20664_v26  ;;  %v15320_v28 = vld [vmem:[%s20790_s28] sm:$0xff]   ;;  %13892 = vmatprep.mubr.msk.bf16.mxu1 %vm16061_vm6, %v20673_v25  ;;  %13928 = vmatprep.mubr.msk.bf16.mxu0 %vm16061_vm6, %v20673_v25 }
 0x113   : > { %v855_v33 = vpop.f32.mrb[17].mxu0  ;;  %v16332_v34 = vadd.f32 %v13882_v30, %v16245_v38  ;;  %13889 = vmatpush3.bf16.msra.mxu1 %v15320_v28 }
 0x114   : > { %v16335_v35 = vadd.f32 %v16245_v38, %v855_v33  ;;  %v13883_v36 = vpop.f32.mrb[18].mxu0  ;;  %978 = vrot.lane.b32.xlu0 %v970_v31, %s20657_s24  ;;  %v972_v37 = vmax.f32 %v971_v32, %v20663_v29  ;;  %13890 = vmatprep.subr.bf16.mxu1 %v20673_v25  ;;  %v15321_v33 = vld [vmem:[%s20790_s28 + $0x8] sm:$0xff]  }
 0x115   : > { %20782 = vst [vmem:[#allocation18_spill] sm:$0xff] %v16332_v34  ;;  %v858_v39 = vpop.f32.mrb[19].mxu0  ;;  %v867_v40 = vadd.f32 %v13883_v36, %v16245_v38  ;;  %v20661_v44 = vmax.f32 %v16332_v34, 0.0 }
 0x116   : > { %20783 = vst [vmem:[#allocation19_spill] sm:$0xff] %v16335_v35  ;;  %v859_v43 = vadd.f32 %v16245_v38, %v858_v39  ;;  %982 = vrot.lane.b32.xlu1 %v972_v37, %s16059_s26 }
 0x117   : > { %v16346_v46 = vmax.f32 %v867_v40, 0.0  ;;  %13891 = vmatpush3.bf16.msra.mxu1 %v15321_v33 }
 0x118   : > { %v16344_v45 = vmax.f32 %v859_v43, 0.0  ;;  %13904 = vmatprep.subr.bf16.mxu1 %v20673_v25 }
 0x119   : > { %20785 = vst [vmem:[#allocation21_spill] sm:$0xff] %v16346_v46 }
 0x11a   : > { %20784 = vst [vmem:[#allocation20_spill] sm:$0xff] %v16344_v45  ;;  %v13886_v50 = vpop.f32.mrb[20].mxu0  ;;  %v1017_v51 = vmax.f32 %v16344_v45, %v20661_v44 }
 0x11b   : > { %v871_v52 = vpop.f32.mrb[21].mxu0  ;;  %v16352_v55 = vadd.f32 %v13886_v50, %v16245_v38 }
 0x11c   : > { %v16355_v56 = vadd.f32 %v16245_v38, %v871_v52  ;;  %v13887_v57 = vpop.f32.mrb[22].mxu0  ;;  %v1018_v60 = vmax.f32 %v1017_v51, %v16346_v46  ;;  %v20667_v51 = vmax.f32 %v16291_v6, 0.0 }
 0x11d   : > { %20786 = vst [vmem:[#allocation22_spill] sm:$0xff] %v16352_v55  ;;  %v874_v63 = vpop.f32.mrb[23].mxu0  ;;  %v16360_v1 = vadd.f32 %v13887_v57, %v16245_v38  ;;  %v20655_v4 = vmax.f32 %v16352_v55, 0.0 }
 0x11e   : > { %20787 = vst [vmem:[#allocation23_spill] sm:$0xff] %v16355_v56  ;;  %v20656_v0 = vmax.f32 %v16355_v56, 0.0  ;;  %v875_v3 = vadd.f32 %v16245_v38, %v874_v63  ;;  %1024 = vrot.lane.b32.xlu0 %v1018_v60, %s16057_s1  ;;  %v966_v63 = vmax.f32 %v20667_v51, %v16300_v13 }
 0x11f   : > { %20788 = vst [vmem:[#allocation24_spill] sm:$0xff] %v16360_v1  ;;  %v20654_v9 = vmax.f32 %v16360_v1, 0.0 }
 0x120   : > { %v16365_v7 = vmax.f32 %v875_v3, 0.0  ;;  %v1019_v8 = vmax.f32 %v16346_v46, %v20656_v0 }
 0x122   : > { %20789 = vst [vmem:[#allocation25_spill] sm:$0xff] %v16365_v7  ;;  %v1020_v10 = vmax.f32 %v1019_v8, %v16365_v7  ;;  %v1021_v11 = vmax.f32 %v16365_v7, %v20655_v4 }
 0x124   : > { %1028 = vrot.lane.b32.xlu1 %v1020_v10, %s20657_s24  ;;  %v1022_v38 = vmax.f32 %v1021_v11, %v20654_v9 }
 0x126   : > { %1032 = vrot.lane.b32.xlu0 %v1022_v38, %s16059_s26 }
 0x170   : > { %v919_v16 = vpop.permute.xlu0 %918 }
 0x171   : > { %v930_v20 = vsel %vm929_vm2, %v910_v17, %v919_v16 }
 0x176   : > { %v923_v21 = vpop.permute.xlu0 %922 }
 0x177   : > { %v932_v22 = vsel %vm931_vm3, %v930_v20, %v923_v21 }
 0x178   : > { %v927_v30 = vpop.permute.xlu1 %926 }
 0x179   : > { %v934_v31 = vsel %vm933_vm4, %v932_v22, %v927_v30 }
 0x17a   : > { %v936_v32 = vrot.slane %v934_v31, 1  ;;  %v939_v37 = vrot.slane %v934_v31, 2 }
 0x17c   : > { %v938_v36 = vmax.f32 %v934_v31, %v936_v32  ;;  %v20662_v32 = vmax.f32 %v16335_v35, 0.0 }
 0x17e   : > { %v941_v39 = vmax.f32 %v938_v36, %v939_v37 }
 0x180   : > { %v943_v40 = vrot.slane %v941_v39, 1  ;;  %v945_v43 = vrot.slane %v941_v39, 2  ;;  %v948_v50 = vsel %vm947_vm5, %v938_v36, %v941_v39  ;;  %v975_v57 = vpop.permute.xlu1 %974  ;;  %v1016_v39 = vmax.f32 %v20662_v32, %v16344_v45 }
 0x181   : > { %v985_v8 = vsel %vm929_vm2, %v966_v63, %v975_v57 }
 0x182   : > { %v949_v52 = vsel %vm753_vm0, %v948_v50, %v943_v40 }
 0x183   : > { %v951_v60 = vsel %vm950_vm7, %v949_v52, %v945_v43 }
 0x184   : > { %957 = vrot.lane.b32.xlu0 %v951_v60, %s20657_s24  ;;  %v953_v3 = vrot.slane %v951_v60, 4 }
 0x186   : > { %v979_v10 = vpop.permute.xlu0 %978  ;;  %954 = vrot.lane.b32.xlu1 %v953_v3, %s16059_s26 }
 0x187   : > { %v986_v11 = vsel %vm931_vm3, %v985_v8, %v979_v10 }
 0x188   : > { %v983_v38 = vpop.permute.xlu1 %982 }
 0x189   : > { %v987_v16 = vsel %vm933_vm4, %v986_v11, %v983_v38 }
 0x18a   : > { %v989_v17 = vrot.slane %v987_v16, 1  ;;  %960 = vrot.lane.b32.xlu1 %v953_v3, %s16057_s1  ;;  %v992_v21 = vrot.slane %v987_v16, 2 }
 0x18c   : > { %v991_v20 = vmax.f32 %v987_v16, %v989_v17 }
 0x18e   : > { %v994_v22 = vmax.f32 %v991_v20, %v992_v21 }
 0x190   : > { %v996_v28 = vrot.slane %v994_v22, 1  ;;  %v998_v30 = vrot.slane %v994_v22, 2  ;;  %v1000_v31 = vsel %vm947_vm5, %v991_v20, %v994_v22  ;;  %v1025_v36 = vpop.permute.xlu0 %1024 }
 0x191   : > { %v1035_v43 = vsel %vm929_vm2, %v1016_v39, %v1025_v36 }
 0x192   : > { %v1001_v33 = vsel %vm753_vm0, %v1000_v31, %v996_v28 }
 0x193   : > { %v1002_v37 = vsel %vm950_vm7, %v1001_v33, %v998_v30 }
 0x194   : > { %1008 = vrot.lane.b32.xlu1 %v1002_v37, %s20657_s24  ;;  %v1004_v40 = vrot.slane %v1002_v37, 4 }
 0x196   : > { %v1029_v50 = vpop.permute.xlu1 %1028  ;;  %1005 = vrot.lane.b32.xlu0 %v1004_v40, %s16059_s26 }
 0x197   : > { %v1036_v52 = vsel %vm931_vm3, %v1035_v43, %v1029_v50 }
 0x198   : > { %v1033_v57 = vpop.permute.xlu0 %1032 }
 0x199   : > { %v1037_v63 = vsel %vm933_vm4, %v1036_v52, %v1033_v57 }
 0x19a   : > { %v1039_v3 = vrot.slane %v1037_v63, 1  ;;  %1011 = vrot.lane.b32.xlu0 %v1004_v40, %s16057_s1  ;;  %v1042_v10 = vrot.slane %v1037_v63, 2 }
 0x19c   : > { %v1041_v8 = vmax.f32 %v1037_v63, %v1039_v3 }
 0x19e   : > { %v1044_v11 = vmax.f32 %v1041_v8, %v1042_v10 }
 0x1a0   : > { %v1046_v38 = vrot.slane %v1044_v11, 1  ;;  %v1048_v16 = vrot.slane %v1044_v11, 2  ;;  %v1050_v17 = vsel %vm947_vm5, %v1041_v8, %v1044_v11 }
 0x1a2   : > { %v1051_v20 = vsel %vm753_vm0, %v1050_v17, %v1046_v38  ;;  %v12113_v38 = vld [vmem:[%s20791_s5] ss:$0 sm:$0xff] }
 0x1a3   : > { %v1052_v21 = vsel %vm950_vm7, %v1051_v20, %v1048_v16 }
 0x1a4   : > { %1058 = vrot.lane.b32.xlu0 %v1052_v21, %s20657_s24  ;;  %v1054_v22 = vrot.slane %v1052_v21, 4 }
 0x1a6   : > { %1055 = vrot.lane.b32.xlu1 %v1054_v22, %s16059_s26 }
 0x1aa   : > { %1061 = vrot.lane.b32.xlu1 %v1054_v22, %s16057_s1  ;;  %s20704_s1 = smov 120  }
 0x1f6   : > { %v958_v30 = vpop.permute.xlu0 %957 }
 0x1f8   : > { %v955_v28 = vpop.permute.xlu1 %954 }
 0x1f9   : > { %v16433_v33 = vsel %vm963_vm8, %v951_v60, %v955_v28 }
 0x1fc   : > { %v961_v31 = vpop.permute.xlu1 %960 }
 0x1fd   : > { %v16436_v36 = vsel %vm963_vm8, %v958_v30, %v961_v31 }
 0x1fe   : > { %v1067_v39 = vpack.c.bf16 %v16436_v36, %v16433_v33 }
 0x200   : > { %13893 = vmatmul.mubr.msk.bf16.vlgmr.msra.gmra.mrb[0].mxu1 %vm929_vm2, %v1067_v39 }
 0x201   : > { %13896 = vmatprep.mubr.msk.bf16.mxu1 %vm16061_vm6, %v20673_v25 }
 0x206   : > { %v1009_v43 = vpop.permute.xlu1 %1008 }
 0x208   : > { %v1006_v40 = vpop.permute.xlu0 %1005 }
 0x209   : > { %v16444_v52 = vsel %vm963_vm8, %v1002_v37, %v1006_v40 }
 0x20c   : > { %v1012_v50 = vpop.permute.xlu0 %1011 }
 0x20d   : > { %v16447_v60 = vsel %vm963_vm8, %v1009_v43, %v1012_v50 }
 0x20e   : > { %v1068_v57 = vpack.c.bf16 %v16447_v60, %v16444_v52 }
 0x210   : > { %13897 = vmatmul.mubr.msk.bf16.gmra.mrb[4].mxu1 %vm929_vm2, %v1068_v57 }
 0x211   : > { %13900 = vmatprep.mubr.msk.bf16.mxu1 %vm16061_vm6, %v20673_v25 }
 0x216   : > { %v1059_v3 = vpop.permute.xlu0 %1058 }
 0x218   : > { %v1056_v63 = vpop.permute.xlu1 %1055 }
 0x219   : > { %v16455_v10 = vsel %vm963_vm8, %v1052_v21, %v1056_v63 }
 0x21c   : > { %v1062_v8 = vpop.permute.xlu1 %1061 }
 0x21d   : > { %v16458_v37 = vsel %vm963_vm8, %v1059_v3, %v1062_v8 }
 0x21e   : > { %v1069_v11 = vpack.c.bf16 %v16458_v37, %v16455_v10 }
 0x220   : > { %13901 = vmatmul.mubr.msk.bf16.gmra.mrb[8].mxu1 %vm929_vm2, %v1069_v11 }
 0x221   : > { %13910 = vmatprep.mubr.msk.bf16.mxu1 %vm16061_vm6, %v20673_v25 }
 0x2d3   : > { %v1136_v16 = vpop.f32.mrb[0].mxu1 }
 0x2d4   : > { %v13894_v17 = vpop.f32.mrb[1].mxu1  ;;  %v1137_v21 = vadd.f32 %v12113_v38, %v1136_v16 }
 0x2d5   : > { %v1139_v20 = vpop.f32.mrb[2].mxu1 }
 0x2d6   : > { %v1140_v22 = vadd.f32 %v12113_v38, %v1139_v20  ;;  %v13895_v28 = vpop.f32.mrb[3].mxu1 }
 0x2d8   : > { %v16468_v30 = vpack.c.bf16 %v1140_v22, %v1137_v21 }
 0x2da   : > { %1171 = vrot.lane.b32.xlu0 %v16468_v30, %s16059_s26 }
 0x2e3   : > { %v1144_v31 = vpop.f32.mrb[4].mxu1 }
 0x2e4   : > { %v13898_v39 = vpop.f32.mrb[5].mxu1  ;;  %v1145_v43 = vadd.f32 %v12113_v38, %v1144_v31 }
 0x2e5   : > { %v1147_v40 = vpop.f32.mrb[6].mxu1 }
 0x2e6   : > { %v1148_v50 = vadd.f32 %v12113_v38, %v1147_v40  ;;  %v13899_v57 = vpop.f32.mrb[7].mxu1 }
 0x2e8   : > { %v16472_v63 = vpack.c.bf16 %v1148_v50, %v1145_v43 }
 0x2ea   : > { %1173 = vrot.lane.b32.xlu1 %v16472_v63, %s16059_s26 }
 0x2ee   : > { %1404 = vrot.lane.b32.xlu1 %v16468_v30, %s16062_s22 }
 0x2f3   : > { %v1152_v3 = vpop.f32.mrb[8].mxu1 }
 0x2f4   : > { %v13902_v8 = vpop.f32.mrb[9].mxu1  ;;  %v1153_v16 = vadd.f32 %v12113_v38, %v1152_v3 }
 0x2f5   : > { %v1155_v11 = vpop.f32.mrb[10].mxu1 }
 0x2f6   : > { %v1156_v17 = vadd.f32 %v12113_v38, %v1155_v11  ;;  %v13903_v20 = vpop.f32.mrb[11].mxu1 }
 0x2f8   : > { %v16478_v21 = vpack.c.bf16 %v1156_v17, %v1153_v16 }
 0x2fa   : > { %1408 = vrot.lane.b32.xlu1 %v16478_v21, %s16062_s22  ;;  %1175 = vrot.lane.b32.xlu0 %v16478_v21, %s16059_s26 }
 0x2fe   : > { %1635 = vrot.lane.b32.xlu1 %v16468_v30, %s20694_s23  ;;  %1406 = vrot.lane.b32.xlu0 %v16472_v63, %s16062_s22 }
 0x302   : > { %1637 = vrot.lane.b32.xlu1 %v16472_v63, %s20694_s23  ;;  %1398 = vrot.lane.b32.xlu0 %v16468_v30, %s20704_s1 }
 0x306   : > { %1639 = vrot.lane.b32.xlu1 %v16478_v21, %s20694_s23  ;;  %1400 = vrot.lane.b32.xlu0 %v16472_v63, %s20704_s1  ;;  %s20698_s23 = smov 16  }
 0x30a   : > { %1866 = vrot.lane.b32.xlu1 %v16468_v30, %s20659_s27  ;;  %1402 = vrot.lane.b32.xlu0 %v16478_v21, %s20704_s1  ;;  %s20795_s1 = smov 112  }
 0x30e   : > { %1868 = vrot.lane.b32.xlu1 %v16472_v63, %s20659_s27  ;;  %1629 = vrot.lane.b32.xlu0 %v16468_v30, %s20702_s3 }
 0x312   : > { %1870 = vrot.lane.b32.xlu1 %v16478_v21, %s20659_s27  ;;  %1631 = vrot.lane.b32.xlu0 %v16472_v63, %s20702_s3 }
 0x316   : > { %1862 = vrot.lane.b32.xlu1 %v16472_v63, %s20692_s29  ;;  %1633 = vrot.lane.b32.xlu0 %v16478_v21, %s20702_s3  ;;  %s20796_s3 = smov 80  }
 0x31a   : > { %1325 = vrot.lane.b32.xlu1 %v16472_v63, %s20657_s24  ;;  %1860 = vrot.lane.b32.xlu0 %v16468_v30, %s20692_s29 }
 0x31e   : > { %1554 = vrot.lane.b32.xlu1 %v16468_v30, %s20690_s0  ;;  %1864 = vrot.lane.b32.xlu0 %v16478_v21, %s20692_s29  ;;  %s20696_s29 = smov 24  }
 0x322   : > { %1323 = vrot.lane.b32.xlu0 %v16468_v30, %s20657_s24 }
 0x326   : > { %1556 = vrot.lane.b32.xlu0 %v16472_v63, %s20690_s0 }
 0x32a   : > { %1327 = vrot.lane.b32.xlu0 %v16478_v21, %s20657_s24  ;;  %s20792_s24 = sld [smem:[#allocation38_spill]] }
 0x330   : > { %s16598_s27 = scalar_lea.vmem %s20792_s24, %s20901_s25  ;;  %s20688_s24 = smov 48  }
 0x34c   : > { %v1172_v38 = vpop.permute.xlu0 %1171 }
 0x34d   : > { %v1188_v22 = vsel %vm1177_vm9, %v1172_v38, 0 }
 0x34e   : > { %13905 = vmatpush3.bf16.xpose.msra.mxu1 %v1188_v22 }
 0x34f   : > { %13906 = vmatprep.subr.bf16.mxu1 %v20673_v25 }
 0x35c   : > { %v1174_v28 = vpop.permute.xlu1 %1173 }
 0x35d   : > { %v1191_v31 = vsel %vm1177_vm9, %v1174_v28, 0 }
 0x35e   : > { %13907 = vmatpush3.bf16.xpose.msra.mxu1 %v1191_v31 }
 0x35f   : > { %13908 = vmatprep.subr.bf16.mxu1 %v20673_v25 }
 0x360   : > { %v1405_v39 = vpop.permute.xlu1 %1404 }
 0x361   : > { %v1420_v16 = vsel %vm1177_vm9, %v1405_v39, 0 }
 0x36c   : > { %v1176_v40 = vpop.permute.xlu0 %1175  ;;  %v1409_v43 = vpop.permute.xlu1 %1408 }
 0x36d   : > { %v1194_v50 = vsel %vm1177_vm9, %v1176_v40, 0  ;;  %v1426_v40 = vsel %vm1177_vm9, %v1409_v43, 0 }
 0x36e   : > { %13909 = vmatpush3.bf16.xpose.msra.mxu1 %v1194_v50 }
 0x36f   : > { %13940 = vmatprep.subr.bf16.mxu1 %v20673_v25 }
 0x370   : > { %v1407_v57 = vpop.permute.xlu0 %1406  ;;  %v1636_v3 = vpop.permute.xlu1 %1635 }
 0x371   : > { %v1423_v22 = vsel %vm1177_vm9, %v1407_v57, 0  ;;  %v1651_v9 = vsel %vm1177_vm9, %v1636_v3, 0 }
 0x374   : > { %v1399_v8 = vpop.permute.xlu0 %1398  ;;  %v1638_v11 = vpop.permute.xlu1 %1637 }
 0x375   : > { %13911 = vmatmul.mubr.msk.bf16.vlgmr.msra.gmra.mrb[12].mxu1 %vm1177_vm9, %v16468_v30  ;;  %v1654_v0 = vsel %vm1177_vm9, %v1638_v11, 0 }
 0x376   : > { %13941 = vmatpush3.bf16.xpose.msra.mxu1 %v1420_v16  ;;  %13914 = vmatprep.mubr.msk.bf16.mxu1 %vm16061_vm6, %v20673_v25 }
 0x377   : > { %13942 = vmatprep.subr.bf16.mxu1 %v20673_v25 }
 0x378   : > { %v1401_v17 = vpop.permute.xlu0 %1400  ;;  %v1640_v20 = vpop.permute.xlu1 %1639 }
 0x379   : > { %v1657_v11 = vsel %vm1177_vm9, %v1640_v20, 0  ;;  %v16601_v20 = vld [vmem:[%s16598_s27] ss:$0 sm:$0xff] }
 0x37c   : > { %v1403_v38 = vpop.permute.xlu0 %1402  ;;  %v1867_v28 = vpop.permute.xlu1 %1866 }
 0x37d   : > { %13915 = vmatmul.mubr.msk.bf16.gmra.mrb[16].mxu1 %vm1177_vm9, %v16472_v63 }
 0x37e   : > { %13943 = vmatpush3.bf16.xpose.msra.mxu1 %v1423_v22  ;;  %13918 = vmatprep.mubr.msk.bf16.mxu1 %vm16061_vm6, %v20673_v25 }
 0x37f   : > { %13944 = vmatprep.subr.bf16.mxu1 %v20673_v25 }
 0x380   : > { %v1630_v31 = vpop.permute.xlu0 %1629  ;;  %v1869_v50 = vpop.permute.xlu1 %1868 }
 0x384   : > { %v1632_v39 = vpop.permute.xlu0 %1631  ;;  %v1871_v16 = vpop.permute.xlu1 %1870 }
 0x385   : > { %13919 = vmatmul.mubr.msk.bf16.gmra.mrb[20].mxu1 %vm1177_vm9, %v16478_v21 }
 0x386   : > { %13945 = vmatpush3.bf16.xpose.msra.mxu1 %v1426_v40  ;;  %13946 = vmatprep.mubr.msk.bf16.mxu1 %vm16061_vm6, %v20673_v25 }
 0x387   : > { %13976 = vmatprep.subr.bf16.mxu1 %v20673_v25 }
 0x388   : > { %v1634_v57 = vpop.permute.xlu0 %1633  ;;  %v1863_v40 = vpop.permute.xlu1 %1862 }
 0x38c   : > { %v1861_v22 = vpop.permute.xlu0 %1860 }
 0x38d   : > { %13947 = vmatmul.mubr.msk.bf16.vlgmr.msra.gmra.mrb[24].mxu1 %vm1177_vm9, %v1399_v8 }
 0x38e   : > { %13977 = vmatpush3.bf16.xpose.msra.mxu1 %v1651_v9  ;;  %13950 = vmatprep.mubr.msk.bf16.mxu1 %vm16061_vm6, %v20673_v25  ;;  %v1326_v9 = vpop.permute.xlu1 %1325 }
 0x38f   : > { %13978 = vmatprep.subr.bf16.mxu1 %v20673_v25 }
 0x390   : > { %v1865_v43 = vpop.permute.xlu0 %1864 }
 0x394   : > { %v1324_v4 = vpop.permute.xlu0 %1323 }
 0x395   : > { %13923 = vmatpush3.bf16.msra.mxu0 %v1324_v4  ;;  %13951 = vmatmul.mubr.msk.bf16.gmra.mrb[28].mxu1 %vm1177_vm9, %v1401_v17  ;;  %v1885_v4 = vsel %vm1177_vm9, %v1869_v50, 0  ;;  %v1888_v17 = vsel %vm1177_vm9, %v1871_v16, 0 }
 0x396   : > { %13979 = vmatpush3.bf16.xpose.msra.mxu1 %v1654_v0  ;;  %13924 = vmatprep.subr.bf16.mxu0 %v20673_v25  ;;  %v1882_v0 = vsel %vm1177_vm9, %v1867_v28, 0 }
 0x397   : > { %13954 = vmatprep.mubr.msk.bf16.mxu1 %vm16061_vm6, %v20673_v25  ;;  %13980 = vmatprep.subr.bf16.mxu1 %v20673_v25 }
 0x398   : > { %v16561_v3 = vpop.permute.xlu0 %1556 }
 0x399   : > { %13925 = vmatpush3.bf16.msra.mxu0 %v1326_v9 }
 0x39a   : > { %13926 = vmatprep.subr.bf16.mxu0 %v20673_v25 }
 0x39c   : > { %v1328_v8 = vpop.permute.xlu0 %1327 }
 0x39d   : > { %13927 = vmatpush3.bf16.msra.mxu0 %v1328_v8  ;;  %13955 = vmatmul.mubr.msk.bf16.gmra.mrb[32].mxu1 %vm1177_vm9, %v1403_v38 }
 0x39e   : > { %13981 = vmatpush3.bf16.xpose.msra.mxu1 %v1657_v11  ;;  %13982 = vmatprep.mubr.msk.bf16.mxu1 %vm16061_vm6, %v20673_v25 }
 0x39f   : > { %14012 = vmatprep.subr.bf16.mxu1 %v20673_v25  ;;  %13958 = vmatprep.subr.bf16.mxu0 %v20673_v25 }
 0x3a5   : > { %13983 = vmatmul.mubr.msk.bf16.vlgmr.msra.gmra.mrb[36].mxu1 %vm1177_vm9, %v1630_v31 }
 0x3a6   : > { %14013 = vmatpush3.bf16.xpose.msra.mxu1 %v1882_v0  ;;  %13986 = vmatprep.mubr.msk.bf16.mxu1 %vm16061_vm6, %v20673_v25 }
 0x3a7   : > { %14014 = vmatprep.subr.bf16.mxu1 %v20673_v25 }
 0x3ad   : > { %13987 = vmatmul.mubr.msk.bf16.gmra.mrb[40].mxu1 %vm1177_vm9, %v1632_v39 }
 0x3ae   : > { %14015 = vmatpush3.bf16.xpose.msra.mxu1 %v1885_v4  ;;  %13990 = vmatprep.mubr.msk.bf16.mxu1 %vm16061_vm6, %v20673_v25 }
 0x3af   : > { %14016 = vmatprep.subr.bf16.mxu1 %v20673_v25 }
 0x3b5   : > { %13991 = vmatmul.mubr.msk.bf16.gmra.mrb[44].mxu1 %vm1177_vm9, %v1634_v57 }
 0x3b6   : > { %14017 = vmatpush3.bf16.xpose.msra.mxu1 %v1888_v17  ;;  %14018 = vmatprep.mubr.msk.bf16.mxu1 %vm16061_vm6, %v20673_v25 }
 0x3b7   : > { %14048 = vmatprep.subr.bf16.mxu1 %v20673_v25 }
 0x3bd   : > { %14019 = vmatmul.mubr.msk.bf16.vlgmr.msra.gmra.mrb[48].mxu1 %vm1177_vm9, %v1861_v22 }
 0x3be   : > { %14022 = vmatprep.mubr.msk.bf16.mxu1 %vm16061_vm6, %v20673_v25 }
 0x3c5   : > { %14023 = vmatmul.mubr.msk.bf16.gmra.mrb[52].mxu1 %vm1177_vm9, %v1863_v40 }
 0x3c6   : > { %14026 = vmatprep.mubr.msk.bf16.mxu1 %vm16061_vm6, %v20673_v25 }
 0x3cd   : > { %14027 = vmatmul.mubr.msk.bf16.gmra.mrb[56].mxu1 %vm1177_vm9, %v1865_v43 }
 0x3ce   : > { %14052 = vmatprep.mubr.msk.bf16.mxu1 %vm16061_vm6, %v20673_v25 }
 0x448   : > { %v1230_v38 = vpop.f32.mrb[12].mxu1 }
 0x449   : > { %v13912_v28 = vpop.f32.mrb[13].mxu1  ;;  %v16604_v31 = vadd.f32 %v16601_v20, %v1230_v38 }
 0x44a   : > { %v1233_v39 = vpop.f32.mrb[14].mxu1 }
 0x44b   : > { %v13913_v50 = vpop.f32.mrb[15].mxu1  ;;  %v1254_v57 = vsel %vm1253_vm10, %v16604_v31, -inf  ;;  %v16609_v16 = vadd.f32 %v16601_v20, %v1233_v39 }
 0x44c   : > { %1255 = vmax.xlane.f32.xlu1 %v1254_v57 }
 0x44d   : > { %v1257_v22 = vsel %vm1253_vm10, %v16609_v16, -inf }
 0x44e   : > { %1258 = vmax.xlane.f32.xlu0 %v1257_v22 }
 0x450   : > { %v1238_v43 = vpop.f32.mrb[16].mxu1 }
 0x451   : > { %v13916_v40 = vpop.f32.mrb[17].mxu1  ;;  %v16614_v9 = vadd.f32 %v16601_v20, %v1238_v43 }
 0x452   : > { %v1241_v8 = vpop.f32.mrb[18].mxu1 }
 0x453   : > { %v13917_v11 = vpop.f32.mrb[19].mxu1  ;;  %v1260_v0 = vsel %vm1253_vm10, %v16614_v9, -inf  ;;  %v16619_v4 = vadd.f32 %v16601_v20, %v1241_v8 }
 0x454   : > { %1261 = vmax.xlane.f32.xlu0 %v1260_v0 }
 0x455   : > { %v1263_v17 = vsel %vm1253_vm10, %v16619_v4, -inf }
 0x456   : > { %1264 = vmax.xlane.f32.xlu1 %v1263_v17 }
 0x458   : > { %v1246_v38 = vpop.f32.mrb[20].mxu1 }
 0x459   : > { %v13920_v28 = vpop.f32.mrb[21].mxu1  ;;  %v16624_v39 = vadd.f32 %v16601_v20, %v1246_v38 }
 0x45a   : > { %v1249_v50 = vpop.f32.mrb[22].mxu1 }
 0x45b   : > { %v13921_v57 = vpop.f32.mrb[23].mxu1  ;;  %v1266_v22 = vsel %vm1253_vm10, %v16624_v39, -inf  ;;  %v16629_v43 = vadd.f32 %v16601_v20, %v1249_v50 }
 0x45c   : > { %1267 = vmax.xlane.f32.xlu0 %v1266_v22 }
 0x45d   : > { %v1269_v40 = vsel %vm1253_vm10, %v16629_v43, -inf }
 0x45e   : > { %1270 = vmax.xlane.f32.xlu1 %v1269_v40 }
 0x460   : > { %v1462_v8 = vpop.f32.mrb[24].mxu1 }
 0x461   : > { %v13948_v11 = vpop.f32.mrb[25].mxu1  ;;  %v16634_v0 = vadd.f32 %v16601_v20, %v1462_v8 }
 0x462   : > { %v1465_v17 = vpop.f32.mrb[26].mxu1 }
 0x463   : > { %v13949_v38 = vpop.f32.mrb[27].mxu1  ;;  %v1485_v28 = vsel %vm1253_vm10, %v16634_v0, -inf  ;;  %v16639_v57 = vadd.f32 %v16601_v20, %v1465_v17 }
 0x464   : > { %1486 = vmax.xlane.f32.xlu0 %v1485_v28 }
 0x465   : > { %v1488_v50 = vsel %vm1253_vm10, %v16639_v57, -inf }
 0x466   : > { %1489 = vmax.xlane.f32.xlu1 %v1488_v50 }
 0x468   : > { %v1470_v22 = vpop.f32.mrb[28].mxu1 }
 0x469   : > { %v13952_v40 = vpop.f32.mrb[29].mxu1  ;;  %v16644_v11 = vadd.f32 %v16601_v20, %v1470_v22 }
 0x46a   : > { %v1473_v8 = vpop.f32.mrb[30].mxu1 }
 0x46b   : > { %v13953_v44 = vpop.f32.mrb[31].mxu1  ;;  %v1491_v38 = vsel %vm1253_vm10, %v16644_v11, -inf  ;;  %v16649_v32 = vadd.f32 %v16601_v20, %v1473_v8 }
 0x46c   : > { %1492 = vmax.xlane.f32.xlu0 %v1491_v38 }
 0x46d   : > { %v1494_v17 = vsel %vm1253_vm10, %v16649_v32, -inf }
 0x46e   : > { %1495 = vmax.xlane.f32.xlu1 %v1494_v17 }
 0x470   : > { %v1478_v28 = vpop.f32.mrb[32].mxu1 }
 0x471   : > { %v13956_v50 = vpop.f32.mrb[33].mxu1  ;;  %v16654_v40 = vadd.f32 %v16601_v20, %v1478_v28 }
 0x472   : > { %v1481_v22 = vpop.f32.mrb[34].mxu1 }
 0x473   : > { %v13957_v29 = vpop.f32.mrb[35].mxu1  ;;  %v1497_v44 = vsel %vm1253_vm10, %v16654_v40, -inf  ;;  %v16659_v26 = vadd.f32 %v16601_v20, %v1481_v22 }
 0x474   : > { %1498 = vmax.xlane.f32.xlu0 %v1497_v44 }
 0x475   : > { %v1500_v8 = vsel %vm1253_vm10, %v16659_v26, -inf }
 0x476   : > { %1501 = vmax.xlane.f32.xlu1 %v1500_v8 }
 0x478   : > { %v1693_v38 = vpop.f32.mrb[36].mxu1 }
 0x479   : > { %v13984_v17 = vpop.f32.mrb[37].mxu1  ;;  %v16664_v50 = vadd.f32 %v16601_v20, %v1693_v38 }
 0x47a   : > { %v1696_v28 = vpop.f32.mrb[38].mxu1 }
 0x47b   : > { %v13985_v23 = vpop.f32.mrb[39].mxu1  ;;  %v1716_v29 = vsel %vm1253_vm10, %v16664_v50, -inf  ;;  %v16675_v7 = vadd.f32 %v16601_v20, %v1696_v28 }
 0x47c   : > { %1717 = vmax.xlane.f32.xlu0 %v1716_v29 }
 0x480   : > { %v1701_v12 = vpop.f32.mrb[40].mxu1 }
 0x481   : > { %v13988_v51 = vpop.f32.mrb[41].mxu1 }
 0x482   : > { %v1704_v22 = vpop.f32.mrb[42].mxu1 }
 0x483   : > { %v13989_v2 = vpop.f32.mrb[43].mxu1  ;;  %v16683_v56 = vadd.f32 %v16601_v20, %v1704_v22 }
 0x485   : > { %v1725_v28 = vsel %vm1253_vm10, %v16683_v56, -inf }
 0x487   : > { %1785 = vrot.lane.b32.xlu1 %v16468_v30, %s20688_s24 }
 0x488   : > { %v1709_v44 = vpop.f32.mrb[44].mxu1 }
 0x489   : > { %v13992_v8 = vpop.f32.mrb[45].mxu1 }
 0x48a   : > { %v1712_v17 = vpop.f32.mrb[46].mxu1 }
 0x48b   : > { %1787 = vrot.lane.b32.xlu1 %v16472_v63, %s20688_s24  ;;  %v13993_v38 = vpop.f32.mrb[47].mxu1 }
 0x48c   : > { %v16678_v38 = vadd.f32 %v16601_v20, %v1701_v12  ;;  %v16693_v12 = vadd.f32 %v16601_v20, %v1712_v17 }
 0x490   : > { %v1924_v23 = vpop.f32.mrb[48].mxu1 }
 0x491   : > { %v14020_v61 = vpop.f32.mrb[49].mxu1  ;;  %v16698_v22 = vadd.f32 %v16601_v20, %v1924_v23 }
 0x492   : > { %1558 = vrot.lane.b32.xlu0 %v16478_v21, %s20690_s0  ;;  %v1927_v29 = vpop.f32.mrb[50].mxu1  ;;  %v1719_v61 = vsel %vm1253_vm10, %v16675_v7, -inf  ;;  %s20803_s0 = smov 8  }
 0x493   : > { %v14021_v51 = vpop.f32.mrb[51].mxu1 }
 0x498   : > { %v1932_v58 = vpop.f32.mrb[52].mxu1 }
 0x499   : > { %v14024_v2 = vpop.f32.mrb[53].mxu1  ;;  %v16708_v17 = vadd.f32 %v16601_v20, %v1932_v58 }
 0x49a   : > { %v1935_v47 = vpop.f32.mrb[54].mxu1  ;;  %v1731_v2 = vsel %vm1253_vm10, %v16693_v12, -inf }
 0x49b   : > { %v14025_v15 = vpop.f32.mrb[55].mxu1  ;;  %v16713_v23 = vadd.f32 %v16601_v20, %v1935_v47 }
 0x49c   : > { %v1722_v15 = vsel %vm1253_vm10, %v16678_v38, -inf }
 0x4a0   : > { %v1940_v25 = vpop.f32.mrb[56].mxu1 }
 0x4a1   : > { %v14028_v1 = vpop.f32.mrb[57].mxu1 }
 0x4a2   : > { %v1943_v55 = vpop.f32.mrb[58].mxu1  ;;  %v16688_v1 = vadd.f32 %v16601_v20, %v1709_v44  ;;  %v16703_v44 = vadd.f32 %v16601_v20, %v1927_v29  ;;  %v16718_v29 = vadd.f32 %v16601_v20, %v1940_v25 }
 0x4a3   : > { %v14029_v8 = vpop.f32.mrb[59].mxu1  ;;  %v16723_v58 = vadd.f32 %v16601_v20, %v1943_v55 }
 0x4a4   : > { %v1728_v51 = vsel %vm1253_vm10, %v16688_v1, -inf  ;;  %v1947_v8 = vsel %vm1253_vm10, %v16698_v22, -inf }
 0x4a5   : > { %v1962_v47 = vsel %vm1253_vm10, %v16723_v58, -inf }
 0x4af   : > { %1720 = vmax.xlane.f32.xlu1 %v1719_v61  ;;  %v1950_v61 = vsel %vm1253_vm10, %v16703_v44, -inf }
 0x4b1   : > { %1723 = vmax.xlane.f32.xlu0 %v1722_v15  ;;  %v1953_v15 = vsel %vm1253_vm10, %v16708_v17, -inf }
 0x4b3   : > { %1726 = vmax.xlane.f32.xlu1 %v1725_v28  ;;  %v1956_v28 = vsel %vm1253_vm10, %v16713_v23, -inf }
 0x4b5   : > { %1729 = vmax.xlane.f32.xlu0 %v1728_v51  ;;  %v1959_v51 = vsel %vm1253_vm10, %v16718_v29, -inf }
 0x4b7   : > { %1732 = vmax.xlane.f32.xlu1 %v1731_v2  ;;  %v16729_v2 = vpop.permute.xlu1 %1554 }
 0x4b9   : > { %1948 = vmax.xlane.f32.xlu0 %v1947_v8 }
 0x4bb   : > { %1951 = vmax.xlane.f32.xlu1 %v1950_v61 }
 0x4bd   : > { %1954 = vmax.xlane.f32.xlu0 %v1953_v15 }
 0x4bf   : > { %1957 = vmax.xlane.f32.xlu1 %v1956_v28 }
 0x4c1   : > { %1960 = vmax.xlane.f32.xlu0 %v1959_v51 }
 0x4c3   : > { %1963 = vmax.xlane.f32.xlu1 %v1962_v47 }
 0x4d9   : > { %v1256_v25 = vpop.xlane.xlu1 %1255 }
 0x4da   : > { %v1272_v8 = vsub.f32 %v16604_v31, %v1256_v25 }
 0x4db   : > { %v1259_v61 = vpop.xlane.xlu0 %1258 }
 0x4dc   : > { %v1278_v15 = vmul.f32 1.442695, %v1272_v8  ;;  %v1273_v46 = vsub.f32 %v16609_v16, %v1259_v61 }
 0x4de   : > { %15808 = vpow2.f32 %v1278_v15  ;;  %v1280_v55 = vmul.f32 1.442695, %v1273_v46 }
 0x4e0   : > { %15810 = vpow2.f32 %v1280_v55 }
 0x4e1   : > { %v1262_v20 = vpop.xlane.xlu0 %1261 }
 0x4e2   : > { %v1274_v28 = vsub.f32 %v16614_v9, %v1262_v20 }
 0x4e3   : > { %v1265_v51 = vpop.xlane.xlu1 %1264 }
 0x4e4   : > { %v1282_v34 = vmul.f32 1.442695, %v1274_v28  ;;  %v1275_v45 = vsub.f32 %v16619_v4, %v1265_v51 }
 0x4e6   : > { %15812 = vpow2.f32 %v1282_v34  ;;  %v1284_v47 = vmul.f32 1.442695, %v1275_v45 }
 0x4e8   : > { %v16735_v35 = vpop.eup %15808  ;;  %15814 = vpow2.f32 %v1284_v47 }
 0x4e9   : > { %v1268_v31 = vpop.xlane.xlu0 %1267  ;;  %v1290_v25 = vsel %vm1253_vm10, %v16735_v35, 0.0 }
 0x4ea   : > { %v16739_v16 = vpop.eup %15810  ;;  %v1276_v46 = vsub.f32 %v16624_v39, %v1268_v31  ;;  %1291 = vadd.xlane.f32.xlu0 %v1290_v25 }
 0x4eb   : > { %v1271_v8 = vpop.xlane.xlu1 %1270  ;;  %v1293_v9 = vsel %vm1253_vm10, %v16739_v16, 0.0 }
 0x4ec   : > { %v1286_v61 = vmul.f32 1.442695, %v1276_v46  ;;  %v1277_v34 = vsub.f32 %v16629_v43, %v1271_v8  ;;  %1294 = vadd.xlane.f32.xlu1 %v1293_v9 }
 0x4ee   : > { %15816 = vpow2.f32 %v1286_v61  ;;  %v1288_v45 = vmul.f32 1.442695, %v1277_v34 }
 0x4f0   : > { %v16745_v4 = vpop.eup %15812  ;;  %15818 = vpow2.f32 %v1288_v45 }
 0x4f1   : > { %v1487_v15 = vpop.xlane.xlu0 %1486  ;;  %v1296_v55 = vsel %vm1253_vm10, %v16745_v4, 0.0 }
 0x4f2   : > { %v16749_v20 = vpop.eup %15814  ;;  %v1503_v39 = vsub.f32 %v16634_v0, %v1487_v15  ;;  %1297 = vadd.xlane.f32.xlu0 %v1296_v55 }
 0x4f3   : > { %v1490_v28 = vpop.xlane.xlu1 %1489  ;;  %v1299_v51 = vsel %vm1253_vm10, %v16749_v20, 0.0 }
 0x4f4   : > { %v1509_v43 = vmul.f32 1.442695, %v1503_v39  ;;  %v1504_v47 = vsub.f32 %v16639_v57, %v1490_v28  ;;  %1300 = vadd.xlane.f32.xlu1 %v1299_v51 }
 0x4f6   : > { %15820 = vpow2.f32 %v1509_v43  ;;  %v1511_v31 = vmul.f32 1.442695, %v1504_v47 }
 0x4f8   : > { %v16755_v25 = vpop.eup %15816  ;;  %15822 = vpow2.f32 %v1511_v31 }
 0x4f9   : > { %v1493_v46 = vpop.xlane.xlu0 %1492  ;;  %v1302_v8 = vsel %vm1253_vm10, %v16755_v25, 0.0 }
 0x4fa   : > { %v16759_v9 = vpop.eup %15818  ;;  %v1505_v0 = vsub.f32 %v16644_v11, %v1493_v46  ;;  %1303 = vadd.xlane.f32.xlu0 %v1302_v8 }
 0x4fb   : > { %v1496_v61 = vpop.xlane.xlu1 %1495  ;;  %v1305_v34 = vsel %vm1253_vm10, %v16759_v9, 0.0 }
 0x4fc   : > { %v1513_v57 = vmul.f32 1.442695, %v1505_v0  ;;  %v1506_v45 = vsub.f32 %v16649_v32, %v1496_v61  ;;  %1306 = vadd.xlane.f32.xlu1 %v1305_v34 }
 0x4fe   : > { %15824 = vpow2.f32 %v1513_v57  ;;  %v1515_v15 = vmul.f32 1.442695, %v1506_v45 }
 0x500   : > { %v16765_v55 = vpop.eup %15820  ;;  %15826 = vpow2.f32 %v1515_v15 }
 0x501   : > { %v1499_v39 = vpop.xlane.xlu0 %1498  ;;  %v1521_v28 = vsel %vm1253_vm10, %v16765_v55, 0.0 }
 0x502   : > { %v16769_v51 = vpop.eup %15822  ;;  %v1507_v11 = vsub.f32 %v16654_v40, %v1499_v39  ;;  %1522 = vadd.xlane.f32.xlu1 %v1521_v28 }
 0x503   : > { %v1502_v43 = vpop.xlane.xlu1 %1501  ;;  %v1524_v47 = vsel %vm1253_vm10, %v16769_v51, 0.0 }
 0x504   : > { %v1517_v32 = vmul.f32 1.442695, %v1507_v11  ;;  %v1508_v31 = vsub.f32 %v16659_v26, %v1502_v43  ;;  %1525 = vadd.xlane.f32.xlu0 %v1524_v47 }
 0x506   : > { %15828 = vpow2.f32 %v1517_v32  ;;  %v1519_v46 = vmul.f32 1.442695, %v1508_v31 }
 0x507   : > { %v16800_v43 = vpop.permute.xlu1 %1785 }
 0x508   : > { %v16775_v8 = vpop.eup %15824  ;;  %15830 = vpow2.f32 %v1519_v46 }
 0x509   : > { %v1718_v0 = vpop.xlane.xlu0 %1717  ;;  %v1527_v61 = vsel %vm1253_vm10, %v16775_v8, 0.0 }
 0x50a   : > { %v16779_v34 = vpop.eup %15826  ;;  %v1734_v40 = vsub.f32 %v16664_v50, %v1718_v0  ;;  %1528 = vadd.xlane.f32.xlu1 %v1527_v61 }
 0x50b   : > { %v1530_v45 = vsel %vm1253_vm10, %v16779_v34, 0.0  ;;  %v16802_v47 = vpop.permute.xlu1 %1787 }
 0x50c   : > { %v1740_v57 = vmul.f32 1.442695, %v1734_v40 }
 0x50d   : > { %v16804_v32 = vpop.permute.xlu0 %1558 }
 0x50e   : > { %15832 = vpow2.f32 %v1740_v57  ;;  %1531 = vadd.xlane.f32.xlu1 %v1530_v45 }
 0x510   : > { %v16784_v26 = vpop.eup %15828 }
 0x511   : > { %v1533_v15 = vsel %vm1253_vm10, %v16784_v26, 0.0 }
 0x512   : > { %v16788_v39 = vpop.eup %15830  ;;  %1534 = vadd.xlane.f32.xlu1 %v1533_v15 }
 0x513   : > { %v1536_v28 = vsel %vm1253_vm10, %v16788_v39, 0.0 }
 0x516   : > { %1537 = vadd.xlane.f32.xlu1 %v1536_v28 }
 0x518   : > { %v16792_v50 = vpop.eup %15832 }
 0x519   : > { %v1752_v11 = vsel %vm1253_vm10, %v16792_v50, 0.0 }
 0x51a   : > { %1753 = vadd.xlane.f32.xlu0 %v1752_v11 }
 0x527   : > { %2016 = vrot.lane.b32.xlu1 %v16468_v30, %s20686_s4 }
 0x530   : > { %1789 = vrot.lane.b32.xlu0 %v16478_v21, %s20688_s24 }
 0x53c   : > { %v1721_v31 = vpop.xlane.xlu1 %1720 }
 0x53d   : > { %v1735_v46 = vsub.f32 %v16675_v7, %v1721_v31 }
 0x53e   : > { %v1724_v0 = vpop.xlane.xlu0 %1723 }
 0x53f   : > { %v1742_v61 = vmul.f32 1.442695, %v1735_v46  ;;  %v1736_v40 = vsub.f32 %v16678_v38, %v1724_v0 }
 0x540   : > { %v1727_v57 = vpop.xlane.xlu1 %1726 }
 0x541   : > { %15834 = vpow2.f32 %v1742_v61  ;;  %v1744_v45 = vmul.f32 1.442695, %v1736_v40  ;;  %v1737_v30 = vsub.f32 %v16683_v56, %v1727_v57 }
 0x542   : > { %v1730_v15 = vpop.xlane.xlu0 %1729 }
 0x543   : > { %15836 = vpow2.f32 %v1744_v45  ;;  %v1746_v28 = vmul.f32 1.442695, %v1737_v30  ;;  %v1738_v11 = vsub.f32 %v16688_v1, %v1730_v15 }
 0x544   : > { %v1733_v24 = vpop.xlane.xlu1 %1732 }
 0x545   : > { %v1739_v18 = vsub.f32 %v16693_v12, %v1733_v24  ;;  %15838 = vpow2.f32 %v1746_v28  ;;  %v1748_v7 = vmul.f32 1.442695, %v1738_v11 }
 0x546   : > { %v1949_v27 = vpop.xlane.xlu0 %1948 }
 0x547   : > { %v1750_v31 = vmul.f32 1.442695, %v1739_v18  ;;  %v1965_v46 = vsub.f32 %v16698_v22, %v1949_v27 }
 0x548   : > { %v1952_v38 = vpop.xlane.xlu1 %1951 }
 0x549   : > { %15840 = vpow2.f32 %v1750_v31  ;;  %v1966_v0 = vsub.f32 %v16703_v44, %v1952_v38  ;;  %v1971_v61 = vmul.f32 1.442695, %v1965_v46 }
 0x54a   : > { %v1955_v56 = vpop.xlane.xlu0 %1954  ;;  %15842 = vpow2.f32 %v1748_v7 }
 0x54b   : > { %v16813_v40 = vpop.eup %15834  ;;  %v1973_v57 = vmul.f32 1.442695, %v1966_v0  ;;  %v1967_v1 = vsub.f32 %v16708_v17, %v1955_v56 }
 0x54c   : > { %v1958_v45 = vpop.xlane.xlu1 %1957  ;;  %v1755_v24 = vsel %vm1253_vm10, %v16813_v40, 0.0 }
 0x54d   : > { %v16818_v12 = vpop.eup %15836  ;;  %15844 = vpow2.f32 %v1973_v57  ;;  %v1975_v18 = vmul.f32 1.442695, %v1967_v1  ;;  %v1968_v27 = vsub.f32 %v16713_v23, %v1958_v45  ;;  %1756 = vadd.xlane.f32.xlu1 %v1755_v24 }
 0x54e   : > { %15846 = vpow2.f32 %v1971_v61  ;;  %v1961_v22 = vpop.xlane.xlu0 %1960  ;;  %v1758_v17 = vsel %vm1253_vm10, %v16818_v12, 0.0 }
 0x54f   : > { %15848 = vpow2.f32 %v1975_v18  ;;  %v1977_v44 = vmul.f32 1.442695, %v1968_v27  ;;  %v1969_v30 = vsub.f32 %v16718_v29, %v1961_v22  ;;  %v16824_v28 = vpop.eup %15838 }
 0x550   : > { %v1964_v15 = vpop.xlane.xlu1 %1963  ;;  %v1761_v31 = vsel %vm1253_vm10, %v16824_v28, 0.0 }
 0x551   : > { %1759 = vadd.xlane.f32.xlu1 %v1758_v17  ;;  %15850 = vpow2.f32 %v1977_v44  ;;  %v1979_v7 = vmul.f32 1.442695, %v1969_v30  ;;  %v1970_v23 = vsub.f32 %v16723_v58, %v1964_v15 }
 0x553   : > { %v16826_v11 = vpop.eup %15840  ;;  %15852 = vpow2.f32 %v1979_v7  ;;  %v1981_v0 = vmul.f32 1.442695, %v1970_v23 }
 0x554   : > { %v1767_v46 = vsel %vm1253_vm10, %v16826_v11, 0.0  ;;  %v16833_v29 = vpop.eup %15842 }
 0x555   : > { %1762 = vadd.xlane.f32.xlu1 %v1761_v31  ;;  %1768 = vadd.xlane.f32.xlu0 %v1767_v46  ;;  %v1764_v56 = vsel %vm1253_vm10, %v16833_v29, 0.0  ;;  %15854 = vpow2.f32 %v1981_v0 }
 0x557   : > { %v16835_v38 = vpop.eup %15844 }
 0x558   : > { %v16837_v61 = vpop.eup %15846  ;;  %v1986_v58 = vsel %vm1253_vm10, %v16835_v38, 0.0 }
 0x559   : > { %v16843_v57 = vpop.eup %15848  ;;  %1765 = vadd.xlane.f32.xlu1 %v1764_v56  ;;  %1987 = vadd.xlane.f32.xlu0 %v1986_v58  ;;  %v1983_v1 = vsel %vm1253_vm10, %v16837_v61, 0.0 }
 0x55a   : > { %v1989_v45 = vsel %vm1253_vm10, %v16843_v57, 0.0 }
 0x55b   : > { %v16849_v24 = vpop.eup %15850 }
 0x55c   : > { %v1992_v18 = vsel %vm1253_vm10, %v16849_v24, 0.0 }
 0x55d   : > { %1984 = vadd.xlane.f32.xlu1 %v1983_v1  ;;  %1990 = vadd.xlane.f32.xlu0 %v1989_v45  ;;  %v16853_v27 = vpop.eup %15852 }
 0x55e   : > { %v1995_v22 = vsel %vm1253_vm10, %v16853_v27, 0.0 }
 0x55f   : > { %v16857_v44 = vpop.eup %15854 }
 0x560   : > { %v1998_v30 = vsel %vm1253_vm10, %v16857_v44, 0.0 }
 0x561   : > { %1993 = vadd.xlane.f32.xlu1 %v1992_v18 }
 0x565   : > { %1996 = vadd.xlane.f32.xlu1 %v1995_v22 }
 0x569   : > { %1999 = vadd.xlane.f32.xlu1 %v1998_v30 }
 0x573   : > { %2018 = vrot.lane.b32.xlu0 %v16472_v63, %s20686_s4 }
 0x577   : > { %v1292_v15 = vpop.xlane.xlu0 %1291 }
 0x578   : > { %15856 = vrcp.f32 %v1292_v15 }
 0x579   : > { %v1295_v17 = vpop.xlane.xlu1 %1294 }
 0x57a   : > { %15858 = vrcp.f32 %v1295_v17  ;;  %2020 = vrot.lane.b32.xlu1 %v16478_v21, %s20686_s4  ;;  %v20793_v21 = vmov 0.0   ;;  %s20802_s4 = smov 40  }
 0x57f   : > { %v1298_v7 = vpop.xlane.xlu0 %1297 }
 0x580   : > { %15860 = vrcp.f32 %v1298_v7 }
 0x581   : > { %v1301_v23 = vpop.xlane.xlu1 %1300 }
 0x582   : > { %v15857_v31 = vpop.eup %15856  ;;  %15862 = vrcp.f32 %v1301_v23 }
 0x583   : > { %v1314_v0 = vmul.f32 %v15857_v31, %v16735_v35 }
 0x584   : > { %v15859_v46 = vpop.eup %15858 }
 0x585   : > { %v1315_v56 = vmul.f32 %v15859_v46, %v16739_v16 }
 0x587   : > { %v1320_v58 = vpack.c.bf16 %v1315_v56, %v1314_v0  ;;  %v1304_v1 = vpop.xlane.xlu0 %1303 }
 0x588   : > { %15864 = vrcp.f32 %v1304_v1 }
 0x589   : > { %13929 = vmatmul.mubr.msk.bf16.vlgmr.msra.gmra.mrb[24].mxu0 %vm1253_vm10, %v1320_v58  ;;  %v1307_v63 = vpop.xlane.xlu1 %1306 }
 0x58a   : > { %v15861_v45 = vpop.eup %15860  ;;  %13959 = vmatpush3.bf16.msra.mxu0 %v16729_v2  ;;  %15866 = vrcp.f32 %v1307_v63  ;;  %13932 = vmatprep.mubr.msk.bf16.mxu0 %vm16061_vm6, %v20793_v21 }
 0x58b   : > { %13960 = vmatprep.subr.bf16.mxu0 %v20793_v21  ;;  %v1316_v35 = vmul.f32 %v15861_v45, %v16745_v4 }
 0x58c   : > { %v15863_v18 = vpop.eup %15862 }
 0x58d   : > { %v1317_v16 = vmul.f32 %v15863_v18, %v16749_v20 }
 0x58e   : > { %13961 = vmatpush3.bf16.msra.mxu0 %v16561_v3 }
 0x58f   : > { %v1523_v22 = vpop.xlane.xlu1 %1522  ;;  %13962 = vmatprep.subr.bf16.mxu0 %v20793_v21  ;;  %v1321_v30 = vpack.c.bf16 %v1317_v16, %v1316_v35 }
 0x590   : > { %15868 = vrcp.f32 %v1523_v22 }
 0x591   : > { %v1526_v15 = vpop.xlane.xlu0 %1525  ;;  %13933 = vmatmul.mubr.msk.bf16.gmra.mrb[28].mxu0 %vm1253_vm10, %v1321_v30 }
 0x592   : > { %v15865_v2 = vpop.eup %15864  ;;  %15870 = vrcp.f32 %v1526_v15  ;;  %13963 = vmatpush3.bf16.msra.mxu0 %v16804_v32  ;;  %13936 = vmatprep.mubr.msk.bf16.mxu0 %vm16061_vm6, %v20793_v21 }
 0x593   : > { %13994 = vmatprep.subr.bf16.mxu0 %v20793_v21  ;;  %v1318_v3 = vmul.f32 %v15865_v2, %v16755_v25 }
 0x594   : > { %v15867_v4 = vpop.eup %15866 }
 0x595   : > { %v1319_v20 = vmul.f32 %v15867_v4, %v16759_v9 }
 0x597   : > { %v1529_v17 = vpop.xlane.xlu1 %1528  ;;  %v1322_v7 = vpack.c.bf16 %v1319_v20, %v1318_v3 }
 0x598   : > { %15872 = vrcp.f32 %v1529_v17 }
 0x599   : > { %13937 = vmatmul.mubr.msk.bf16.gmra.mrb[32].mxu0 %vm1253_vm10, %v1322_v7 }
 0x59a   : > { %v15869_v23 = vpop.eup %15868  ;;  %13964 = vmatprep.mubr.msk.bf16.mxu0 %vm16061_vm6, %v20793_v21 }
 0x59b   : > { %v1532_v32 = vpop.xlane.xlu1 %1531  ;;  %v1545_v46 = vmul.f32 %v15869_v23, %v16765_v55 }
 0x59c   : > { %v15871_v31 = vpop.eup %15870  ;;  %15874 = vrcp.f32 %v1532_v32 }
 0x59d   : > { %v1546_v0 = vmul.f32 %v15871_v31, %v16769_v51 }
 0x59f   : > { %v1551_v56 = vpack.c.bf16 %v1546_v0, %v1545_v46  ;;  %v1535_v25 = vpop.xlane.xlu1 %1534 }
 0x5a0   : > { %15876 = vrcp.f32 %v1535_v25 }
 0x5a1   : > { %13965 = vmatmul.mubr.msk.bf16.vlgmr.msra.gmra.mrb[36].mxu0 %vm1253_vm10, %v1551_v56 }
 0x5a2   : > { %13995 = vmatpush3.bf16.msra.mxu0 %v16800_v43  ;;  %13968 = vmatprep.mubr.msk.bf16.mxu0 %vm16061_vm6, %v20793_v21  ;;  %v15873_v58 = vpop.eup %15872 }
 0x5a3   : > { %v1538_v9 = vpop.xlane.xlu1 %1537  ;;  %13996 = vmatprep.subr.bf16.mxu0 %v20793_v21  ;;  %v1547_v51 = vmul.f32 %v15873_v58, %v16775_v8 }
 0x5a4   : > { %15878 = vrcp.f32 %v1538_v9 }
 0x5a6   : > { %v15875_v1 = vpop.eup %15874  ;;  %13997 = vmatpush3.bf16.msra.mxu0 %v16802_v47 }
 0x5a7   : > { %v1754_v55 = vpop.xlane.xlu0 %1753  ;;  %v1548_v63 = vmul.f32 %v15875_v1, %v16779_v34  ;;  %13998 = vmatprep.subr.bf16.mxu0 %v20793_v21  ;;  %v2017_v34 = vpop.permute.xlu1 %2016 }
 0x5a8   : > { %15880 = vrcp.f32 %v1754_v55 }
 0x5a9   : > { %v1552_v45 = vpack.c.bf16 %v1548_v63, %v1547_v51 }
 0x5aa   : > { %v15877_v18 = vpop.eup %15876 }
 0x5ab   : > { %v1790_v43 = vpop.permute.xlu0 %1789  ;;  %13969 = vmatmul.mubr.msk.bf16.gmra.mrb[40].mxu0 %vm1253_vm10, %v1552_v45  ;;  %v1549_v47 = vmul.f32 %v15877_v18, %v16784_v26 }
 0x5ac   : > { %13999 = vmatpush3.bf16.msra.mxu0 %v1790_v43  ;;  %13972 = vmatprep.mubr.msk.bf16.mxu0 %vm16061_vm6, %v20793_v21 }
 0x5ad   : > { %14030 = vmatprep.subr.bf16.mxu0 %v20793_v21 }
 0x5ae   : > { %v15879_v35 = vpop.eup %15878 }
 0x5af   : > { %v1550_v8 = vmul.f32 %v15879_v35, %v16788_v39 }
 0x5b1   : > { %v1553_v16 = vpack.c.bf16 %v1550_v8, %v1549_v47 }
 0x5b2   : > { %v15881_v4 = vpop.eup %15880 }
 0x5b3   : > { %13973 = vmatmul.mubr.msk.bf16.gmra.mrb[44].mxu0 %vm1253_vm10, %v1553_v16  ;;  %v1776_v26 = vmul.f32 %v15881_v4, %v16792_v50 }
 0x5b4   : > { %14000 = vmatprep.mubr.msk.bf16.mxu0 %vm16061_vm6, %v20793_v21 }
 0x5da   : > { %v1757_v22 = vpop.xlane.xlu1 %1756 }
 0x5db   : > { %15882 = vrcp.f32 %v1757_v22 }
 0x5de   : > { %v1760_v30 = vpop.xlane.xlu1 %1759 }
 0x5df   : > { %15884 = vrcp.f32 %v1760_v30 }
 0x5e2   : > { %v1769_v15 = vpop.xlane.xlu0 %1768  ;;  %v1763_v2 = vpop.xlane.xlu1 %1762 }
 0x5e3   : > { %15886 = vrcp.f32 %v1763_v2 }
 0x5e5   : > { %v15883_v3 = vpop.eup %15882 }
 0x5e6   : > { %v1777_v39 = vmul.f32 %v15883_v3, %v16813_v40  ;;  %v1988_v20 = vpop.xlane.xlu0 %1987  ;;  %v1766_v17 = vpop.xlane.xlu1 %1765 }
 0x5e7   : > { %15888 = vrcp.f32 %v1766_v17 }
 0x5e8   : > { %v1782_v7 = vpack.c.bf16 %v1777_v39, %v1776_v26  ;;  %15890 = vrcp.f32 %v1769_v15 }
 0x5e9   : > { %v15885_v31 = vpop.eup %15884 }
 0x5ea   : > { %v1991_v23 = vpop.xlane.xlu0 %1990  ;;  %14001 = vmatmul.mubr.msk.bf16.vlgmr.msra.gmra.mrb[48].mxu0 %vm1253_vm10, %v1782_v7  ;;  %v1985_v32 = vpop.xlane.xlu1 %1984  ;;  %v1778_v40 = vmul.f32 %v15885_v31, %v16818_v12 }
 0x5eb   : > { %14031 = vmatpush3.bf16.msra.mxu0 %v2017_v34  ;;  %14004 = vmatprep.mubr.msk.bf16.mxu0 %vm16061_vm6, %v20793_v21  ;;  %15892 = vrcp.f32 %v1985_v32 }
 0x5ec   : > { %14032 = vmatprep.subr.bf16.mxu0 %v20793_v21  ;;  %15894 = vrcp.f32 %v1988_v20 }
 0x5ed   : > { %v15887_v46 = vpop.eup %15886 }
 0x5ee   : > { %v2019_v50 = vpop.permute.xlu0 %2018  ;;  %v1994_v0 = vpop.xlane.xlu1 %1993  ;;  %v1779_v56 = vmul.f32 %v15887_v46, %v16824_v28 }
 0x5ef   : > { %14033 = vmatpush3.bf16.msra.mxu0 %v2019_v50  ;;  %15896 = vrcp.f32 %v1994_v0 }
 0x5f0   : > { %14034 = vmatprep.subr.bf16.mxu0 %v20793_v21  ;;  %v1783_v25 = vpack.c.bf16 %v1779_v56, %v1778_v40  ;;  %15898 = vrcp.f32 %v1991_v23 }
 0x5f1   : > { %v15889_v9 = vpop.eup %15888 }
 0x5f2   : > { %v1997_v58 = vpop.xlane.xlu1 %1996  ;;  %14005 = vmatmul.mubr.msk.bf16.gmra.mrb[52].mxu0 %vm1253_vm10, %v1783_v25  ;;  %v15891_v1 = vpop.eup %15890  ;;  %v1780_v55 = vmul.f32 %v15889_v9, %v16833_v29 }
 0x5f3   : > { %14008 = vmatprep.mubr.msk.bf16.mxu0 %vm16061_vm6, %v20793_v21  ;;  %v1781_v12 = vmul.f32 %v15891_v1, %v16826_v11 }
 0x5f5   : > { %v1784_v28 = vpack.c.bf16 %v1781_v12, %v1780_v55  ;;  %v15893_v63 = vpop.eup %15892 }
 0x5f6   : > { %v2000_v51 = vpop.xlane.xlu1 %1999  ;;  %v15895_v43 = vpop.eup %15894  ;;  %v2007_v18 = vmul.f32 %v15893_v63, %v16837_v61  ;;  %v15323_v63 = vld [vmem:[%s20636_s6 + $0x8] sm:$0xff]  }
 0x5f7   : > { %v2008_v29 = vmul.f32 %v15895_v43, %v16835_v38  ;;  %15900 = vrcp.f32 %v2000_v51 }
 0x5f8   : > { %15902 = vrcp.f32 %v1997_v58 }
 0x5f9   : > { %v2013_v11 = vpack.c.bf16 %v2008_v29, %v2007_v18  ;;  %v15897_v35 = vpop.eup %15896 }
 0x5fa   : > { %v2021_v45 = vpop.permute.xlu1 %2020  ;;  %14009 = vmatmul.mubr.msk.bf16.gmra.mrb[56].mxu0 %vm1253_vm10, %v1784_v28  ;;  %v15899_v47 = vpop.eup %15898  ;;  %v2010_v8 = vmul.f32 %v15897_v35, %v16849_v24  ;;  %v15322_v28 = vld [vmem:[%s20636_s6] sm:$0xff]  }
 0x5fb   : > { %14035 = vmatpush3.bf16.msra.mxu0 %v2021_v45  ;;  %14036 = vmatprep.mubr.msk.bf16.mxu0 %vm16061_vm6, %v20793_v21  ;;  %v2009_v16 = vmul.f32 %v15899_v47, %v16843_v57 }
 0x5fc   : > { %14064 = vmatprep.subr.bf16.mxu0 %v20793_v21  ;;  %14049 = vmatpush3.bf16.msra.mxu1 %v15322_v28 }
 0x5fd   : > { %v2014_v34 = vpack.c.bf16 %v2010_v8, %v2009_v16  ;;  %14050 = vmatprep.subr.bf16.mxu1 %v20793_v21 }
 0x600   : > { %14051 = vmatpush3.bf16.msra.mxu1 %v15323_v63 }
 0x601   : > { %v15901_v61 = vpop.eup %15900  ;;  %14080 = vmatprep.subr.bf16.mxu1 %v20793_v21 }
 0x602   : > { %14037 = vmatmul.mubr.msk.bf16.vlgmr.msra.gmra.mrb[60].mxu0 %vm1253_vm10, %v2013_v11  ;;  %v15903_v22 = vpop.eup %15902  ;;  %v2012_v38 = vmul.f32 %v15901_v61, %v16857_v44 }
 0x603   : > { %14040 = vmatprep.mubr.msk.bf16.mxu0 %vm16061_vm6, %v20793_v21  ;;  %v2011_v30 = vmul.f32 %v15903_v22, %v16853_v27 }
 0x605   : > { %v2015_v15 = vpack.c.bf16 %v2012_v38, %v2011_v30 }
 0x60a   : > { %14041 = vmatmul.mubr.msk.bf16.gmra.mrb[64].mxu0 %vm1253_vm10, %v2014_v34 }
 0x60b   : > { %14044 = vmatprep.mubr.msk.bf16.mxu0 %vm16061_vm6, %v20793_v21 }
 0x612   : > { %14045 = vmatmul.mubr.msk.bf16.gmra.mrb[68].mxu0 %vm1253_vm10, %v2015_v15 }
 0x613   : > { %14068 = vmatprep.mubr.msk.bf16.mxu0 %vm16061_vm6, %v20793_v21 }
 0x65c   : > { %v16939_v24 = vpop.f32.mrb[24].mxu0 }
 0x65d   : > { %v13930_v57 = vpop.f32.mrb[25].mxu0 }
 0x65e   : > { %v16941_v2 = vpop.f32.mrb[26].mxu0 }
 0x65f   : > { %v13931_v4 = vpop.f32.mrb[27].mxu0 }
 0x664   : > { %v16943_v3 = vpop.f32.mrb[28].mxu0 }
 0x665   : > { %v13934_v26 = vpop.f32.mrb[29].mxu0 }
 0x666   : > { %v16945_v39 = vpop.f32.mrb[30].mxu0 }
 0x667   : > { %v13935_v44 = vpop.f32.mrb[31].mxu0 }
 0x66c   : > { %v16947_v20 = vpop.f32.mrb[32].mxu0 }
 0x66d   : > { %v13938_v27 = vpop.f32.mrb[33].mxu0 }
 0x66e   : > { %v16949_v17 = vpop.f32.mrb[34].mxu0 }
 0x66f   : > { %v13939_v7 = vpop.f32.mrb[35].mxu0 }
 0x674   : > { %v1606_v23 = vpop.f32.mrb[36].mxu0 }
 0x675   : > { %v13966_v32 = vpop.f32.mrb[37].mxu0 }
 0x676   : > { %v1609_v31 = vpop.f32.mrb[38].mxu0 }
 0x677   : > { %v15228_v46 = vpack.i.bf16 %v1609_v31, %v1606_v23  ;;  %v13967_v50 = vpop.f32.mrb[39].mxu0 }
 0x679   : > { %15229 = vrot.lane.b32.xlu1 %v15228_v46, %s20700_s30 }
 0x67e   : > { %v1614_v0 = vpop.f32.mrb[40].mxu0 }
 0x67f   : > { %v13970_v40 = vpop.f32.mrb[41].mxu0 }
 0x680   : > { %v1617_v56 = vpop.f32.mrb[42].mxu0 }
 0x681   : > { %v15243_v25 = vpack.i.bf16 %v1617_v56, %v1614_v0  ;;  %v13971_v9 = vpop.f32.mrb[43].mxu0 }
 0x686   : > { %v1622_v58 = vpop.f32.mrb[44].mxu0 }
 0x687   : > { %v13974_v1 = vpop.f32.mrb[45].mxu0 }
 0x688   : > { %v1625_v55 = vpop.f32.mrb[46].mxu0 }
 0x689   : > { %v15258_v51 = vpack.i.bf16 %v1625_v55, %v1622_v58  ;;  %v13975_v12 = vpop.f32.mrb[47].mxu0 }
 0x6bd   : > { %v1837_v45 = vpop.f32.mrb[48].mxu0 }
 0x6be   : > { %v14002_v43 = vpop.f32.mrb[49].mxu0 }
 0x6bf   : > { %v1840_v18 = vpop.f32.mrb[50].mxu0 }
 0x6c0   : > { %v15233_v29 = vpack.i.bf16 %v1840_v18, %v1837_v45  ;;  %v14003_v11 = vpop.f32.mrb[51].mxu0 }
 0x6c2   : > { %15234 = vrot.lane.b32.xlu1 %v15233_v29, %s20698_s23 }
 0x6c5   : > { %v1845_v35 = vpop.f32.mrb[52].mxu0 }
 0x6c6   : > { %v14006_v47 = vpop.f32.mrb[53].mxu0 }
 0x6c7   : > { %v1848_v8 = vpop.f32.mrb[54].mxu0 }
 0x6c8   : > { %v15248_v16 = vpack.i.bf16 %v1848_v8, %v1845_v35  ;;  %v14007_v34 = vpop.f32.mrb[55].mxu0 }
 0x6cd   : > { %v1853_v61 = vpop.f32.mrb[56].mxu0 }
 0x6ce   : > { %v14010_v22 = vpop.f32.mrb[57].mxu0 }
 0x6cf   : > { %v1856_v38 = vpop.f32.mrb[58].mxu0 }
 0x6d0   : > { %v15263_v30 = vpack.i.bf16 %v1856_v38, %v1853_v61  ;;  %v14011_v15 = vpop.f32.mrb[59].mxu0 }
 0x6d5   : > { %v2068_v57 = vpop.f32.mrb[60].mxu0 }
 0x6d6   : > { %v14038_v4 = vpop.f32.mrb[61].mxu0 }
 0x6d7   : > { %v2071_v26 = vpop.f32.mrb[62].mxu0 }
 0x6d8   : > { %v15238_v44 = vpack.i.bf16 %v2071_v26, %v2068_v57  ;;  %v14039_v27 = vpop.f32.mrb[63].mxu0 }
 0x6da   : > { %15239 = vrot.lane.b32.xlu1 %v15238_v44, %s20696_s29 }
 0x6dd   : > { %v2076_v7 = vpop.f32.mrb[64].mxu0 }
 0x6de   : > { %15244 = vrot.lane.b32.xlu1 %v15243_v25, %s20700_s30  ;;  %v14042_v23 = vpop.f32.mrb[65].mxu0 }
 0x6df   : > { %v2079_v32 = vpop.f32.mrb[66].mxu0 }
 0x6e0   : > { %v15253_v31 = vpack.i.bf16 %v2079_v32, %v2076_v7  ;;  %v14043_v46 = vpop.f32.mrb[67].mxu0 }
 0x6e2   : > { %15249 = vrot.lane.b32.xlu1 %v15248_v16, %s20698_s23  ;;  %15254 = vrot.lane.b32.xlu0 %v15253_v31, %s20696_s29 }
 0x6e5   : > { %v2084_v50 = vpop.f32.mrb[68].mxu0 }
 0x6e6   : > { %15259 = vrot.lane.b32.xlu1 %v15258_v51, %s20700_s30  ;;  %15264 = vrot.lane.b32.xlu0 %v15263_v30, %s20698_s23  ;;  %v14046_v0 = vpop.f32.mrb[69].mxu0  ;;  %s20794_s23 = smov 120   ;;  %s20799_s30 = smov 64  }
 0x6e7   : > { %v2087_v40 = vpop.f32.mrb[70].mxu0 }
 0x6e8   : > { %v15268_v56 = vpack.i.bf16 %v2087_v40, %v2084_v50  ;;  %v14047_v9 = vpop.f32.mrb[71].mxu0 }
 0x6ea   : > { %15269 = vrot.lane.b32.xlu1 %v15268_v56, %s20696_s29  ;;  %s20800_s29 = smov 56  }
 0x6eb   : > { %v15230_v25 = vpop.permute.xlu1 %15229 }
 0x6ec   : > { %v15232_v1 = vunpack.i.h.bf16 %v15230_v25  ;;  %v15231_v55 = vunpack.i.l.bf16 %v15230_v25 }
 0x6ee   : > { %v2164_v51 = vsel %vm1177_vm9, %v16941_v2, %v15232_v1  ;;  %v2163_v45 = vsel %vm1177_vm9, %v16939_v24, %v15231_v55 }
 0x734   : > { %v15235_v58 = vpop.permute.xlu1 %15234 }
 0x735   : > { %v15237_v12 = vunpack.i.h.bf16 %v15235_v58  ;;  %v15236_v28 = vunpack.i.l.bf16 %v15235_v58 }
 0x737   : > { %v2170_v29 = vsel %vm2169_vm11, %v2163_v45, %v15236_v28  ;;  %v2171_v11 = vsel %vm2169_vm11, %v2164_v51, %v15237_v12 }
 0x74c   : > { %v15240_v63 = vpop.permute.xlu1 %15239 }
 0x74d   : > { %v15242_v43 = vunpack.i.h.bf16 %v15240_v63  ;;  %v15241_v18 = vunpack.i.l.bf16 %v15240_v63 }
 0x74f   : > { %v2177_v35 = vsel %vm2176_vm12, %v2170_v29, %v15241_v18  ;;  %v2178_v47 = vsel %vm2176_vm12, %v2171_v11, %v15242_v43 }
 0x750   : > { %v2183_v8 = vpack.c.bf16 %v2178_v47, %v2177_v35  ;;  %v15245_v16 = vpop.permute.xlu1 %15244 }
 0x751   : > { %v15247_v34 = vunpack.i.h.bf16 %v15245_v16  ;;  %v15246_v61 = vunpack.i.l.bf16 %v15245_v16 }
 0x752   : > { %14053 = vmatmul.mubr.msk.bf16.vlgmr.msra.gmra.mrb[60].mxu1 %vm929_vm2, %v2183_v8 }
 0x753   : > { %14056 = vmatprep.mubr.msk.bf16.mxu1 %vm16061_vm6, %v20793_v21  ;;  %v2166_v57 = vsel %vm1177_vm9, %v16945_v39, %v15247_v34  ;;  %v2165_v4 = vsel %vm1177_vm9, %v16943_v3, %v15246_v61 }
 0x754   : > { %v15255_v24 = vpop.permute.xlu0 %15254  ;;  %v15250_v2 = vpop.permute.xlu1 %15249 }
 0x755   : > { %v15257_v22 = vunpack.i.h.bf16 %v15255_v24  ;;  %v15256_v38 = vunpack.i.l.bf16 %v15255_v24  ;;  %v15252_v30 = vunpack.i.h.bf16 %v15250_v2  ;;  %v15251_v15 = vunpack.i.l.bf16 %v15250_v2 }
 0x757   : > { %v2172_v26 = vsel %vm2169_vm11, %v2165_v4, %v15251_v15  ;;  %v2173_v44 = vsel %vm2169_vm11, %v2166_v57, %v15252_v30 }
 0x758   : > { %v15265_v27 = vpop.permute.xlu0 %15264  ;;  %v15260_v7 = vpop.permute.xlu1 %15259  ;;  %v2179_v23 = vsel %vm2176_vm12, %v2172_v26, %v15256_v38  ;;  %v2180_v32 = vsel %vm2176_vm12, %v2173_v44, %v15257_v22 }
 0x759   : > { %v15262_v31 = vunpack.i.h.bf16 %v15260_v7  ;;  %v15261_v46 = vunpack.i.l.bf16 %v15260_v7  ;;  %v15267_v50 = vunpack.i.h.bf16 %v15265_v27  ;;  %v15266_v0 = vunpack.i.l.bf16 %v15265_v27 }
 0x75a   : > { %v2184_v40 = vpack.c.bf16 %v2180_v32, %v2179_v23 }
 0x75b   : > { %v2168_v39 = vsel %vm1177_vm9, %v16949_v17, %v15262_v31  ;;  %v2167_v3 = vsel %vm1177_vm9, %v16947_v20, %v15261_v46  ;;  %v12144_v20 = vld [vmem:[%s20637_s7] ss:$0 sm:$0xff] }
 0x75c   : > { %14057 = vmatmul.mubr.msk.bf16.gmra.mrb[64].mxu1 %vm929_vm2, %v2184_v40  ;;  %v15270_v56 = vpop.permute.xlu1 %15269  ;;  %v2174_v58 = vsel %vm2169_vm11, %v2167_v3, %v15266_v0  ;;  %v2175_v1 = vsel %vm2169_vm11, %v2168_v39, %v15267_v50 }
 0x75d   : > { %v15272_v9 = vunpack.i.h.bf16 %v15270_v56  ;;  %v15271_v25 = vunpack.i.l.bf16 %v15270_v56  ;;  %14060 = vmatprep.mubr.msk.bf16.mxu1 %vm16061_vm6, %v20793_v21 }
 0x75f   : > { %v2181_v55 = vsel %vm2176_vm12, %v2174_v58, %v15271_v25  ;;  %v2182_v12 = vsel %vm2176_vm12, %v2175_v1, %v15272_v9 }
 0x760   : > { %v2185_v17 = vpack.c.bf16 %v2182_v12, %v2181_v55 }
 0x764   : > { %14061 = vmatmul.mubr.msk.bf16.gmra.mrb[68].mxu1 %vm929_vm2, %v2185_v17 }
 0x765   : > { %14088 = vmatprep.mubr.msk.bf16.mxu1 %vm16061_vm6, %v20793_v21 }
 0x825   : > { %v2252_v28 = vpop.f32.mrb[60].mxu1 }
 0x826   : > { %v2253_v63 = vadd.f32 %v12144_v20, %v2252_v28  ;;  %v14054_v51 = vpop.f32.mrb[61].mxu1 }
 0x827   : > { %v2255_v45 = vpop.f32.mrb[62].mxu1 }
 0x828   : > { %v2256_v43 = vadd.f32 %v12144_v20, %v2255_v45  ;;  %v14055_v18 = vpop.f32.mrb[63].mxu1  ;;  %v2276_v29 = vadd.f32 %v2253_v63, %v16433_v33 }
 0x82a   : > { %v2282_v11 = vsel %vm929_vm2, %v2276_v29, 0.0  ;;  %v2277_v35 = vadd.f32 %v2256_v43, %v16436_v36 }
 0x82b   : > { %2283 = vadd.xlane.f32.xlu0 %v2282_v11 }
 0x82c   : > { %v2285_v47 = vsel %vm929_vm2, %v2277_v35, 0.0 }
 0x82d   : > { %2286 = vadd.xlane.f32.xlu1 %v2285_v47 }
 0x82f   : > { %v2260_v8 = vpop.f32.mrb[64].mxu1 }
 0x830   : > { %v2261_v16 = vadd.f32 %v12144_v20, %v2260_v8  ;;  %v14058_v34 = vpop.f32.mrb[65].mxu1  ;;  %v15324_v8 = vld [vmem:[%s20638_s8] sm:$0xff]  }
 0x831   : > { %v2263_v61 = vpop.f32.mrb[66].mxu1  ;;  %14065 = vmatpush3.bf16.msra.mxu0 %v15324_v8  ;;  %v15326_v34 = vld [vmem:[%s20640_s10] sm:$0xff]  }
 0x832   : > { %v2264_v24 = vadd.f32 %v12144_v20, %v2263_v61  ;;  %v14059_v2 = vpop.f32.mrb[67].mxu1  ;;  %v2278_v22 = vadd.f32 %v2261_v16, %v16444_v52  ;;  %14066 = vmatprep.subr.bf16.mxu0 %v20793_v21  ;;  %v15325_v16 = vld [vmem:[%s20638_s8 + $0x8] sm:$0xff]   ;;  %14081 = vmatpush3.bf16.msra.mxu1 %v15326_v34 }
 0x833   : > { %v15327_v61 = vld [vmem:[%s20640_s10 + $0x8] sm:$0xff]   ;;  %14082 = vmatprep.subr.bf16.mxu1 %v20793_v21 }
 0x834   : > { %v2288_v38 = vsel %vm929_vm2, %v2278_v22, 0.0  ;;  %v2279_v33 = vadd.f32 %v2264_v24, %v16447_v60 }
 0x835   : > { %2289 = vadd.xlane.f32.xlu0 %v2288_v38  ;;  %14067 = vmatpush3.bf16.msra.mxu0 %v15325_v16 }
 0x836   : > { %v2291_v57 = vsel %vm929_vm2, %v2279_v33, 0.0  ;;  %14100 = vmatprep.subr.bf16.mxu0 %v20793_v21  ;;  %14083 = vmatpush3.bf16.msra.mxu1 %v15327_v61 }
 0x837   : > { %v2268_v30 = vpop.f32.mrb[68].mxu1  ;;  %14084 = vmatprep.subr.bf16.mxu1 %v20793_v21 }
 0x838   : > { %v2269_v15 = vadd.f32 %v12144_v20, %v2268_v30  ;;  %v14062_v36 = vpop.f32.mrb[69].mxu1 }
 0x839   : > { %2292 = vadd.xlane.f32.xlu0 %v2291_v57  ;;  %v2271_v4 = vpop.f32.mrb[70].mxu1 }
 0x83a   : > { %v2272_v26 = vadd.f32 %v12144_v20, %v2271_v4  ;;  %v14063_v44 = vpop.f32.mrb[71].mxu1  ;;  %v2280_v27 = vadd.f32 %v2269_v15, %v16455_v10 }
 0x83c   : > { %v2294_v7 = vsel %vm929_vm2, %v2280_v27, 0.0  ;;  %v2281_v52 = vadd.f32 %v2272_v26, %v16458_v37  ;;  %v17068_v26 = vld [vmem:[%s20642_s12] sm:$0xf] }
 0x83d   : > { %2295 = vadd.xlane.f32.xlu0 %v2294_v7 }
 0x83e   : > { %v2297_v23 = vsel %vm929_vm2, %v2281_v52, 0.0 }
 0x83f   : > { %2298 = vadd.xlane.f32.xlu1 %v2297_v23 }
 0x8b8   : > { %v2284_v60 = vpop.xlane.xlu0 %2283 }
 0x8b9   : > { %v2301_v32 = vmul.f32 0.03125, %v2284_v60 }
 0x8ba   : > { %v2287_v31 = vpop.xlane.xlu1 %2286 }
 0x8bb   : > { %v17016_v46 = vsub.f32 %v2276_v29, %v2301_v32  ;;  %v2302_v50 = vmul.f32 0.03125, %v2287_v31 }
 0x8bd   : > { %v17018_v0 = vsub.f32 %v2277_v35, %v2302_v50  ;;  %v2313_v40 = vmul.f32 %v17016_v46, %v17016_v46 }
 0x8bf   : > { %v2319_v10 = vsel %vm929_vm2, %v2313_v40, 0.0  ;;  %v2314_v37 = vmul.f32 %v17018_v0, %v17018_v0 }
 0x8c0   : > { %2320 = vadd.xlane.f32.xlu0 %v2319_v10 }
 0x8c1   : > { %v2322_v39 = vsel %vm929_vm2, %v2314_v37, 0.0 }
 0x8c2   : > { %v2290_v3 = vpop.xlane.xlu0 %2289  ;;  %2323 = vadd.xlane.f32.xlu1 %v2322_v39 }
 0x8c3   : > { %v2303_v56 = vmul.f32 0.03125, %v2290_v3 }
 0x8c5   : > { %v17026_v9 = vsub.f32 %v2278_v22, %v2303_v56  ;;  %v2361_v22 = vlaneseq }
 0x8c6   : > { %v2293_v25 = vpop.xlane.xlu0 %2292 }
 0x8c7   : > { %v2304_v58 = vmul.f32 0.03125, %v2293_v25  ;;  %v2315_v1 = vmul.f32 %v17026_v9, %v17026_v9  ;;  %v17062_v36 = vshrl.u32 %v2361_v22, 7 }
 0x8c9   : > { %v17030_v55 = vsub.f32 %v2279_v33, %v2304_v58  ;;  %v2325_v12 = vsel %vm929_vm2, %v2315_v1, 0.0  ;;  %v20709_v57 = vsub.s32 0, %v17062_v36 }
 0x8ca   : > { %2326 = vadd.xlane.f32.xlu0 %v2325_v12  ;;  %v2296_v17 = vpop.xlane.xlu0 %2295 }
 0x8cb   : > { %v2305_v20 = vmul.f32 0.03125, %v2296_v17  ;;  %v2316_v28 = vmul.f32 %v17030_v55, %v17030_v55  ;;  %v2364_v7 = vrot.slane %v17068_v26, %v20709_v57 }
 0x8cc   : > { %v2299_v63 = vpop.xlane.xlu1 %2298 }
 0x8cd   : > { %v17035_v51 = vsub.f32 %v2280_v27, %v2305_v20  ;;  %v2306_v45 = vmul.f32 0.03125, %v2299_v63  ;;  %v2328_v43 = vsel %vm929_vm2, %v2316_v28, 0.0 }
 0x8ce   : > { %2329 = vadd.xlane.f32.xlu1 %v2328_v43 }
 0x8cf   : > { %v17038_v18 = vsub.f32 %v2281_v52, %v2306_v45  ;;  %v2317_v29 = vmul.f32 %v17035_v51, %v17035_v51  ;;  %v20708_v52 = vsub.s32 1, %v17062_v36 }
 0x8d1   : > { %v2331_v11 = vsel %vm929_vm2, %v2317_v29, 0.0  ;;  %v2318_v35 = vmul.f32 %v17038_v18, %v17038_v18  ;;  %v2374_v10 = vrot.slane %v17068_v26, %v20708_v52 }
 0x8d2   : > { %2332 = vadd.xlane.f32.xlu0 %v2331_v11 }
 0x8d3   : > { %v2334_v47 = vsel %vm929_vm2, %v2318_v35, 0.0 }
 0x8d4   : > { %2335 = vadd.xlane.f32.xlu1 %v2334_v47 }
 0x94d   : > { %v2321_v24 = vpop.xlane.xlu0 %2320 }
 0x94e   : > { %v2337_v2 = vmul.f32 0.03125, %v2321_v24 }
 0x94f   : > { %v2324_v38 = vpop.xlane.xlu1 %2323 }
 0x950   : > { %v2343_v33 = vadd.f32 1e-05, %v2337_v2  ;;  %v2338_v30 = vmul.f32 0.03125, %v2324_v38  ;;  %v15329_v38 = vld [vmem:[%s20640_s10 + $0x18] sm:$0xff]  }
 0x952   : > { %15904 = vrsqrt.f32 %v2343_v33  ;;  %v2344_v15 = vadd.f32 1e-05, %v2338_v30  ;;  %v12150_v33 = vld [vmem:[%s20639_s9] ss:$0 sm:$0xff] }
 0x954   : > { %15906 = vrsqrt.f32 %v2344_v15 }
 0x957   : > { %v2327_v4 = vpop.xlane.xlu0 %2326 }
 0x958   : > { %v2339_v44 = vmul.f32 0.03125, %v2327_v4 }
 0x95a   : > { %v2345_v27 = vadd.f32 1e-05, %v2339_v44 }
 0x95b   : > { %v2330_v23 = vpop.xlane.xlu1 %2329 }
 0x95c   : > { %v15905_v60 = vpop.eup %15904  ;;  %15908 = vrsqrt.f32 %v2345_v27  ;;  %v2340_v32 = vmul.f32 0.03125, %v2330_v23 }
 0x95d   : > { %v2355_v31 = vmul.f32 %v15905_v60, %v17016_v46 }
 0x95e   : > { %v15907_v50 = vpop.eup %15906  ;;  %v2346_v40 = vadd.f32 1e-05, %v2340_v32 }
 0x95f   : > { %v2365_v37 = vmul.f32 %v2364_v7, %v2355_v31  ;;  %v2356_v39 = vmul.f32 %v15907_v50, %v17018_v0  ;;  %v2333_v3 = vpop.xlane.xlu0 %2332 }
 0x960   : > { %15910 = vrsqrt.f32 %v2346_v40  ;;  %v2341_v56 = vmul.f32 0.03125, %v2333_v3 }
 0x961   : > { %v2366_v25 = vmul.f32 %v2364_v7, %v2356_v39  ;;  %v2336_v58 = vpop.xlane.xlu1 %2335  ;;  %v17079_v17 = vadd.f32 %v2374_v10, %v2365_v37 }
 0x962   : > { %v2347_v1 = vadd.f32 1e-05, %v2341_v56  ;;  %v2342_v12 = vmul.f32 0.03125, %v2336_v58 }
 0x963   : > { %v17081_v20 = vadd.f32 %v2374_v10, %v2366_v25 }
 0x964   : > { %15912 = vrsqrt.f32 %v2347_v1  ;;  %v2348_v46 = vadd.f32 1e-05, %v2342_v12 }
 0x965   : > { %v2381_v28 = vpack.c.bf16 %v17081_v20, %v17079_v17 }
 0x966   : > { %v15909_v63 = vpop.eup %15908  ;;  %15914 = vrsqrt.f32 %v2348_v46 }
 0x967   : > { %14069 = vmatmul.mubr.msk.bf16.vlgmr.msra.gmra.mrb[72].mxu0 %vm929_vm2, %v2381_v28  ;;  %v2357_v0 = vmul.f32 %v15909_v63, %v17026_v9 }
 0x968   : > { %14072 = vmatprep.mubr.msk.bf16.mxu0 %vm16061_vm6, %v20793_v21 }
 0x969   : > { %v2367_v29 = vmul.f32 %v2364_v7, %v2357_v0 }
 0x96a   : > { %v15911_v45 = vpop.eup %15910 }
 0x96b   : > { %v2358_v43 = vmul.f32 %v15911_v45, %v17030_v55  ;;  %v17090_v47 = vadd.f32 %v2374_v10, %v2367_v29  ;;  %v12156_v29 = vld [vmem:[%s20641_s11] ss:$0 sm:$0xff] }
 0x96d   : > { %v2368_v11 = vmul.f32 %v2364_v7, %v2358_v43 }
 0x96e   : > { %v15913_v35 = vpop.eup %15912 }
 0x96f   : > { %v17092_v8 = vadd.f32 %v2374_v10, %v2368_v11  ;;  %v2359_v16 = vmul.f32 %v15913_v35, %v17035_v51 }
 0x970   : > { %v15915_v34 = vpop.eup %15914 }
 0x971   : > { %v2382_v61 = vpack.c.bf16 %v17092_v8, %v17090_v47  ;;  %v2360_v9 = vmul.f32 %v15915_v34, %v17038_v18  ;;  %v2369_v24 = vmul.f32 %v2364_v7, %v2359_v16  ;;  %v15328_v18 = vld [vmem:[%s20640_s10 + $0x10] sm:$0xff]  }
 0x972   : > { %14085 = vmatpush3.bf16.msra.mxu1 %v15328_v18 }
 0x973   : > { %14073 = vmatmul.mubr.msk.bf16.gmra.mrb[76].mxu0 %vm929_vm2, %v2382_v61  ;;  %v2370_v2 = vmul.f32 %v2364_v7, %v2360_v9  ;;  %v17103_v22 = vadd.f32 %v2374_v10, %v2369_v24  ;;  %14086 = vmatprep.subr.bf16.mxu1 %v20793_v21 }
 0x974   : > { %14076 = vmatprep.mubr.msk.bf16.mxu0 %vm16061_vm6, %v20793_v21 }
 0x975   : > { %v17101_v55 = vadd.f32 %v2374_v10, %v2370_v2 }
 0x976   : > { %14087 = vmatpush3.bf16.msra.mxu1 %v15329_v38 }
 0x977   : > { %v2383_v51 = vpack.c.bf16 %v17101_v55, %v17103_v22  ;;  %14116 = vmatprep.subr.bf16.mxu1 %v20793_v21 }
 0x97b   : > { %14077 = vmatmul.mubr.msk.bf16.gmra.mrb[80].mxu0 %vm929_vm2, %v2383_v51 }
 0x97c   : > { %14104 = vmatprep.mubr.msk.bf16.mxu0 %vm16061_vm6, %v20793_v21 }
 0xa3a   : > { %v2450_v30 = vpop.f32.mrb[72].mxu0 }
 0xa3b   : > { %v2451_v15 = vadd.f32 %v12150_v33, %v2450_v30  ;;  %v14070_v4 = vpop.f32.mrb[73].mxu0 }
 0xa3c   : > { %v2453_v44 = vpop.f32.mrb[74].mxu0 }
 0xa3d   : > { %v2454_v27 = vadd.f32 %v12150_v33, %v2453_v44  ;;  %v14071_v7 = vpop.f32.mrb[75].mxu0  ;;  %v2473_v23 = vmax.f32 %v2451_v15, 0.0 }
 0xa3f   : > { %v2474_v60 = vmax.f32 %v2454_v27, 0.0 }
 0xa41   : > { %v2479_v32 = vpack.c.bf16 %v2474_v60, %v2473_v23 }
 0xa43   : > { %14089 = vmatmul.mubr.msk.bf16.vlgmr.msra.gmra.mrb[72].mxu1 %vm931_vm3, %v2479_v32 }
 0xa44   : > { %14092 = vmatprep.mubr.msk.bf16.mxu1 %vm16061_vm6, %v20793_v21 }
 0xa46   : > { %v2458_v31 = vpop.f32.mrb[76].mxu0 }
 0xa47   : > { %v2459_v50 = vadd.f32 %v12150_v33, %v2458_v31  ;;  %v14074_v40 = vpop.f32.mrb[77].mxu0 }
 0xa48   : > { %v2461_v10 = vpop.f32.mrb[78].mxu0 }
 0xa49   : > { %v2462_v37 = vadd.f32 %v12150_v33, %v2461_v10  ;;  %v14075_v39 = vpop.f32.mrb[79].mxu0  ;;  %v2475_v3 = vmax.f32 %v2459_v50, 0.0 }
 0xa4b   : > { %v2476_v56 = vmax.f32 %v2462_v37, 0.0 }
 0xa4d   : > { %v2480_v25 = vpack.c.bf16 %v2476_v56, %v2475_v3 }
 0xa4e   : > { %v2466_v58 = vpop.f32.mrb[80].mxu0 }
 0xa4f   : > { %v2467_v1 = vadd.f32 %v12150_v33, %v2466_v58  ;;  %v14078_v12 = vpop.f32.mrb[81].mxu0  ;;  %14093 = vmatmul.mubr.msk.bf16.gmra.mrb[76].mxu1 %vm931_vm3, %v2480_v25 }
 0xa50   : > { %v2469_v46 = vpop.f32.mrb[82].mxu0  ;;  %14096 = vmatprep.mubr.msk.bf16.mxu1 %vm16061_vm6, %v20793_v21 }
 0xa51   : > { %v2470_v28 = vadd.f32 %v12150_v33, %v2469_v46  ;;  %v14079_v63 = vpop.f32.mrb[83].mxu0  ;;  %v2477_v0 = vmax.f32 %v2467_v1, 0.0 }
 0xa53   : > { %v2478_v45 = vmax.f32 %v2470_v28, 0.0 }
 0xa55   : > { %v2481_v43 = vpack.c.bf16 %v2478_v45, %v2477_v0 }
 0xa57   : > { %14097 = vmatmul.mubr.msk.bf16.gmra.mrb[80].mxu1 %vm931_vm3, %v2481_v43 }
 0xa58   : > { %14122 = vmatprep.mubr.msk.bf16.mxu1 %vm16061_vm6, %v20793_v21 }
 0xb16   : > { %v2564_v11 = vpop.f32.mrb[72].mxu1 }
 0xb17   : > { %v2565_v35 = vadd.f32 %v12156_v29, %v2564_v11  ;;  %v14090_v16 = vpop.f32.mrb[73].mxu1 }
 0xb18   : > { %v2567_v34 = vpop.f32.mrb[74].mxu1 }
 0xb19   : > { %v2568_v61 = vadd.f32 %v12156_v29, %v2567_v34  ;;  %v14091_v9 = vpop.f32.mrb[75].mxu1  ;;  %v2587_v24 = vadd.f32 %v2565_v35, %v17079_v17 }
 0xb1b   : > { %v2593_v2 = vsel %vm929_vm2, %v2587_v24, 0.0  ;;  %v2588_v51 = vadd.f32 %v2568_v61, %v17081_v20 }
 0xb1c   : > { %2594 = vadd.xlane.f32.xlu0 %v2593_v2 }
 0xb1d   : > { %v2596_v18 = vsel %vm929_vm2, %v2588_v51, 0.0 }
 0xb1e   : > { %2597 = vadd.xlane.f32.xlu1 %v2596_v18 }
 0xb22   : > { %v2572_v38 = vpop.f32.mrb[76].mxu1 }
 0xb23   : > { %v2573_v33 = vadd.f32 %v12156_v29, %v2572_v38  ;;  %v14094_v30 = vpop.f32.mrb[77].mxu1 }
 0xb24   : > { %v2575_v15 = vpop.f32.mrb[78].mxu1 }
 0xb25   : > { %v2576_v4 = vadd.f32 %v12156_v29, %v2575_v15  ;;  %v14095_v44 = vpop.f32.mrb[79].mxu1  ;;  %v2589_v27 = vadd.f32 %v2573_v33, %v17090_v47 }
 0xb26   : > { %v15331_v44 = vld [vmem:[%s20790_s28 + $0x18] sm:$0xff]  }
 0xb27   : > { %v2599_v7 = vsel %vm929_vm2, %v2589_v27, 0.0  ;;  %v2590_v17 = vadd.f32 %v2576_v4, %v17092_v8  ;;  %v15330_v4 = vld [vmem:[%s20790_s28 + $0x10] sm:$0xff]  }
 0xb28   : > { %2600 = vadd.xlane.f32.xlu0 %v2599_v7  ;;  %14101 = vmatpush3.bf16.msra.mxu0 %v15330_v4 }
 0xb29   : > { %v2602_v23 = vsel %vm929_vm2, %v2590_v17, 0.0  ;;  %14102 = vmatprep.subr.bf16.mxu0 %v20793_v21 }
 0xb2a   : > { %2603 = vadd.xlane.f32.xlu1 %v2602_v23  ;;  %v2580_v20 = vpop.f32.mrb[80].mxu1 }
 0xb2b   : > { %v2581_v60 = vadd.f32 %v12156_v29, %v2580_v20  ;;  %v14098_v32 = vpop.f32.mrb[81].mxu1 }
 0xb2c   : > { %v2583_v31 = vpop.f32.mrb[82].mxu1  ;;  %14103 = vmatpush3.bf16.msra.mxu0 %v15331_v44  ;;  %v20707_v32 = vsub.s32 2, %v17062_v36 }
 0xb2d   : > { %v2584_v50 = vadd.f32 %v12156_v29, %v2583_v31  ;;  %v14099_v40 = vpop.f32.mrb[83].mxu1  ;;  %v2591_v10 = vadd.f32 %v2581_v60, %v17103_v22  ;;  %14134 = vmatprep.subr.bf16.mxu0 %v20793_v21 }
 0xb2e   : > { %v2674_v40 = vrot.slane %v17068_v26, %v20707_v32 }
 0xb2f   : > { %v2605_v37 = vsel %vm929_vm2, %v2591_v10, 0.0  ;;  %v2592_v47 = vadd.f32 %v2584_v50, %v17101_v55 }
 0xb30   : > { %2606 = vadd.xlane.f32.xlu0 %v2605_v37 }
 0xb31   : > { %v2608_v39 = vsel %vm929_vm2, %v2592_v47, 0.0 }
 0xb32   : > { %2609 = vadd.xlane.f32.xlu1 %v2608_v39 }
 0xba9   : > { %v2595_v8 = vpop.xlane.xlu0 %2594 }
 0xbaa   : > { %v2611_v3 = vmul.f32 0.03125, %v2595_v8 }
 0xbab   : > { %v2598_v56 = vpop.xlane.xlu1 %2597 }
 0xbac   : > { %v2617_v25 = vsub.f32 %v2587_v24, %v2611_v3  ;;  %v2612_v58 = vmul.f32 0.03125, %v2598_v56 }
 0xbae   : > { %v2618_v1 = vsub.f32 %v2588_v51, %v2612_v58  ;;  %v2623_v12 = vmul.f32 %v2617_v25, %v2617_v25 }
 0xbb0   : > { %v2629_v46 = vsel %vm929_vm2, %v2623_v12, 0.0  ;;  %v2624_v28 = vmul.f32 %v2618_v1, %v2618_v1 }
 0xbb1   : > { %2630 = vadd.xlane.f32.xlu0 %v2629_v46 }
 0xbb2   : > { %v2632_v22 = vsel %vm929_vm2, %v2624_v28, 0.0 }
 0xbb3   : > { %2633 = vadd.xlane.f32.xlu1 %v2632_v22 }
 0xbb5   : > { %v2601_v63 = vpop.xlane.xlu0 %2600 }
 0xbb6   : > { %v2613_v55 = vmul.f32 0.03125, %v2601_v63 }
 0xbb7   : > { %v2604_v0 = vpop.xlane.xlu1 %2603 }
 0xbb8   : > { %v17147_v45 = vsub.f32 %v2589_v27, %v2613_v55  ;;  %v2614_v43 = vmul.f32 0.03125, %v2604_v0 }
 0xbba   : > { %v17149_v29 = vsub.f32 %v2590_v17, %v2614_v43  ;;  %v2625_v11 = vmul.f32 %v17147_v45, %v17147_v45 }
 0xbbc   : > { %v2635_v35 = vsel %vm929_vm2, %v2625_v11, 0.0  ;;  %v2626_v16 = vmul.f32 %v17149_v29, %v17149_v29 }
 0xbbd   : > { %2636 = vadd.xlane.f32.xlu0 %v2635_v35  ;;  %v2607_v34 = vpop.xlane.xlu0 %2606 }
 0xbbe   : > { %v2615_v61 = vmul.f32 0.03125, %v2607_v34  ;;  %v2638_v9 = vsel %vm929_vm2, %v2626_v16, 0.0 }
 0xbbf   : > { %2639 = vadd.xlane.f32.xlu1 %v2638_v9  ;;  %v2610_v24 = vpop.xlane.xlu1 %2609 }
 0xbc0   : > { %v17157_v2 = vsub.f32 %v2591_v10, %v2615_v61  ;;  %v2616_v51 = vmul.f32 0.03125, %v2610_v24  ;;  %v20706_v10 = vsub.s32 3, %v17062_v36 }
 0xbc2   : > { %v17159_v18 = vsub.f32 %v2592_v47, %v2616_v51  ;;  %v2627_v38 = vmul.f32 %v17157_v2, %v17157_v2  ;;  %v2684_v12 = vrot.slane %v17068_v26, %v20706_v10 }
 0xbc4   : > { %v2641_v33 = vsel %vm929_vm2, %v2627_v38, 0.0  ;;  %v2628_v30 = vmul.f32 %v17159_v18, %v17159_v18 }
 0xbc5   : > { %2642 = vadd.xlane.f32.xlu0 %v2641_v33 }
 0xbc6   : > { %v2644_v15 = vsel %vm929_vm2, %v2628_v30, 0.0 }
 0xbc7   : > { %2645 = vadd.xlane.f32.xlu1 %v2644_v15 }
 0xc3e   : > { %v2631_v27 = vpop.xlane.xlu0 %2630 }
 0xc3f   : > { %v2647_v7 = vmul.f32 0.03125, %v2631_v27 }
 0xc40   : > { %v2634_v17 = vpop.xlane.xlu1 %2633 }
 0xc41   : > { %v2653_v23 = vadd.f32 1e-05, %v2647_v7  ;;  %v2648_v20 = vmul.f32 0.03125, %v2634_v17 }
 0xc43   : > { %15916 = vrsqrt.f32 %v2653_v23  ;;  %v2654_v60 = vadd.f32 1e-05, %v2648_v20 }
 0xc45   : > { %15918 = vrsqrt.f32 %v2654_v60 }
 0xc4a   : > { %v2637_v31 = vpop.xlane.xlu0 %2636 }
 0xc4b   : > { %v2649_v50 = vmul.f32 0.03125, %v2637_v31 }
 0xc4c   : > { %v2640_v37 = vpop.xlane.xlu1 %2639 }
 0xc4d   : > { %v15917_v47 = vpop.eup %15916  ;;  %v2655_v39 = vadd.f32 1e-05, %v2649_v50  ;;  %v2650_v8 = vmul.f32 0.03125, %v2640_v37 }
 0xc4e   : > { %v2665_v3 = vmul.f32 %v15917_v47, %v2617_v25 }
 0xc4f   : > { %v15919_v56 = vpop.eup %15918  ;;  %15920 = vrsqrt.f32 %v2655_v39  ;;  %v2656_v58 = vadd.f32 1e-05, %v2650_v8 }
 0xc50   : > { %v2675_v46 = vmul.f32 %v2674_v40, %v2665_v3  ;;  %v2666_v28 = vmul.f32 %v15919_v56, %v2618_v1 }
 0xc51   : > { %15922 = vrsqrt.f32 %v2656_v58 }
 0xc52   : > { %v2676_v22 = vmul.f32 %v2674_v40, %v2666_v28  ;;  %v2643_v63 = vpop.xlane.xlu0 %2642  ;;  %v17183_v0 = vadd.f32 %v2684_v12, %v2675_v46 }
 0xc53   : > { %v2651_v55 = vmul.f32 0.03125, %v2643_v63 }
 0xc54   : > { %v17185_v43 = vadd.f32 %v2684_v12, %v2676_v22  ;;  %v2646_v11 = vpop.xlane.xlu1 %2645 }
 0xc55   : > { %v2657_v35 = vadd.f32 1e-05, %v2651_v55  ;;  %v2652_v25 = vmul.f32 0.03125, %v2646_v11 }
 0xc56   : > { %v2691_v16 = vpack.c.bf16 %v17185_v43, %v17183_v0 }
 0xc57   : > { %15924 = vrsqrt.f32 %v2657_v35  ;;  %v2658_v34 = vadd.f32 1e-05, %v2652_v25 }
 0xc58   : > { %14105 = vmatmul.mubr.msk.bf16.vlgmr.msra.gmra.mrb[84].mxu0 %vm929_vm2, %v2691_v16 }
 0xc59   : > { %v15921_v26 = vpop.eup %15920  ;;  %15926 = vrsqrt.f32 %v2658_v34  ;;  %14108 = vmatprep.mubr.msk.bf16.mxu0 %vm16061_vm6, %v20793_v21 }
 0xc5a   : > { %v2667_v1 = vmul.f32 %v15921_v26, %v17147_v45 }
 0xc5b   : > { %v15923_v61 = vpop.eup %15922 }
 0xc5c   : > { %v2668_v9 = vmul.f32 %v15923_v61, %v17149_v29  ;;  %v2677_v24 = vmul.f32 %v2674_v40, %v2667_v1 }
 0xc5e   : > { %v2678_v51 = vmul.f32 %v2674_v40, %v2668_v9  ;;  %v17194_v38 = vadd.f32 %v2684_v12, %v2677_v24 }
 0xc60   : > { %v17196_v33 = vadd.f32 %v2684_v12, %v2678_v51 }
 0xc61   : > { %v15925_v30 = vpop.eup %15924 }
 0xc62   : > { %v2692_v15 = vpack.c.bf16 %v17196_v33, %v17194_v38  ;;  %v2669_v4 = vmul.f32 %v15925_v30, %v17157_v2  ;;  %v12169_v2 = vld [vmem:[%s20791_s5 + $0x1] ss:$0 sm:$0xff] }
 0xc63   : > { %v15927_v44 = vpop.eup %15926 }
 0xc64   : > { %14109 = vmatmul.mubr.msk.bf16.gmra.mrb[88].mxu0 %vm929_vm2, %v2692_v15  ;;  %v2670_v45 = vmul.f32 %v15927_v44, %v17159_v18  ;;  %v2679_v27 = vmul.f32 %v2674_v40, %v2669_v4 }
 0xc65   : > { %14112 = vmatprep.mubr.msk.bf16.mxu0 %vm16061_vm6, %v20793_v21 }
 0xc66   : > { %v2680_v29 = vmul.f32 %v2674_v40, %v2670_v45  ;;  %v17205_v7 = vadd.f32 %v2684_v12, %v2679_v27 }
 0xc68   : > { %v17207_v17 = vadd.f32 %v2684_v12, %v2680_v29 }
 0xc6a   : > { %v2693_v23 = vpack.c.bf16 %v17207_v17, %v17205_v7 }
 0xc6c   : > { %14113 = vmatmul.mubr.msk.bf16.gmra.mrb[92].mxu0 %vm929_vm2, %v2693_v23 }
 0xc6d   : > { %14140 = vmatprep.mubr.msk.bf16.mxu0 %vm16061_vm6, %v20793_v21 }
 0xd2b   : > { %v2762_v18 = vpop.f32.mrb[84].mxu0 }
 0xd2c   : > { %v14106_v20 = vpop.f32.mrb[85].mxu0  ;;  %v2763_v31 = vadd.f32 %v12169_v2, %v2762_v18 }
 0xd2d   : > { %v2765_v60 = vpop.f32.mrb[86].mxu0 }
 0xd2e   : > { %v2766_v50 = vadd.f32 %v12169_v2, %v2765_v60  ;;  %v14107_v40 = vpop.f32.mrb[87].mxu0 }
 0xd30   : > { %v17217_v37 = vpack.c.bf16 %v2766_v50, %v2763_v31 }
 0xd32   : > { %2791 = vrot.lane.b32.xlu0 %v17217_v37, %s16059_s26 }
 0xd37   : > { %v2770_v47 = vpop.f32.mrb[88].mxu0 }
 0xd38   : > { %v14110_v39 = vpop.f32.mrb[89].mxu0  ;;  %v2771_v3 = vadd.f32 %v12169_v2, %v2770_v47 }
 0xd39   : > { %v2773_v8 = vpop.f32.mrb[90].mxu0 }
 0xd3a   : > { %v2774_v56 = vadd.f32 %v12169_v2, %v2773_v8  ;;  %v14111_v58 = vpop.f32.mrb[91].mxu0 }
 0xd3c   : > { %v17221_v12 = vpack.c.bf16 %v2774_v56, %v2771_v3 }
 0xd3e   : > { %3024 = vrot.lane.b32.xlu0 %v17221_v12, %s16062_s22  ;;  %2793 = vrot.lane.b32.xlu1 %v17221_v12, %s16059_s26 }
 0xd3f   : > { %v2778_v46 = vpop.f32.mrb[92].mxu0 }
 0xd40   : > { %v14114_v28 = vpop.f32.mrb[93].mxu0  ;;  %v2779_v63 = vadd.f32 %v12169_v2, %v2778_v46 }
 0xd41   : > { %v2781_v22 = vpop.f32.mrb[94].mxu0 }
 0xd42   : > { %v2782_v55 = vadd.f32 %v12169_v2, %v2781_v22  ;;  %3016 = vrot.lane.b32.xlu0 %v17217_v37, %s20794_s23  ;;  %v14115_v11 = vpop.f32.mrb[95].mxu0 }
 0xd44   : > { %v17229_v35 = vpack.c.bf16 %v2782_v55, %v2779_v63 }
 0xd46   : > { %3018 = vrot.lane.b32.xlu0 %v17221_v12, %s20794_s23  ;;  %2795 = vrot.lane.b32.xlu1 %v17229_v35, %s16059_s26  ;;  %s20797_s26 = smov 104  }
 0xd4a   : > { %3020 = vrot.lane.b32.xlu0 %v17229_v35, %s20794_s23  ;;  %3022 = vrot.lane.b32.xlu1 %v17217_v37, %s16062_s22 }
 0xd4e   : > { %3247 = vrot.lane.b32.xlu0 %v17217_v37, %s20795_s1  ;;  %3026 = vrot.lane.b32.xlu1 %v17229_v35, %s16062_s22  ;;  %s20798_s22 = smov 72  }
 0xd52   : > { %3249 = vrot.lane.b32.xlu0 %v17221_v12, %s20795_s1  ;;  %3253 = vrot.lane.b32.xlu1 %v17217_v37, %s20796_s3 }
 0xd56   : > { %3251 = vrot.lane.b32.xlu0 %v17229_v35, %s20795_s1  ;;  %3255 = vrot.lane.b32.xlu1 %v17221_v12, %s20796_s3 }
 0xd5a   : > { %3478 = vrot.lane.b32.xlu0 %v17217_v37, %s20797_s26  ;;  %3257 = vrot.lane.b32.xlu1 %v17229_v35, %s20796_s3 }
 0xd5e   : > { %3482 = vrot.lane.b32.xlu0 %v17229_v35, %s20797_s26  ;;  %3484 = vrot.lane.b32.xlu1 %v17217_v37, %s20798_s22 }
 0xd62   : > { %2943 = vrot.lane.b32.xlu0 %v17221_v12, %s20799_s30  ;;  %3486 = vrot.lane.b32.xlu1 %v17221_v12, %s20798_s22 }
 0xd66   : > { %3174 = vrot.lane.b32.xlu0 %v17221_v12, %s20800_s29  ;;  %3488 = vrot.lane.b32.xlu1 %v17229_v35, %s20798_s22  ;;  %s20805_s22 = smov 24  }
 0xd6a   : > { %3480 = vrot.lane.b32.xlu1 %v17221_v12, %s20797_s26  ;;  %s20804_s26 = smov 16  }
 0xd6e   : > { %2941 = vrot.lane.b32.xlu1 %v17217_v37, %s20799_s30 }
 0xd72   : > { %3172 = vrot.lane.b32.xlu1 %v17217_v37, %s20800_s29 }
 0xd76   : > { %2945 = vrot.lane.b32.xlu1 %v17229_v35, %s20799_s30 }
 0xda4   : > { %v2792_v25 = vpop.permute.xlu0 %2791 }
 0xda5   : > { %v2807_v16 = vsel %vm1177_vm9, %v2792_v25, 0 }
 0xda6   : > { %14117 = vmatpush3.bf16.xpose.msra.mxu1 %v2807_v16 }
 0xda7   : > { %14118 = vmatprep.subr.bf16.mxu1 %v20793_v21 }
 0xdb0   : > { %v3025_v34 = vpop.permute.xlu0 %3024  ;;  %v2794_v26 = vpop.permute.xlu1 %2793 }
 0xdb1   : > { %v2810_v1 = vsel %vm1177_vm9, %v2794_v26, 0  ;;  %v3041_v23 = vsel %vm1177_vm9, %v3025_v34, 0  ;;  %v17344_v34 = vld [vmem:[%s16598_s27] ss:$0 sm:$0xff]  ;;  %s20801_s27 = smov 48  }
 0xdb2   : > { %14119 = vmatpush3.bf16.xpose.msra.mxu1 %v2810_v1 }
 0xdb3   : > { %14120 = vmatprep.subr.bf16.mxu1 %v20793_v21 }
 0xdb4   : > { %v3017_v61 = vpop.permute.xlu0 %3016 }
 0xdb8   : > { %v2796_v9 = vpop.permute.xlu1 %2795  ;;  %v3019_v51 = vpop.permute.xlu0 %3018 }
 0xdb9   : > { %v2813_v24 = vsel %vm1177_vm9, %v2796_v9, 0 }
 0xdba   : > { %14121 = vmatpush3.bf16.xpose.msra.mxu1 %v2813_v24 }
 0xdbb   : > { %14152 = vmatprep.subr.bf16.mxu1 %v20793_v21 }
 0xdbc   : > { %v3023_v30 = vpop.permute.xlu1 %3022  ;;  %v3021_v15 = vpop.permute.xlu0 %3020 }
 0xdbd   : > { %v3038_v44 = vsel %vm1177_vm9, %v3023_v30, 0 }
 0xdc0   : > { %v3027_v4 = vpop.permute.xlu1 %3026  ;;  %v3248_v27 = vpop.permute.xlu0 %3247 }
 0xdc1   : > { %14123 = vmatmul.mubr.msk.bf16.vlgmr.msra.gmra.mrb[84].mxu1 %vm1177_vm9, %v17217_v37  ;;  %v3044_v60 = vsel %vm1177_vm9, %v3027_v4, 0 }
 0xdc2   : > { %14153 = vmatpush3.bf16.xpose.msra.mxu1 %v3038_v44  ;;  %14126 = vmatprep.mubr.msk.bf16.mxu1 %vm16061_vm6, %v20793_v21 }
 0xdc3   : > { %14154 = vmatprep.subr.bf16.mxu1 %v20793_v21 }
 0xdc4   : > { %v3254_v45 = vpop.permute.xlu1 %3253  ;;  %v3250_v2 = vpop.permute.xlu0 %3249 }
 0xdc5   : > { %v3269_v39 = vsel %vm1177_vm9, %v3254_v45, 0 }
 0xdc8   : > { %v3256_v29 = vpop.permute.xlu1 %3255  ;;  %v3252_v31 = vpop.permute.xlu0 %3251 }
 0xdc9   : > { %14127 = vmatmul.mubr.msk.bf16.gmra.mrb[88].mxu1 %vm1177_vm9, %v17221_v12  ;;  %v3272_v58 = vsel %vm1177_vm9, %v3256_v29, 0 }
 0xdca   : > { %14155 = vmatpush3.bf16.xpose.msra.mxu1 %v3041_v23  ;;  %14130 = vmatprep.mubr.msk.bf16.mxu1 %vm16061_vm6, %v20793_v21 }
 0xdcb   : > { %14156 = vmatprep.subr.bf16.mxu1 %v20793_v21 }
 0xdcc   : > { %v3258_v18 = vpop.permute.xlu1 %3257  ;;  %v3479_v40 = vpop.permute.xlu0 %3478 }
 0xdcd   : > { %v3275_v63 = vsel %vm1177_vm9, %v3258_v18, 0 }
 0xdd0   : > { %v3485_v20 = vpop.permute.xlu1 %3484  ;;  %v3483_v3 = vpop.permute.xlu0 %3482 }
 0xdd1   : > { %14131 = vmatmul.mubr.msk.bf16.gmra.mrb[92].mxu1 %vm1177_vm9, %v17229_v35  ;;  %v3500_v55 = vsel %vm1177_vm9, %v3485_v20, 0 }
 0xdd2   : > { %14157 = vmatpush3.bf16.xpose.msra.mxu1 %v3044_v60  ;;  %14158 = vmatprep.mubr.msk.bf16.mxu1 %vm16061_vm6, %v20793_v21 }
 0xdd3   : > { %14188 = vmatprep.subr.bf16.mxu1 %v20793_v21 }
 0xdd4   : > { %v3487_v50 = vpop.permute.xlu1 %3486  ;;  %v2944_v46 = vpop.permute.xlu0 %2943 }
 0xdd5   : > { %v3503_v11 = vsel %vm1177_vm9, %v3487_v50, 0 }
 0xdd8   : > { %v3489_v47 = vpop.permute.xlu1 %3488 }
 0xdd9   : > { %14159 = vmatmul.mubr.msk.bf16.vlgmr.msra.gmra.mrb[96].mxu1 %vm1177_vm9, %v3017_v61  ;;  %v3506_v25 = vsel %vm1177_vm9, %v3489_v47, 0 }
 0xdda   : > { %14189 = vmatpush3.bf16.xpose.msra.mxu1 %v3269_v39  ;;  %14162 = vmatprep.mubr.msk.bf16.mxu1 %vm16061_vm6, %v20793_v21 }
 0xddb   : > { %14190 = vmatprep.subr.bf16.mxu1 %v20793_v21 }
 0xddc   : > { %v3481_v8 = vpop.permute.xlu1 %3480 }
 0xde0   : > { %v2942_v56 = vpop.permute.xlu1 %2941 }
 0xde1   : > { %14135 = vmatpush3.bf16.msra.mxu0 %v2942_v56  ;;  %14163 = vmatmul.mubr.msk.bf16.gmra.mrb[100].mxu1 %vm1177_vm9, %v3019_v51 }
 0xde2   : > { %14191 = vmatpush3.bf16.xpose.msra.mxu1 %v3272_v58  ;;  %14136 = vmatprep.subr.bf16.mxu0 %v20793_v21 }
 0xde3   : > { %14166 = vmatprep.mubr.msk.bf16.mxu1 %vm16061_vm6, %v20793_v21  ;;  %14192 = vmatprep.subr.bf16.mxu1 %v20793_v21 }
 0xde4   : > { %v17310_v28 = vpop.permute.xlu1 %3172 }
 0xde5   : > { %14137 = vmatpush3.bf16.msra.mxu0 %v2944_v46 }
 0xde6   : > { %14138 = vmatprep.subr.bf16.mxu0 %v20793_v21 }
 0xde8   : > { %v2946_v22 = vpop.permute.xlu1 %2945 }
 0xde9   : > { %14139 = vmatpush3.bf16.msra.mxu0 %v2946_v22  ;;  %14167 = vmatmul.mubr.msk.bf16.gmra.mrb[104].mxu1 %vm1177_vm9, %v3021_v15 }
 0xdea   : > { %14193 = vmatpush3.bf16.xpose.msra.mxu1 %v3275_v63  ;;  %14194 = vmatprep.mubr.msk.bf16.mxu1 %vm16061_vm6, %v20793_v21 }
 0xdeb   : > { %14224 = vmatprep.subr.bf16.mxu1 %v20793_v21  ;;  %14170 = vmatprep.subr.bf16.mxu0 %v20793_v21 }
 0xdf1   : > { %14195 = vmatmul.mubr.msk.bf16.vlgmr.msra.gmra.mrb[108].mxu1 %vm1177_vm9, %v3248_v27 }
 0xdf2   : > { %14225 = vmatpush3.bf16.xpose.msra.mxu1 %v3500_v55  ;;  %14198 = vmatprep.mubr.msk.bf16.mxu1 %vm16061_vm6, %v20793_v21 }
 0xdf3   : > { %14226 = vmatprep.subr.bf16.mxu1 %v20793_v21 }
 0xdf9   : > { %14199 = vmatmul.mubr.msk.bf16.gmra.mrb[112].mxu1 %vm1177_vm9, %v3250_v2 }
 0xdfa   : > { %14227 = vmatpush3.bf16.xpose.msra.mxu1 %v3503_v11  ;;  %14202 = vmatprep.mubr.msk.bf16.mxu1 %vm16061_vm6, %v20793_v21 }
 0xdfb   : > { %14228 = vmatprep.subr.bf16.mxu1 %v20793_v21 }
 0xe01   : > { %14203 = vmatmul.mubr.msk.bf16.gmra.mrb[116].mxu1 %vm1177_vm9, %v3252_v31 }
 0xe02   : > { %14229 = vmatpush3.bf16.xpose.msra.mxu1 %v3506_v25  ;;  %14230 = vmatprep.mubr.msk.bf16.mxu1 %vm16061_vm6, %v20793_v21 }
 0xe03   : > { %14260 = vmatprep.subr.bf16.mxu1 %v20793_v21 }
 0xe09   : > { %14231 = vmatmul.mubr.msk.bf16.vlgmr.msra.gmra.mrb[120].mxu1 %vm1177_vm9, %v3479_v40 }
 0xe0a   : > { %14234 = vmatprep.mubr.msk.bf16.mxu1 %vm16061_vm6, %v20793_v21 }
 0xe11   : > { %14235 = vmatmul.mubr.msk.bf16.gmra.mrb[124].mxu1 %vm1177_vm9, %v3481_v8 }
 0xe12   : > { %14238 = vmatprep.mubr.msk.bf16.mxu1 %vm16061_vm6, %v20793_v21 }
 0xe19   : > { %14239 = vmatmul.mubr.msk.bf16.gmra.mrb[128].mxu1 %vm1177_vm9, %v3483_v3 }
 0xe1a   : > { %14264 = vmatprep.mubr.msk.bf16.mxu1 %vm16061_vm6, %v20793_v21 }
 0xe94   : > { %v2849_v16 = vpop.f32.mrb[84].mxu1 }
 0xe95   : > { %v17347_v26 = vadd.f32 %v17344_v34, %v2849_v16  ;;  %v14124_v1 = vpop.f32.mrb[85].mxu1 }
 0xe96   : > { %v2852_v61 = vpop.f32.mrb[86].mxu1 }
 0xe97   : > { %v17350_v9 = vadd.f32 %v17344_v34, %v2852_v61  ;;  %v14125_v24 = vpop.f32.mrb[87].mxu1  ;;  %v2872_v51 = vsel %vm1253_vm10, %v17347_v26, -inf }
 0xe98   : > { %2873 = vmax.xlane.f32.xlu1 %v2872_v51 }
 0xe99   : > { %v2875_v30 = vsel %vm1253_vm10, %v17350_v9, -inf }
 0xe9a   : > { %2876 = vmax.xlane.f32.xlu0 %v2875_v30 }
 0xe9c   : > { %v2857_v15 = vpop.f32.mrb[88].mxu1 }
 0xe9d   : > { %v17357_v4 = vadd.f32 %v17344_v34, %v2857_v15  ;;  %v14128_v44 = vpop.f32.mrb[89].mxu1 }
 0xe9e   : > { %v2860_v45 = vpop.f32.mrb[90].mxu1 }
 0xe9f   : > { %v17360_v27 = vadd.f32 %v17344_v34, %v2860_v45  ;;  %v14129_v29 = vpop.f32.mrb[91].mxu1  ;;  %v2878_v23 = vsel %vm1253_vm10, %v17357_v4, -inf }
 0xea0   : > { %2879 = vmax.xlane.f32.xlu0 %v2878_v23 }
 0xea1   : > { %v2881_v2 = vsel %vm1253_vm10, %v17360_v27, -inf }
 0xea4   : > { %2882 = vmax.xlane.f32.xlu0 %v2881_v2  ;;  %v2865_v18 = vpop.f32.mrb[92].mxu1 }
 0xea5   : > { %v17367_v20 = vadd.f32 %v17344_v34, %v2865_v18  ;;  %v14132_v60 = vpop.f32.mrb[93].mxu1 }
 0xea6   : > { %v2868_v31 = vpop.f32.mrb[94].mxu1 }
 0xea7   : > { %v17370_v50 = vadd.f32 %v17344_v34, %v2868_v31  ;;  %v14133_v40 = vpop.f32.mrb[95].mxu1  ;;  %v2884_v47 = vsel %vm1253_vm10, %v17367_v20, -inf }
 0xea8   : > { %2885 = vmax.xlane.f32.xlu1 %v2884_v47 }
 0xea9   : > { %v2887_v39 = vsel %vm1253_vm10, %v17370_v50, -inf }
 0xeaa   : > { %2888 = vmax.xlane.f32.xlu0 %v2887_v39 }
 0xeac   : > { %v3080_v8 = vpop.f32.mrb[96].mxu1 }
 0xead   : > { %v17377_v3 = vadd.f32 %v17344_v34, %v3080_v8  ;;  %v14160_v56 = vpop.f32.mrb[97].mxu1 }
 0xeae   : > { %v3083_v58 = vpop.f32.mrb[98].mxu1 }
 0xeaf   : > { %v17380_v46 = vadd.f32 %v17344_v34, %v3083_v58  ;;  %v14161_v22 = vpop.f32.mrb[99].mxu1  ;;  %v3103_v63 = vsel %vm1253_vm10, %v17377_v3, -inf }
 0xeb0   : > { %3104 = vmax.xlane.f32.xlu1 %v3103_v63 }
 0xeb1   : > { %v3106_v55 = vsel %vm1253_vm10, %v17380_v46, -inf }
 0xeb2   : > { %3107 = vmax.xlane.f32.xlu0 %v3106_v55 }
 0xeb4   : > { %v3088_v11 = vpop.f32.mrb[100].mxu1 }
 0xeb5   : > { %v17387_v25 = vadd.f32 %v17344_v34, %v3088_v11  ;;  %v14164_v16 = vpop.f32.mrb[101].mxu1 }
 0xeb6   : > { %v3091_v1 = vpop.f32.mrb[102].mxu1 }
 0xeb7   : > { %v17390_v61 = vadd.f32 %v17344_v34, %v3091_v1  ;;  %v14165_v24 = vpop.f32.mrb[103].mxu1  ;;  %v3109_v51 = vsel %vm1253_vm10, %v17387_v25, -inf }
 0xeb8   : > { %3110 = vmax.xlane.f32.xlu1 %v3109_v51 }
 0xeb9   : > { %v3112_v30 = vsel %vm1253_vm10, %v17390_v61, -inf }
 0xeba   : > { %3113 = vmax.xlane.f32.xlu0 %v3112_v30 }
 0xebc   : > { %v3096_v15 = vpop.f32.mrb[104].mxu1 }
 0xebd   : > { %v17397_v44 = vadd.f32 %v17344_v34, %v3096_v15  ;;  %v14168_v45 = vpop.f32.mrb[105].mxu1 }
 0xebe   : > { %v3099_v29 = vpop.f32.mrb[106].mxu1 }
 0xebf   : > { %v14169_v23 = vpop.f32.mrb[107].mxu1  ;;  %v3115_v2 = vsel %vm1253_vm10, %v17397_v44, -inf }
 0xec0   : > { %3116 = vmax.xlane.f32.xlu1 %v3115_v2 }
 0xec4   : > { %v3311_v18 = vpop.f32.mrb[108].mxu1 }
 0xec5   : > { %v14196_v60 = vpop.f32.mrb[109].mxu1 }
 0xec6   : > { %v3314_v31 = vpop.f32.mrb[110].mxu1  ;;  %v17408_v60 = vadd.f32 %v17344_v34, %v3099_v29 }
 0xec7   : > { %v14197_v40 = vpop.f32.mrb[111].mxu1 }
 0xecc   : > { %v3319_v47 = vpop.f32.mrb[112].mxu1 }
 0xecd   : > { %v14200_v39 = vpop.f32.mrb[113].mxu1 }
 0xece   : > { %v3322_v8 = vpop.f32.mrb[114].mxu1 }
 0xecf   : > { %v14201_v56 = vpop.f32.mrb[115].mxu1  ;;  %v17424_v29 = vadd.f32 %v17344_v34, %v3322_v8 }
 0xed0   : > { %3403 = vrot.lane.b32.xlu0 %v17217_v37, %s20801_s27  ;;  %v17411_v56 = vadd.f32 %v17344_v34, %v3311_v18 }
 0xed1   : > { %3176 = vrot.lane.b32.xlu1 %v17229_v35, %s20800_s29 }
 0xed4   : > { %3405 = vrot.lane.b32.xlu0 %v17221_v12, %s20801_s27  ;;  %v3327_v58 = vpop.f32.mrb[116].mxu1 }
 0xed5   : > { %v14204_v22 = vpop.f32.mrb[117].mxu1 }
 0xed6   : > { %v3330_v63 = vpop.f32.mrb[118].mxu1  ;;  %v17414_v22 = vadd.f32 %v17344_v34, %v3314_v31  ;;  %v17429_v31 = vadd.f32 %v17344_v34, %v3327_v58 }
 0xed7   : > { %v14205_v55 = vpop.f32.mrb[119].mxu1 }
 0xed8   : > { %v3118_v55 = vsel %vm1253_vm10, %v17408_v60, -inf  ;;  %v3337_v18 = vsel %vm1253_vm10, %v17414_v22, -inf }
 0xedc   : > { %v3542_v11 = vpop.f32.mrb[120].mxu1 }
 0xedd   : > { %v14232_v16 = vpop.f32.mrb[121].mxu1  ;;  %v17439_v8 = vadd.f32 %v17344_v34, %v3542_v11 }
 0xede   : > { %v3545_v1 = vpop.f32.mrb[122].mxu1  ;;  %v17419_v16 = vadd.f32 %v17344_v34, %v3319_v47  ;;  %v17434_v47 = vadd.f32 %v17344_v34, %v3330_v63 }
 0xedf   : > { %v14233_v24 = vpop.f32.mrb[123].mxu1  ;;  %v17444_v58 = vadd.f32 %v17344_v34, %v3545_v1 }
 0xee0   : > { %v3334_v24 = vsel %vm1253_vm10, %v17411_v56, -inf }
 0xee4   : > { %v3550_v51 = vpop.f32.mrb[124].mxu1 }
 0xee5   : > { %v14236_v30 = vpop.f32.mrb[125].mxu1  ;;  %v17449_v63 = vadd.f32 %v17344_v34, %v3550_v51 }
 0xee6   : > { %v3553_v15 = vpop.f32.mrb[126].mxu1  ;;  %v3340_v30 = vsel %vm1253_vm10, %v17419_v16, -inf }
 0xee7   : > { %v14237_v45 = vpop.f32.mrb[127].mxu1  ;;  %v17454_v11 = vadd.f32 %v17344_v34, %v3553_v15 }
 0xee8   : > { %v3343_v45 = vsel %vm1253_vm10, %v17424_v29, -inf }
 0xeec   : > { %v3558_v23 = vpop.f32.mrb[128].mxu1 }
 0xeed   : > { %v14240_v2 = vpop.f32.mrb[129].mxu1  ;;  %v17459_v1 = vadd.f32 %v17344_v34, %v3558_v23  ;;  %v17472_v23 = vpop.permute.xlu0 %3174 }
 0xeee   : > { %v3561_v40 = vpop.f32.mrb[130].mxu1  ;;  %v3346_v2 = vsel %vm1253_vm10, %v17429_v31, -inf }
 0xeef   : > { %v14241_v39 = vpop.f32.mrb[131].mxu1  ;;  %v17464_v51 = vadd.f32 %v17344_v34, %v3561_v40  ;;  %v3577_v15 = vsel %vm1253_vm10, %v17459_v1, -inf }
 0xef0   : > { %v3349_v39 = vsel %vm1253_vm10, %v17434_v47, -inf }
 0xef3   : > { %3119 = vmax.xlane.f32.xlu0 %v3118_v55  ;;  %v3565_v55 = vsel %vm1253_vm10, %v17439_v8, -inf }
 0xef5   : > { %3335 = vmax.xlane.f32.xlu1 %v3334_v24  ;;  %v3568_v24 = vsel %vm1253_vm10, %v17444_v58, -inf }
 0xef7   : > { %3338 = vmax.xlane.f32.xlu0 %v3337_v18  ;;  %v3571_v18 = vsel %vm1253_vm10, %v17449_v63, -inf }
 0xef9   : > { %3341 = vmax.xlane.f32.xlu1 %v3340_v30  ;;  %v3574_v30 = vsel %vm1253_vm10, %v17454_v11, -inf }
 0xefb   : > { %3344 = vmax.xlane.f32.xlu0 %v3343_v45  ;;  %v3580_v45 = vsel %vm1253_vm10, %v17464_v51, -inf }
 0xefd   : > { %3347 = vmax.xlane.f32.xlu1 %v3346_v2 }
 0xeff   : > { %3350 = vmax.xlane.f32.xlu0 %v3349_v39 }
 0xf01   : > { %3566 = vmax.xlane.f32.xlu1 %v3565_v55 }
 0xf03   : > { %3569 = vmax.xlane.f32.xlu0 %v3568_v24 }
 0xf05   : > { %3572 = vmax.xlane.f32.xlu1 %v3571_v18 }
 0xf07   : > { %3575 = vmax.xlane.f32.xlu0 %v3574_v30 }
 0xf09   : > { %3578 = vmax.xlane.f32.xlu1 %v3577_v15 }
 0xf0b   : > { %3581 = vmax.xlane.f32.xlu0 %v3580_v45 }
 0xf25   : > { %v2874_v2 = vpop.xlane.xlu1 %2873 }
 0xf26   : > { %v2890_v39 = vsub.f32 %v17347_v26, %v2874_v2 }
 0xf27   : > { %v2877_v55 = vpop.xlane.xlu0 %2876 }
 0xf28   : > { %v2896_v34 = vmul.f32 1.442695, %v2890_v39  ;;  %v2891_v40 = vsub.f32 %v17350_v9, %v2877_v55 }
 0xf2a   : > { %15928 = vpow2.f32 %v2896_v34  ;;  %v2898_v24 = vmul.f32 1.442695, %v2891_v40 }
 0xf2c   : > { %15930 = vpow2.f32 %v2898_v24 }
 0xf2d   : > { %v2880_v18 = vpop.xlane.xlu0 %2879 }
 0xf2e   : > { %v2892_v30 = vsub.f32 %v17357_v4, %v2880_v18 }
 0xf30   : > { %v2900_v15 = vmul.f32 1.442695, %v2892_v30 }
 0xf31   : > { %v2883_v10 = vpop.xlane.xlu0 %2882 }
 0xf32   : > { %15932 = vpow2.f32 %v2900_v15  ;;  %v2893_v45 = vsub.f32 %v17360_v27, %v2883_v10 }
 0xf34   : > { %v17478_v32 = vpop.eup %15928  ;;  %v2902_v52 = vmul.f32 1.442695, %v2893_v45 }
 0xf35   : > { %v2886_v57 = vpop.xlane.xlu1 %2885  ;;  %v2908_v26 = vsel %vm1253_vm10, %v17478_v32, 0.0 }
 0xf36   : > { %v17482_v2 = vpop.eup %15930  ;;  %15934 = vpow2.f32 %v2902_v52  ;;  %v2894_v9 = vsub.f32 %v17367_v20, %v2886_v57  ;;  %2909 = vadd.xlane.f32.xlu1 %v2908_v26 }
 0xf37   : > { %v2889_v39 = vpop.xlane.xlu0 %2888  ;;  %v2911_v4 = vsel %vm1253_vm10, %v17482_v2, 0.0 }
 0xf38   : > { %v2904_v55 = vmul.f32 1.442695, %v2894_v9  ;;  %v2895_v10 = vsub.f32 %v17370_v50, %v2889_v39  ;;  %2912 = vadd.xlane.f32.xlu0 %v2911_v4 }
 0xf3a   : > { %15936 = vpow2.f32 %v2904_v55  ;;  %v2906_v27 = vmul.f32 1.442695, %v2895_v10 }
 0xf3c   : > { %v17488_v34 = vpop.eup %15932  ;;  %15938 = vpow2.f32 %v2906_v27 }
 0xf3d   : > { %v3105_v40 = vpop.xlane.xlu1 %3104  ;;  %v2914_v52 = vsel %vm1253_vm10, %v17488_v34, 0.0 }
 0xf3e   : > { %v3121_v57 = vsub.f32 %v17377_v3, %v3105_v40  ;;  %2915 = vadd.xlane.f32.xlu1 %v2914_v52 }
 0xf3f   : > { %v3108_v9 = vpop.xlane.xlu0 %3107 }
 0xf40   : > { %v17493_v20 = vpop.eup %15934  ;;  %v3127_v24 = vmul.f32 1.442695, %v3121_v57  ;;  %v3122_v39 = vsub.f32 %v17380_v46, %v3108_v9 }
 0xf41   : > { %v2917_v18 = vsel %vm1253_vm10, %v17493_v20, 0.0 }
 0xf42   : > { %15940 = vpow2.f32 %v3127_v24  ;;  %2918 = vadd.xlane.f32.xlu0 %v2917_v18  ;;  %v3129_v55 = vmul.f32 1.442695, %v3122_v39 }
 0xf44   : > { %v17497_v50 = vpop.eup %15936  ;;  %15942 = vpow2.f32 %v3129_v55 }
 0xf45   : > { %v2920_v30 = vsel %vm1253_vm10, %v17497_v50, 0.0  ;;  %v3111_v4 = vpop.xlane.xlu1 %3110 }
 0xf46   : > { %v17501_v15 = vpop.eup %15938  ;;  %2921 = vadd.xlane.f32.xlu1 %v2920_v30  ;;  %v3123_v10 = vsub.f32 %v17387_v25, %v3111_v4 }
 0xf47   : > { %v2923_v3 = vsel %vm1253_vm10, %v17501_v15, 0.0  ;;  %v3114_v27 = vpop.xlane.xlu0 %3113 }
 0xf48   : > { %2924 = vadd.xlane.f32.xlu0 %v2923_v3  ;;  %v3131_v40 = vmul.f32 1.442695, %v3123_v10  ;;  %v3124_v52 = vsub.f32 %v17390_v61, %v3114_v27 }
 0xf4a   : > { %15944 = vpow2.f32 %v3131_v40  ;;  %v3133_v24 = vmul.f32 1.442695, %v3124_v52 }
 0xf4b   : > { %v17517_v18 = vpop.permute.xlu0 %3403 }
 0xf4c   : > { %v17505_v45 = vpop.eup %15940  ;;  %15946 = vpow2.f32 %v3133_v24 }
 0xf4d   : > { %v3139_v26 = vsel %vm1253_vm10, %v17505_v45, 0.0  ;;  %v3117_v57 = vpop.xlane.xlu1 %3116 }
 0xf4e   : > { %3140 = vadd.xlane.f32.xlu1 %v3139_v26  ;;  %v17519_v3 = vpop.eup %15942 }
 0xf4f   : > { %v17521_v46 = vpop.permute.xlu0 %3405  ;;  %v3142_v25 = vsel %vm1253_vm10, %v17519_v3, 0.0 }
 0xf51   : > { %v17527_v61 = vpop.permute.xlu1 %3176 }
 0xf54   : > { %v17525_v26 = vpop.eup %15944 }
 0xf56   : > { %v17531_v39 = vpop.eup %15946 }
 0xf57   : > { %v3148_v52 = vsel %vm1253_vm10, %v17531_v39, 0.0 }
 0xf5e   : > { %3634 = vrot.lane.b32.xlu0 %v17217_v37, %s20802_s4  ;;  %v3125_v37 = vsub.f32 %v17397_v44, %v3117_v57  ;;  %v3145_v44 = vsel %vm1253_vm10, %v17525_v26, 0.0 }
 0xf5f   : > { %3407 = vrot.lane.b32.xlu1 %v17229_v35, %s20801_s27  ;;  %s13402_s27 = sshll.u32 %s20901_s25, 4 }
 0xf60   : > { %v3135_v30 = vmul.f32 1.442695, %v3125_v37  ;;  %s670_s24 = scalar_lea.vmem %s20651_s21, %s13402_s27 }
 0xf62   : > { %15948 = vpow2.f32 %v3135_v30 }
 0xf6c   : > { %v17537_v57 = vpop.eup %15948 }
 0xf7d   : > { %3143 = vadd.xlane.f32.xlu0 %v3142_v25 }
 0xf80   : > { %v3120_v9 = vpop.xlane.xlu0 %3119 }
 0xf81   : > { %v3126_v4 = vsub.f32 %v17408_v60, %v3120_v9  ;;  %3146 = vadd.xlane.f32.xlu0 %v3145_v44 }
 0xf82   : > { %v3336_v55 = vpop.xlane.xlu1 %3335 }
 0xf83   : > { %v3137_v10 = vmul.f32 1.442695, %v3126_v4  ;;  %v3352_v27 = vsub.f32 %v17411_v56, %v3336_v55  ;;  %v3151_v56 = vsel %vm1253_vm10, %v17537_v57, 0.0 }
 0xf84   : > { %v3339_v40 = vpop.xlane.xlu0 %3338 }
 0xf85   : > { %15950 = vpow2.f32 %v3137_v10  ;;  %v3358_v24 = vmul.f32 1.442695, %v3352_v27  ;;  %v3353_v37 = vsub.f32 %v17414_v22, %v3339_v40  ;;  %3149 = vadd.xlane.f32.xlu0 %v3148_v52 }
 0xf86   : > { %v3342_v30 = vpop.xlane.xlu1 %3341 }
 0xf87   : > { %15952 = vpow2.f32 %v3358_v24  ;;  %v3360_v25 = vmul.f32 1.442695, %v3353_v37  ;;  %v3354_v60 = vsub.f32 %v17419_v16, %v3342_v30 }
 0xf88   : > { %v3345_v9 = vpop.xlane.xlu0 %3344 }
 0xf89   : > { %15954 = vpow2.f32 %v3360_v25  ;;  %v3362_v44 = vmul.f32 1.442695, %v3354_v60  ;;  %v3355_v4 = vsub.f32 %v17424_v29, %v3345_v9  ;;  %3152 = vadd.xlane.f32.xlu0 %v3151_v56 }
 0xf8a   : > { %v3348_v55 = vpop.xlane.xlu1 %3347 }
 0xf8b   : > { %15956 = vpow2.f32 %v3362_v44  ;;  %v3364_v10 = vmul.f32 1.442695, %v3355_v4  ;;  %v3356_v22 = vsub.f32 %v17429_v31, %v3348_v55 }
 0xf8c   : > { %v3351_v27 = vpop.xlane.xlu0 %3350 }
 0xf8d   : > { %15958 = vpow2.f32 %v3364_v10  ;;  %v3366_v40 = vmul.f32 1.442695, %v3356_v22  ;;  %v3357_v52 = vsub.f32 %v17434_v47, %v3351_v27 }
 0xf8e   : > { %v3567_v16 = vpop.xlane.xlu1 %3566 }
 0xf8f   : > { %v17546_v24 = vpop.eup %15950  ;;  %15960 = vpow2.f32 %v3366_v40  ;;  %v3368_v37 = vmul.f32 1.442695, %v3357_v52  ;;  %v3583_v30 = vsub.f32 %v17439_v8, %v3567_v16 }
 0xf90   : > { %v3570_v25 = vpop.xlane.xlu0 %3569  ;;  %v3154_v29 = vsel %vm1253_vm10, %v17546_v24, 0.0 }
 0xf91   : > { %v17551_v60 = vpop.eup %15952  ;;  %v3589_v9 = vmul.f32 1.442695, %v3583_v30  ;;  %v3584_v31 = vsub.f32 %v17444_v58, %v3570_v25  ;;  %3155 = vadd.xlane.f32.xlu0 %v3154_v29  ;;  %15962 = vpow2.f32 %v3368_v37 }
 0xf92   : > { %v3573_v56 = vpop.xlane.xlu1 %3572  ;;  %v3370_v47 = vsel %vm1253_vm10, %v17551_v60, 0.0 }
 0xf93   : > { %v17556_v44 = vpop.eup %15954  ;;  %15964 = vpow2.f32 %v3589_v9  ;;  %v3591_v4 = vmul.f32 1.442695, %v3584_v31  ;;  %v3585_v8 = vsub.f32 %v17449_v63, %v3573_v56  ;;  %3371 = vadd.xlane.f32.xlu1 %v3370_v47 }
 0xf94   : > { %v3576_v55 = vpop.xlane.xlu0 %3575  ;;  %v3373_v10 = vsel %vm1253_vm10, %v17556_v44, 0.0 }
 0xf95   : > { %v17561_v22 = vpop.eup %15956  ;;  %v3593_v58 = vmul.f32 1.442695, %v3585_v8  ;;  %v3586_v27 = vsub.f32 %v17454_v11, %v3576_v55  ;;  %3374 = vadd.xlane.f32.xlu0 %v3373_v10  ;;  %15966 = vpow2.f32 %v3591_v4 }
 0xf96   : > { %v3579_v40 = vpop.xlane.xlu1 %3578  ;;  %v3376_v25 = vsel %vm1253_vm10, %v17561_v22, 0.0 }
 0xf97   : > { %v17564_v52 = vpop.eup %15958  ;;  %15968 = vpow2.f32 %v3593_v58  ;;  %v3595_v16 = vmul.f32 1.442695, %v3586_v27  ;;  %v3587_v37 = vsub.f32 %v17459_v1, %v3579_v40 }
 0xf98   : > { %v3582_v63 = vpop.xlane.xlu0 %3581  ;;  %v3379_v30 = vsel %vm1253_vm10, %v17564_v52, 0.0 }
 0xf99   : > { %v17571_v29 = vpop.eup %15960  ;;  %3380 = vadd.xlane.f32.xlu1 %v3379_v30  ;;  %3377 = vadd.xlane.f32.xlu0 %v3376_v25  ;;  %15970 = vpow2.f32 %v3595_v16  ;;  %v3597_v11 = vmul.f32 1.442695, %v3587_v37  ;;  %v3588_v9 = vsub.f32 %v17464_v51, %v3582_v63 }
 0xf9a   : > { %v3382_v1 = vsel %vm1253_vm10, %v17571_v29, 0.0 }
 0xf9b   : > { %v17574_v31 = vpop.eup %15962  ;;  %15972 = vpow2.f32 %v3597_v11  ;;  %v3599_v4 = vmul.f32 1.442695, %v3588_v9 }
 0xf9c   : > { %v3385_v55 = vsel %vm1253_vm10, %v17574_v31, 0.0 }
 0xf9d   : > { %v17578_v56 = vpop.eup %15964  ;;  %3383 = vadd.xlane.f32.xlu0 %v3382_v1  ;;  %15974 = vpow2.f32 %v3599_v4 }
 0xf9e   : > { %v3601_v47 = vsel %vm1253_vm10, %v17578_v56, 0.0 }
 0xf9f   : > { %3602 = vadd.xlane.f32.xlu1 %v3601_v47  ;;  %v17582_v8 = vpop.eup %15966 }
 0xfa0   : > { %v3604_v58 = vsel %vm1253_vm10, %v17582_v8, 0.0 }
 0xfa1   : > { %v17586_v51 = vpop.eup %15968  ;;  %3386 = vadd.xlane.f32.xlu0 %v3385_v55 }
 0xfa2   : > { %v3607_v10 = vsel %vm1253_vm10, %v17586_v51, 0.0 }
 0xfa3   : > { %3608 = vadd.xlane.f32.xlu1 %v3607_v10  ;;  %v17592_v27 = vpop.eup %15970 }
 0xfa4   : > { %v3610_v40 = vsel %vm1253_vm10, %v17592_v27, 0.0 }
 0xfa5   : > { %3605 = vadd.xlane.f32.xlu0 %v3604_v58  ;;  %v17596_v16 = vpop.eup %15972 }
 0xfa6   : > { %v3613_v37 = vsel %vm1253_vm10, %v17596_v16, 0.0 }
 0xfa7   : > { %v17600_v63 = vpop.eup %15974 }
 0xfa8   : > { %v3616_v30 = vsel %vm1253_vm10, %v17600_v63, 0.0 }
 0xfa9   : > { %3611 = vadd.xlane.f32.xlu0 %v3610_v40 }
 0xfad   : > { %3614 = vadd.xlane.f32.xlu0 %v3613_v37 }
 0xfb1   : > { %3617 = vadd.xlane.f32.xlu0 %v3616_v30 }
 0xfb4   : > { %3636 = vrot.lane.b32.xlu1 %v17221_v12, %s20802_s4 }
 0xfc3   : > { %v2910_v25 = vpop.xlane.xlu1 %2909 }
 0xfc4   : > { %15976 = vrcp.f32 %v2910_v25 }
 0xfc5   : > { %v2913_v11 = vpop.xlane.xlu0 %2912 }
 0xfc6   : > { %15978 = vrcp.f32 %v2913_v11 }
 0xfc7   : > { %3638 = vrot.lane.b32.xlu0 %v17229_v35, %s20802_s4 }
 0xfcb   : > { %v2916_v9 = vpop.xlane.xlu1 %2915 }
 0xfcc   : > { %15980 = vrcp.f32 %v2916_v9 }
 0xfce   : > { %v15977_v1 = vpop.eup %15976 }
 0xfcf   : > { %v2919_v47 = vpop.xlane.xlu0 %2918  ;;  %v2932_v55 = vmul.f32 %v15977_v1, %v17478_v32 }
 0xfd0   : > { %v15979_v4 = vpop.eup %15978  ;;  %15982 = vrcp.f32 %v2919_v47 }
 0xfd1   : > { %v2933_v10 = vmul.f32 %v15979_v4, %v17482_v2 }
 0xfd3   : > { %v2938_v58 = vpack.c.bf16 %v2933_v10, %v2932_v55  ;;  %v2922_v40 = vpop.xlane.xlu1 %2921 }
 0xfd4   : > { %15984 = vrcp.f32 %v2922_v40 }
 0xfd5   : > { %14141 = vmatmul.mubr.msk.bf16.vlgmr.msra.gmra.mrb[96].mxu0 %vm1253_vm10, %v2938_v58  ;;  %v2925_v12 = vpop.xlane.xlu0 %2924 }
 0xfd6   : > { %14171 = vmatpush3.bf16.msra.mxu0 %v17310_v28  ;;  %15986 = vrcp.f32 %v2925_v12  ;;  %14144 = vmatprep.mubr.msk.bf16.mxu0 %vm16061_vm6, %v20793_v21  ;;  %v15981_v35 = vpop.eup %15980 }
 0xfd7   : > { %14172 = vmatprep.subr.bf16.mxu0 %v20793_v21  ;;  %v2934_v32 = vmul.f32 %v15981_v35, %v17488_v34 }
 0xfd9   : > { %v17629_v34 = vpop.permute.xlu0 %3634 }
 0xfda   : > { %v15983_v37 = vpop.eup %15982  ;;  %14173 = vmatpush3.bf16.msra.mxu0 %v17472_v23 }
 0xfdb   : > { %14174 = vmatprep.subr.bf16.mxu0 %v20793_v21  ;;  %v2935_v2 = vmul.f32 %v15983_v37, %v17493_v20  ;;  %v3141_v20 = vpop.xlane.xlu1 %3140 }
 0xfdc   : > { %15988 = vrcp.f32 %v3141_v20 }
 0xfdd   : > { %v2939_v30 = vpack.c.bf16 %v2935_v2, %v2934_v32 }
 0xfde   : > { %14175 = vmatpush3.bf16.msra.mxu0 %v17527_v61  ;;  %v15985_v28 = vpop.eup %15984 }
 0xfdf   : > { %14145 = vmatmul.mubr.msk.bf16.gmra.mrb[100].mxu0 %vm1253_vm10, %v2939_v30  ;;  %14206 = vmatprep.subr.bf16.mxu0 %v20793_v21  ;;  %v2936_v11 = vmul.f32 %v15985_v28, %v17497_v50  ;;  %v3408_v35 = vpop.permute.xlu1 %3407 }
 0xfe0   : > { %v15987_v25 = vpop.eup %15986  ;;  %14148 = vmatprep.mubr.msk.bf16.mxu0 %vm16061_vm6, %v20793_v21 }
 0xfe1   : > { %v2937_v23 = vmul.f32 %v15987_v25, %v17501_v15 }
 0xfe3   : > { %v2940_v9 = vpack.c.bf16 %v2937_v23, %v2936_v11 }
 0xfe6   : > { %v15989_v4 = vpop.eup %15988 }
 0xfe7   : > { %14149 = vmatmul.mubr.msk.bf16.gmra.mrb[104].mxu0 %vm1253_vm10, %v2940_v9  ;;  %v3163_v50 = vmul.f32 %v15989_v4, %v17505_v45 }
 0xfe8   : > { %14176 = vmatprep.mubr.msk.bf16.mxu0 %vm16061_vm6, %v20793_v21 }
0x100a   : > { %v3144_v61 = vpop.xlane.xlu0 %3143 }
0x100b   : > { %15990 = vrcp.f32 %v3144_v61 }
0x100e   : > { %v3147_v1 = vpop.xlane.xlu0 %3146 }
0x100f   : > { %15992 = vrcp.f32 %v3147_v1 }
0x1012   : > { %v3150_v47 = vpop.xlane.xlu0 %3149 }
0x1013   : > { %15994 = vrcp.f32 %v3150_v47 }
0x1015   : > { %v15991_v15 = vpop.eup %15990 }
0x1016   : > { %v3164_v55 = vmul.f32 %v15991_v15, %v17519_v3  ;;  %v3153_v58 = vpop.xlane.xlu0 %3152 }
0x1017   : > { %15996 = vrcp.f32 %v3153_v58 }
0x1018   : > { %v3169_v10 = vpack.c.bf16 %v3164_v55, %v3163_v50 }
0x1019   : > { %v15993_v40 = vpop.eup %15992 }
0x101a   : > { %14177 = vmatmul.mubr.msk.bf16.vlgmr.msra.gmra.mrb[108].mxu0 %vm1253_vm10, %v3169_v10  ;;  %v3165_v45 = vmul.f32 %v15993_v40, %v17525_v26 }
0x101b   : > { %14207 = vmatpush3.bf16.msra.mxu0 %v17517_v18  ;;  %14180 = vmatprep.mubr.msk.bf16.mxu0 %vm16061_vm6, %v20793_v21 }
0x101c   : > { %14208 = vmatprep.subr.bf16.mxu0 %v20793_v21 }
0x101d   : > { %v15995_v12 = vpop.eup %15994 }
0x101e   : > { %v3156_v37 = vpop.xlane.xlu0 %3155  ;;  %v3166_v3 = vmul.f32 %v15995_v12, %v17531_v39 }
0x101f   : > { %14209 = vmatpush3.bf16.msra.mxu0 %v17521_v46  ;;  %15998 = vrcp.f32 %v3156_v37 }
0x1020   : > { %14210 = vmatprep.subr.bf16.mxu0 %v20793_v21  ;;  %v3170_v32 = vpack.c.bf16 %v3166_v3, %v3165_v45  ;;  %v3372_v18 = vpop.xlane.xlu1 %3371 }
0x1021   : > { %v15997_v39 = vpop.eup %15996 }
0x1022   : > { %14181 = vmatmul.mubr.msk.bf16.gmra.mrb[112].mxu0 %vm1253_vm10, %v3170_v32  ;;  %v3375_v2 = vpop.xlane.xlu0 %3374  ;;  %v3167_v25 = vmul.f32 %v15997_v39, %v17537_v57 }
0x1023   : > { %14211 = vmatpush3.bf16.msra.mxu0 %v3408_v35  ;;  %16000 = vrcp.f32 %v3375_v2  ;;  %14184 = vmatprep.mubr.msk.bf16.mxu0 %vm16061_vm6, %v20793_v21 }
0x1024   : > { %14242 = vmatprep.subr.bf16.mxu0 %v20793_v21  ;;  %16002 = vrcp.f32 %v3372_v18 }
0x1026   : > { %v3378_v26 = vpop.xlane.xlu0 %3377  ;;  %v3381_v30 = vpop.xlane.xlu1 %3380 }
0x1027   : > { %16004 = vrcp.f32 %v3381_v30 }
0x1028   : > { %16006 = vrcp.f32 %v3378_v26 }
0x1029   : > { %v15999_v46 = vpop.eup %15998 }
0x102a   : > { %v3384_v28 = vpop.xlane.xlu0 %3383  ;;  %v3168_v23 = vmul.f32 %v15999_v46, %v17546_v24 }
0x102c   : > { %v3171_v11 = vpack.c.bf16 %v3168_v23, %v3167_v25  ;;  %v3603_v20 = vpop.xlane.xlu1 %3602 }
0x102d   : > { %v16001_v9 = vpop.eup %16000 }
0x102e   : > { %14185 = vmatmul.mubr.msk.bf16.gmra.mrb[116].mxu0 %vm1253_vm10, %v3171_v11  ;;  %v3387_v61 = vpop.xlane.xlu0 %3386  ;;  %v16003_v1 = vpop.eup %16002  ;;  %v3395_v47 = vmul.f32 %v16001_v9, %v17556_v44 }
0x102f   : > { %14212 = vmatprep.mubr.msk.bf16.mxu0 %vm16061_vm6, %v20793_v21  ;;  %v3394_v4 = vmul.f32 %v16003_v1, %v17551_v60  ;;  %16008 = vrcp.f32 %v3387_v61 }
0x1030   : > { %v3609_v24 = vpop.xlane.xlu1 %3608  ;;  %16010 = vrcp.f32 %v3384_v28 }
0x1031   : > { %v16005_v57 = vpop.eup %16004  ;;  %v3400_v50 = vpack.c.bf16 %v3395_v47, %v3394_v4 }
0x1032   : > { %v3606_v15 = vpop.xlane.xlu0 %3605  ;;  %v16007_v55 = vpop.eup %16006  ;;  %v3397_v60 = vmul.f32 %v16005_v57, %v17564_v52 }
0x1033   : > { %v3396_v44 = vmul.f32 %v16007_v55, %v17561_v22  ;;  %16012 = vrcp.f32 %v3606_v15 }
0x1034   : > { %v3637_v58 = vpop.permute.xlu1 %3636  ;;  %16014 = vrcp.f32 %v3603_v20 }
0x1035   : > { %v3401_v12 = vpack.c.bf16 %v3397_v60, %v3396_v44 }
0x1036   : > { %14213 = vmatmul.mubr.msk.bf16.vlgmr.msra.gmra.mrb[120].mxu0 %vm1253_vm10, %v3400_v50  ;;  %v3612_v10 = vpop.xlane.xlu0 %3611 }
0x1037   : > { %14243 = vmatpush3.bf16.msra.mxu0 %v17629_v34  ;;  %14216 = vmatprep.mubr.msk.bf16.mxu0 %vm16061_vm6, %v20793_v21  ;;  %16016 = vrcp.f32 %v3612_v10 }
0x1038   : > { %14244 = vmatprep.subr.bf16.mxu0 %v20793_v21  ;;  %16018 = vrcp.f32 %v3609_v24 }
0x1039   : > { %v16009_v35 = vpop.eup %16008 }
0x103a   : > { %v3615_v40 = vpop.xlane.xlu0 %3614  ;;  %v16011_v37 = vpop.eup %16010  ;;  %v3399_v22 = vmul.f32 %v16009_v35, %v17574_v31 }
0x103b   : > { %14245 = vmatpush3.bf16.msra.mxu0 %v3637_v58  ;;  %v3398_v52 = vmul.f32 %v16011_v37, %v17571_v29 }
0x103c   : > { %14246 = vmatprep.subr.bf16.mxu0 %v20793_v21 }
0x103d   : > { %v3402_v3 = vpack.c.bf16 %v3399_v22, %v3398_v52  ;;  %v16013_v32 = vpop.eup %16012 }
0x103e   : > { %14217 = vmatmul.mubr.msk.bf16.gmra.mrb[124].mxu0 %vm1253_vm10, %v3401_v12  ;;  %v3618_v34 = vpop.xlane.xlu0 %3617  ;;  %v16015_v18 = vpop.eup %16014  ;;  %v3626_v2 = vmul.f32 %v16013_v32, %v17582_v8 }
0x103f   : > { %14220 = vmatprep.mubr.msk.bf16.mxu0 %vm16061_vm6, %v20793_v21  ;;  %v3625_v31 = vmul.f32 %v16015_v18, %v17578_v56  ;;  %16020 = vrcp.f32 %v3618_v34  ;;  %v15333_v18 = vld [vmem:[%s20636_s6 + $0x18] sm:$0xff]  }
0x1040   : > { %16022 = vrcp.f32 %v3615_v40 }
0x1041   : > { %v3631_v26 = vpack.c.bf16 %v3626_v2, %v3625_v31  ;;  %v16017_v29 = vpop.eup %16016 }
0x1042   : > { %v3639_v45 = vpop.permute.xlu0 %3638  ;;  %v16019_v39 = vpop.eup %16018  ;;  %v3628_v30 = vmul.f32 %v16017_v29, %v17592_v27 }
0x1043   : > { %14247 = vmatpush3.bf16.msra.mxu0 %v3639_v45  ;;  %v3627_v46 = vmul.f32 %v16019_v39, %v17586_v51 }
0x1044   : > { %14276 = vmatprep.subr.bf16.mxu0 %v20793_v21 }
0x1045   : > { %v3632_v28 = vpack.c.bf16 %v3628_v30, %v3627_v46 }
0x1046   : > { %14221 = vmatmul.mubr.msk.bf16.gmra.mrb[128].mxu0 %vm1253_vm10, %v3402_v3  ;;  %v15332_v3 = vld [vmem:[%s20636_s6 + $0x10] sm:$0xff]  }
0x1047   : > { %14248 = vmatprep.mubr.msk.bf16.mxu0 %vm16061_vm6, %v20793_v21  ;;  %14261 = vmatpush3.bf16.msra.mxu1 %v15332_v3 }
0x1048   : > { %14262 = vmatprep.subr.bf16.mxu1 %v20793_v21 }
0x1049   : > { %v16021_v25 = vpop.eup %16020 }
0x104a   : > { %v16023_v8 = vpop.eup %16022  ;;  %v3630_v56 = vmul.f32 %v16021_v25, %v17600_v63 }
0x104b   : > { %v3629_v23 = vmul.f32 %v16023_v8, %v17596_v16  ;;  %14263 = vmatpush3.bf16.msra.mxu1 %v15333_v18 }
0x104c   : > { %14292 = vmatprep.subr.bf16.mxu1 %v20793_v21 }
0x104d   : > { %v3633_v11 = vpack.c.bf16 %v3630_v56, %v3629_v23 }
0x104e   : > { %14249 = vmatmul.mubr.msk.bf16.vlgmr.msra.gmra.mrb[132].mxu0 %vm1253_vm10, %v3631_v26 }
0x104f   : > { %14252 = vmatprep.mubr.msk.bf16.mxu0 %vm16061_vm6, %v20793_v21 }
0x1056   : > { %14253 = vmatmul.mubr.msk.bf16.gmra.mrb[136].mxu0 %vm1253_vm10, %v3632_v28 }
0x1057   : > { %14256 = vmatprep.mubr.msk.bf16.mxu0 %vm16061_vm6, %v20793_v21 }
0x105e   : > { %14257 = vmatmul.mubr.msk.bf16.gmra.mrb[140].mxu0 %vm1253_vm10, %v3633_v11 }
0x105f   : > { %14280 = vmatprep.mubr.msk.bf16.mxu0 %vm16061_vm6, %v20793_v21 }
0x10a8   : > { %v17685_v27 = vpop.f32.mrb[96].mxu0 }
0x10a9   : > { %v14142_v51 = vpop.f32.mrb[97].mxu0 }
0x10aa   : > { %v17687_v9 = vpop.f32.mrb[98].mxu0 }
0x10ab   : > { %v14143_v20 = vpop.f32.mrb[99].mxu0 }
0x10b2   : > { %v17689_v61 = vpop.f32.mrb[100].mxu0 }
0x10b3   : > { %v14146_v1 = vpop.f32.mrb[101].mxu0 }
0x10b4   : > { %v17691_v47 = vpop.f32.mrb[102].mxu0 }
0x10b5   : > { %v14147_v63 = vpop.f32.mrb[103].mxu0 }
0x10ba   : > { %v17693_v4 = vpop.f32.mrb[104].mxu0 }
0x10bb   : > { %v14150_v16 = vpop.f32.mrb[105].mxu0 }
0x10bc   : > { %v17695_v15 = vpop.f32.mrb[106].mxu0 }
0x10bd   : > { %v14151_v57 = vpop.f32.mrb[107].mxu0 }
0x10ed   : > { %v3224_v50 = vpop.f32.mrb[108].mxu0 }
0x10ee   : > { %v14178_v24 = vpop.f32.mrb[109].mxu0 }
0x10ef   : > { %v3227_v55 = vpop.f32.mrb[110].mxu0 }
0x10f0   : > { %v15273_v10 = vpack.i.bf16 %v3227_v55, %v3224_v50  ;;  %v14179_v44 = vpop.f32.mrb[111].mxu0 }
0x10f2   : > { %15274 = vrot.lane.b32.xlu0 %v15273_v10, %s20803_s0 }
0x10f5   : > { %v3232_v60 = vpop.f32.mrb[112].mxu0 }
0x10f6   : > { %v14182_v58 = vpop.f32.mrb[113].mxu0 }
0x10f7   : > { %v3235_v40 = vpop.f32.mrb[114].mxu0 }
0x10f8   : > { %v15288_v12 = vpack.i.bf16 %v3235_v40, %v3232_v60  ;;  %v14183_v35 = vpop.f32.mrb[115].mxu0 }
0x1101   : > { %v3240_v34 = vpop.f32.mrb[116].mxu0 }
0x1102   : > { %v14186_v37 = vpop.f32.mrb[117].mxu0 }
0x1103   : > { %v3243_v22 = vpop.f32.mrb[118].mxu0 }
0x1104   : > { %v15303_v45 = vpack.i.bf16 %v3243_v22, %v3240_v34  ;;  %v14187_v52 = vpop.f32.mrb[119].mxu0 }
0x1109   : > { %v3455_v32 = vpop.f32.mrb[120].mxu0 }
0x110a   : > { %v14214_v2 = vpop.f32.mrb[121].mxu0 }
0x110b   : > { %v3458_v31 = vpop.f32.mrb[122].mxu0 }
0x110c   : > { %v15278_v26 = vpack.i.bf16 %v3458_v31, %v3455_v32  ;;  %v14215_v29 = vpop.f32.mrb[123].mxu0 }
0x110e   : > { %15279 = vrot.lane.b32.xlu0 %v15278_v26, %s20804_s26 }
0x1111   : > { %v3463_v39 = vpop.f32.mrb[124].mxu0 }
0x1112   : > { %15289 = vrot.lane.b32.xlu0 %v15288_v12, %s20803_s0  ;;  %v14218_v30 = vpop.f32.mrb[125].mxu0 }
0x1113   : > { %v3466_v46 = vpop.f32.mrb[126].mxu0 }
0x1114   : > { %v15293_v28 = vpack.i.bf16 %v3466_v46, %v3463_v39  ;;  %v14219_v25 = vpop.f32.mrb[127].mxu0 }
0x1119   : > { %v3471_v8 = vpop.f32.mrb[128].mxu0 }
0x111a   : > { %v14222_v56 = vpop.f32.mrb[129].mxu0 }
0x111b   : > { %v3474_v23 = vpop.f32.mrb[130].mxu0 }
0x111c   : > { %v15308_v11 = vpack.i.bf16 %v3474_v23, %v3471_v8  ;;  %v14223_v51 = vpop.f32.mrb[131].mxu0 }
0x1121   : > { %v3686_v20 = vpop.f32.mrb[132].mxu0 }
0x1122   : > { %v14250_v1 = vpop.f32.mrb[133].mxu0 }
0x1123   : > { %v3689_v63 = vpop.f32.mrb[134].mxu0 }
0x1124   : > { %v15283_v16 = vpack.i.bf16 %v3689_v63, %v3686_v20  ;;  %v14251_v57 = vpop.f32.mrb[135].mxu0 }
0x1126   : > { %15284 = vrot.lane.b32.xlu1 %v15283_v16, %s20805_s22 }
0x1129   : > { %v3694_v50 = vpop.f32.mrb[136].mxu0 }
0x112a   : > { %15294 = vrot.lane.b32.xlu1 %v15293_v28, %s20804_s26  ;;  %v14254_v24 = vpop.f32.mrb[137].mxu0 }
0x112b   : > { %v3697_v55 = vpop.f32.mrb[138].mxu0 }
0x112c   : > { %v15298_v10 = vpack.i.bf16 %v3697_v55, %v3694_v50  ;;  %v14255_v44 = vpop.f32.mrb[139].mxu0 }
0x112e   : > { %15304 = vrot.lane.b32.xlu1 %v15303_v45, %s20803_s0  ;;  %15299 = vrot.lane.b32.xlu0 %v15298_v10, %s20805_s22 }
0x1131   : > { %v3702_v60 = vpop.f32.mrb[140].mxu0 }
0x1132   : > { %15309 = vrot.lane.b32.xlu0 %v15308_v11, %s20804_s26  ;;  %v14258_v58 = vpop.f32.mrb[141].mxu0 }
0x1133   : > { %v3705_v40 = vpop.f32.mrb[142].mxu0 }
0x1134   : > { %v15313_v12 = vpack.i.bf16 %v3705_v40, %v3702_v60  ;;  %v14259_v35 = vpop.f32.mrb[143].mxu0 }
0x1136   : > { %15314 = vrot.lane.b32.xlu1 %v15313_v12, %s20805_s22 }
0x1164   : > { %v15275_v34 = vpop.permute.xlu0 %15274 }
0x1165   : > { %v15277_v22 = vunpack.i.h.bf16 %v15275_v34  ;;  %v15276_v52 = vunpack.i.l.bf16 %v15275_v34 }
0x1167   : > { %v3782_v45 = vsel %vm1177_vm9, %v17687_v9, %v15277_v22  ;;  %v3781_v2 = vsel %vm1177_vm9, %v17685_v27, %v15276_v52 }
0x1180   : > { %v15280_v37 = vpop.permute.xlu0 %15279 }
0x1181   : > { %v15282_v3 = vunpack.i.h.bf16 %v15280_v37  ;;  %v15281_v32 = vunpack.i.l.bf16 %v15280_v37 }
0x1183   : > { %v3787_v29 = vsel %vm2169_vm11, %v3781_v2, %v15281_v32  ;;  %v3788_v39 = vsel %vm2169_vm11, %v3782_v45, %v15282_v3 }
0x1184   : > { %v15290_v30 = vpop.permute.xlu0 %15289 }
0x1185   : > { %v15292_v56 = vunpack.i.h.bf16 %v15290_v30  ;;  %v15291_v23 = vunpack.i.l.bf16 %v15290_v30 }
0x1187   : > { %v3784_v51 = vsel %vm1177_vm9, %v17691_v47, %v15292_v56  ;;  %v3783_v20 = vsel %vm1177_vm9, %v17689_v61, %v15291_v23 }
0x1198   : > { %v15285_v18 = vpop.permute.xlu1 %15284 }
0x1199   : > { %v15287_v31 = vunpack.i.h.bf16 %v15285_v18  ;;  %v15286_v26 = vunpack.i.l.bf16 %v15285_v18 }
0x119b   : > { %v3793_v46 = vsel %vm2176_vm12, %v3787_v29, %v15286_v26  ;;  %v3794_v28 = vsel %vm2176_vm12, %v3788_v39, %v15287_v31 }
0x119c   : > { %v3799_v25 = vpack.c.bf16 %v3794_v28, %v3793_v46  ;;  %v15295_v8 = vpop.permute.xlu1 %15294 }
0x119d   : > { %v15297_v11 = vunpack.i.h.bf16 %v15295_v8  ;;  %v15296_v9 = vunpack.i.l.bf16 %v15295_v8 }
0x119e   : > { %14265 = vmatmul.mubr.msk.bf16.vlgmr.msra.gmra.mrb[132].mxu1 %vm929_vm2, %v3799_v25 }
0x119f   : > { %14268 = vmatprep.mubr.msk.bf16.mxu1 %vm16061_vm6, %v20793_v21  ;;  %v3789_v16 = vsel %vm2169_vm11, %v3783_v20, %v15296_v9  ;;  %v3790_v57 = vsel %vm2169_vm11, %v3784_v51, %v15297_v11 }
0x11a0   : > { %v15300_v27 = vpop.permute.xlu0 %15299  ;;  %v15305_v50 = vpop.permute.xlu1 %15304 }
0x11a1   : > { %v15302_v1 = vunpack.i.h.bf16 %v15300_v27  ;;  %v15301_v63 = vunpack.i.l.bf16 %v15300_v27  ;;  %v15307_v60 = vunpack.i.h.bf16 %v15305_v50  ;;  %v15306_v58 = vunpack.i.l.bf16 %v15305_v50 }
0x11a3   : > { %v3795_v24 = vsel %vm2176_vm12, %v3789_v16, %v15301_v63  ;;  %v3796_v55 = vsel %vm2176_vm12, %v3790_v57, %v15302_v1  ;;  %v3786_v12 = vsel %vm1177_vm9, %v17695_v15, %v15307_v60  ;;  %v3785_v35 = vsel %vm1177_vm9, %v17693_v4, %v15306_v58  ;;  %v12204_v4 = vld [vmem:[%s20637_s7 + $0x1] ss:$0 sm:$0xff] }
0x11a4   : > { %v3800_v10 = vpack.c.bf16 %v3796_v55, %v3795_v24  ;;  %v15310_v44 = vpop.permute.xlu0 %15309 }
0x11a5   : > { %v15312_v40 = vunpack.i.h.bf16 %v15310_v44  ;;  %v15311_v47 = vunpack.i.l.bf16 %v15310_v44 }
0x11a6   : > { %14269 = vmatmul.mubr.msk.bf16.gmra.mrb[136].mxu1 %vm929_vm2, %v3800_v10 }
0x11a7   : > { %14272 = vmatprep.mubr.msk.bf16.mxu1 %vm16061_vm6, %v20793_v21  ;;  %v3792_v22 = vsel %vm2169_vm11, %v3786_v12, %v15312_v40  ;;  %v3791_v52 = vsel %vm2169_vm11, %v3785_v35, %v15311_v47 }
0x11a8   : > { %v15315_v61 = vpop.permute.xlu1 %15314 }
0x11a9   : > { %v15317_v34 = vunpack.i.h.bf16 %v15315_v61  ;;  %v15316_v37 = vunpack.i.l.bf16 %v15315_v61 }
0x11ab   : > { %v3797_v3 = vsel %vm2176_vm12, %v3791_v52, %v15316_v37  ;;  %v3798_v32 = vsel %vm2176_vm12, %v3792_v22, %v15317_v34 }
0x11ac   : > { %v3801_v18 = vpack.c.bf16 %v3798_v32, %v3797_v3 }
0x11ae   : > { %14273 = vmatmul.mubr.msk.bf16.gmra.mrb[140].mxu1 %vm929_vm2, %v3801_v18 }
0x11af   : > { %14300 = vmatprep.mubr.msk.bf16.mxu1 %vm16061_vm6, %v20793_v21 }
0x1271   : > { %v3870_v15 = vpop.f32.mrb[132].mxu1 }
0x1272   : > { %v3871_v45 = vadd.f32 %v12204_v4, %v3870_v15  ;;  %v14266_v2 = vpop.f32.mrb[133].mxu1 }
0x1273   : > { %v3873_v31 = vpop.f32.mrb[134].mxu1 }
0x1274   : > { %v3874_v26 = vadd.f32 %v12204_v4, %v3873_v31  ;;  %v14267_v29 = vpop.f32.mrb[135].mxu1  ;;  %v3895_v39 = vadd.f32 %v3871_v45, %v17183_v0 }
0x1276   : > { %v3901_v30 = vsel %vm929_vm2, %v3895_v39, 0.0  ;;  %v3896_v46 = vadd.f32 %v3874_v26, %v17185_v43 }
0x1277   : > { %3902 = vadd.xlane.f32.xlu0 %v3901_v30 }
0x1278   : > { %v3904_v28 = vsel %vm929_vm2, %v3896_v46, 0.0 }
0x1279   : > { %3905 = vadd.xlane.f32.xlu1 %v3904_v28  ;;  %v3878_v25 = vpop.f32.mrb[136].mxu1 }
0x127a   : > { %v3879_v8 = vadd.f32 %v12204_v4, %v3878_v25  ;;  %v14270_v56 = vpop.f32.mrb[137].mxu1 }
0x127b   : > { %v3881_v23 = vpop.f32.mrb[138].mxu1  ;;  %v15335_v56 = vld [vmem:[%s20638_s8 + $0x18] sm:$0xff]  }
0x127c   : > { %v3882_v11 = vadd.f32 %v12204_v4, %v3881_v23  ;;  %v14271_v9 = vpop.f32.mrb[139].mxu1  ;;  %v3897_v27 = vadd.f32 %v3879_v8, %v17194_v38  ;;  %v15334_v8 = vld [vmem:[%s20638_s8 + $0x10] sm:$0xff]   ;;  %v15336_v23 = vld [vmem:[%s20640_s10 + $0x20] sm:$0xff]  }
0x127d   : > { %14277 = vmatpush3.bf16.msra.mxu0 %v15334_v8  ;;  %14293 = vmatpush3.bf16.msra.mxu1 %v15336_v23 }
0x127e   : > { %v3907_v51 = vsel %vm929_vm2, %v3897_v27, 0.0  ;;  %v3898_v0 = vadd.f32 %v3882_v11, %v17196_v33  ;;  %14278 = vmatprep.subr.bf16.mxu0 %v20793_v21  ;;  %v15337_v11 = vld [vmem:[%s20640_s10 + $0x28] sm:$0xff]   ;;  %14294 = vmatprep.subr.bf16.mxu1 %v20793_v21 }
0x127f   : > { %3908 = vadd.xlane.f32.xlu0 %v3907_v51 }
0x1280   : > { %v3910_v63 = vsel %vm929_vm2, %v3898_v0, 0.0 }
0x1281   : > { %v3886_v20 = vpop.f32.mrb[140].mxu1  ;;  %14279 = vmatpush3.bf16.msra.mxu0 %v15335_v56  ;;  %14295 = vmatpush3.bf16.msra.mxu1 %v15337_v11 }
0x1282   : > { %v3887_v1 = vadd.f32 %v12204_v4, %v3886_v20  ;;  %v14274_v43 = vpop.f32.mrb[141].mxu1  ;;  %14312 = vmatprep.subr.bf16.mxu0 %v20793_v21  ;;  %14296 = vmatprep.subr.bf16.mxu1 %v20793_v21 }
0x1283   : > { %3911 = vadd.xlane.f32.xlu0 %v3910_v63  ;;  %v3889_v16 = vpop.f32.mrb[142].mxu1 }
0x1284   : > { %v3890_v57 = vadd.f32 %v12204_v4, %v3889_v16  ;;  %v14275_v50 = vpop.f32.mrb[143].mxu1  ;;  %v3899_v24 = vadd.f32 %v3887_v1, %v17205_v7  ;;  %v17811_v16 = vld [vmem:[%s20642_s12 + $0x4] sm:$0xf] }
0x1286   : > { %v3913_v55 = vsel %vm929_vm2, %v3899_v24, 0.0  ;;  %v3900_v38 = vadd.f32 %v3890_v57, %v17207_v17 }
0x1287   : > { %3914 = vadd.xlane.f32.xlu1 %v3913_v55  ;;  %v20806_v55 = vsub.s32 0, %v17062_v36 }
0x1288   : > { %v3916_v10 = vsel %vm929_vm2, %v3900_v38, 0.0 }
0x1289   : > { %3917 = vadd.xlane.f32.xlu0 %v3916_v10 }
0x1304   : > { %v3903_v33 = vpop.xlane.xlu0 %3902 }
0x1305   : > { %v3919_v44 = vmul.f32 0.03125, %v3903_v33 }
0x1306   : > { %v3906_v60 = vpop.xlane.xlu1 %3905 }
0x1307   : > { %v17762_v58 = vsub.f32 %v3895_v39, %v3919_v44  ;;  %v3920_v40 = vmul.f32 0.03125, %v3906_v60 }
0x1309   : > { %v17764_v47 = vsub.f32 %v3896_v46, %v3920_v40  ;;  %v3931_v61 = vmul.f32 %v17762_v58, %v17762_v58 }
0x130b   : > { %v3937_v7 = vsel %vm929_vm2, %v3931_v61, 0.0  ;;  %v3932_v17 = vmul.f32 %v17764_v47, %v17764_v47 }
0x130c   : > { %v3909_v12 = vpop.xlane.xlu0 %3908  ;;  %3938 = vadd.xlane.f32.xlu1 %v3937_v7  ;;  %v20807_v7 = vsub.s32 1, %v17062_v36 }
0x130d   : > { %v3921_v35 = vmul.f32 0.03125, %v3909_v12  ;;  %v3940_v34 = vsel %vm929_vm2, %v3932_v17, 0.0 }
0x130e   : > { %3941 = vadd.xlane.f32.xlu0 %v3940_v34  ;;  %v3992_v17 = vrot.slane %v17811_v16, %v20807_v7 }
0x130f   : > { %v17772_v37 = vsub.f32 %v3897_v27, %v3921_v35 }
0x1310   : > { %v3912_v22 = vpop.xlane.xlu0 %3911 }
0x1311   : > { %v3922_v52 = vmul.f32 0.03125, %v3912_v22  ;;  %v3933_v3 = vmul.f32 %v17772_v37, %v17772_v37 }
0x1313   : > { %v17776_v32 = vsub.f32 %v3898_v0, %v3922_v52  ;;  %v3943_v18 = vsel %vm929_vm2, %v3933_v3, 0.0 }
0x1314   : > { %3944 = vadd.xlane.f32.xlu1 %v3943_v18  ;;  %v3915_v4 = vpop.xlane.xlu1 %3914 }
0x1315   : > { %v3923_v15 = vmul.f32 0.03125, %v3915_v4  ;;  %v3934_v45 = vmul.f32 %v17776_v32, %v17776_v32 }
0x1316   : > { %v3918_v2 = vpop.xlane.xlu0 %3917 }
0x1317   : > { %v17781_v31 = vsub.f32 %v3899_v24, %v3923_v15  ;;  %v3924_v26 = vmul.f32 0.03125, %v3918_v2  ;;  %v3946_v29 = vsel %vm929_vm2, %v3934_v45, 0.0 }
0x1318   : > { %3947 = vadd.xlane.f32.xlu0 %v3946_v29 }
0x1319   : > { %v17784_v39 = vsub.f32 %v3900_v38, %v3924_v26  ;;  %v3935_v30 = vmul.f32 %v17781_v31, %v17781_v31  ;;  %v3982_v38 = vrot.slane %v17811_v16, %v20806_v55 }
0x131b   : > { %v3949_v46 = vsel %vm929_vm2, %v3935_v30, 0.0  ;;  %v3936_v28 = vmul.f32 %v17784_v39, %v17784_v39 }
0x131c   : > { %3950 = vadd.xlane.f32.xlu1 %v3949_v46 }
0x131d   : > { %v3952_v25 = vsel %vm929_vm2, %v3936_v28, 0.0 }
0x131e   : > { %3953 = vadd.xlane.f32.xlu0 %v3952_v25 }
0x1399   : > { %v3939_v9 = vpop.xlane.xlu1 %3938 }
0x139a   : > { %v3955_v27 = vmul.f32 0.03125, %v3939_v9 }
0x139b   : > { %v3942_v51 = vpop.xlane.xlu0 %3941 }
0x139c   : > { %v3961_v0 = vadd.f32 1e-05, %v3955_v27  ;;  %v3956_v20 = vmul.f32 0.03125, %v3942_v51  ;;  %v15339_v51 = vld [vmem:[%s20640_s10 + $0x38] sm:$0xff]  }
0x139e   : > { %16024 = vrsqrt.f32 %v3961_v0  ;;  %v3962_v1 = vadd.f32 1e-05, %v3956_v20  ;;  %v12216_v0 = vld [vmem:[%s20639_s9 + $0x1] ss:$0 sm:$0xff] }
0x13a0   : > { %16026 = vrsqrt.f32 %v3962_v1 }
0x13a1   : > { %v3945_v43 = vpop.xlane.xlu1 %3944 }
0x13a2   : > { %v3957_v63 = vmul.f32 0.03125, %v3945_v43 }
0x13a4   : > { %v3963_v57 = vadd.f32 1e-05, %v3957_v63 }
0x13a5   : > { %v3948_v50 = vpop.xlane.xlu0 %3947 }
0x13a6   : > { %16028 = vrsqrt.f32 %v3963_v57  ;;  %v3958_v24 = vmul.f32 0.03125, %v3948_v50 }
0x13a8   : > { %v16025_v10 = vpop.eup %16024  ;;  %v3964_v33 = vadd.f32 1e-05, %v3958_v24 }
0x13a9   : > { %v3973_v44 = vmul.f32 %v16025_v10, %v17762_v58  ;;  %v3951_v60 = vpop.xlane.xlu1 %3950 }
0x13aa   : > { %v16027_v40 = vpop.eup %16026  ;;  %16030 = vrsqrt.f32 %v3964_v33  ;;  %v3959_v61 = vmul.f32 0.03125, %v3951_v60 }
0x13ab   : > { %v3983_v12 = vmul.f32 %v3982_v38, %v3973_v44  ;;  %v3974_v35 = vmul.f32 %v16027_v40, %v17764_v47  ;;  %v3954_v34 = vpop.xlane.xlu0 %3953 }
0x13ac   : > { %v3965_v22 = vadd.f32 1e-05, %v3959_v61  ;;  %v3960_v52 = vmul.f32 0.03125, %v3954_v34 }
0x13ad   : > { %v3984_v3 = vmul.f32 %v3982_v38, %v3974_v35  ;;  %v17821_v4 = vadd.f32 %v3992_v17, %v3983_v12 }
0x13ae   : > { %16032 = vrsqrt.f32 %v3965_v22  ;;  %v3966_v18 = vadd.f32 1e-05, %v3960_v52 }
0x13af   : > { %v17823_v58 = vadd.f32 %v3992_v17, %v3984_v3 }
0x13b0   : > { %v16029_v15 = vpop.eup %16028  ;;  %16034 = vrsqrt.f32 %v3966_v18 }
0x13b1   : > { %v3975_v45 = vmul.f32 %v16029_v15, %v17772_v37  ;;  %v3999_v2 = vpack.c.bf16 %v17823_v58, %v17821_v4 }
0x13b3   : > { %14281 = vmatmul.mubr.msk.bf16.vlgmr.msra.gmra.mrb[144].mxu0 %vm929_vm2, %v3999_v2  ;;  %v3985_v29 = vmul.f32 %v3982_v38, %v3975_v45 }
0x13b4   : > { %v16031_v47 = vpop.eup %16030  ;;  %14284 = vmatprep.mubr.msk.bf16.mxu0 %vm16061_vm6, %v20793_v21 }
0x13b5   : > { %v3976_v26 = vmul.f32 %v16031_v47, %v17776_v32  ;;  %v17833_v25 = vadd.f32 %v3992_v17, %v3985_v29  ;;  %v12231_v47 = vld [vmem:[%s20641_s11 + $0x1] ss:$0 sm:$0xff] }
0x13b7   : > { %v3986_v30 = vmul.f32 %v3982_v38, %v3976_v26 }
0x13b8   : > { %v16033_v46 = vpop.eup %16032 }
0x13b9   : > { %v3977_v28 = vmul.f32 %v16033_v46, %v17781_v31  ;;  %v17835_v8 = vadd.f32 %v3992_v17, %v3986_v30 }
0x13ba   : > { %v16035_v37 = vpop.eup %16034 }
0x13bb   : > { %v3978_v56 = vmul.f32 %v16035_v37, %v17784_v39  ;;  %v4000_v23 = vpack.c.bf16 %v17835_v8, %v17833_v25  ;;  %v3987_v11 = vmul.f32 %v3982_v38, %v3977_v28  ;;  %v15338_v39 = vld [vmem:[%s20640_s10 + $0x30] sm:$0xff]  }
0x13bc   : > { %14297 = vmatpush3.bf16.msra.mxu1 %v15338_v39 }
0x13bd   : > { %14285 = vmatmul.mubr.msk.bf16.gmra.mrb[148].mxu0 %vm929_vm2, %v4000_v23  ;;  %v3988_v9 = vmul.f32 %v3982_v38, %v3978_v56  ;;  %v17845_v31 = vadd.f32 %v3992_v17, %v3987_v11  ;;  %14298 = vmatprep.subr.bf16.mxu1 %v20793_v21 }
0x13be   : > { %14288 = vmatprep.mubr.msk.bf16.mxu0 %vm16061_vm6, %v20793_v21 }
0x13bf   : > { %v17843_v32 = vadd.f32 %v3992_v17, %v3988_v9 }
0x13c0   : > { %14299 = vmatpush3.bf16.msra.mxu1 %v15339_v51 }
0x13c1   : > { %v4001_v27 = vpack.c.bf16 %v17843_v32, %v17845_v31 }
0x13c5   : > { %14289 = vmatmul.mubr.msk.bf16.gmra.mrb[152].mxu0 %vm929_vm2, %v4001_v27 }
0x13c6   : > { %14316 = vmatprep.mubr.msk.bf16.mxu0 %vm16061_vm6, %v20793_v21 }
0x1486   : > { %v4070_v20 = vpop.f32.mrb[144].mxu0 }
0x1487   : > { %v4071_v1 = vadd.f32 %v12216_v0, %v4070_v20  ;;  %v14282_v43 = vpop.f32.mrb[145].mxu0 }
0x1488   : > { %v4073_v63 = vpop.f32.mrb[146].mxu0 }
0x1489   : > { %v4074_v57 = vadd.f32 %v12216_v0, %v4073_v63  ;;  %v14283_v50 = vpop.f32.mrb[147].mxu0  ;;  %v4093_v24 = vmax.f32 %v4071_v1, 0.0 }
0x148b   : > { %v4094_v55 = vmax.f32 %v4074_v57, 0.0 }
0x148d   : > { %v4099_v38 = vpack.c.bf16 %v4094_v55, %v4093_v24 }
0x148f   : > { %14301 = vmatmul.mubr.msk.bf16.vlgmr.msra.gmra.mrb[144].mxu1 %vm931_vm3, %v4099_v38 }
0x1490   : > { %v4078_v10 = vpop.f32.mrb[148].mxu0  ;;  %14304 = vmatprep.mubr.msk.bf16.mxu1 %vm16061_vm6, %v20793_v21 }
0x1491   : > { %v4079_v33 = vadd.f32 %v12216_v0, %v4078_v10  ;;  %v14286_v44 = vpop.f32.mrb[149].mxu0 }
0x1492   : > { %v4081_v60 = vpop.f32.mrb[150].mxu0 }
0x1493   : > { %v4082_v40 = vadd.f32 %v12216_v0, %v4081_v60  ;;  %v14287_v61 = vpop.f32.mrb[151].mxu0  ;;  %v4095_v7 = vmax.f32 %v4079_v33, 0.0 }
0x1495   : > { %v4096_v17 = vmax.f32 %v4082_v40, 0.0 }
0x1497   : > { %v4100_v12 = vpack.c.bf16 %v4096_v17, %v4095_v7 }
0x1498   : > { %v4086_v35 = vpop.f32.mrb[152].mxu0 }
0x1499   : > { %v4087_v34 = vadd.f32 %v12216_v0, %v4086_v35  ;;  %v14290_v22 = vpop.f32.mrb[153].mxu0  ;;  %14305 = vmatmul.mubr.msk.bf16.gmra.mrb[148].mxu1 %vm931_vm3, %v4100_v12 }
0x149a   : > { %v4089_v52 = vpop.f32.mrb[154].mxu0  ;;  %14308 = vmatprep.mubr.msk.bf16.mxu1 %vm16061_vm6, %v20793_v21 }
0x149b   : > { %v4090_v3 = vadd.f32 %v12216_v0, %v4089_v52  ;;  %v14291_v18 = vpop.f32.mrb[155].mxu0  ;;  %v4097_v15 = vmax.f32 %v4087_v34, 0.0 }
0x149d   : > { %v4098_v45 = vmax.f32 %v4090_v3, 0.0 }
0x149f   : > { %v4101_v2 = vpack.c.bf16 %v4098_v45, %v4097_v15 }
0x14a1   : > { %14309 = vmatmul.mubr.msk.bf16.gmra.mrb[152].mxu1 %vm931_vm3, %v4101_v2 }
0x1562   : > { %v4186_v26 = vpop.f32.mrb[144].mxu1 }
0x1563   : > { %v4187_v29 = vadd.f32 %v12231_v47, %v4186_v26  ;;  %v14302_v30 = vpop.f32.mrb[145].mxu1 }
0x1564   : > { %v4189_v46 = vpop.f32.mrb[146].mxu1 }
0x1565   : > { %v4190_v28 = vadd.f32 %v12231_v47, %v4189_v46  ;;  %v14303_v37 = vpop.f32.mrb[147].mxu1  ;;  %v4209_v56 = vadd.f32 %v4187_v29, %v17821_v4 }
0x1567   : > { %v4215_v23 = vsel %vm929_vm2, %v4209_v56, 0.0  ;;  %v4210_v11 = vadd.f32 %v4190_v28, %v17823_v58 }
0x1568   : > { %4216 = vadd.xlane.f32.xlu1 %v4215_v23 }
0x1569   : > { %v4218_v9 = vsel %vm929_vm2, %v4210_v11, 0.0 }
0x156a   : > { %4219 = vadd.xlane.f32.xlu0 %v4218_v9 }
0x156c   : > { %v4194_v27 = vpop.f32.mrb[148].mxu1 }
0x156d   : > { %v4195_v39 = vadd.f32 %v12231_v47, %v4194_v27  ;;  %v14306_v51 = vpop.f32.mrb[149].mxu1 }
0x156e   : > { %v4197_v0 = vpop.f32.mrb[150].mxu1  ;;  %v15340_v51 = vld [vmem:[%s20645_s15] sm:$0xff]  }
0x156f   : > { %v4198_v20 = vadd.f32 %v12231_v47, %v4197_v0  ;;  %v14307_v1 = vpop.f32.mrb[151].mxu1  ;;  %v4211_v43 = vadd.f32 %v4195_v39, %v17833_v25  ;;  %14313 = vmatpush3.bf16.msra.mxu0 %v15340_v51  ;;  %v15341_v0 = vld [vmem:[%s20645_s15 + $0x8] sm:$0xff]  }
0x1570   : > { %14314 = vmatprep.subr.bf16.mxu0 %v20793_v21 }
0x1571   : > { %v4221_v63 = vsel %vm929_vm2, %v4211_v43, 0.0  ;;  %v4212_v4 = vadd.f32 %v4198_v20, %v17835_v8 }
0x1572   : > { %4222 = vadd.xlane.f32.xlu1 %v4221_v63 }
0x1573   : > { %v4224_v57 = vsel %vm929_vm2, %v4212_v4, 0.0  ;;  %14315 = vmatpush3.bf16.msra.mxu0 %v15341_v0 }
0x1574   : > { %4225 = vadd.xlane.f32.xlu0 %v4224_v57  ;;  %v4202_v58 = vpop.f32.mrb[152].mxu1 }
0x1575   : > { %v4203_v50 = vadd.f32 %v12231_v47, %v4202_v58  ;;  %v14310_v24 = vpop.f32.mrb[153].mxu1 }
0x1576   : > { %v4205_v55 = vpop.f32.mrb[154].mxu1 }
0x1577   : > { %v4206_v38 = vadd.f32 %v12231_v47, %v4205_v55  ;;  %v14311_v10 = vpop.f32.mrb[155].mxu1  ;;  %v4213_v33 = vadd.f32 %v4203_v50, %v17845_v31 }
0x1578   : > { %v20808_v10 = vsub.s32 2, %v17062_v36 }
0x1579   : > { %v4227_v44 = vsel %vm929_vm2, %v4213_v33, 0.0  ;;  %v4214_v25 = vadd.f32 %v4206_v38, %v17843_v32 }
0x157a   : > { %4228 = vadd.xlane.f32.xlu1 %v4227_v44 }
0x157b   : > { %v4230_v60 = vsel %vm929_vm2, %v4214_v25, 0.0 }
0x157c   : > { %4231 = vadd.xlane.f32.xlu0 %v4230_v60 }
0x15f5   : > { %v4217_v8 = vpop.xlane.xlu1 %4216 }
0x15f6   : > { %v4233_v40 = vmul.f32 0.03125, %v4217_v8 }
0x15f7   : > { %v4220_v61 = vpop.xlane.xlu0 %4219 }
0x15f8   : > { %v4239_v7 = vsub.f32 %v4209_v56, %v4233_v40  ;;  %v4234_v17 = vmul.f32 0.03125, %v4220_v61  ;;  %v20809_v40 = vsub.s32 3, %v17062_v36 }
0x15fa   : > { %v4240_v12 = vsub.f32 %v4210_v11, %v4234_v17  ;;  %v4245_v35 = vmul.f32 %v4239_v7, %v4239_v7  ;;  %v4306_v61 = vrot.slane %v17811_v16, %v20809_v40  ;;  %v15345_v40 = vld [vmem:[%s20643_s13 + $0x10] sm:$0xff]  }
0x15fc   : > { %v4251_v34 = vsel %vm929_vm2, %v4245_v35, 0.0  ;;  %v4246_v22 = vmul.f32 %v4240_v12, %v4240_v12 }
0x15fd   : > { %4252 = vadd.xlane.f32.xlu1 %v4251_v34 }
0x15fe   : > { %v4254_v31 = vsel %vm929_vm2, %v4246_v22, 0.0 }
0x15ff   : > { %v4223_v52 = vpop.xlane.xlu1 %4222  ;;  %4255 = vadd.xlane.f32.xlu0 %v4254_v31 }
0x1600   : > { %v4235_v32 = vmul.f32 0.03125, %v4223_v52 }
0x1601   : > { %v4226_v3 = vpop.xlane.xlu0 %4225 }
0x1602   : > { %v4241_v18 = vsub.f32 %v4211_v43, %v4235_v32  ;;  %v4236_v15 = vmul.f32 0.03125, %v4226_v3 }
0x1604   : > { %v17886_v45 = vsub.f32 %v4212_v4, %v4236_v15  ;;  %v4247_v2 = vmul.f32 %v4241_v18, %v4241_v18 }
0x1606   : > { %v4257_v47 = vsel %vm929_vm2, %v4247_v2, 0.0  ;;  %v4248_v26 = vmul.f32 %v17886_v45, %v17886_v45 }
0x1607   : > { %4258 = vadd.xlane.f32.xlu1 %v4257_v47  ;;  %v4229_v29 = vpop.xlane.xlu1 %4228 }
0x1608   : > { %v4237_v30 = vmul.f32 0.03125, %v4229_v29  ;;  %v4260_v46 = vsel %vm929_vm2, %v4248_v26, 0.0 }
0x1609   : > { %4261 = vadd.xlane.f32.xlu0 %v4260_v46  ;;  %v4232_v28 = vpop.xlane.xlu0 %4231 }
0x160a   : > { %v4243_v37 = vsub.f32 %v4213_v33, %v4237_v30  ;;  %v4238_v56 = vmul.f32 0.03125, %v4232_v28  ;;  %v4296_v33 = vrot.slane %v17811_v16, %v20808_v10 }
0x160c   : > { %v4244_v23 = vsub.f32 %v4214_v25, %v4238_v56  ;;  %v4249_v11 = vmul.f32 %v4243_v37, %v4243_v37 }
0x160e   : > { %v4263_v9 = vsel %vm929_vm2, %v4249_v11, 0.0  ;;  %v4250_v27 = vmul.f32 %v4244_v23, %v4244_v23 }
0x160f   : > { %4264 = vadd.xlane.f32.xlu1 %v4263_v9 }
0x1610   : > { %v4266_v39 = vsel %vm929_vm2, %v4250_v27, 0.0 }
0x1611   : > { %4267 = vadd.xlane.f32.xlu0 %v4266_v39 }
0x168a   : > { %v4253_v20 = vpop.xlane.xlu1 %4252 }
0x168b   : > { %v4269_v1 = vmul.f32 0.03125, %v4253_v20 }
0x168c   : > { %v4256_v43 = vpop.xlane.xlu0 %4255 }
0x168d   : > { %v4275_v63 = vadd.f32 1e-05, %v4269_v1  ;;  %v4270_v4 = vmul.f32 0.03125, %v4256_v43 }
0x168f   : > { %16036 = vrsqrt.f32 %v4275_v63  ;;  %v4276_v57 = vadd.f32 1e-05, %v4270_v4 }
0x1691   : > { %16038 = vrsqrt.f32 %v4276_v57 }
0x1694   : > { %v4259_v58 = vpop.xlane.xlu1 %4258 }
0x1695   : > { %v4271_v50 = vmul.f32 0.03125, %v4259_v58 }
0x1696   : > { %v4262_v24 = vpop.xlane.xlu0 %4261 }
0x1697   : > { %v4277_v55 = vadd.f32 1e-05, %v4271_v50  ;;  %v4272_v38 = vmul.f32 0.03125, %v4262_v24 }
0x1699   : > { %v16037_v44 = vpop.eup %16036  ;;  %16040 = vrsqrt.f32 %v4277_v55  ;;  %v4278_v25 = vadd.f32 1e-05, %v4272_v38 }
0x169a   : > { %v4287_v60 = vmul.f32 %v16037_v44, %v4239_v7 }
0x169b   : > { %v16039_v8 = vpop.eup %16038  ;;  %16042 = vrsqrt.f32 %v4278_v25 }
0x169c   : > { %v4297_v17 = vmul.f32 %v4296_v33, %v4287_v60  ;;  %v4288_v35 = vmul.f32 %v16039_v8, %v4240_v12  ;;  %v4265_v34 = vpop.xlane.xlu1 %4264  ;;  %v15343_v60 = vld [vmem:[%s20643_s13 + $0x8] sm:$0xff]   ;;  %v15344_v8 = vld [vmem:[%s20645_s15 + $0x10] sm:$0xff]  }
0x169d   : > { %v4273_v22 = vmul.f32 0.03125, %v4265_v34  ;;  %v15348_v34 = vld [vmem:[%s20643_s13 + $0x28] sm:$0xff]  }
0x169e   : > { %v4298_v31 = vmul.f32 %v4296_v33, %v4288_v35  ;;  %v4268_v52 = vpop.xlane.xlu0 %4267  ;;  %v4307_v15 = vadd.f32 %v4306_v61, %v4297_v17  ;;  %v15346_v17 = vld [vmem:[%s20643_s13 + $0x18] sm:$0xff]   ;;  %v15347_v35 = vld [vmem:[%s20643_s13 + $0x20] sm:$0xff]  }
0x169f   : > { %v4279_v32 = vadd.f32 1e-05, %v4273_v22  ;;  %v4274_v3 = vmul.f32 0.03125, %v4268_v52  ;;  %v15350_v22 = vld [vmem:[%s20643_s13 + $0x30] sm:$0xff]   ;;  %v15352_v52 = vld [vmem:[%s20645_s15 + $0x20] sm:$0xff]  }
0x16a0   : > { %v4308_v2 = vadd.f32 %v4306_v61, %v4298_v31  ;;  %v15351_v31 = vld [vmem:[%s20643_s13 + $0x38] sm:$0xff]  }
0x16a1   : > { %16044 = vrsqrt.f32 %v4279_v32  ;;  %v4280_v47 = vadd.f32 1e-05, %v4274_v3  ;;  %v15353_v32 = vld [vmem:[%s20645_s15 + $0x28] sm:$0xff]   ;;  %v15354_v3 = vld [vmem:[%s20645_s15 + $0x30] sm:$0xff]  }
0x16a2   : > { %v17907_v26 = vpack.c.bf16 %v4308_v2, %v4307_v15  ;;  %v15355_v15 = vld [vmem:[%s20645_s15 + $0x38] sm:$0xff]   ;;  %v15356_v2 = vld [vmem:[%s20645_s15 + $0x40] sm:$0xff]  }
0x16a3   : > { %v16041_v7 = vpop.eup %16040  ;;  %16046 = vrsqrt.f32 %v4280_v47  ;;  %v15357_v47 = vld [vmem:[%s20645_s15 + $0x48] sm:$0xff]  }
0x16a4   : > { %v4289_v29 = vmul.f32 %v16041_v7, %v4241_v18  ;;  %14317 = vmatmul.mubr.msk.bf16.vlgmr.msra.gmra.mrb[156].mxu0 %vm929_vm2, %v17907_v26  ;;  %v15358_v7 = vld [vmem:[%s20645_s15 + $0x50] sm:$0xff]  }
0x16a5   : > { %v16043_v36 = vpop.eup %16042  ;;  %14320 = vmatprep.mubr.msk.bf16.mxu0 %vm16061_vm6, %v20793_v21 }
0x16a6   : > { %v4299_v16 = vmul.f32 %v4296_v33, %v4289_v29  ;;  %v4290_v12 = vmul.f32 %v16043_v36, %v17886_v45  ;;  %v15359_v29 = vld [vmem:[%s20645_s15 + $0x58] sm:$0xff]   ;;  %v15366_v36 = vld [vmem:[%s20643_s13 + $0x40] sm:$0xff]  }
0x16a7   : > { %14350 = vmatprep.mubr.msk.bf16.mxu1 %vm1253_vm10, %v15366_v36 }
0x16a8   : > { %v4300_v30 = vmul.f32 %v4296_v33, %v4290_v12  ;;  %v4309_v46 = vadd.f32 %v4306_v61, %v4299_v16  ;;  %v15367_v16 = vld [vmem:[%s20643_s13 + $0x48] sm:$0xff]   ;;  %v15360_v12 = vld [vmem:[%s20645_s15 + $0x60] sm:$0xff]  }
0x16aa   : > { %v4310_v28 = vadd.f32 %v4306_v61, %v4300_v30  ;;  %v15361_v30 = vld [vmem:[%s20645_s15 + $0x68] sm:$0xff]  }
0x16ab   : > { %v16045_v56 = vpop.eup %16044 }
0x16ac   : > { %v17914_v11 = vpack.c.bf16 %v4310_v28, %v4309_v46  ;;  %v4291_v9 = vmul.f32 %v16045_v56, %v4243_v37  ;;  %v15342_v37 = vld [vmem:[%s20643_s13] sm:$0xff]   ;;  %v15368_v46 = vld [vmem:[%s20643_s13 + $0x50] sm:$0xff]   ;;  %v15369_v28 = vld [vmem:[%s20643_s13 + $0x58] sm:$0xff]  }
0x16ad   : > { %v16047_v27 = vpop.eup %16046  ;;  %v15370_v56 = vld [vmem:[%s20643_s13 + $0x60] sm:$0xff]  }
0x16ae   : > { %v4301_v39 = vmul.f32 %v4296_v33, %v4291_v9  ;;  %v4292_v18 = vmul.f32 %v16047_v27, %v4244_v23  ;;  %14321 = vmatmul.mubr.msk.bf16.gmra.mrb[160].mxu0 %vm929_vm2, %v17914_v11  ;;  %v15362_v9 = vld [vmem:[%s20645_s15 + $0x70] sm:$0xff]   ;;  %v15363_v27 = vld [vmem:[%s20645_s15 + $0x78] sm:$0xff]  }
0x16af   : > { %14324 = vmatprep.mubr.msk.bf16.mxu0 %vm16061_vm6, %v20793_v21 }
0x16b0   : > { %v4302_v51 = vmul.f32 %v4296_v33, %v4292_v18  ;;  %v4311_v0 = vadd.f32 %v4306_v61, %v4301_v39  ;;  %v15364_v39 = vld [vmem:[%s20645_s15 + $0x80] sm:$0xff]   ;;  %v15365_v18 = vld [vmem:[%s20645_s15 + $0x88] sm:$0xff]  }
0x16b2   : > { %v4312_v20 = vadd.f32 %v4306_v61, %v4302_v51  ;;  %v15349_v61 = vld [vmem:[%s20645_s15 + $0x18] sm:$0xff]  }
0x16b4   : > { %v17920_v45 = vpack.c.bf16 %v4312_v20, %v4311_v0 }
0x16b6   : > { %14325 = vmatmul.mubr.msk.bf16.gmra.mrb[164].mxu0 %vm929_vm2, %v17920_v45 }
0x16b7   : > { %14334 = vmatprep.mubr.msk.bf16.mxu0 %vm1253_vm10, %v15342_v37 }
0x1777   : > { %v4399_v23 = vpop.f32.mrb[156].mxu0 }
0x1778   : > { %v14318_v1 = vpop.f32.mrb[157].mxu0 }
0x1779   : > { %v4402_v43 = vpop.f32.mrb[158].mxu0 }
0x177a   : > { %v4446_v63 = vpack.c.bf16 %v4402_v43, %v4399_v23  ;;  %v14319_v4 = vpop.f32.mrb[159].mxu0 }
0x177c   : > { %14328 = vmatprep.subr.bf16.mxu0 %v4446_v63  ;;  %14978 = vmatprep.subr.bf16.mxu1 %v4446_v63 }
0x177d   : > { %14329 = vmatpush3.bf16.msra.mxu0 %v4446_v63  ;;  %14981 = vmatpush3.bf16.msra.mxu1 %v4446_v63 }
0x1781   : > { %v4407_v57 = vpop.f32.mrb[160].mxu0 }
0x1782   : > { %v14322_v58 = vpop.f32.mrb[161].mxu0 }
0x1783   : > { %v4410_v50 = vpop.f32.mrb[162].mxu0 }
0x1784   : > { %v4447_v24 = vpack.c.bf16 %v4410_v50, %v4407_v57  ;;  %v14323_v55 = vpop.f32.mrb[163].mxu0 }
0x1786   : > { %14330 = vmatprep.subr.bf16.mxu0 %v4447_v24  ;;  %14979 = vmatprep.subr.bf16.mxu1 %v4447_v24 }
0x1787   : > { %14331 = vmatpush3.bf16.msra.mxu0 %v4447_v24  ;;  %14982 = vmatpush3.bf16.msra.mxu1 %v4447_v24 }
0x1789   : > { %v4415_v38 = vpop.f32.mrb[164].mxu0 }
0x178a   : > { %v14326_v10 = vpop.f32.mrb[165].mxu0 }
0x178b   : > { %v4418_v33 = vpop.f32.mrb[166].mxu0 }
0x178c   : > { %v4448_v44 = vpack.c.bf16 %v4418_v33, %v4415_v38  ;;  %v14327_v25 = vpop.f32.mrb[167].mxu0 }
0x178e   : > { %14332 = vmatprep.subr.bf16.mxu0 %v4448_v44  ;;  %14980 = vmatprep.subr.bf16.mxu1 %v4448_v44 }
0x178f   : > { %14333 = vmatpush3.bf16.msra.mxu0 %v4448_v44  ;;  %14983 = vmatpush3.bf16.msra.mxu1 %v4448_v44 }
0x1790   : > { %14358 = vmatprep.subr.bf16.mxu0 %v20793_v21 }
0x1792   : > { %14335 = vmatmul.mubr.msk.bf16.vlgmr.msra.gmra.mrb[168].mxu0 %vm1253_vm10, %v15343_v60  ;;  %14351 = vmatmul.mubr.msk.bf16.vlgmr.msra.gmra.mrb[156].mxu1 %vm1253_vm10, %v15367_v16 }
0x1793   : > { %14359 = vmatpush3.bf16.msra.mxu0 %v15344_v8  ;;  %14338 = vmatprep.mubr.msk.bf16.mxu0 %vm1253_vm10, %v15345_v40 }
0x1794   : > { %14360 = vmatprep.subr.bf16.mxu0 %v20793_v21  ;;  %14354 = vmatprep.mubr.msk.bf16.mxu1 %vm1253_vm10, %v15368_v46 }
0x1797   : > { %14361 = vmatpush3.bf16.msra.mxu0 %v15349_v61 }
0x1798   : > { %14404 = vmatprep.subr.bf16.mxu0 %v20793_v21 }
0x179a   : > { %14339 = vmatmul.mubr.msk.bf16.gmra.mrb[172].mxu0 %vm1253_vm10, %v15346_v17  ;;  %14355 = vmatmul.mubr.msk.bf16.gmra.mrb[160].mxu1 %vm1253_vm10, %v15369_v28  ;;  %v15375_v28 = vld [vmem:[%s20643_s13 + $0x88] sm:$0xff]  }
0x179b   : > { %14342 = vmatprep.mubr.msk.bf16.mxu0 %vm1253_vm10, %v15347_v35  ;;  %14380 = vmatprep.mubr.msk.bf16.mxu1 %vm1253_vm10, %v15370_v56  ;;  %v15376_v56 = vld [vmem:[%s20643_s13 + $0x90] sm:$0xff]  }
0x17a2   : > { %14343 = vmatmul.mubr.msk.bf16.gmra.mrb[176].mxu0 %vm1253_vm10, %v15348_v34 }
0x17a3   : > { %14346 = vmatprep.mubr.msk.bf16.mxu0 %vm1253_vm10, %v15350_v22 }
0x17aa   : > { %14347 = vmatmul.mubr.msk.bf16.gmra.mrb[180].mxu0 %vm1253_vm10, %v15351_v31  ;;  %v15371_v31 = vld [vmem:[%s20643_s13 + $0x68] sm:$0xff]  }
0x17ab   : > { %14362 = vmatprep.mubr.msk.bf16.mxu0 %vm16061_vm6, %v20793_v21 }
0x17b2   : > { %14363 = vmatmul.mubr.msk.bf16.vlgmr.msra.gmra.mrb[184].mxu0 %vm929_vm2, %v17907_v26 }
0x17b3   : > { %14366 = vmatprep.mubr.msk.bf16.mxu0 %vm16061_vm6, %v20793_v21  ;;  %14405 = vmatpush3.bf16.msra.mxu0 %v15352_v52  ;;  %v15372_v52 = vld [vmem:[%s20643_s13 + $0x70] sm:$0xff]  }
0x17b4   : > { %14406 = vmatprep.subr.bf16.mxu0 %v20793_v21 }
0x17b7   : > { %14407 = vmatpush3.bf16.msra.mxu0 %v15353_v32 }
0x17b8   : > { %14450 = vmatprep.subr.bf16.mxu0 %v20793_v21 }
0x17ba   : > { %14367 = vmatmul.mubr.msk.bf16.gmra.mrb[188].mxu0 %vm929_vm2, %v17914_v11 }
0x17bb   : > { %14370 = vmatprep.mubr.msk.bf16.mxu0 %vm16061_vm6, %v20793_v21 }
0x17c2   : > { %14371 = vmatmul.mubr.msk.bf16.gmra.mrb[192].mxu0 %vm929_vm2, %v17920_v45 }
0x17c3   : > { %14408 = vmatprep.mubr.msk.bf16.mxu0 %vm16061_vm6, %v20793_v21 }
0x17ca   : > { %14409 = vmatmul.mubr.msk.bf16.vlgmr.msra.gmra.mrb[196].mxu0 %vm929_vm2, %v17907_v26 }
0x17cb   : > { %14412 = vmatprep.mubr.msk.bf16.mxu0 %vm16061_vm6, %v20793_v21  ;;  %14451 = vmatpush3.bf16.msra.mxu0 %v15354_v3 }
0x17cc   : > { %14452 = vmatprep.subr.bf16.mxu0 %v20793_v21 }
0x17cf   : > { %14453 = vmatpush3.bf16.msra.mxu0 %v15355_v15 }
0x17d0   : > { %14496 = vmatprep.subr.bf16.mxu0 %v20793_v21 }
0x17d2   : > { %14413 = vmatmul.mubr.msk.bf16.gmra.mrb[200].mxu0 %vm929_vm2, %v17914_v11 }
0x17d3   : > { %14416 = vmatprep.mubr.msk.bf16.mxu0 %vm16061_vm6, %v20793_v21 }
0x17da   : > { %14417 = vmatmul.mubr.msk.bf16.gmra.mrb[204].mxu0 %vm929_vm2, %v17920_v45 }
0x17db   : > { %14454 = vmatprep.mubr.msk.bf16.mxu0 %vm16061_vm6, %v20793_v21 }
0x17e2   : > { %14455 = vmatmul.mubr.msk.bf16.vlgmr.msra.gmra.mrb[208].mxu0 %vm929_vm2, %v17907_v26 }
0x17e3   : > { %14458 = vmatprep.mubr.msk.bf16.mxu0 %vm16061_vm6, %v20793_v21  ;;  %14497 = vmatpush3.bf16.msra.mxu0 %v15356_v2 }
0x17e4   : > { %14498 = vmatprep.subr.bf16.mxu0 %v20793_v21 }
0x17e7   : > { %14499 = vmatpush3.bf16.msra.mxu0 %v15357_v47 }
0x17e8   : > { %14542 = vmatprep.subr.bf16.mxu0 %v20793_v21 }
0x17ea   : > { %14459 = vmatmul.mubr.msk.bf16.gmra.mrb[212].mxu0 %vm929_vm2, %v17914_v11 }
0x17eb   : > { %14462 = vmatprep.mubr.msk.bf16.mxu0 %vm16061_vm6, %v20793_v21 }
0x17f2   : > { %14463 = vmatmul.mubr.msk.bf16.gmra.mrb[216].mxu0 %vm929_vm2, %v17920_v45 }
0x17f3   : > { %14500 = vmatprep.mubr.msk.bf16.mxu0 %vm16061_vm6, %v20793_v21 }
0x17fa   : > { %14501 = vmatmul.mubr.msk.bf16.vlgmr.msra.gmra.mrb[220].mxu0 %vm929_vm2, %v17907_v26 }
0x17fb   : > { %14504 = vmatprep.mubr.msk.bf16.mxu0 %vm16061_vm6, %v20793_v21  ;;  %14543 = vmatpush3.bf16.msra.mxu0 %v15358_v7  ;;  %v15373_v7 = vld [vmem:[%s20643_s13 + $0x78] sm:$0xff]  }
0x17fc   : > { %14544 = vmatprep.subr.bf16.mxu0 %v20793_v21 }
0x17ff   : > { %14545 = vmatpush3.bf16.msra.mxu0 %v15359_v29  ;;  %v15374_v29 = vld [vmem:[%s20643_s13 + $0x80] sm:$0xff]  }
0x1800   : > { %14588 = vmatprep.subr.bf16.mxu0 %v20793_v21 }
0x1802   : > { %14505 = vmatmul.mubr.msk.bf16.gmra.mrb[224].mxu0 %vm929_vm2, %v17914_v11 }
0x1803   : > { %14508 = vmatprep.mubr.msk.bf16.mxu0 %vm16061_vm6, %v20793_v21 }
0x180a   : > { %14509 = vmatmul.mubr.msk.bf16.gmra.mrb[228].mxu0 %vm929_vm2, %v17920_v45 }
0x180b   : > { %14546 = vmatprep.mubr.msk.bf16.mxu0 %vm16061_vm6, %v20793_v21 }
0x1812   : > { %14547 = vmatmul.mubr.msk.bf16.vlgmr.msra.gmra.mrb[232].mxu0 %vm929_vm2, %v17907_v26 }
0x1813   : > { %14550 = vmatprep.mubr.msk.bf16.mxu0 %vm16061_vm6, %v20793_v21  ;;  %14589 = vmatpush3.bf16.msra.mxu0 %v15360_v12 }
0x1814   : > { %14590 = vmatprep.subr.bf16.mxu0 %v20793_v21 }
0x1817   : > { %14591 = vmatpush3.bf16.msra.mxu0 %v15361_v30 }
0x1818   : > { %14634 = vmatprep.subr.bf16.mxu0 %v20793_v21 }
0x181a   : > { %14551 = vmatmul.mubr.msk.bf16.gmra.mrb[236].mxu0 %vm929_vm2, %v17914_v11 }
0x181b   : > { %14554 = vmatprep.mubr.msk.bf16.mxu0 %vm16061_vm6, %v20793_v21 }
0x1822   : > { %14555 = vmatmul.mubr.msk.bf16.gmra.mrb[240].mxu0 %vm929_vm2, %v17920_v45 }
0x1823   : > { %14592 = vmatprep.mubr.msk.bf16.mxu0 %vm16061_vm6, %v20793_v21 }
0x182a   : > { %14593 = vmatmul.mubr.msk.bf16.vlgmr.msra.gmra.mrb[244].mxu0 %vm929_vm2, %v17907_v26 }
0x182b   : > { %14596 = vmatprep.mubr.msk.bf16.mxu0 %vm16061_vm6, %v20793_v21  ;;  %14635 = vmatpush3.bf16.msra.mxu0 %v15362_v9 }
0x182c   : > { %14636 = vmatprep.subr.bf16.mxu0 %v20793_v21 }
0x182f   : > { %14637 = vmatpush3.bf16.msra.mxu0 %v15363_v27 }
0x1830   : > { %14680 = vmatprep.subr.bf16.mxu0 %v20793_v21 }
0x1832   : > { %14597 = vmatmul.mubr.msk.bf16.gmra.mrb[248].mxu0 %vm929_vm2, %v17914_v11 }
0x1833   : > { %14600 = vmatprep.mubr.msk.bf16.mxu0 %vm16061_vm6, %v20793_v21 }
0x183a   : > { %14601 = vmatmul.mubr.msk.bf16.gmra.mrb[252].mxu0 %vm929_vm2, %v17920_v45 }
0x183b   : > { %14638 = vmatprep.mubr.msk.bf16.mxu0 %vm16061_vm6, %v20793_v21 }
0x1842   : > { %14639 = vmatmul.mubr.msk.bf16.vlgmr.msra.gmra.mrb[0].mxu0 %vm929_vm2, %v17907_v26 }
0x1843   : > { %14642 = vmatprep.mubr.msk.bf16.mxu0 %vm16061_vm6, %v20793_v21  ;;  %14681 = vmatpush3.bf16.msra.mxu0 %v15364_v39 }
0x1844   : > { %14682 = vmatprep.subr.bf16.mxu0 %v20793_v21 }
0x1847   : > { %14683 = vmatpush3.bf16.msra.mxu0 %v15365_v18 }
0x184a   : > { %14643 = vmatmul.mubr.msk.bf16.gmra.mrb[4].mxu0 %vm929_vm2, %v17914_v11 }
0x184b   : > { %14646 = vmatprep.mubr.msk.bf16.mxu0 %vm16061_vm6, %v20793_v21 }
0x1852   : > { %14647 = vmatmul.mubr.msk.bf16.gmra.mrb[8].mxu0 %vm929_vm2, %v17920_v45 }
0x1853   : > { %14684 = vmatprep.mubr.msk.bf16.mxu0 %vm16061_vm6, %v20793_v21 }
0x185a   : > { %14685 = vmatmul.mubr.msk.bf16.vlgmr.msra.gmra.mrb[12].mxu0 %vm929_vm2, %v17907_v26 }
0x185b   : > { %14688 = vmatprep.mubr.msk.bf16.mxu0 %vm16061_vm6, %v20793_v21 }
0x1862   : > { %14689 = vmatmul.mubr.msk.bf16.gmra.mrb[16].mxu0 %vm929_vm2, %v17914_v11 }
0x1863   : > { %14692 = vmatprep.mubr.msk.bf16.mxu0 %vm16061_vm6, %v20793_v21 }
0x1865   : > { %v18134_v51 = vpop.f32.mrb[168].mxu0 }
0x1866   : > { %v18136_v0 = vpop.f32.mrb[169].mxu0 }
0x1867   : > { %v18138_v20 = vpop.f32.mrb[170].mxu0 }
0x1868   : > { %v18140_v37 = vpop.f32.mrb[171].mxu0 }
0x186a   : > { %14693 = vmatmul.mubr.msk.bf16.gmra.mrb[20].mxu0 %vm929_vm2, %v17920_v45 }
0x186d   : > { %v18144_v26 = vpop.f32.mrb[172].mxu0 }
0x186e   : > { %v18146_v23 = vpop.f32.mrb[173].mxu0 }
0x186f   : > { %v18148_v1 = vpop.f32.mrb[174].mxu0 }
0x1870   : > { %v18150_v11 = vpop.f32.mrb[175].mxu0 }
0x1875   : > { %v18152_v21 = vpop.f32.mrb[176].mxu0 }
0x1876   : > { %v18154_v43 = vpop.f32.mrb[177].mxu0 }
0x1877   : > { %v18156_v63 = vpop.f32.mrb[178].mxu0 }
0x1878   : > { %v18158_v4 = vpop.f32.mrb[179].mxu0 }
0x187d   : > { %v18160_v57 = vpop.f32.mrb[180].mxu0 }
0x187e   : > { %v18162_v58 = vpop.f32.mrb[181].mxu0 }
0x187f   : > { %v18164_v45 = vpop.f32.mrb[182].mxu0 }
0x1880   : > { %v18166_v50 = vpop.f32.mrb[183].mxu0 }
0x1885   : > { %v4749_v24 = vpop.f32.mrb[184].mxu0 }
0x1886   : > { %v14364_v55 = vpop.f32.mrb[185].mxu0 }
0x1887   : > { %v4752_v38 = vpop.f32.mrb[186].mxu0  ;;  %v15377_v55 = vld [vmem:[%s20643_s13 + $0x98] sm:$0xff]  }
0x1888   : > { %v4797_v10 = vpack.c.bf16 %v4752_v38, %v4749_v24  ;;  %v14365_v33 = vpop.f32.mrb[187].mxu0  ;;  %v15378_v38 = vld [vmem:[%s20643_s13 + $0xa0] sm:$0xff]  }
0x188a   : > { %14374 = vmatprep.subr.bf16.mxu1 %v4797_v10 }
0x188b   : > { %14375 = vmatpush3.bf16.msra.mxu1 %v4797_v10 }
0x188d   : > { %v4757_v44 = vpop.f32.mrb[188].mxu0 }
0x188e   : > { %v14368_v25 = vpop.f32.mrb[189].mxu0 }
0x188f   : > { %v4760_v60 = vpop.f32.mrb[190].mxu0 }
0x1890   : > { %v4798_v8 = vpack.c.bf16 %v4760_v60, %v4757_v44  ;;  %v14369_v40 = vpop.f32.mrb[191].mxu0 }
0x1891   : > { %v15380_v40 = vld [vmem:[%s20643_s13 + $0xb0] sm:$0xff]  }
0x1892   : > { %14376 = vmatprep.subr.bf16.mxu1 %v4798_v8 }
0x1893   : > { %14377 = vmatpush3.bf16.msra.mxu1 %v4798_v8  ;;  %v15379_v8 = vld [vmem:[%s20643_s13 + $0xa8] sm:$0xff]  }
0x1895   : > { %v4765_v61 = vpop.f32.mrb[192].mxu0 }
0x1896   : > { %v14372_v17 = vpop.f32.mrb[193].mxu0 }
0x1897   : > { %v4768_v35 = vpop.f32.mrb[194].mxu0 }
0x1898   : > { %v4799_v34 = vpack.c.bf16 %v4768_v35, %v4765_v61  ;;  %v14373_v22 = vpop.f32.mrb[195].mxu0 }
0x189a   : > { %14378 = vmatprep.subr.bf16.mxu1 %v4799_v34 }
0x189b   : > { %14379 = vmatpush3.bf16.msra.mxu1 %v4799_v34 }
0x189d   : > { %v5100_v32 = vpop.f32.mrb[196].mxu0 }
0x189e   : > { %14381 = vmatmul.mubr.msk.bf16.vlgmr.msra.gmra.mrb[164].mxu1 %vm1253_vm10, %v15371_v31  ;;  %v14410_v3 = vpop.f32.mrb[197].mxu0  ;;  %v15381_v31 = vld [vmem:[%s20643_s13 + $0xb8] sm:$0xff]  }
0x189f   : > { %v5103_v15 = vpop.f32.mrb[198].mxu0  ;;  %14384 = vmatprep.mubr.msk.bf16.mxu1 %vm1253_vm10, %v15372_v52  ;;  %v15382_v52 = vld [vmem:[%s20643_s13 + $0xc0] sm:$0xff]  }
0x18a0   : > { %v5148_v2 = vpack.c.bf16 %v5103_v15, %v5100_v32  ;;  %v14411_v47 = vpop.f32.mrb[199].mxu0 }
0x18a2   : > { %14420 = vmatprep.subr.bf16.mxu1 %v5148_v2 }
0x18a3   : > { %14421 = vmatpush3.bf16.msra.mxu1 %v5148_v2 }
0x18a5   : > { %v5108_v36 = vpop.f32.mrb[200].mxu0 }
0x18a6   : > { %14385 = vmatmul.mubr.msk.bf16.gmra.mrb[168].mxu1 %vm1253_vm10, %v15373_v7  ;;  %v14414_v16 = vpop.f32.mrb[201].mxu0  ;;  %v15383_v7 = vld [vmem:[%s20643_s13 + $0xc8] sm:$0xff]  }
0x18a7   : > { %v5111_v12 = vpop.f32.mrb[202].mxu0  ;;  %14388 = vmatprep.mubr.msk.bf16.mxu1 %vm1253_vm10, %v15374_v29  ;;  %v15384_v29 = vld [vmem:[%s20643_s13 + $0xd0] sm:$0xff]  }
0x18a8   : > { %v5149_v30 = vpack.c.bf16 %v5111_v12, %v5108_v36  ;;  %v14415_v46 = vpop.f32.mrb[203].mxu0 }
0x18aa   : > { %14422 = vmatprep.subr.bf16.mxu1 %v5149_v30 }
0x18ab   : > { %14423 = vmatpush3.bf16.msra.mxu1 %v5149_v30 }
0x18ad   : > { %v5116_v9 = vpop.f32.mrb[204].mxu0 }
0x18ae   : > { %14389 = vmatmul.mubr.msk.bf16.gmra.mrb[172].mxu1 %vm1253_vm10, %v15375_v28  ;;  %v14418_v27 = vpop.f32.mrb[205].mxu0  ;;  %v15385_v28 = vld [vmem:[%s20643_s13 + $0xd8] sm:$0xff]  }
0x18af   : > { %v5119_v39 = vpop.f32.mrb[206].mxu0  ;;  %14392 = vmatprep.mubr.msk.bf16.mxu1 %vm1253_vm10, %v15376_v56  ;;  %v15386_v56 = vld [vmem:[%s20643_s13 + $0xe0] sm:$0xff]  }
0x18b0   : > { %v5150_v18 = vpack.c.bf16 %v5119_v39, %v5116_v9  ;;  %v14419_v24 = vpop.f32.mrb[207].mxu0 }
0x18b2   : > { %14424 = vmatprep.subr.bf16.mxu1 %v5150_v18 }
0x18b3   : > { %14425 = vmatpush3.bf16.msra.mxu1 %v5150_v18 }
0x18b5   : > { %v5451_v10 = vpop.f32.mrb[208].mxu0 }
0x18b6   : > { %14393 = vmatmul.mubr.msk.bf16.gmra.mrb[176].mxu1 %vm1253_vm10, %v15377_v55  ;;  %v14456_v33 = vpop.f32.mrb[209].mxu0  ;;  %v15387_v55 = vld [vmem:[%s20643_s13 + $0xe8] sm:$0xff]  }
0x18b7   : > { %v5454_v44 = vpop.f32.mrb[210].mxu0  ;;  %14396 = vmatprep.mubr.msk.bf16.mxu1 %vm1253_vm10, %v15378_v38  ;;  %v15388_v38 = vld [vmem:[%s20643_s13 + $0xf0] sm:$0xff]  }
0x18b8   : > { %v5499_v25 = vpack.c.bf16 %v5454_v44, %v5451_v10  ;;  %v14457_v60 = vpop.f32.mrb[211].mxu0 }
0x18ba   : > { %14466 = vmatprep.subr.bf16.mxu1 %v5499_v25 }
0x18bd   : > { %v5459_v61 = vpop.f32.mrb[212].mxu0 }
0x18be   : > { %14397 = vmatmul.mubr.msk.bf16.gmra.mrb[156].mxu1 %vm1253_vm10, %v15379_v8  ;;  %v14460_v17 = vpop.f32.mrb[213].mxu0  ;;  %v15389_v8 = vld [vmem:[%s20643_s13 + $0xf8] sm:$0xff]  }
0x18bf   : > { %v5462_v35 = vpop.f32.mrb[214].mxu0  ;;  %14400 = vmatprep.mubr.msk.bf16.mxu1 %vm1253_vm10, %v15380_v40  ;;  %v15390_v40 = vld [vmem:[%s20643_s13 + $0x100] sm:$0xff]  }
0x18c0   : > { %v5500_v34 = vpack.c.bf16 %v5462_v35, %v5459_v61  ;;  %v14461_v22 = vpop.f32.mrb[215].mxu0 }
0x18c5   : > { %v5467_v32 = vpop.f32.mrb[216].mxu0 }
0x18c6   : > { %14401 = vmatmul.mubr.msk.bf16.gmra.mrb[160].mxu1 %vm1253_vm10, %v15381_v31  ;;  %v14464_v3 = vpop.f32.mrb[217].mxu0  ;;  %v15391_v31 = vld [vmem:[%s20643_s13 + $0x108] sm:$0xff]  }
0x18c7   : > { %v5470_v15 = vpop.f32.mrb[218].mxu0  ;;  %14426 = vmatprep.mubr.msk.bf16.mxu1 %vm1253_vm10, %v15382_v52  ;;  %v15392_v52 = vld [vmem:[%s20643_s13 + $0x110] sm:$0xff]  }
0x18c8   : > { %v5501_v2 = vpack.c.bf16 %v5470_v15, %v5467_v32  ;;  %v14465_v47 = vpop.f32.mrb[219].mxu0 }
0x18cd   : > { %v5802_v36 = vpop.f32.mrb[220].mxu0 }
0x18ce   : > { %14427 = vmatmul.mubr.msk.bf16.vlgmr.msra.gmra.mrb[164].mxu1 %vm1253_vm10, %v15383_v7  ;;  %v14502_v16 = vpop.f32.mrb[221].mxu0  ;;  %v15393_v7 = vld [vmem:[%s20643_s13 + $0x118] sm:$0xff]  }
0x18cf   : > { %14467 = vmatpush3.bf16.msra.mxu1 %v5499_v25  ;;  %v5805_v12 = vpop.f32.mrb[222].mxu0  ;;  %14430 = vmatprep.mubr.msk.bf16.mxu1 %vm1253_vm10, %v15384_v29  ;;  %v15394_v29 = vld [vmem:[%s20643_s13 + $0x120] sm:$0xff]  }
0x18d0   : > { %14468 = vmatprep.subr.bf16.mxu1 %v5500_v34  ;;  %v5850_v30 = vpack.c.bf16 %v5805_v12, %v5802_v36  ;;  %v14503_v46 = vpop.f32.mrb[223].mxu0 }
0x18d3   : > { %14469 = vmatpush3.bf16.msra.mxu1 %v5500_v34 }
0x18d4   : > { %14470 = vmatprep.subr.bf16.mxu1 %v5501_v2 }
0x18d5   : > { %v5810_v9 = vpop.f32.mrb[224].mxu0 }
0x18d6   : > { %14431 = vmatmul.mubr.msk.bf16.gmra.mrb[168].mxu1 %vm1253_vm10, %v15385_v28  ;;  %v14506_v27 = vpop.f32.mrb[225].mxu0 }
0x18d7   : > { %14471 = vmatpush3.bf16.msra.mxu1 %v5501_v2  ;;  %v5813_v39 = vpop.f32.mrb[226].mxu0  ;;  %14434 = vmatprep.mubr.msk.bf16.mxu1 %vm1253_vm10, %v15386_v56  ;;  %v15395_v56 = vld [vmem:[%s20643_s13 + $0x128] sm:$0xff]  }
0x18d8   : > { %v5851_v18 = vpack.c.bf16 %v5813_v39, %v5810_v9  ;;  %14512 = vmatprep.subr.bf16.mxu1 %v5850_v30  ;;  %v14507_v24 = vpop.f32.mrb[227].mxu0  ;;  %v15396_v9 = vld [vmem:[%s20643_s13 + $0x130] sm:$0xff]  }
0x18dd   : > { %v5818_v10 = vpop.f32.mrb[228].mxu0 }
0x18de   : > { %14435 = vmatmul.mubr.msk.bf16.gmra.mrb[172].mxu1 %vm1253_vm10, %v15387_v55  ;;  %v14510_v33 = vpop.f32.mrb[229].mxu0 }
0x18df   : > { %v5821_v44 = vpop.f32.mrb[230].mxu0  ;;  %14438 = vmatprep.mubr.msk.bf16.mxu1 %vm1253_vm10, %v15388_v38  ;;  %v15398_v33 = vld [vmem:[%s20643_s13 + $0x140] sm:$0xff]  }
0x18e0   : > { %v5852_v25 = vpack.c.bf16 %v5821_v44, %v5818_v10  ;;  %v14511_v60 = vpop.f32.mrb[231].mxu0  ;;  %v15397_v10 = vld [vmem:[%s20643_s13 + $0x138] sm:$0xff]  }
0x18e5   : > { %v6153_v61 = vpop.f32.mrb[232].mxu0 }
0x18e6   : > { %14439 = vmatmul.mubr.msk.bf16.gmra.mrb[176].mxu1 %vm1253_vm10, %v15389_v8  ;;  %v14548_v17 = vpop.f32.mrb[233].mxu0 }
0x18e7   : > { %v6156_v35 = vpop.f32.mrb[234].mxu0  ;;  %14442 = vmatprep.mubr.msk.bf16.mxu1 %vm1253_vm10, %v15390_v40 }
0x18e8   : > { %v18248_v34 = vpack.c.bf16 %v6156_v35, %v6153_v61  ;;  %v14549_v22 = vpop.f32.mrb[235].mxu0  ;;  %v15400_v61 = vld [vmem:[%s20643_s13 + $0x150] sm:$0xff]  }
0x18ed   : > { %v6161_v32 = vpop.f32.mrb[236].mxu0 }
0x18ee   : > { %14443 = vmatmul.mubr.msk.bf16.gmra.mrb[156].mxu1 %vm1253_vm10, %v15391_v31  ;;  %v14552_v3 = vpop.f32.mrb[237].mxu0 }
0x18ef   : > { %v6164_v15 = vpop.f32.mrb[238].mxu0  ;;  %14446 = vmatprep.mubr.msk.bf16.mxu1 %vm1253_vm10, %v15392_v52  ;;  %v15401_v52 = vld [vmem:[%s20643_s13 + $0x158] sm:$0xff]  }
0x18f0   : > { %v18258_v2 = vpack.c.bf16 %v6164_v15, %v6161_v32  ;;  %v14553_v47 = vpop.f32.mrb[239].mxu0  ;;  %v15402_v32 = vld [vmem:[%s20643_s13 + $0x160] sm:$0xff]  }
0x18f5   : > { %v6169_v36 = vpop.f32.mrb[240].mxu0 }
0x18f6   : > { %14447 = vmatmul.mubr.msk.bf16.gmra.mrb[160].mxu1 %vm1253_vm10, %v15393_v7  ;;  %v14556_v16 = vpop.f32.mrb[241].mxu0 }
0x18f7   : > { %v6172_v12 = vpop.f32.mrb[242].mxu0  ;;  %14472 = vmatprep.mubr.msk.bf16.mxu1 %vm1253_vm10, %v15394_v29  ;;  %v15404_v16 = vld [vmem:[%s20643_s13 + $0x170] sm:$0xff]  }
0x18f8   : > { %v18268_v46 = vpack.c.bf16 %v6172_v12, %v6169_v36  ;;  %v14557_v28 = vpop.f32.mrb[243].mxu0  ;;  %v15403_v36 = vld [vmem:[%s20643_s13 + $0x168] sm:$0xff]  }
0x18fd   : > { %v6504_v27 = vpop.f32.mrb[244].mxu0 }
0x18fe   : > { %14473 = vmatmul.mubr.msk.bf16.vlgmr.msra.gmra.mrb[164].mxu1 %vm1253_vm10, %v15395_v56  ;;  %v14594_v39 = vpop.f32.mrb[245].mxu0 }
0x18ff   : > { %14513 = vmatpush3.bf16.msra.mxu1 %v5850_v30  ;;  %v6507_v24 = vpop.f32.mrb[246].mxu0  ;;  %14476 = vmatprep.mubr.msk.bf16.mxu1 %vm1253_vm10, %v15396_v9  ;;  %v15405_v39 = vld [vmem:[%s20643_s13 + $0x178] sm:$0xff]  }
0x1900   : > { %14514 = vmatprep.subr.bf16.mxu1 %v5851_v18  ;;  %v18278_v55 = vpack.c.bf16 %v6507_v24, %v6504_v27  ;;  %v14595_v38 = vpop.f32.mrb[247].mxu0  ;;  %v15406_v24 = vld [vmem:[%s20643_s13 + $0x180] sm:$0xff]  }
0x1903   : > { %14515 = vmatpush3.bf16.msra.mxu1 %v5851_v18  ;;  %v15399_v18 = vld [vmem:[%s20643_s13 + $0x148] sm:$0xff]  }
0x1904   : > { %14516 = vmatprep.subr.bf16.mxu1 %v5852_v25 }
0x1905   : > { %v6512_v44 = vpop.f32.mrb[248].mxu0 }
0x1906   : > { %14477 = vmatmul.mubr.msk.bf16.gmra.mrb[168].mxu1 %vm1253_vm10, %v15397_v10  ;;  %v14598_v30 = vpop.f32.mrb[249].mxu0 }
0x1907   : > { %14517 = vmatpush3.bf16.msra.mxu1 %v5852_v25  ;;  %v6515_v60 = vpop.f32.mrb[250].mxu0  ;;  %14480 = vmatprep.mubr.msk.bf16.mxu1 %vm1253_vm10, %v15398_v33 }
0x1908   : > { %14558 = vmatprep.subr.bf16.mxu1 %v18248_v34  ;;  %v18289_v8 = vpack.c.bf16 %v6515_v60, %v6512_v44  ;;  %v14599_v40 = vpop.f32.mrb[251].mxu0  ;;  %v15407_v60 = vld [vmem:[%s20643_s13 + $0x188] sm:$0xff]  }
0x1909   : > { %v15408_v40 = vld [vmem:[%s20643_s13 + $0x190] sm:$0xff]  }
0x190d   : > { %v6520_v17 = vpop.f32.mrb[252].mxu0 }
0x190e   : > { %14481 = vmatmul.mubr.msk.bf16.gmra.mrb[172].mxu1 %vm1253_vm10, %v15399_v18  ;;  %v14602_v25 = vpop.f32.mrb[253].mxu0 }
0x190f   : > { %v6523_v35 = vpop.f32.mrb[254].mxu0  ;;  %14484 = vmatprep.mubr.msk.bf16.mxu1 %vm1253_vm10, %v15400_v61 }
0x1910   : > { %v18299_v22 = vpack.c.bf16 %v6523_v35, %v6520_v17  ;;  %v14603_v31 = vpop.f32.mrb[255].mxu0 }
0x1911   : > { %v15409_v31 = vld [vmem:[%s20643_s13 + $0x198] sm:$0xff]  }
0x1915   : > { %v6855_v3 = vpop.f32.mrb[0].mxu0 }
0x1916   : > { %14485 = vmatmul.mubr.msk.bf16.gmra.mrb[176].mxu1 %vm1253_vm10, %v15401_v52  ;;  %v14640_v15 = vpop.f32.mrb[1].mxu0  ;;  %v15410_v52 = vld [vmem:[%s20643_s13 + $0x1a0] sm:$0xff]  }
0x1917   : > { %v6858_v47 = vpop.f32.mrb[2].mxu0  ;;  %14488 = vmatprep.mubr.msk.bf16.mxu1 %vm1253_vm10, %v15402_v32 }
0x1918   : > { %v18309_v7 = vpack.c.bf16 %v6858_v47, %v6855_v3  ;;  %v14641_v29 = vpop.f32.mrb[3].mxu0  ;;  %v15411_v47 = vld [vmem:[%s20643_s13 + $0x1a8] sm:$0xff]  }
0x1919   : > { %v15412_v29 = vld [vmem:[%s20643_s13 + $0x1b0] sm:$0xff]  }
0x191d   : > { %v6863_v12 = vpop.f32.mrb[4].mxu0 }
0x191e   : > { %14489 = vmatmul.mubr.msk.bf16.gmra.mrb[156].mxu1 %vm1253_vm10, %v15403_v36  ;;  %v14644_v28 = vpop.f32.mrb[5].mxu0 }
0x191f   : > { %v6866_v56 = vpop.f32.mrb[6].mxu0  ;;  %14492 = vmatprep.mubr.msk.bf16.mxu1 %vm1253_vm10, %v15404_v16 }
0x1920   : > { %v18319_v9 = vpack.c.bf16 %v6866_v56, %v6863_v12  ;;  %v14645_v27 = vpop.f32.mrb[7].mxu0  ;;  %v15413_v56 = vld [vmem:[%s20643_s13 + $0x1b8] sm:$0xff]  }
0x1921   : > { %v15414_v27 = vld [vmem:[%s20643_s13 + $0x1c0] sm:$0xff]  }
0x1925   : > { %v6871_v38 = vpop.f32.mrb[8].mxu0 }
0x1926   : > { %14493 = vmatmul.mubr.msk.bf16.gmra.mrb[160].mxu1 %vm1253_vm10, %v15405_v39  ;;  %v14648_v10 = vpop.f32.mrb[9].mxu0  ;;  %v15415_v39 = vld [vmem:[%s20643_s13 + $0x1c8] sm:$0xff]  }
0x1927   : > { %v6874_v33 = vpop.f32.mrb[10].mxu0  ;;  %14518 = vmatprep.mubr.msk.bf16.mxu1 %vm1253_vm10, %v15406_v24  ;;  %v15416_v24 = vld [vmem:[%s20643_s13 + $0x1d0] sm:$0xff]   ;;  %v15418_v10 = vld [vmem:[%s20643_s13 + $0x1e0] sm:$0xff]  }
0x1928   : > { %v18329_v44 = vpack.c.bf16 %v6874_v33, %v6871_v38  ;;  %v14649_v30 = vpop.f32.mrb[11].mxu0  ;;  %v15417_v38 = vld [vmem:[%s20643_s13 + $0x1d8] sm:$0xff]   ;;  %v15419_v33 = vld [vmem:[%s20643_s13 + $0x1e8] sm:$0xff]  }
0x1929   : > { %v15420_v30 = vld [vmem:[%s20643_s13 + $0x1f0] sm:$0xff]  }
0x192d   : > { %v7206_v18 = vpop.f32.mrb[12].mxu0 }
0x192e   : > { %14519 = vmatmul.mubr.msk.bf16.vlgmr.msra.gmra.mrb[164].mxu1 %vm1253_vm10, %v15407_v60  ;;  %v14686_v61 = vpop.f32.mrb[13].mxu0  ;;  %v15421_v60 = vld [vmem:[%s20643_s13 + $0x1f8] sm:$0xff]  }
0x192f   : > { %14559 = vmatpush3.bf16.msra.mxu1 %v18248_v34  ;;  %v7209_v17 = vpop.f32.mrb[14].mxu0  ;;  %14522 = vmatprep.mubr.msk.bf16.mxu1 %vm1253_vm10, %v15408_v40  ;;  %v15422_v40 = vld [vmem:[%s20643_s13 + $0x200] sm:$0xff]   ;;  %v15427_v61 = vld [vmem:[%s20643_s13 + $0x228] sm:$0xff]  }
0x1930   : > { %14560 = vmatprep.subr.bf16.mxu1 %v18258_v2  ;;  %v18341_v25 = vpack.c.bf16 %v7209_v17, %v7206_v18  ;;  %v14687_v35 = vpop.f32.mrb[15].mxu0  ;;  %v15426_v18 = vld [vmem:[%s20643_s13 + $0x220] sm:$0xff]   ;;  %v15428_v17 = vld [vmem:[%s20643_s13 + $0x230] sm:$0xff]  }
0x1931   : > { %v15429_v35 = vld [vmem:[%s20643_s13 + $0x238] sm:$0xff]  }
0x1933   : > { %14561 = vmatpush3.bf16.msra.mxu1 %v18258_v2 }
0x1934   : > { %14562 = vmatprep.subr.bf16.mxu1 %v18268_v46 }
0x1935   : > { %v7214_v34 = vpop.f32.mrb[16].mxu0 }
0x1936   : > { %14523 = vmatmul.mubr.msk.bf16.gmra.mrb[168].mxu1 %vm1253_vm10, %v15409_v31  ;;  %v14690_v32 = vpop.f32.mrb[17].mxu0  ;;  %v15430_v31 = vld [vmem:[%s20643_s13 + $0x240] sm:$0xff]  }
0x1937   : > { %14563 = vmatpush3.bf16.msra.mxu1 %v18268_v46  ;;  %v7217_v3 = vpop.f32.mrb[18].mxu0  ;;  %14526 = vmatprep.mubr.msk.bf16.mxu1 %vm1253_vm10, %v15410_v52  ;;  %v15431_v52 = vld [vmem:[%s20643_s13 + $0x248] sm:$0xff]   ;;  %v15433_v32 = vld [vmem:[%s20643_s13 + $0x258] sm:$0xff]  }
0x1938   : > { %14604 = vmatprep.subr.bf16.mxu1 %v18278_v55  ;;  %v18355_v15 = vpack.c.bf16 %v7217_v3, %v7214_v34  ;;  %v14691_v2 = vpop.f32.mrb[19].mxu0  ;;  %v15432_v34 = vld [vmem:[%s20643_s13 + $0x250] sm:$0xff]   ;;  %v15434_v3 = vld [vmem:[%s20643_s13 + $0x260] sm:$0xff]  }
0x1939   : > { %v15436_v2 = vld [vmem:[%s20643_s13 + $0x270] sm:$0xff]  }
0x193d   : > { %v7222_v36 = vpop.f32.mrb[20].mxu0 }
0x193e   : > { %14527 = vmatmul.mubr.msk.bf16.gmra.mrb[172].mxu1 %vm1253_vm10, %v15411_v47  ;;  %v14694_v46 = vpop.f32.mrb[21].mxu0  ;;  %v15438_v47 = vld [vmem:[%s20643_s13 + $0x280] sm:$0xff]  }
0x193f   : > { %v7225_v16 = vpop.f32.mrb[22].mxu0  ;;  %14530 = vmatprep.mubr.msk.bf16.mxu1 %vm1253_vm10, %v15412_v29  ;;  %v15439_v29 = vld [vmem:[%s20643_s13 + $0x288] sm:$0xff]   ;;  %v15441_v46 = vld [vmem:[%s20643_s13 + $0x298] sm:$0xff]  }
0x1940   : > { %v18365_v12 = vpack.c.bf16 %v7225_v16, %v7222_v36  ;;  %v14695_v28 = vpop.f32.mrb[23].mxu0  ;;  %v15440_v36 = vld [vmem:[%s20643_s13 + $0x290] sm:$0xff]   ;;  %v15442_v16 = vld [vmem:[%s20643_s13 + $0x2a0] sm:$0xff]  }
0x1941   : > { %v15443_v28 = vld [vmem:[%s20643_s13 + $0x2a8] sm:$0xff]  }
0x1946   : > { %14531 = vmatmul.mubr.msk.bf16.gmra.mrb[176].mxu1 %vm1253_vm10, %v15413_v56  ;;  %v15444_v56 = vld [vmem:[%s20643_s13 + $0x2b0] sm:$0xff]  }
0x1947   : > { %14534 = vmatprep.mubr.msk.bf16.mxu1 %vm1253_vm10, %v15414_v27  ;;  %v15445_v27 = vld [vmem:[%s20643_s13 + $0x2b8] sm:$0xff]  }
0x194e   : > { %14535 = vmatmul.mubr.msk.bf16.gmra.mrb[156].mxu1 %vm1253_vm10, %v15415_v39  ;;  %v15446_v39 = vld [vmem:[%s20643_s13 + $0x2c0] sm:$0xff]  }
0x194f   : > { %14538 = vmatprep.mubr.msk.bf16.mxu1 %vm1253_vm10, %v15416_v24  ;;  %v15449_v24 = vld [vmem:[%s20643_s13 + $0x2d8] sm:$0xff]  }
0x1956   : > { %14539 = vmatmul.mubr.msk.bf16.gmra.mrb[160].mxu1 %vm1253_vm10, %v15417_v38  ;;  %v15451_v38 = vld [vmem:[%s20643_s13 + $0x2e8] sm:$0xff]  }
0x1957   : > { %14564 = vmatprep.mubr.msk.bf16.mxu1 %vm1253_vm10, %v15418_v10  ;;  %v15452_v10 = vld [vmem:[%s20643_s13 + $0x2f0] sm:$0xff]  }
0x195e   : > { %14565 = vmatmul.mubr.msk.bf16.vlgmr.msra.gmra.mrb[164].mxu1 %vm1253_vm10, %v15419_v33  ;;  %v15453_v33 = vld [vmem:[%s20643_s13 + $0x2f8] sm:$0xff]  }
0x195f   : > { %14605 = vmatpush3.bf16.msra.mxu1 %v18278_v55  ;;  %14568 = vmatprep.mubr.msk.bf16.mxu1 %vm1253_vm10, %v15420_v30  ;;  %v15423_v55 = vld [vmem:[%s20643_s13 + $0x208] sm:$0xff]   ;;  %v15454_v30 = vld [vmem:[%s20643_s13 + $0x300] sm:$0xff]  }
0x1960   : > { %14606 = vmatprep.subr.bf16.mxu1 %v18289_v8 }
0x1963   : > { %14607 = vmatpush3.bf16.msra.mxu1 %v18289_v8  ;;  %v15424_v8 = vld [vmem:[%s20643_s13 + $0x210] sm:$0xff]  }
0x1964   : > { %14608 = vmatprep.subr.bf16.mxu1 %v18299_v22 }
0x1966   : > { %14569 = vmatmul.mubr.msk.bf16.gmra.mrb[168].mxu1 %vm1253_vm10, %v15421_v60  ;;  %v15455_v60 = vld [vmem:[%s20643_s13 + $0x308] sm:$0xff]  }
0x1967   : > { %14609 = vmatpush3.bf16.msra.mxu1 %v18299_v22  ;;  %14572 = vmatprep.mubr.msk.bf16.mxu1 %vm1253_vm10, %v15422_v40  ;;  %v15425_v22 = vld [vmem:[%s20643_s13 + $0x218] sm:$0xff]   ;;  %v15456_v40 = vld [vmem:[%s20643_s13 + $0x310] sm:$0xff]  }
0x1968   : > { %14650 = vmatprep.subr.bf16.mxu1 %v18309_v7 }
0x196e   : > { %14573 = vmatmul.mubr.msk.bf16.gmra.mrb[172].mxu1 %vm1253_vm10, %v15423_v55  ;;  %v15457_v55 = vld [vmem:[%s20643_s13 + $0x318] sm:$0xff]  }
0x196f   : > { %14576 = vmatprep.mubr.msk.bf16.mxu1 %vm1253_vm10, %v15424_v8  ;;  %v15458_v8 = vld [vmem:[%s20643_s13 + $0x320] sm:$0xff]  }
0x1976   : > { %14577 = vmatmul.mubr.msk.bf16.gmra.mrb[176].mxu1 %vm1253_vm10, %v15425_v22  ;;  %v15459_v22 = vld [vmem:[%s20643_s13 + $0x328] sm:$0xff]  }
0x1977   : > { %14580 = vmatprep.mubr.msk.bf16.mxu1 %vm1253_vm10, %v15426_v18  ;;  %v15460_v18 = vld [vmem:[%s20643_s13 + $0x330] sm:$0xff]  }
0x197e   : > { %14581 = vmatmul.mubr.msk.bf16.gmra.mrb[156].mxu1 %vm1253_vm10, %v15427_v61  ;;  %v15461_v61 = vld [vmem:[%s20643_s13 + $0x338] sm:$0xff]  }
0x197f   : > { %14584 = vmatprep.mubr.msk.bf16.mxu1 %vm1253_vm10, %v15428_v17  ;;  %v15462_v17 = vld [vmem:[%s20643_s13 + $0x340] sm:$0xff]  }
0x1986   : > { %14585 = vmatmul.mubr.msk.bf16.gmra.mrb[160].mxu1 %vm1253_vm10, %v15429_v35  ;;  %v15463_v35 = vld [vmem:[%s20643_s13 + $0x348] sm:$0xff]  }
0x1987   : > { %14610 = vmatprep.mubr.msk.bf16.mxu1 %vm1253_vm10, %v15430_v31  ;;  %v15464_v31 = vld [vmem:[%s20643_s13 + $0x350] sm:$0xff]  }
0x198e   : > { %14611 = vmatmul.mubr.msk.bf16.vlgmr.msra.gmra.mrb[164].mxu1 %vm1253_vm10, %v15431_v52  ;;  %v15465_v52 = vld [vmem:[%s20643_s13 + $0x358] sm:$0xff]  }
0x198f   : > { %14651 = vmatpush3.bf16.msra.mxu1 %v18309_v7  ;;  %14614 = vmatprep.mubr.msk.bf16.mxu1 %vm1253_vm10, %v15432_v34  ;;  %v15466_v7 = vld [vmem:[%s20647_s17] sm:$0xff]  }
0x1990   : > { %14652 = vmatprep.subr.bf16.mxu1 %v18319_v9  ;;  %14726 = vmatprep.subr.bf16.mxu0 %v15466_v7  ;;  %v15468_v34 = vld [vmem:[%s20647_s17 + $0x20] sm:$0xff]  }
0x1991   : > { %14727 = vmatpush3.bf16.msra.mxu0 %v15466_v7  ;;  %v15470_v7 = vld [vmem:[%s20647_s17 + $0x10] sm:$0xff]  }
0x1993   : > { %14653 = vmatpush3.bf16.msra.mxu1 %v18319_v9  ;;  %v15435_v9 = vld [vmem:[%s20643_s13 + $0x268] sm:$0xff]  }
0x1994   : > { %14654 = vmatprep.subr.bf16.mxu1 %v18329_v44 }
0x1996   : > { %14615 = vmatmul.mubr.msk.bf16.gmra.mrb[168].mxu1 %vm1253_vm10, %v15433_v32  ;;  %v15467_v32 = vld [vmem:[%s20647_s17 + $0x8] sm:$0xff]  }
0x1997   : > { %14655 = vmatpush3.bf16.msra.mxu1 %v18329_v44  ;;  %14618 = vmatprep.mubr.msk.bf16.mxu1 %vm1253_vm10, %v15434_v3  ;;  %v15437_v44 = vld [vmem:[%s20643_s13 + $0x278] sm:$0xff]   ;;  %v15469_v3 = vld [vmem:[%s20647_s17 + $0x28] sm:$0xff]  }
0x1998   : > { %14696 = vmatprep.subr.bf16.mxu1 %v18341_v25  ;;  %14728 = vmatprep.subr.bf16.mxu0 %v15467_v32 }
0x1999   : > { %14729 = vmatpush3.bf16.msra.mxu0 %v15467_v32  ;;  %v4324_v32 = vld [vmem:[%s20646_s16 + $0x40] sm:$0xff] }
0x199a   : > { %14754 = vmatprep.subr.bf16.mxu0 %v15470_v7 }
0x199e   : > { %14619 = vmatmul.mubr.msk.bf16.gmra.mrb[172].mxu1 %vm1253_vm10, %v15435_v9  ;;  %v4318_v9 = vld [vmem:[%s20646_s16 + $0x10] sm:$0xff] }
0x199f   : > { %14622 = vmatprep.mubr.msk.bf16.mxu1 %vm1253_vm10, %v15436_v2  ;;  %v4316_v2 = vld [vmem:[%s20646_s16] sm:$0xff] }
0x19a6   : > { %14623 = vmatmul.mubr.msk.bf16.gmra.mrb[176].mxu1 %vm1253_vm10, %v15437_v44  ;;  %v4319_v44 = vld [vmem:[%s20646_s16 + $0x18] sm:$0xff] }
0x19a7   : > { %14626 = vmatprep.mubr.msk.bf16.mxu1 %vm1253_vm10, %v15438_v47  ;;  %v4676_v47 = vadd.f32 %v18134_v51, %v4318_v9  ;;  %v4322_v51 = vld [vmem:[%s20646_s16 + $0x30] sm:$0xff] }
0x19ae   : > { %14627 = vmatmul.mubr.msk.bf16.gmra.mrb[156].mxu1 %vm1253_vm10, %v15439_v29  ;;  %v4317_v29 = vld [vmem:[%s20646_s16 + $0x8] sm:$0xff] }
0x19af   : > { %14630 = vmatprep.mubr.msk.bf16.mxu1 %vm1253_vm10, %v15440_v36  ;;  %v4674_v36 = vadd.f32 %v18136_v0, %v4316_v2  ;;  %v4320_v0 = vld [vmem:[%s20646_s16 + $0x20] sm:$0xff]  ;;  %v4327_v2 = vld [vmem:[%s20646_s16 + $0x58] sm:$0xff] }
0x19b6   : > { %14631 = vmatmul.mubr.msk.bf16.gmra.mrb[160].mxu1 %vm1253_vm10, %v15441_v46 }
0x19b7   : > { %14656 = vmatprep.mubr.msk.bf16.mxu1 %vm1253_vm10, %v15442_v16  ;;  %v4677_v16 = vadd.f32 %v18138_v20, %v4319_v44  ;;  %v4323_v20 = vld [vmem:[%s20646_s16 + $0x38] sm:$0xff] }
0x19be   : > { %14657 = vmatmul.mubr.msk.bf16.vlgmr.msra.gmra.mrb[164].mxu1 %vm1253_vm10, %v15443_v28 }
0x19bf   : > { %14697 = vmatpush3.bf16.msra.mxu1 %v18341_v25  ;;  %14660 = vmatprep.mubr.msk.bf16.mxu1 %vm1253_vm10, %v15444_v56  ;;  %v15447_v25 = vld [vmem:[%s20643_s13 + $0x2c8] sm:$0xff]  }
0x19c0   : > { %14698 = vmatprep.subr.bf16.mxu1 %v18355_v15 }
0x19c3   : > { %14699 = vmatpush3.bf16.msra.mxu1 %v18355_v15  ;;  %v15448_v15 = vld [vmem:[%s20643_s13 + $0x2d0] sm:$0xff]  }
0x19c4   : > { %14700 = vmatprep.subr.bf16.mxu1 %v18365_v12 }
0x19c6   : > { %14661 = vmatmul.mubr.msk.bf16.gmra.mrb[168].mxu1 %vm1253_vm10, %v15445_v27  ;;  %v4675_v27 = vadd.f32 %v18140_v37, %v4317_v29 }
0x19c7   : > { %14701 = vmatpush3.bf16.msra.mxu1 %v18365_v12  ;;  %14664 = vmatprep.mubr.msk.bf16.mxu1 %vm1253_vm10, %v15446_v39  ;;  %v15450_v12 = vld [vmem:[%s20643_s13 + $0x2e0] sm:$0xff]  }
0x19c8   : > { %14782 = vmatprep.subr.bf16.mxu1 %v15468_v34 }
0x19ce   : > { %14665 = vmatmul.mubr.msk.bf16.gmra.mrb[172].mxu1 %vm1253_vm10, %v15447_v25 }
0x19cf   : > { %14668 = vmatprep.mubr.msk.bf16.mxu1 %vm1253_vm10, %v15448_v15 }
0x19d6   : > { %14669 = vmatmul.mubr.msk.bf16.gmra.mrb[176].mxu1 %vm1253_vm10, %v15449_v24 }
0x19d7   : > { %14672 = vmatprep.mubr.msk.bf16.mxu1 %vm1253_vm10, %v15450_v12 }
0x19de   : > { %14673 = vmatmul.mubr.msk.bf16.gmra.mrb[156].mxu1 %vm1253_vm10, %v15451_v38 }
0x19df   : > { %14676 = vmatprep.mubr.msk.bf16.mxu1 %vm1253_vm10, %v15452_v10 }
0x19e6   : > { %14677 = vmatmul.mubr.msk.bf16.gmra.mrb[160].mxu1 %vm1253_vm10, %v15453_v33 }
0x19e7   : > { %14702 = vmatprep.mubr.msk.bf16.mxu1 %vm1253_vm10, %v15454_v30  ;;  %v4680_v30 = vadd.f32 %v18144_v26, %v4322_v51  ;;  %v4328_v51 = vld [vmem:[%s20646_s16 + $0x60] sm:$0xff] }
0x19ee   : > { %14703 = vmatmul.mubr.msk.bf16.vlgmr.msra.gmra.mrb[164].mxu1 %vm1253_vm10, %v15455_v60  ;;  %v4321_v60 = vld [vmem:[%s20646_s16 + $0x28] sm:$0xff] }
0x19ef   : > { %14706 = vmatprep.mubr.msk.bf16.mxu1 %vm1253_vm10, %v15456_v40  ;;  %14783 = vmatpush3.bf16.msra.mxu1 %v15468_v34  ;;  %v4679_v26 = vadd.f32 %v18150_v11, %v4321_v60  ;;  %v4686_v60 = vadd.f32 %v18162_v58, %v4328_v51 }
0x19f0   : > { %14784 = vmatprep.subr.bf16.mxu1 %v15469_v3 }
0x19f3   : > { %14785 = vmatpush3.bf16.msra.mxu1 %v15469_v3 }
0x19f6   : > { %14707 = vmatmul.mubr.msk.bf16.gmra.mrb[168].mxu1 %vm1253_vm10, %v15457_v55  ;;  %v4678_v55 = vadd.f32 %v18146_v23, %v4320_v0 }
0x19f7   : > { %14710 = vmatprep.mubr.msk.bf16.mxu1 %vm1253_vm10, %v15458_v8 }
0x19fe   : > { %14711 = vmatmul.mubr.msk.bf16.gmra.mrb[172].mxu1 %vm1253_vm10, %v15459_v22 }
0x19ff   : > { %14714 = vmatprep.mubr.msk.bf16.mxu1 %vm1253_vm10, %v15460_v18  ;;  %v4681_v18 = vadd.f32 %v18148_v1, %v4323_v20  ;;  %v4326_v1 = vld [vmem:[%s20646_s16 + $0x50] sm:$0xff] }
0x1a00   : > { %v4684_v29 = vadd.f32 %v18152_v21, %v4326_v1  ;;  %v4334_v1 = vld [vmem:[%s20646_s16 + $0x90] sm:$0xff] }
0x1a06   : > { %14715 = vmatmul.mubr.msk.bf16.gmra.mrb[176].mxu1 %vm1253_vm10, %v15461_v61 }
0x1a07   : > { %14718 = vmatprep.mubr.msk.bf16.mxu1 %vm1253_vm10, %v15462_v17 }
0x1a0e   : > { %14719 = vmatmul.mubr.msk.bf16.gmra.mrb[156].mxu1 %vm1253_vm10, %v15463_v35  ;;  %v15471_v35 = vld [vmem:[%s20647_s17 + $0x18] sm:$0xff]  }
0x1a0f   : > { %14722 = vmatprep.mubr.msk.bf16.mxu1 %vm1253_vm10, %v15464_v31 }
0x1a16   : > { %14723 = vmatmul.mubr.msk.bf16.gmra.mrb[160].mxu1 %vm1253_vm10, %v15465_v52 }
0x1ac1   : > { %v14704_v46 = vpop.f32.mrb[164].mxu1 }
0x1ac2   : > { %v14985_v28 = vadd.f32 %v14704_v46, %v4676_v47  ;;  %v7387_v56 = vpop.f32.mrb[165].mxu1  ;;  %v4682_v46 = vadd.f32 %v18154_v43, %v4324_v32  ;;  %v4332_v32 = vld [vmem:[%s20646_s16 + $0x80] sm:$0xff] }
0x1ac3   : > { %v14987_v39 = vadd.f32 %v7387_v56, %v4674_v36  ;;  %v14705_v25 = vpop.f32.mrb[166].mxu1  ;;  %v4325_v36 = vld [vmem:[%s20646_s16 + $0x48] sm:$0xff]  ;;  %v4685_v56 = vadd.f32 %v18156_v63, %v4327_v2  ;;  %v4330_v63 = vld [vmem:[%s20646_s16 + $0x70] sm:$0xff]  ;;  %v4335_v2 = vld [vmem:[%s20646_s16 + $0x98] sm:$0xff] }
0x1ac4   : > { %v14989_v15 = vadd.f32 %v14705_v25, %v4677_v16  ;;  %v7390_v24 = vpop.f32.mrb[167].mxu1  ;;  %v7508_v38 = vmax.f32 %v14985_v28, 0.0  ;;  %v4683_v25 = vadd.f32 %v18158_v4, %v4325_v36 }
0x1ac5   : > { %v14991_v12 = vadd.f32 %v7390_v24, %v4675_v27  ;;  %v7506_v37 = vmax.f32 %v14987_v39, 0.0 }
0x1ac6   : > { %v7509_v10 = vmax.f32 %v14989_v15, 0.0 }
0x1ac7   : > { %v7507_v33 = vmax.f32 %v14991_v12, 0.0 }
0x1ac8   : > { %v18640_v40 = vpack.c.bf16 %v7509_v10, %v7508_v38  ;;  %v4331_v38 = vld [vmem:[%s20646_s16 + $0x78] sm:$0xff] }
0x1ac9   : > { %v18643_v8 = vpack.c.bf16 %v7507_v33, %v7506_v37  ;;  %v14708_v22 = vpop.f32.mrb[168].mxu1  ;;  %v4688_v37 = vadd.f32 %v18160_v57, %v4330_v63  ;;  %v4329_v33 = vld [vmem:[%s20646_s16 + $0x68] sm:$0xff]  ;;  %v4336_v63 = vld [vmem:[%s20646_s16 + $0xa0] sm:$0xff] }
0x1aca   : > { %20810 = vst [vmem:[#allocation26_spill] sm:$0xff] %v18640_v40  ;;  %v14993_v61 = vadd.f32 %v14708_v22, %v4680_v30  ;;  %v7403_v17 = vpop.f32.mrb[169].mxu1 }
0x1acb   : > { %v14995_v31 = vadd.f32 %v7403_v17, %v4678_v55  ;;  %v14709_v52 = vpop.f32.mrb[170].mxu1  ;;  %14730 = vmatprep.mubr.msk.bf16.mxu0 %vm929_vm2, %v18643_v8  ;;  %14786 = vmatprep.mubr.msk.bf16.mxu1 %vm929_vm2, %v18643_v8 }
0x1acc   : > { %v14997_v23 = vadd.f32 %v14709_v52, %v4681_v18  ;;  %v7406_v34 = vpop.f32.mrb[171].mxu1  ;;  %14731 = vmatmul.mubr.msk.bf16.vlgmr.msra.gmra.mrb[24].mxu0 %vm929_vm2, %v18640_v40  ;;  %14787 = vmatmul.mubr.msk.bf16.vlgmr.msra.gmra.mrb[180].mxu1 %vm929_vm2, %v18640_v40  ;;  %v7512_v3 = vmax.f32 %v14993_v61, 0.0  ;;  %v4689_v18 = vadd.f32 %v18164_v45, %v4331_v38 }
0x1acd   : > { %v14999_v11 = vadd.f32 %v7406_v34, %v4679_v26  ;;  %14755 = vmatpush3.bf16.msra.mxu0 %v15470_v7  ;;  %v7510_v44 = vmax.f32 %v14995_v31, 0.0 }
0x1ace   : > { %v7513_v9 = vmax.f32 %v14997_v23, 0.0  ;;  %14756 = vmatprep.subr.bf16.mxu0 %v15471_v35 }
0x1acf   : > { %v7511_v47 = vmax.f32 %v14999_v11, 0.0 }
0x1ad0   : > { %v18671_v7 = vpack.c.bf16 %v7513_v9, %v7512_v3 }
0x1ad1   : > { %v18674_v16 = vpack.c.bf16 %v7511_v47, %v7510_v44  ;;  %v14712_v28 = vpop.f32.mrb[172].mxu1  ;;  %14757 = vmatpush3.bf16.msra.mxu0 %v15471_v35  ;;  %v4687_v35 = vadd.f32 %v18166_v50, %v4329_v33 }
0x1ad2   : > { %20811 = vst [vmem:[#allocation27_spill] sm:$0xff] %v18671_v7  ;;  %v15001_v27 = vadd.f32 %v14712_v28, %v4684_v29  ;;  %v7419_v39 = vpop.f32.mrb[173].mxu1  ;;  %v4333_v29 = vld [vmem:[%s20646_s16 + $0x88] sm:$0xff] }
0x1ad3   : > { %20812 = vst [vmem:[#allocation28_spill] sm:$0xff] %v18674_v16  ;;  %v15003_v15 = vadd.f32 %v7419_v39, %v4682_v46  ;;  %v14713_v21 = vpop.f32.mrb[174].mxu1  ;;  %14734 = vmatprep.mubr.msk.bf16.mxu0 %vm929_vm2, %v18674_v16  ;;  %14790 = vmatprep.mubr.msk.bf16.mxu1 %vm929_vm2, %v18674_v16 }
0x1ad4   : > { %v15005_v24 = vadd.f32 %v14713_v21, %v4685_v56  ;;  %v7422_v43 = vpop.f32.mrb[175].mxu1  ;;  %14735 = vmatmul.mubr.msk.bf16.gmra.mrb[28].mxu0 %vm929_vm2, %v18671_v7  ;;  %14791 = vmatmul.mubr.msk.bf16.gmra.mrb[184].mxu1 %vm929_vm2, %v18671_v7  ;;  %v7516_v12 = vmax.f32 %v15001_v27, 0.0 }
0x1ad5   : > { %v15007_v4 = vadd.f32 %v7422_v43, %v4683_v25  ;;  %v7514_v10 = vmax.f32 %v15003_v15, 0.0 }
0x1ad6   : > { %v7517_v0 = vmax.f32 %v15005_v24, 0.0  ;;  %v4338_v24 = vld [vmem:[%s20646_s16 + $0xb0] sm:$0xff] }
0x1ad7   : > { %v7515_v20 = vmax.f32 %v15007_v4, 0.0 }
0x1ad8   : > { %v18699_v30 = vpack.c.bf16 %v7517_v0, %v7516_v12  ;;  %v4339_v12 = vld [vmem:[%s20646_s16 + $0xb8] sm:$0xff] }
0x1ad9   : > { %v18702_v55 = vpack.c.bf16 %v7515_v20, %v7514_v10  ;;  %v14716_v22 = vpop.f32.mrb[176].mxu1  ;;  %v4337_v10 = vld [vmem:[%s20646_s16 + $0xa8] sm:$0xff] }
0x1ada   : > { %20813 = vst [vmem:[#allocation29_spill] sm:$0xff] %v18699_v30  ;;  %v15009_v61 = vadd.f32 %v14716_v22, %v4688_v37  ;;  %v7435_v17 = vpop.f32.mrb[177].mxu1 }
0x1adb   : > { %20814 = vst [vmem:[#allocation30_spill] sm:$0xff] %v18702_v55  ;;  %v15011_v26 = vadd.f32 %v7435_v17, %v4686_v60  ;;  %v14717_v31 = vpop.f32.mrb[178].mxu1  ;;  %14738 = vmatprep.mubr.msk.bf16.mxu0 %vm929_vm2, %v18702_v55  ;;  %14794 = vmatprep.mubr.msk.bf16.mxu1 %vm929_vm2, %v18702_v55 }
0x1adc   : > { %v15013_v57 = vadd.f32 %v14717_v31, %v4689_v18  ;;  %v7438_v52 = vpop.f32.mrb[179].mxu1  ;;  %14739 = vmatmul.mubr.msk.bf16.gmra.mrb[32].mxu0 %vm929_vm2, %v18699_v30  ;;  %14795 = vmatmul.mubr.msk.bf16.gmra.mrb[188].mxu1 %vm929_vm2, %v18699_v30  ;;  %v7520_v45 = vmax.f32 %v15009_v61, 0.0 }
0x1add   : > { %v15015_v58 = vadd.f32 %v7438_v52, %v4687_v35  ;;  %v7518_v50 = vmax.f32 %v15011_v26, 0.0  ;;  %v15474_v52 = vld [vmem:[%s20644_s14 + $0x184] ss:$8 sps:$4 sm:$0xff]  }
0x1ade   : > { %v7521_v23 = vmax.f32 %v15013_v57, 0.0  ;;  %v20710_v57 = vmov 0  }
0x1adf   : > { %v7519_v34 = vmax.f32 %v15015_v58, 0.0  ;;  %8815 = vmatprep.subr.bf16.mxu1 %v20710_v57  ;;  %8086 = vmatprep.subr.bf16.mxu0 %v20710_v57  ;;  %v15492_v58 = vld [vmem:[%s20644_s14 + $0xc4] ss:$8 sps:$4 sm:$0xff]  }
0x1ae0   : > { %v18717_v11 = vpack.c.bf16 %v7521_v23, %v7520_v45  ;;  %15318 = vset.pattern.permute.xlu1 %v20710_v57  ;;  %15319 = vset.pattern.permute.xlu0 %v20710_v57 }
0x1ae1   : > { %v18722_v3 = vpack.c.bf16 %v7519_v34, %v7518_v50  ;;  %v14720_v9 = vpop.f32.mrb[156].mxu1 }
0x1ae2   : > { %20815 = vst [vmem:[#allocation31_spill] sm:$0xff] %v18717_v11  ;;  %v15016_v44 = vadd.f32 %v14720_v9, %v4334_v1  ;;  %v7451_v47 = vpop.f32.mrb[157].mxu1 }
0x1ae3   : > { %20816 = vst [vmem:[#allocation32_spill] sm:$0xff] %v18722_v3  ;;  %v15017_v36 = vadd.f32 %v7451_v47, %v4332_v32  ;;  %v14721_v46 = vpop.f32.mrb[158].mxu1  ;;  %14742 = vmatprep.mubr.msk.bf16.mxu0 %vm929_vm2, %v18722_v3  ;;  %14798 = vmatprep.mubr.msk.bf16.mxu1 %vm929_vm2, %v18722_v3 }
0x1ae4   : > { %v15018_v28 = vadd.f32 %v14721_v46, %v4335_v2  ;;  %v7454_v56 = vpop.f32.mrb[159].mxu1  ;;  %14743 = vmatmul.mubr.msk.bf16.gmra.mrb[36].mxu0 %vm929_vm2, %v18717_v11  ;;  %14799 = vmatmul.mubr.msk.bf16.gmra.mrb[192].mxu1 %vm929_vm2, %v18717_v11  ;;  %v7524_v39 = vmax.f32 %v15016_v44, 0.0 }
0x1ae5   : > { %v15019_v27 = vadd.f32 %v7454_v56, %v4333_v29  ;;  %v7522_v15 = vmax.f32 %v15017_v36, 0.0 }
0x1ae6   : > { %v7525_v25 = vmax.f32 %v15018_v28, 0.0 }
0x1ae7   : > { %v7523_v21 = vmax.f32 %v15019_v27, 0.0 }
0x1ae8   : > { %v18741_v43 = vpack.c.bf16 %v7525_v25, %v7524_v39 }
0x1ae9   : > { %v18746_v4 = vpack.c.bf16 %v7523_v21, %v7522_v15  ;;  %v14724_v51 = vpop.f32.mrb[160].mxu1 }
0x1aea   : > { %20817 = vst [vmem:[#allocation33_spill] sm:$0xff] %v18741_v43  ;;  %v15020_v0 = vadd.f32 %v14724_v51, %v4338_v24  ;;  %v7467_v38 = vpop.f32.mrb[161].mxu1 }
0x1aeb   : > { %20818 = vst [vmem:[#allocation34_spill] sm:$0xff] %v18746_v4  ;;  %v15021_v20 = vadd.f32 %v7467_v38, %v4336_v63  ;;  %v14725_v37 = vpop.f32.mrb[162].mxu1  ;;  %14746 = vmatprep.mubr.msk.bf16.mxu0 %vm929_vm2, %v18746_v4  ;;  %14802 = vmatprep.mubr.msk.bf16.mxu1 %vm929_vm2, %v18746_v4 }
0x1aec   : > { %v15022_v33 = vadd.f32 %v14725_v37, %v4339_v12  ;;  %v7470_v60 = vpop.f32.mrb[163].mxu1  ;;  %14747 = vmatmul.mubr.msk.bf16.gmra.mrb[40].mxu0 %vm929_vm2, %v18741_v43  ;;  %14803 = vmatmul.mubr.msk.bf16.gmra.mrb[196].mxu1 %vm929_vm2, %v18741_v43  ;;  %v7528_v18 = vmax.f32 %v15020_v0, 0.0 }
0x1aed   : > { %v15023_v22 = vadd.f32 %v7470_v60, %v4337_v10  ;;  %v7526_v17 = vmax.f32 %v15021_v20, 0.0 }
0x1aee   : > { %v7529_v61 = vmax.f32 %v15022_v33, 0.0 }
0x1aef   : > { %v7527_v35 = vmax.f32 %v15023_v22, 0.0 }
0x1af0   : > { %v18762_v26 = vpack.c.bf16 %v7529_v61, %v7528_v18 }
0x1af1   : > { %v18764_v31 = vpack.c.bf16 %v7527_v35, %v7526_v17 }
0x1af2   : > { %20819 = vst [vmem:[#allocation35_spill] sm:$0xff] %v18762_v26 }
0x1af3   : > { %20820 = vst [vmem:[#allocation36_spill] sm:$0xff] %v18764_v31  ;;  %14750 = vmatprep.mubr.msk.bf16.mxu0 %vm929_vm2, %v18764_v31  ;;  %14806 = vmatprep.mubr.msk.bf16.mxu1 %vm929_vm2, %v18764_v31 }
0x1af4   : > { %14751 = vmatmul.mubr.msk.bf16.gmra.mrb[44].mxu0 %vm929_vm2, %v18762_v26  ;;  %14807 = vmatmul.mubr.msk.bf16.gmra.mrb[200].mxu1 %vm929_vm2, %v18762_v26 }
0x1af5   : > { %14758 = vmatprep.mubr.msk.bf16.mxu0 %vm929_vm2, %v18643_v8  ;;  %12918 = vmatprep.mubr.msk.bf16.mxu1 %vm931_vm3, %v15474_v52 }
0x1afc   : > { %14759 = vmatmul.mubr.msk.bf16.vlgmr.msra.gmra.mrb[48].mxu0 %vm929_vm2, %v18640_v40 }
0x1afd   : > { %14762 = vmatprep.mubr.msk.bf16.mxu0 %vm929_vm2, %v18674_v16 }
0x1b04   : > { %14763 = vmatmul.mubr.msk.bf16.gmra.mrb[52].mxu0 %vm929_vm2, %v18671_v7 }
0x1b05   : > { %14766 = vmatprep.mubr.msk.bf16.mxu0 %vm929_vm2, %v18702_v55 }
0x1b0c   : > { %14767 = vmatmul.mubr.msk.bf16.gmra.mrb[56].mxu0 %vm929_vm2, %v18699_v30 }
0x1b0d   : > { %14770 = vmatprep.mubr.msk.bf16.mxu0 %vm929_vm2, %v18722_v3 }
0x1b14   : > { %14771 = vmatmul.mubr.msk.bf16.gmra.mrb[60].mxu0 %vm929_vm2, %v18717_v11 }
0x1b15   : > { %14774 = vmatprep.mubr.msk.bf16.mxu0 %vm929_vm2, %v18746_v4 }
0x1b1c   : > { %14775 = vmatmul.mubr.msk.bf16.gmra.mrb[64].mxu0 %vm929_vm2, %v18741_v43 }
0x1b1d   : > { %14778 = vmatprep.mubr.msk.bf16.mxu0 %vm929_vm2, %v18764_v31 }
0x1b24   : > { %14779 = vmatmul.mubr.msk.bf16.gmra.mrb[68].mxu0 %vm929_vm2, %v18762_v26 }
0x1b25   : > { %12804 = vmatprep.mubr.msk.bf16.mxu0 %vm931_vm3, %v15492_v58 }
0x1b9f   : > { %v18810_v45 = vpop.f32.mrb[24].mxu0  ;;  %v14788_v23 = vpop.f32.mrb[180].mxu1 }
0x1ba0   : > { %v18812_v50 = vpop.f32.mrb[25].mxu0  ;;  %v8539_v34 = vpop.f32.mrb[181].mxu1 }
0x1ba1   : > { %v18814_v1 = vpop.f32.mrb[26].mxu0  ;;  %v14789_v32 = vpop.f32.mrb[182].mxu1 }
0x1ba2   : > { %v7748_v9 = vpack.c.bf16 %v18814_v1, %v18810_v45  ;;  %v8660_v2 = vpack.c.bf16 %v14789_v32, %v14788_v23  ;;  %v18818_v44 = vpop.f32.mrb[27].mxu0  ;;  %v8542_v47 = vpop.f32.mrb[183].mxu1  ;;  %v15502_v45 = vld [vmem:[%s20644_s14 + $0xe0] ss:$8 sps:$4 sm:$0xff]  }
0x1ba3   : > { %v7747_v29 = vpack.c.bf16 %v18818_v44, %v18812_v50  ;;  %v8659_v36 = vpack.c.bf16 %v8542_v47, %v8539_v34  ;;  %v15504_v50 = vld [vmem:[%s20644_s14 + $0xe4] ss:$8 sps:$4 sm:$0xff]   ;;  %v15507_v1 = vld [vmem:[%s20644_s14 + $0x200] ss:$8 sps:$4 sm:$0xff]  }
0x1ba4   : > { %v15505_v44 = vld [vmem:[%s20644_s14 + $0x204] ss:$8 sps:$4 sm:$0xff]  }
0x1ba5   : > { %8816 = vmatpush1.bf16.msra.mxu1 %v8659_v36 }
0x1ba6   : > { %8817 = vmatprep.subr.bf16.mxu1 %v20710_v57 }
0x1ba7   : > { %v18823_v46 = vpop.f32.mrb[28].mxu0  ;;  %v14792_v28 = vpop.f32.mrb[184].mxu1 }
0x1ba8   : > { %v18825_v56 = vpop.f32.mrb[29].mxu0  ;;  %v8555_v27 = vpop.f32.mrb[185].mxu1 }
0x1ba9   : > { %v18827_v39 = vpop.f32.mrb[30].mxu0  ;;  %v14793_v25 = vpop.f32.mrb[186].mxu1  ;;  %8818 = vmatpush1.bf16.msra.mxu1 %v8660_v2 }
0x1baa   : > { %v8662_v21 = vpack.c.bf16 %v14793_v25, %v14792_v28  ;;  %v18831_v24 = vpop.f32.mrb[31].mxu0  ;;  %v8558_v63 = vpop.f32.mrb[187].mxu1  ;;  %8819 = vmatprep.subr.bf16.mxu1 %v20710_v57 }
0x1bab   : > { %v8661_v12 = vpack.c.bf16 %v8558_v63, %v8555_v27 }
0x1bad   : > { %8820 = vmatpush1.bf16.msra.mxu1 %v8661_v12 }
0x1bae   : > { %8821 = vmatprep.subr.bf16.mxu1 %v20710_v57 }
0x1baf   : > { %v18837_v0 = vpop.f32.mrb[32].mxu0  ;;  %v14796_v38 = vpop.f32.mrb[188].mxu1 }
0x1bb0   : > { %v18839_v10 = vpop.f32.mrb[33].mxu0  ;;  %v8571_v20 = vpop.f32.mrb[189].mxu1 }
0x1bb1   : > { %v18841_v37 = vpop.f32.mrb[34].mxu0  ;;  %v14797_v33 = vpop.f32.mrb[190].mxu1  ;;  %8822 = vmatpush1.bf16.msra.mxu1 %v8662_v21 }
0x1bb2   : > { %v8664_v22 = vpack.c.bf16 %v14797_v33, %v14796_v38  ;;  %v18845_v18 = vpop.f32.mrb[35].mxu0  ;;  %v8574_v61 = vpop.f32.mrb[191].mxu1  ;;  %8823 = vmatprep.subr.bf16.mxu1 %v20710_v57 }
0x1bb3   : > { %v8663_v35 = vpack.c.bf16 %v8574_v61, %v8571_v20 }
0x1bb5   : > { %8824 = vmatpush1.bf16.msra.mxu1 %v8663_v35 }
0x1bb6   : > { %8825 = vmatprep.subr.bf16.mxu1 %v20710_v57 }
0x1bb7   : > { %v18851_v52 = vpop.f32.mrb[36].mxu0  ;;  %v14800_v58 = vpop.f32.mrb[192].mxu1 }
0x1bb8   : > { %v18853_v23 = vpop.f32.mrb[37].mxu0  ;;  %v8587_v34 = vpop.f32.mrb[193].mxu1 }
0x1bb9   : > { %v18855_v32 = vpop.f32.mrb[38].mxu0  ;;  %v14801_v2 = vpop.f32.mrb[194].mxu1  ;;  %8826 = vmatpush1.bf16.msra.mxu1 %v8664_v22 }
0x1bba   : > { %v8666_v36 = vpack.c.bf16 %v14801_v2, %v14800_v58  ;;  %v18859_v28 = vpop.f32.mrb[39].mxu0  ;;  %v8590_v27 = vpop.f32.mrb[195].mxu1  ;;  %8827 = vmatprep.subr.bf16.mxu1 %v20710_v57 }
0x1bbb   : > { %v8665_v21 = vpack.c.bf16 %v8590_v27, %v8587_v34 }
0x1bbd   : > { %8828 = vmatpush1.bf16.msra.mxu1 %v8665_v21 }
0x1bbe   : > { %8829 = vmatprep.subr.bf16.mxu1 %v20710_v57 }
0x1bbf   : > { %v18865_v63 = vpop.f32.mrb[40].mxu0  ;;  %v14804_v12 = vpop.f32.mrb[196].mxu1 }
0x1bc0   : > { %v18867_v38 = vpop.f32.mrb[41].mxu0  ;;  %v8603_v20 = vpop.f32.mrb[197].mxu1 }
0x1bc1   : > { %v18869_v33 = vpop.f32.mrb[42].mxu0  ;;  %v14805_v22 = vpop.f32.mrb[198].mxu1  ;;  %8830 = vmatpush1.bf16.msra.mxu1 %v8666_v36 }
0x1bc2   : > { %v8668_v35 = vpack.c.bf16 %v14805_v22, %v14804_v12  ;;  %v18873_v58 = vpop.f32.mrb[43].mxu0  ;;  %v8606_v34 = vpop.f32.mrb[199].mxu1  ;;  %8831 = vmatprep.subr.bf16.mxu1 %v20710_v57  ;;  %v15475_v22 = vld [vmem:[%s20644_s14 + $0x194] ss:$8 sps:$4 sm:$0xff]  }
0x1bc3   : > { %v8667_v27 = vpack.c.bf16 %v8606_v34, %v8603_v20  ;;  %v15527_v34 = vld [vmem:[%s20647_s17 + $0x48] sm:$0xff]  }
0x1bc5   : > { %8832 = vmatpush1.bf16.msra.mxu1 %v8667_v27 }
0x1bc6   : > { %8833 = vmatprep.subr.bf16.mxu1 %v20710_v57 }
0x1bc7   : > { %v18879_v21 = vpop.f32.mrb[44].mxu0  ;;  %v14808_v47 = vpop.f32.mrb[200].mxu1 }
0x1bc8   : > { %v18881_v36 = vpop.f32.mrb[45].mxu0  ;;  %v8619_v25 = vpop.f32.mrb[201].mxu1 }
0x1bc9   : > { %v18883_v61 = vpop.f32.mrb[46].mxu0  ;;  %v14809_v12 = vpop.f32.mrb[202].mxu1  ;;  %8834 = vmatpush1.bf16.msra.mxu1 %v8668_v35  ;;  %v15526_v35 = vld [vmem:[%s20647_s17 + $0x40] sm:$0xff]  }
0x1bca   : > { %v8670_v60 = vpack.c.bf16 %v14809_v12, %v14808_v47  ;;  %v18887_v17 = vpop.f32.mrb[47].mxu0  ;;  %v8622_v20 = vpop.f32.mrb[203].mxu1  ;;  %8835 = vmatprep.subr.bf16.mxu1 %v20710_v57  ;;  %v15472_v47 = vld [vmem:[%s20644_s14 + $0x180] ss:$8 sps:$4 sm:$0xff]  }
0x1bcb   : > { %v8669_v27 = vpack.c.bf16 %v8622_v20, %v8619_v25 }
0x1bcd   : > { %8836 = vmatpush1.bf16.msra.mxu1 %v8669_v27 }
0x1bce   : > { %8837 = vmatprep.subr.bf16.mxu1 %v20710_v57 }
0x1bcf   : > { %v14760_v2 = vpop.f32.mrb[48].mxu0 }
0x1bd0   : > { %v7810_v15 = vpop.f32.mrb[49].mxu0 }
0x1bd1   : > { %v14761_v12 = vpop.f32.mrb[50].mxu0  ;;  %8838 = vmatpush1.bf16.msra.mxu1 %v8670_v60 }
0x1bd2   : > { %v7931_v25 = vpack.c.bf16 %v14761_v12, %v14760_v2  ;;  %v7813_v20 = vpop.f32.mrb[51].mxu0  ;;  %14838 = vmatprep.subr.bf16.mxu1 %v15526_v35  ;;  %v15477_v2 = vld [vmem:[%s20644_s14 + $0x190] ss:$8 sps:$4 sm:$0xff]  }
0x1bd3   : > { %v7930_v27 = vpack.c.bf16 %v7813_v20, %v7810_v15  ;;  %v15478_v15 = vld [vmem:[%s20644_s14 + $0x1a4] ss:$8 sps:$4 sm:$0xff]  }
0x1bd4   : > { %8848 = vmatmul.mubr.bf16.vlgmr.msra.gmra.mrb[204].mxu1 %v15472_v47 }
0x1bd5   : > { %8087 = vmatpush1.bf16.msra.mxu0 %v7930_v27  ;;  %12919 = vmatprep.mubr.msk.bf16.mxu1 %vm931_vm3, %v15475_v22  ;;  %v15480_v27 = vld [vmem:[%s20644_s14 + $0x1a0] ss:$8 sps:$4 sm:$0xff]  }
0x1bd6   : > { %8088 = vmatprep.subr.bf16.mxu0 %v20710_v57  ;;  %14839 = vmatpush3.bf16.msra.mxu1 %v15526_v35 }
0x1bd7   : > { %v14764_v60 = vpop.f32.mrb[52].mxu0  ;;  %14840 = vmatprep.subr.bf16.mxu1 %v15527_v34 }
0x1bd8   : > { %v7826_v51 = vpop.f32.mrb[53].mxu0 }
0x1bd9   : > { %v14765_v12 = vpop.f32.mrb[54].mxu0  ;;  %8089 = vmatpush1.bf16.msra.mxu0 %v7931_v25 }
0x1bda   : > { %v7933_v47 = vpack.c.bf16 %v14765_v12, %v14764_v60  ;;  %v7829_v20 = vpop.f32.mrb[55].mxu0  ;;  %8090 = vmatprep.subr.bf16.mxu0 %v20710_v57  ;;  %14841 = vmatpush3.bf16.msra.mxu1 %v15527_v34 }
0x1bdb   : > { %v7932_v22 = vpack.c.bf16 %v7829_v20, %v7826_v51  ;;  %9775 = vmatprep.subr.bf16.mxu1 %v20710_v57  ;;  %v15481_v51 = vld [vmem:[%s20644_s14 + $0x1b4] ss:$8 sps:$4 sm:$0xff]  }
0x1bdc   : > { %8856 = vmatmul.mubr.bf16.gmra.mrb[208].mxu1 %v15477_v2 }
0x1bdd   : > { %8091 = vmatpush1.bf16.msra.mxu0 %v7932_v22  ;;  %12920 = vmatprep.mubr.msk.bf16.mxu1 %vm931_vm3, %v15478_v15 }
0x1bde   : > { %8092 = vmatprep.subr.bf16.mxu0 %v20710_v57 }
0x1bdf   : > { %v14768_v35 = vpop.f32.mrb[56].mxu0 }
0x1be0   : > { %v7842_v25 = vpop.f32.mrb[57].mxu0 }
0x1be1   : > { %v14769_v60 = vpop.f32.mrb[58].mxu0  ;;  %8093 = vmatpush1.bf16.msra.mxu0 %v7933_v47  ;;  %v15483_v47 = vld [vmem:[%s20644_s14 + $0x1b0] ss:$8 sps:$4 sm:$0xff]  }
0x1be2   : > { %v7935_v34 = vpack.c.bf16 %v14769_v60, %v14768_v35  ;;  %v7845_v12 = vpop.f32.mrb[59].mxu0  ;;  %8094 = vmatprep.subr.bf16.mxu0 %v20710_v57  ;;  %v15484_v35 = vld [vmem:[%s20644_s14 + $0x1c4] ss:$8 sps:$4 sm:$0xff]  }
0x1be3   : > { %v7934_v2 = vpack.c.bf16 %v7845_v12, %v7842_v25 }
0x1be4   : > { %8864 = vmatmul.mubr.bf16.gmra.mrb[212].mxu1 %v15480_v27 }
0x1be5   : > { %8095 = vmatpush1.bf16.msra.mxu0 %v7934_v2  ;;  %12921 = vmatprep.mubr.msk.bf16.mxu1 %vm931_vm3, %v15481_v51 }
0x1be6   : > { %8096 = vmatprep.subr.bf16.mxu0 %v20710_v57 }
0x1be7   : > { %v14772_v15 = vpop.f32.mrb[60].mxu0 }
0x1be8   : > { %v7858_v20 = vpop.f32.mrb[61].mxu0 }
0x1be9   : > { %v14773_v22 = vpop.f32.mrb[62].mxu0  ;;  %8097 = vmatpush1.bf16.msra.mxu0 %v7935_v34  ;;  %v15486_v34 = vld [vmem:[%s20644_s14 + $0x1c0] ss:$8 sps:$4 sm:$0xff]  }
0x1bea   : > { %v7937_v60 = vpack.c.bf16 %v14773_v22, %v14772_v15  ;;  %v7861_v25 = vpop.f32.mrb[63].mxu0  ;;  %8098 = vmatprep.subr.bf16.mxu0 %v20710_v57  ;;  %v15487_v15 = vld [vmem:[%s20644_s14 + $0x1d4] ss:$8 sps:$4 sm:$0xff]  }
0x1beb   : > { %v7936_v27 = vpack.c.bf16 %v7861_v25, %v7858_v20 }
0x1bec   : > { %8872 = vmatmul.mubr.bf16.gmra.mrb[216].mxu1 %v15483_v47 }
0x1bed   : > { %8099 = vmatpush1.bf16.msra.mxu0 %v7936_v27  ;;  %12922 = vmatprep.mubr.msk.bf16.mxu1 %vm931_vm3, %v15484_v35 }
0x1bee   : > { %8100 = vmatprep.subr.bf16.mxu0 %v20710_v57 }
0x1bef   : > { %v14776_v51 = vpop.f32.mrb[64].mxu0 }
0x1bf0   : > { %v7874_v12 = vpop.f32.mrb[65].mxu0 }
0x1bf1   : > { %v14777_v2 = vpop.f32.mrb[66].mxu0  ;;  %8101 = vmatpush1.bf16.msra.mxu0 %v7937_v60  ;;  %v15489_v60 = vld [vmem:[%s20644_s14 + $0x1d0] ss:$8 sps:$4 sm:$0xff]  }
0x1bf2   : > { %v7939_v22 = vpack.c.bf16 %v14777_v2, %v14776_v51  ;;  %v7877_v20 = vpop.f32.mrb[67].mxu0  ;;  %8102 = vmatprep.subr.bf16.mxu0 %v20710_v57  ;;  %v15493_v51 = vld [vmem:[%s20644_s14 + $0x1e4] ss:$8 sps:$4 sm:$0xff]  }
0x1bf3   : > { %v7938_v47 = vpack.c.bf16 %v7877_v20, %v7874_v12  ;;  %v15498_v20 = vld [vmem:[%s20644_s14 + $0xd4] ss:$8 sps:$4 sm:$0xff]  }
0x1bf4   : > { %8880 = vmatmul.mubr.bf16.gmra.mrb[220].mxu1 %v15486_v34 }
0x1bf5   : > { %8103 = vmatpush1.bf16.msra.mxu0 %v7938_v47  ;;  %12923 = vmatprep.mubr.msk.bf16.mxu1 %vm931_vm3, %v15487_v15  ;;  %v15490_v15 = vld [vmem:[%s20644_s14 + $0xc0] ss:$8 sps:$4 sm:$0xff]   ;;  %v15499_v47 = vld [vmem:[%s20644_s14 + $0x1f4] ss:$8 sps:$4 sm:$0xff]  }
0x1bf6   : > { %8104 = vmatprep.subr.bf16.mxu0 %v20710_v57 }
0x1bf7   : > { %v14780_v35 = vpop.f32.mrb[68].mxu0 }
0x1bf8   : > { %v7890_v25 = vpop.f32.mrb[69].mxu0 }
0x1bf9   : > { %v14781_v27 = vpop.f32.mrb[70].mxu0  ;;  %8105 = vmatpush1.bf16.msra.mxu0 %v7939_v22  ;;  %v15495_v22 = vld [vmem:[%s20644_s14 + $0x1e0] ss:$8 sps:$4 sm:$0xff]  }
0x1bfa   : > { %v7941_v2 = vpack.c.bf16 %v14781_v27, %v14780_v35  ;;  %v7893_v12 = vpop.f32.mrb[71].mxu0  ;;  %8106 = vmatprep.subr.bf16.mxu0 %v20710_v57  ;;  %v15496_v35 = vld [vmem:[%s20644_s14 + $0xd0] ss:$8 sps:$4 sm:$0xff]   ;;  %v20824_v27 = vpack.c.bf16 %v18841_v37, %v18837_v0  ;;  %v15514_v0 = vld [vmem:[%s20644_s14 + $0x100] ss:$8 sps:$4 sm:$0xff]  }
0x1bfb   : > { %v7940_v34 = vpack.c.bf16 %v7893_v12, %v7890_v25  ;;  %v15501_v25 = vld [vmem:[%s20644_s14 + $0x1f0] ss:$8 sps:$4 sm:$0xff]   ;;  %v15519_v37 = vld [vmem:[%s20644_s14 + $0x220] ss:$8 sps:$4 sm:$0xff]   ;;  %v20827_v12 = vpack.c.bf16 %v18873_v58, %v18867_v38  ;;  %v15530_v38 = vld [vmem:[%s20644_s14 + $0x124] ss:$8 sps:$4 sm:$0xff]   ;;  %v20829_v58 = vpack.c.bf16 %v18887_v17, %v18881_v36 }
0x1bfc   : > { %8888 = vmatmul.mubr.bf16.gmra.mrb[224].mxu1 %v15489_v60  ;;  %v20823_v60 = vpack.c.bf16 %v18845_v18, %v18839_v10  ;;  %v15516_v10 = vld [vmem:[%s20644_s14 + $0x104] ss:$8 sps:$4 sm:$0xff]   ;;  %v15533_v17 = vld [vmem:[%s20644_s14 + $0x134] ss:$8 sps:$4 sm:$0xff]   ;;  %v15531_v36 = vld [vmem:[%s20644_s14 + $0x130] ss:$8 sps:$4 sm:$0xff]  }
0x1bfd   : > { %8107 = vmatpush1.bf16.msra.mxu0 %v7940_v34  ;;  %12924 = vmatprep.mubr.msk.bf16.mxu1 %vm931_vm3, %v15493_v51  ;;  %v15517_v18 = vld [vmem:[%s20644_s14 + $0x224] ss:$8 sps:$4 sm:$0xff]   ;;  %v20825_v51 = vpack.c.bf16 %v18859_v28, %v18853_v23  ;;  %v15522_v23 = vld [vmem:[%s20644_s14 + $0x114] ss:$8 sps:$4 sm:$0xff]   ;;  %v20828_v34 = vpack.c.bf16 %v18869_v33, %v18865_v63  ;;  %v15528_v33 = vld [vmem:[%s20644_s14 + $0x120] ss:$8 sps:$4 sm:$0xff]  }
0x1bfe   : > { %8108 = vmatprep.subr.bf16.mxu0 %v20710_v57  ;;  %v15523_v28 = vld [vmem:[%s20644_s14 + $0x234] ss:$8 sps:$4 sm:$0xff]  }
0x1bff   : > { %v15549_v63 = vld [vmem:[%s20647_s17 + $0x30] sm:$0xff]  }
0x1c01   : > { %8109 = vmatpush1.bf16.msra.mxu0 %v7941_v2  ;;  %v20826_v2 = vpack.c.bf16 %v18855_v32, %v18851_v52  ;;  %v15520_v52 = vld [vmem:[%s20644_s14 + $0x110] ss:$8 sps:$4 sm:$0xff]  }
0x1c02   : > { %8359 = vmatprep.subr.bf16.mxu0 %v20710_v57  ;;  %v15525_v32 = vld [vmem:[%s20644_s14 + $0x230] ss:$8 sps:$4 sm:$0xff]  }
0x1c04   : > { %8119 = vmatmul.mubr.bf16.vlgmr.msra.gmra.mrb[72].mxu0 %v15490_v15  ;;  %8896 = vmatmul.mubr.bf16.gmra.mrb[228].mxu1 %v15495_v22  ;;  %v20830_v15 = vpack.c.bf16 %v18883_v61, %v18879_v21  ;;  %v15536_v61 = vld [vmem:[%s20644_s14 + $0x144] ss:$8 sps:$4 sm:$0xff]   ;;  %v15534_v21 = vld [vmem:[%s20644_s14 + $0x140] ss:$8 sps:$4 sm:$0xff]   ;;  %v15539_v22 = vld [vmem:[%s20644_s14 + $0x154] ss:$8 sps:$4 sm:$0xff]  }
0x1c05   : > { %8360 = vmatpush1.bf16.msra.mxu0 %v7747_v29  ;;  %12805 = vmatprep.mubr.msk.bf16.mxu0 %vm931_vm3, %v15498_v20  ;;  %v20821_v29 = vpack.c.bf16 %v18831_v24, %v18825_v56  ;;  %v15510_v56 = vld [vmem:[%s20644_s14 + $0xf4] ss:$8 sps:$4 sm:$0xff]   ;;  %v15537_v20 = vld [vmem:[%s20644_s14 + $0x150] ss:$8 sps:$4 sm:$0xff]  }
0x1c06   : > { %8361 = vmatprep.subr.bf16.mxu0 %v20710_v57  ;;  %12925 = vmatprep.mubr.msk.bf16.mxu1 %vm931_vm3, %v15499_v47  ;;  %v15511_v24 = vld [vmem:[%s20644_s14 + $0x214] ss:$8 sps:$4 sm:$0xff]   ;;  %v15542_v47 = vld [vmem:[%s20644_s14 + $0x164] ss:$8 sps:$4 sm:$0xff]  }
0x1c09   : > { %8362 = vmatpush1.bf16.msra.mxu0 %v7748_v9  ;;  %v20822_v9 = vpack.c.bf16 %v18827_v39, %v18823_v46  ;;  %v15508_v46 = vld [vmem:[%s20644_s14 + $0xf0] ss:$8 sps:$4 sm:$0xff]  }
0x1c0a   : > { %8363 = vmatprep.subr.bf16.mxu0 %v20710_v57  ;;  %v15513_v39 = vld [vmem:[%s20644_s14 + $0x210] ss:$8 sps:$4 sm:$0xff]  }
0x1c0c   : > { %8127 = vmatmul.mubr.bf16.gmra.mrb[76].mxu0 %v15496_v35  ;;  %8904 = vmatmul.mubr.bf16.gmra.mrb[232].mxu1 %v15501_v25  ;;  %v15540_v35 = vld [vmem:[%s20644_s14 + $0x160] ss:$8 sps:$4 sm:$0xff]   ;;  %v15545_v25 = vld [vmem:[%s20644_s14 + $0x174] ss:$8 sps:$4 sm:$0xff]  }
0x1c0d   : > { %8364 = vmatpush1.bf16.msra.mxu0 %v20821_v29  ;;  %12806 = vmatprep.mubr.msk.bf16.mxu0 %vm931_vm3, %v15504_v50  ;;  %v15543_v50 = vld [vmem:[%s20644_s14 + $0x170] ss:$8 sps:$4 sm:$0xff]   ;;  %v15546_v29 = vld [vmem:[%s20644_s14] ss:$8 sps:$4 sm:$0xff]  }
0x1c0e   : > { %8365 = vmatprep.subr.bf16.mxu0 %v20710_v57  ;;  %12926 = vmatprep.mubr.msk.bf16.mxu1 %vm931_vm3, %v15505_v44  ;;  %v15548_v44 = vld [vmem:[%s20644_s14 + $0x4] ss:$8 sps:$4 sm:$0xff]  }
0x1c11   : > { %8366 = vmatpush1.bf16.msra.mxu0 %v20822_v9  ;;  %v15550_v9 = vld [vmem:[%s20644_s14 + $0x10] ss:$8 sps:$4 sm:$0xff]  }
0x1c12   : > { %8367 = vmatprep.subr.bf16.mxu0 %v20710_v57 }
0x1c14   : > { %8135 = vmatmul.mubr.bf16.gmra.mrb[80].mxu0 %v15502_v45  ;;  %8912 = vmatmul.mubr.bf16.gmra.mrb[236].mxu1 %v15507_v1  ;;  %v15552_v45 = vld [vmem:[%s20644_s14 + $0x14] ss:$8 sps:$4 sm:$0xff]  }
0x1c15   : > { %8368 = vmatpush1.bf16.msra.mxu0 %v20823_v60  ;;  %12807 = vmatprep.mubr.msk.bf16.mxu0 %vm931_vm3, %v15510_v56  ;;  %v15568_v1 = vld [vmem:[%s20647_s17 + $0x38] sm:$0xff]   ;;  %v15555_v56 = vld [vmem:[%s20644_s14 + $0x24] ss:$8 sps:$4 sm:$0xff]  }
0x1c16   : > { %8369 = vmatprep.subr.bf16.mxu0 %v20710_v57  ;;  %12927 = vmatprep.mubr.msk.bf16.mxu1 %vm931_vm3, %v15511_v24  ;;  %v15553_v24 = vld [vmem:[%s20644_s14 + $0x20] ss:$8 sps:$4 sm:$0xff]   ;;  %v15558_v60 = vld [vmem:[%s20644_s14 + $0x34] ss:$8 sps:$4 sm:$0xff]  }
0x1c19   : > { %8370 = vmatpush1.bf16.msra.mxu0 %v20824_v27  ;;  %v15559_v27 = vld [vmem:[%s20644_s14 + $0x40] ss:$8 sps:$4 sm:$0xff]  }
0x1c1a   : > { %8371 = vmatprep.subr.bf16.mxu0 %v20710_v57 }
0x1c1c   : > { %8143 = vmatmul.mubr.bf16.gmra.mrb[84].mxu0 %v15508_v46  ;;  %8920 = vmatmul.mubr.bf16.gmra.mrb[240].mxu1 %v15513_v39  ;;  %v15556_v46 = vld [vmem:[%s20644_s14 + $0x30] ss:$8 sps:$4 sm:$0xff]   ;;  %v15561_v39 = vld [vmem:[%s20644_s14 + $0x44] ss:$8 sps:$4 sm:$0xff]  }
0x1c1d   : > { %8372 = vmatpush1.bf16.msra.mxu0 %v20825_v51  ;;  %12808 = vmatprep.mubr.msk.bf16.mxu0 %vm931_vm3, %v15516_v10  ;;  %v15564_v10 = vld [vmem:[%s20644_s14 + $0x54] ss:$8 sps:$4 sm:$0xff]   ;;  %v15567_v51 = vld [vmem:[%s20644_s14 + $0x64] ss:$8 sps:$4 sm:$0xff]  }
0x1c1e   : > { %8373 = vmatprep.subr.bf16.mxu0 %v20710_v57  ;;  %12928 = vmatprep.mubr.msk.bf16.mxu1 %vm931_vm3, %v15517_v18  ;;  %v15562_v18 = vld [vmem:[%s20644_s14 + $0x50] ss:$8 sps:$4 sm:$0xff]  }
0x1c21   : > { %8374 = vmatpush1.bf16.msra.mxu0 %v20826_v2  ;;  %v15569_v2 = vld [vmem:[%s20644_s14 + $0x70] ss:$8 sps:$4 sm:$0xff]  }
0x1c22   : > { %8375 = vmatprep.subr.bf16.mxu0 %v20710_v57 }
0x1c24   : > { %8151 = vmatmul.mubr.bf16.gmra.mrb[88].mxu0 %v15514_v0  ;;  %8928 = vmatmul.mubr.bf16.gmra.mrb[244].mxu1 %v15519_v37  ;;  %v15565_v0 = vld [vmem:[%s20644_s14 + $0x60] ss:$8 sps:$4 sm:$0xff]   ;;  %v15571_v37 = vld [vmem:[%s20644_s14 + $0x74] ss:$8 sps:$4 sm:$0xff]  }
0x1c25   : > { %8376 = vmatpush1.bf16.msra.mxu0 %v20827_v12  ;;  %12809 = vmatprep.mubr.msk.bf16.mxu0 %vm931_vm3, %v15522_v23  ;;  %v15574_v23 = vld [vmem:[%s20644_s14 + $0x84] ss:$8 sps:$4 sm:$0xff]   ;;  %v15577_v12 = vld [vmem:[%s20644_s14 + $0x94] ss:$8 sps:$4 sm:$0xff]  }
0x1c26   : > { %8377 = vmatprep.subr.bf16.mxu0 %v20710_v57  ;;  %12929 = vmatprep.mubr.msk.bf16.mxu1 %vm931_vm3, %v15523_v28  ;;  %v15572_v28 = vld [vmem:[%s20644_s14 + $0x80] ss:$8 sps:$4 sm:$0xff]  }
0x1c29   : > { %8378 = vmatpush1.bf16.msra.mxu0 %v20828_v34 }
0x1c2a   : > { %8379 = vmatprep.subr.bf16.mxu0 %v20710_v57 }
0x1c2c   : > { %8159 = vmatmul.mubr.bf16.gmra.mrb[92].mxu0 %v15520_v52  ;;  %8936 = vmatmul.mubr.bf16.gmra.mrb[248].mxu1 %v15525_v32  ;;  %v15575_v32 = vld [vmem:[%s20644_s14 + $0x90] ss:$8 sps:$4 sm:$0xff]  }
0x1c2d   : > { %8380 = vmatpush1.bf16.msra.mxu0 %v20829_v58  ;;  %14842 = vmatprep.mubr.msk.bf16.mxu1 %vm929_vm2, %v18643_v8 }
0x1c2e   : > { %8381 = vmatprep.subr.bf16.mxu0 %v20710_v57  ;;  %12810 = vmatprep.mubr.msk.bf16.mxu0 %vm931_vm3, %v15530_v38  ;;  %v15580_v38 = vld [vmem:[%s20644_s14 + $0xa4] ss:$8 sps:$4 sm:$0xff]  }
0x1c31   : > { %8382 = vmatpush1.bf16.msra.mxu0 %v20830_v15  ;;  %v15578_v15 = vld [vmem:[%s20644_s14 + $0xa0] ss:$8 sps:$4 sm:$0xff]  }
0x1c32   : > { %14810 = vmatprep.subr.bf16.mxu0 %v15549_v63 }
0x1c34   : > { %8167 = vmatmul.mubr.bf16.gmra.mrb[96].mxu0 %v15528_v33  ;;  %14843 = vmatmul.mubr.msk.bf16.vlgmr.msra.gmra.mrb[252].mxu1 %vm929_vm2, %v18640_v40 }
0x1c35   : > { %14846 = vmatprep.mubr.msk.bf16.mxu1 %vm929_vm2, %v18674_v16  ;;  %12811 = vmatprep.mubr.msk.bf16.mxu0 %vm931_vm3, %v15533_v17 }
0x1c3c   : > { %8175 = vmatmul.mubr.bf16.gmra.mrb[100].mxu0 %v15531_v36  ;;  %14847 = vmatmul.mubr.msk.bf16.gmra.mrb[0].mxu1 %vm929_vm2, %v18671_v7  ;;  %v15583_v36 = vld [vmem:[%s20644_s14 + $0xb4] ss:$8 sps:$4 sm:$0xff]  }
0x1c3d   : > { %14850 = vmatprep.mubr.msk.bf16.mxu1 %vm929_vm2, %v18702_v55  ;;  %12812 = vmatprep.mubr.msk.bf16.mxu0 %vm931_vm3, %v15536_v61 }
0x1c44   : > { %8183 = vmatmul.mubr.bf16.gmra.mrb[104].mxu0 %v15534_v21  ;;  %14851 = vmatmul.mubr.msk.bf16.gmra.mrb[4].mxu1 %vm929_vm2, %v18699_v30 }
0x1c45   : > { %14854 = vmatprep.mubr.msk.bf16.mxu1 %vm929_vm2, %v18722_v3  ;;  %12813 = vmatprep.mubr.msk.bf16.mxu0 %vm931_vm3, %v15539_v22 }
0x1c4c   : > { %8191 = vmatmul.mubr.bf16.gmra.mrb[108].mxu0 %v15537_v20  ;;  %14855 = vmatmul.mubr.msk.bf16.gmra.mrb[8].mxu1 %vm929_vm2, %v18717_v11  ;;  %v15581_v20 = vld [vmem:[%s20644_s14 + $0xb0] ss:$8 sps:$4 sm:$0xff]  }
0x1c4d   : > { %14858 = vmatprep.mubr.msk.bf16.mxu1 %vm929_vm2, %v18746_v4  ;;  %12814 = vmatprep.mubr.msk.bf16.mxu0 %vm931_vm3, %v15542_v47 }
0x1c54   : > { %8199 = vmatmul.mubr.bf16.gmra.mrb[112].mxu0 %v15540_v35  ;;  %14859 = vmatmul.mubr.msk.bf16.gmra.mrb[12].mxu1 %vm929_vm2, %v18741_v43 }
0x1c55   : > { %14862 = vmatprep.mubr.msk.bf16.mxu1 %vm929_vm2, %v18764_v31  ;;  %12815 = vmatprep.mubr.msk.bf16.mxu0 %vm931_vm3, %v15545_v25 }
0x1c5c   : > { %8207 = vmatmul.mubr.bf16.gmra.mrb[116].mxu0 %v15543_v50  ;;  %14863 = vmatmul.mubr.msk.bf16.gmra.mrb[16].mxu1 %vm929_vm2, %v18762_v26  ;;  %v15586_v50 = vld [vmem:[%s20644_s14 + $0x304] ss:$8 sps:$4 sm:$0xff]  }
0x1c5d   : > { %12840 = vmatprep.mubr.msk.bf16.mxu0 %vm931_vm3, %v15548_v44  ;;  %13074 = vmatprep.mubr.msk.bf16.mxu1 %vm931_vm3, %v15586_v50 }
0x1c64   : > { %8392 = vmatmul.mubr.bf16.vlgmr.msra.gmra.mrb[120].mxu0 %v15546_v29 }
0x1c65   : > { %14811 = vmatpush3.bf16.msra.mxu0 %v15549_v63  ;;  %12841 = vmatprep.mubr.msk.bf16.mxu0 %vm931_vm3, %v15552_v45 }
0x1c66   : > { %14812 = vmatprep.subr.bf16.mxu0 %v15568_v1 }
0x1c69   : > { %14813 = vmatpush3.bf16.msra.mxu0 %v15568_v1 }
0x1c6a   : > { %9295 = vmatprep.subr.bf16.mxu0 %v20710_v57 }
0x1c6c   : > { %8400 = vmatmul.mubr.bf16.gmra.mrb[124].mxu0 %v15550_v9 }
0x1c6d   : > { %12842 = vmatprep.mubr.msk.bf16.mxu0 %vm931_vm3, %v15555_v56 }
0x1c74   : > { %8408 = vmatmul.mubr.bf16.gmra.mrb[128].mxu0 %v15553_v24 }
0x1c75   : > { %12843 = vmatprep.mubr.msk.bf16.mxu0 %vm931_vm3, %v15558_v60 }
0x1c7c   : > { %8416 = vmatmul.mubr.bf16.gmra.mrb[132].mxu0 %v15556_v46 }
0x1c7d   : > { %12844 = vmatprep.mubr.msk.bf16.mxu0 %vm931_vm3, %v15561_v39 }
0x1c84   : > { %8424 = vmatmul.mubr.bf16.gmra.mrb[136].mxu0 %v15559_v27 }
0x1c85   : > { %12845 = vmatprep.mubr.msk.bf16.mxu0 %vm931_vm3, %v15564_v10 }
0x1c8c   : > { %8432 = vmatmul.mubr.bf16.gmra.mrb[140].mxu0 %v15562_v18 }
0x1c8d   : > { %12846 = vmatprep.mubr.msk.bf16.mxu0 %vm931_vm3, %v15567_v51 }
0x1c94   : > { %8440 = vmatmul.mubr.bf16.gmra.mrb[144].mxu0 %v15565_v0 }
0x1c95   : > { %12847 = vmatprep.mubr.msk.bf16.mxu0 %vm931_vm3, %v15571_v37 }
0x1c9c   : > { %8448 = vmatmul.mubr.bf16.gmra.mrb[148].mxu0 %v15569_v2 }
0x1c9d   : > { %12848 = vmatprep.mubr.msk.bf16.mxu0 %vm931_vm3, %v15574_v23 }
0x1ca4   : > { %8456 = vmatmul.mubr.bf16.gmra.mrb[152].mxu0 %v15572_v28 }
0x1ca5   : > { %12849 = vmatprep.mubr.msk.bf16.mxu0 %vm931_vm3, %v15577_v12 }
0x1ca7   : > { %v19217_v52 = vpop.f32.mrb[204].mxu1 }
0x1ca8   : > { %v8851_v34 = vpop.f32.mrb[205].mxu1 }
0x1ca9   : > { %v19225_v58 = vpop.f32.mrb[206].mxu1 }
0x1caa   : > { %v8854_v63 = vpop.f32.mrb[207].mxu1 }
0x1cac   : > { %8464 = vmatmul.mubr.bf16.gmra.mrb[156].mxu0 %v15575_v32 }
0x1cad   : > { %12850 = vmatprep.mubr.msk.bf16.mxu0 %vm931_vm3, %v15580_v38 }
0x1caf   : > { %v19228_v33 = vpop.f32.mrb[208].mxu1 }
0x1cb0   : > { %v8859_v17 = vpop.f32.mrb[209].mxu1 }
0x1cb1   : > { %v19236_v61 = vpop.f32.mrb[210].mxu1 }
0x1cb2   : > { %v8862_v21 = vpop.f32.mrb[211].mxu1 }
0x1cb4   : > { %8472 = vmatmul.mubr.bf16.gmra.mrb[160].mxu0 %v15578_v15 }
0x1cb5   : > { %12851 = vmatprep.mubr.msk.bf16.mxu0 %vm931_vm3, %v15583_v36 }
0x1cb7   : > { %v19239_v22 = vpop.f32.mrb[212].mxu1 }
0x1cb8   : > { %v8867_v47 = vpop.f32.mrb[213].mxu1 }
0x1cb9   : > { %v19244_v35 = vpop.f32.mrb[214].mxu1 }
0x1cba   : > { %v8870_v25 = vpop.f32.mrb[215].mxu1 }
0x1cbc   : > { %8480 = vmatmul.mubr.bf16.gmra.mrb[164].mxu0 %v15581_v20 }
0x1cbd   : > { %14814 = vmatprep.mubr.msk.bf16.mxu0 %vm929_vm2, %v18643_v8 }
0x1cbf   : > { %v19252_v44 = vpop.f32.mrb[216].mxu1 }
0x1cc0   : > { %v8875_v29 = vpop.f32.mrb[217].mxu1 }
0x1cc1   : > { %v19254_v45 = vpop.f32.mrb[218].mxu1 }
0x1cc2   : > { %v8878_v1 = vpop.f32.mrb[219].mxu1 }
0x1cc4   : > { %14815 = vmatmul.mubr.msk.bf16.vlgmr.msra.gmra.mrb[184].mxu0 %vm929_vm2, %v18640_v40 }
0x1cc5   : > { %14818 = vmatprep.mubr.msk.bf16.mxu0 %vm929_vm2, %v18674_v16 }
0x1cc7   : > { %v19260_v9 = vpop.f32.mrb[220].mxu1 }
0x1cc8   : > { %v8883_v56 = vpop.f32.mrb[221].mxu1 }
0x1cc9   : > { %v19262_v24 = vpop.f32.mrb[222].mxu1 }
0x1cca   : > { %v8886_v60 = vpop.f32.mrb[223].mxu1 }
0x1ccc   : > { %14819 = vmatmul.mubr.msk.bf16.gmra.mrb[188].mxu0 %vm929_vm2, %v18671_v7 }
0x1ccd   : > { %14822 = vmatprep.mubr.msk.bf16.mxu0 %vm929_vm2, %v18702_v55 }
0x1ccf   : > { %v19268_v46 = vpop.f32.mrb[224].mxu1 }
0x1cd0   : > { %v8891_v39 = vpop.f32.mrb[225].mxu1 }
0x1cd1   : > { %v19270_v27 = vpop.f32.mrb[226].mxu1 }
0x1cd2   : > { %v8894_v10 = vpop.f32.mrb[227].mxu1 }
0x1cd4   : > { %14823 = vmatmul.mubr.msk.bf16.gmra.mrb[168].mxu0 %vm929_vm2, %v18699_v30 }
0x1cd5   : > { %14826 = vmatprep.mubr.msk.bf16.mxu0 %vm929_vm2, %v18722_v3 }
0x1cd7   : > { %v19276_v18 = vpop.f32.mrb[72].mxu0  ;;  %v19278_v51 = vpop.f32.mrb[228].mxu1 }
0x1cd8   : > { %v8122_v0 = vpop.f32.mrb[73].mxu0  ;;  %v8899_v37 = vpop.f32.mrb[229].mxu1 }
0x1cd9   : > { %v19280_v2 = vpop.f32.mrb[74].mxu0  ;;  %v19282_v23 = vpop.f32.mrb[230].mxu1 }
0x1cda   : > { %v8125_v28 = vpop.f32.mrb[75].mxu0  ;;  %v8902_v12 = vpop.f32.mrb[231].mxu1 }
0x1cdc   : > { %14827 = vmatmul.mubr.msk.bf16.gmra.mrb[192].mxu0 %vm929_vm2, %v18717_v11 }
0x1cdd   : > { %14830 = vmatprep.mubr.msk.bf16.mxu0 %vm929_vm2, %v18746_v4 }
0x1cdf   : > { %v19288_v32 = vpop.f32.mrb[76].mxu0  ;;  %v19290_v34 = vpop.f32.mrb[232].mxu1 }
0x1ce0   : > { %v8130_v38 = vpop.f32.mrb[77].mxu0  ;;  %v8907_v63 = vpop.f32.mrb[233].mxu1 }
0x1ce1   : > { %v19292_v15 = vpop.f32.mrb[78].mxu0  ;;  %v19294_v17 = vpop.f32.mrb[234].mxu1 }
0x1ce2   : > { %v8133_v36 = vpop.f32.mrb[79].mxu0  ;;  %v8910_v21 = vpop.f32.mrb[235].mxu1 }
0x1ce4   : > { %14831 = vmatmul.mubr.msk.bf16.gmra.mrb[172].mxu0 %vm929_vm2, %v18741_v43 }
0x1ce5   : > { %14834 = vmatprep.mubr.msk.bf16.mxu0 %vm929_vm2, %v18764_v31 }
0x1ce7   : > { %v19300_v20 = vpop.f32.mrb[80].mxu0  ;;  %v19302_v47 = vpop.f32.mrb[236].mxu1 }
0x1ce8   : > { %v8138_v25 = vpop.f32.mrb[81].mxu0  ;;  %v8915_v50 = vpop.f32.mrb[237].mxu1 }
0x1ce9   : > { %v19304_v29 = vpop.f32.mrb[82].mxu0  ;;  %v19306_v1 = vpop.f32.mrb[238].mxu1 }
0x1cea   : > { %v8141_v56 = vpop.f32.mrb[83].mxu0  ;;  %v8918_v60 = vpop.f32.mrb[239].mxu1 }
0x1cec   : > { %14835 = vmatmul.mubr.msk.bf16.gmra.mrb[176].mxu0 %vm929_vm2, %v18762_v26 }
0x1cef   : > { %v19310_v39 = vpop.f32.mrb[84].mxu0  ;;  %v19312_v10 = vpop.f32.mrb[240].mxu1 }
0x1cf0   : > { %v8146_v0 = vpop.f32.mrb[85].mxu0  ;;  %v8923_v37 = vpop.f32.mrb[241].mxu1 }
0x1cf1   : > { %v19314_v28 = vpop.f32.mrb[86].mxu0  ;;  %v19316_v12 = vpop.f32.mrb[242].mxu1 }
0x1cf2   : > { %v8149_v38 = vpop.f32.mrb[87].mxu0  ;;  %v8926_v63 = vpop.f32.mrb[243].mxu1 }
0x1cf7   : > { %v19318_v36 = vpop.f32.mrb[88].mxu0  ;;  %v19320_v21 = vpop.f32.mrb[244].mxu1 }
0x1cf8   : > { %v8154_v25 = vpop.f32.mrb[89].mxu0  ;;  %v8931_v50 = vpop.f32.mrb[245].mxu1 }
0x1cf9   : > { %v19322_v56 = vpop.f32.mrb[90].mxu0  ;;  %v19324_v60 = vpop.f32.mrb[246].mxu1 }
0x1cfa   : > { %v8157_v57 = vpop.f32.mrb[91].mxu0  ;;  %v8934_v19 = vpop.f32.mrb[247].mxu1 }
0x1cff   : > { %v19326_v0 = vpop.f32.mrb[92].mxu0  ;;  %v19328_v37 = vpop.f32.mrb[248].mxu1 }
0x1d00   : > { %v8162_v14 = vpop.f32.mrb[93].mxu0  ;;  %v8939_v5 = vpop.f32.mrb[249].mxu1 }
0x1d01   : > { %v19330_v38 = vpop.f32.mrb[94].mxu0  ;;  %v19332_v63 = vpop.f32.mrb[250].mxu1  ;;  %v20831_v5 = vmov 0  }
0x1d02   : > { %v8165_v13 = vpop.f32.mrb[95].mxu0  ;;  %v8942_v6 = vpop.f32.mrb[251].mxu1 }
0x1d07   : > { %v14844_v25 = vpop.f32.mrb[252].mxu1  ;;  %v19334_v50 = vpop.f32.mrb[96].mxu0 }
0x1d08   : > { %v9499_v59 = vpop.f32.mrb[253].mxu1  ;;  %v8170_v53 = vpop.f32.mrb[97].mxu0 }
0x1d09   : > { %v14845_v62 = vpop.f32.mrb[254].mxu1  ;;  %v19336_v57 = vpop.f32.mrb[98].mxu0 }
0x1d0a   : > { %v9620_v19 = vpack.c.bf16 %v14845_v62, %v14844_v25  ;;  %v9502_v54 = vpop.f32.mrb[255].mxu1  ;;  %v8173_v49 = vpop.f32.mrb[99].mxu0 }
0x1d0b   : > { %v9619_v41 = vpack.c.bf16 %v9502_v54, %v9499_v59 }
0x1d0d   : > { %9776 = vmatpush1.bf16.msra.mxu1 %v9619_v41 }
0x1d0e   : > { %9777 = vmatprep.subr.bf16.mxu1 %v20831_v5 }
0x1d0f   : > { %v14848_v14 = vpop.f32.mrb[0].mxu1  ;;  %v19339_v48 = vpop.f32.mrb[100].mxu0 }
0x1d10   : > { %v9515_v13 = vpop.f32.mrb[1].mxu1  ;;  %v8178_v6 = vpop.f32.mrb[101].mxu0 }
0x1d11   : > { %v14849_v42 = vpop.f32.mrb[2].mxu1  ;;  %9778 = vmatpush1.bf16.msra.mxu1 %v9620_v19  ;;  %v19341_v26 = vpop.f32.mrb[102].mxu0 }
0x1d12   : > { %v9622_v53 = vpack.c.bf16 %v14849_v42, %v14848_v14  ;;  %v9518_v31 = vpop.f32.mrb[3].mxu1  ;;  %v8181_v43 = vpop.f32.mrb[103].mxu0  ;;  %9779 = vmatprep.subr.bf16.mxu1 %v20831_v5 }
0x1d13   : > { %v9621_v62 = vpack.c.bf16 %v9518_v31, %v9515_v13 }
0x1d15   : > { %9780 = vmatpush1.bf16.msra.mxu1 %v9621_v62 }
0x1d16   : > { %9781 = vmatprep.subr.bf16.mxu1 %v20831_v5 }
0x1d17   : > { %v14852_v41 = vpop.f32.mrb[4].mxu1  ;;  %v19345_v49 = vpop.f32.mrb[104].mxu0 }
0x1d18   : > { %v9531_v54 = vpop.f32.mrb[5].mxu1  ;;  %v8186_v59 = vpop.f32.mrb[105].mxu0 }
0x1d19   : > { %v14853_v25 = vpop.f32.mrb[6].mxu1  ;;  %9782 = vmatpush1.bf16.msra.mxu1 %v9622_v53  ;;  %v19347_v6 = vpop.f32.mrb[106].mxu0 }
0x1d1a   : > { %v9624_v19 = vpack.c.bf16 %v14853_v25, %v14852_v41  ;;  %v9534_v4 = vpop.f32.mrb[7].mxu1  ;;  %v8189_v42 = vpop.f32.mrb[107].mxu0  ;;  %9783 = vmatprep.subr.bf16.mxu1 %v20831_v5 }
0x1d1b   : > { %v9623_v43 = vpack.c.bf16 %v9534_v4, %v9531_v54 }
0x1d1d   : > { %9784 = vmatpush1.bf16.msra.mxu1 %v9623_v43 }
0x1d1e   : > { %9785 = vmatprep.subr.bf16.mxu1 %v20831_v5 }
0x1d1f   : > { %v14856_v31 = vpop.f32.mrb[8].mxu1  ;;  %v19351_v14 = vpop.f32.mrb[108].mxu0 }
0x1d20   : > { %v9547_v13 = vpop.f32.mrb[9].mxu1  ;;  %v8194_v62 = vpop.f32.mrb[109].mxu0 }
0x1d21   : > { %v14857_v11 = vpop.f32.mrb[10].mxu1  ;;  %9786 = vmatpush1.bf16.msra.mxu1 %v9624_v19  ;;  %v19353_v59 = vpop.f32.mrb[110].mxu0 }
0x1d22   : > { %v9626_v53 = vpack.c.bf16 %v14857_v11, %v14856_v31  ;;  %v9550_v3 = vpop.f32.mrb[11].mxu1  ;;  %v8197_v41 = vpop.f32.mrb[111].mxu0  ;;  %9787 = vmatprep.subr.bf16.mxu1 %v20831_v5 }
0x1d23   : > { %v9625_v25 = vpack.c.bf16 %v9550_v3, %v9547_v13 }
0x1d25   : > { %9788 = vmatpush1.bf16.msra.mxu1 %v9625_v25 }
0x1d26   : > { %9789 = vmatprep.subr.bf16.mxu1 %v20831_v5 }
0x1d27   : > { %v14860_v4 = vpop.f32.mrb[12].mxu1  ;;  %v19357_v54 = vpop.f32.mrb[112].mxu0 }
0x1d28   : > { %v9563_v42 = vpop.f32.mrb[13].mxu1  ;;  %v8202_v43 = vpop.f32.mrb[113].mxu0 }
0x1d29   : > { %v14861_v30 = vpop.f32.mrb[14].mxu1  ;;  %9790 = vmatpush1.bf16.msra.mxu1 %v9626_v53  ;;  %v19359_v62 = vpop.f32.mrb[114].mxu0 }
0x1d2a   : > { %v9628_v19 = vpack.c.bf16 %v14861_v30, %v14860_v4  ;;  %v9566_v55 = vpop.f32.mrb[15].mxu1  ;;  %v8205_v11 = vpop.f32.mrb[115].mxu0  ;;  %9791 = vmatprep.subr.bf16.mxu1 %v20831_v5 }
0x1d2b   : > { %v9627_v31 = vpack.c.bf16 %v9566_v55, %v9563_v42  ;;  %v15620_v55 = vld [vmem:[%s20647_s17 + $0x60] sm:$0xff]  }
0x1d2d   : > { %9792 = vmatpush1.bf16.msra.mxu1 %v9627_v31 }
0x1d2e   : > { %9793 = vmatprep.subr.bf16.mxu1 %v20831_v5 }
0x1d2f   : > { %v14864_v3 = vpop.f32.mrb[16].mxu1  ;;  %v19363_v13 = vpop.f32.mrb[116].mxu0 }
0x1d30   : > { %v9579_v41 = vpop.f32.mrb[17].mxu1  ;;  %v8210_v25 = vpop.f32.mrb[117].mxu0 }
0x1d31   : > { %v14865_v7 = vpop.f32.mrb[18].mxu1  ;;  %9794 = vmatpush1.bf16.msra.mxu1 %v9628_v19  ;;  %v19365_v43 = vpop.f32.mrb[118].mxu0  ;;  %v15621_v25 = vld [vmem:[%s20647_s17 + $0x68] sm:$0xff]  }
0x1d32   : > { %v9630_v53 = vpack.c.bf16 %v14865_v7, %v14864_v3  ;;  %v9582_v16 = vpop.f32.mrb[19].mxu1  ;;  %v8213_v30 = vpop.f32.mrb[119].mxu0  ;;  %9795 = vmatprep.subr.bf16.mxu1 %v20831_v5  ;;  %v15584_v7 = vld [vmem:[%s20644_s14 + $0x300] ss:$8 sps:$4 sm:$0xff]  }
0x1d33   : > { %v9629_v4 = vpack.c.bf16 %v9582_v16, %v9579_v41  ;;  %v15589_v16 = vld [vmem:[%s20644_s14 + $0x314] ss:$8 sps:$4 sm:$0xff]  }
0x1d35   : > { %9796 = vmatpush1.bf16.msra.mxu1 %v9629_v4 }
0x1d36   : > { %9797 = vmatprep.subr.bf16.mxu1 %v20831_v5 }
0x1d37   : > { %v8393_v42 = vpop.f32.mrb[120].mxu0 }
0x1d38   : > { %v8394_v11 = vadd.f32 %v8393_v42, %v19276_v18  ;;  %v8395_v31 = vpop.f32.mrb[121].mxu0  ;;  %v15587_v42 = vld [vmem:[%s20644_s14 + $0x310] ss:$8 sps:$4 sm:$0xff]  }
0x1d39   : > { %v8396_v19 = vpop.f32.mrb[122].mxu0  ;;  %9798 = vmatpush1.bf16.msra.mxu1 %v9630_v53 }
0x1d3a   : > { %v8397_v3 = vadd.f32 %v8396_v19, %v19280_v2  ;;  %v8398_v41 = vpop.f32.mrb[123].mxu0  ;;  %14894 = vmatprep.subr.bf16.mxu1 %v15620_v55  ;;  %v19384_v18 = vadd.f32 %v19217_v52, %v8394_v11  ;;  %v15592_v52 = vld [vmem:[%s20644_s14 + $0x324] ss:$8 sps:$4 sm:$0xff]  }
0x1d3c   : > { %9808 = vmatmul.mubr.bf16.vlgmr.msra.gmra.mrb[20].mxu1 %v15584_v7  ;;  %v19387_v30 = vadd.f32 %v19225_v58, %v8397_v3 }
0x1d3d   : > { %13075 = vmatprep.mubr.msk.bf16.mxu1 %vm931_vm3, %v15589_v16  ;;  %14895 = vmatpush3.bf16.msra.mxu1 %v15620_v55 }
0x1d3e   : > { %14896 = vmatprep.subr.bf16.mxu1 %v15621_v25 }
0x1d3f   : > { %v8401_v53 = vpop.f32.mrb[124].mxu0 }
0x1d40   : > { %v8402_v2 = vadd.f32 %v8401_v53, %v19288_v32  ;;  %v8403_v4 = vpop.f32.mrb[125].mxu0 }
0x1d41   : > { %v8404_v31 = vpop.f32.mrb[126].mxu0  ;;  %14897 = vmatpush3.bf16.msra.mxu1 %v15621_v25 }
0x1d42   : > { %v8405_v58 = vadd.f32 %v8404_v31, %v19292_v15  ;;  %v8406_v11 = vpop.f32.mrb[127].mxu0  ;;  %10735 = vmatprep.subr.bf16.mxu1 %v20831_v5  ;;  %v19400_v55 = vadd.f32 %v19228_v33, %v8402_v2  ;;  %v15590_v15 = vld [vmem:[%s20644_s14 + $0x320] ss:$8 sps:$4 sm:$0xff]   ;;  %v15595_v33 = vld [vmem:[%s20644_s14 + $0x334] ss:$8 sps:$4 sm:$0xff]  }
0x1d44   : > { %9816 = vmatmul.mubr.bf16.gmra.mrb[24].mxu1 %v15587_v42  ;;  %v19403_v32 = vadd.f32 %v19236_v61, %v8405_v58  ;;  %v15624_v61 = vld [vmem:[%s20644_s14 + $0x244] ss:$8 sps:$4 sm:$0xff]  }
0x1d45   : > { %13076 = vmatprep.mubr.msk.bf16.mxu1 %vm931_vm3, %v15592_v52  ;;  %12996 = vmatprep.mubr.msk.bf16.mxu0 %vm931_vm3, %v15624_v61 }
0x1d47   : > { %v8409_v7 = vpop.f32.mrb[128].mxu0 }
0x1d48   : > { %v8410_v19 = vadd.f32 %v8409_v7, %v19300_v20  ;;  %v8411_v16 = vpop.f32.mrb[129].mxu0 }
0x1d49   : > { %v8412_v3 = vpop.f32.mrb[130].mxu0  ;;  %v15596_v16 = vld [vmem:[%s20644_s14 + $0x340] ss:$8 sps:$4 sm:$0xff]  }
0x1d4a   : > { %v8413_v41 = vadd.f32 %v8412_v3, %v19304_v29  ;;  %v8414_v25 = vpop.f32.mrb[131].mxu0  ;;  %v19418_v53 = vadd.f32 %v19239_v22, %v8410_v19  ;;  %v15593_v29 = vld [vmem:[%s20644_s14 + $0x330] ss:$8 sps:$4 sm:$0xff]   ;;  %v15598_v22 = vld [vmem:[%s20644_s14 + $0x344] ss:$8 sps:$4 sm:$0xff]  }
0x1d4b   : > { %v15599_v25 = vld [vmem:[%s20644_s14 + $0x350] ss:$8 sps:$4 sm:$0xff]  }
0x1d4c   : > { %9824 = vmatmul.mubr.bf16.gmra.mrb[28].mxu1 %v15590_v15  ;;  %v19422_v20 = vadd.f32 %v19244_v35, %v8413_v41 }
0x1d4d   : > { %13077 = vmatprep.mubr.msk.bf16.mxu1 %vm931_vm3, %v15595_v33 }
0x1d4f   : > { %v8417_v2 = vpop.f32.mrb[132].mxu0 }
0x1d50   : > { %v8418_v4 = vadd.f32 %v8417_v2, %v19310_v39  ;;  %v8419_v42 = vpop.f32.mrb[133].mxu0 }
0x1d51   : > { %v8420_v31 = vpop.f32.mrb[134].mxu0 }
0x1d52   : > { %v8421_v52 = vadd.f32 %v8420_v31, %v19314_v28  ;;  %v8422_v58 = vpop.f32.mrb[135].mxu0  ;;  %v19434_v35 = vadd.f32 %v19252_v44, %v8418_v4  ;;  %v15601_v44 = vld [vmem:[%s20644_s14 + $0x354] ss:$8 sps:$4 sm:$0xff]  }
0x1d54   : > { %9832 = vmatmul.mubr.bf16.gmra.mrb[32].mxu1 %v15593_v29  ;;  %v19437_v11 = vadd.f32 %v19254_v45, %v8421_v52 }
0x1d55   : > { %13078 = vmatprep.mubr.msk.bf16.mxu1 %vm931_vm3, %v15598_v22  ;;  %v15602_v22 = vld [vmem:[%s20644_s14 + $0x360] ss:$8 sps:$4 sm:$0xff]  }
0x1d57   : > { %v8425_v39 = vpop.f32.mrb[136].mxu0 }
0x1d58   : > { %v8426_v7 = vadd.f32 %v8425_v39, %v19318_v36  ;;  %v8427_v19 = vpop.f32.mrb[137].mxu0 }
0x1d59   : > { %v8428_v15 = vpop.f32.mrb[138].mxu0 }
0x1d5a   : > { %v8429_v28 = vadd.f32 %v8428_v15, %v19322_v56  ;;  %v8430_v3 = vpop.f32.mrb[139].mxu0  ;;  %v19449_v45 = vadd.f32 %v19260_v9, %v8426_v7  ;;  %v15604_v9 = vld [vmem:[%s20644_s14 + $0x364] ss:$8 sps:$4 sm:$0xff]  }
0x1d5c   : > { %9840 = vmatmul.mubr.bf16.gmra.mrb[36].mxu1 %v15596_v16  ;;  %v19452_v33 = vadd.f32 %v19262_v24, %v8429_v28  ;;  %v15605_v16 = vld [vmem:[%s20644_s14 + $0x370] ss:$8 sps:$4 sm:$0xff]  }
0x1d5d   : > { %13079 = vmatprep.mubr.msk.bf16.mxu1 %vm931_vm3, %v15601_v44 }
0x1d5f   : > { %v8433_v36 = vpop.f32.mrb[140].mxu0 }
0x1d60   : > { %v8434_v61 = vadd.f32 %v8433_v36, %v19326_v0  ;;  %v8435_v41 = vpop.f32.mrb[141].mxu0 }
0x1d61   : > { %v8436_v2 = vpop.f32.mrb[142].mxu0 }
0x1d62   : > { %v8437_v56 = vadd.f32 %v8436_v2, %v19330_v38  ;;  %v8438_v4 = vpop.f32.mrb[143].mxu0  ;;  %v19464_v24 = vadd.f32 %v19268_v46, %v8434_v61  ;;  %v15607_v46 = vld [vmem:[%s20644_s14 + $0x374] ss:$8 sps:$4 sm:$0xff]   ;;  %v15608_v61 = vld [vmem:[%s20644_s14 + $0x380] ss:$8 sps:$4 sm:$0xff]  }
0x1d63   : > { %v15611_v4 = vld [vmem:[%s20644_s14 + $0x390] ss:$8 sps:$4 sm:$0xff]  }
0x1d64   : > { %9848 = vmatmul.mubr.bf16.gmra.mrb[40].mxu1 %v15599_v25  ;;  %v19467_v42 = vadd.f32 %v19270_v27, %v8437_v56 }
0x1d65   : > { %13080 = vmatprep.mubr.msk.bf16.mxu1 %vm931_vm3, %v15604_v9 }
0x1d67   : > { %v8441_v0 = vpop.f32.mrb[144].mxu0 }
0x1d68   : > { %v8442_v29 = vadd.f32 %v8441_v0, %v19334_v50  ;;  %v8443_v31 = vpop.f32.mrb[145].mxu0 }
0x1d69   : > { %v8444_v52 = vpop.f32.mrb[146].mxu0 }
0x1d6a   : > { %v8445_v38 = vadd.f32 %v8444_v52, %v19336_v57  ;;  %v8446_v58 = vpop.f32.mrb[147].mxu0  ;;  %v19479_v27 = vadd.f32 %v19278_v51, %v8442_v29  ;;  %v15610_v51 = vld [vmem:[%s20644_s14 + $0x384] ss:$8 sps:$4 sm:$0xff]  }
0x1d6c   : > { %9856 = vmatmul.mubr.bf16.gmra.mrb[44].mxu1 %v15602_v22  ;;  %v19482_v39 = vadd.f32 %v19282_v23, %v8445_v38 }
0x1d6d   : > { %13081 = vmatprep.mubr.msk.bf16.mxu1 %vm931_vm3, %v15607_v46  ;;  %v15614_v46 = vld [vmem:[%s20644_s14 + $0x3a0] ss:$8 sps:$4 sm:$0xff]  }
0x1d6f   : > { %v8449_v50 = vpop.f32.mrb[148].mxu0 }
0x1d70   : > { %v8450_v7 = vadd.f32 %v8449_v50, %v19339_v48  ;;  %v8451_v19 = vpop.f32.mrb[149].mxu0 }
0x1d71   : > { %v8452_v15 = vpop.f32.mrb[150].mxu0 }
0x1d72   : > { %v8453_v57 = vadd.f32 %v8452_v15, %v19341_v26  ;;  %v8454_v44 = vpop.f32.mrb[151].mxu0  ;;  %v19494_v23 = vadd.f32 %v19290_v34, %v8450_v7  ;;  %v15613_v26 = vld [vmem:[%s20644_s14 + $0x394] ss:$8 sps:$4 sm:$0xff]  }
0x1d74   : > { %9864 = vmatmul.mubr.bf16.gmra.mrb[48].mxu1 %v15605_v16  ;;  %v19497_v28 = vadd.f32 %v19294_v17, %v8453_v57  ;;  %v15617_v16 = vld [vmem:[%s20644_s14 + $0x3b0] ss:$8 sps:$4 sm:$0xff]  }
0x1d75   : > { %13082 = vmatprep.mubr.msk.bf16.mxu1 %vm931_vm3, %v15610_v51 }
0x1d77   : > { %v8457_v48 = vpop.f32.mrb[152].mxu0 }
0x1d78   : > { %v8458_v3 = vadd.f32 %v8457_v48, %v19345_v49  ;;  %v8459_v36 = vpop.f32.mrb[153].mxu0 }
0x1d79   : > { %v8460_v41 = vpop.f32.mrb[154].mxu0 }
0x1d7a   : > { %v8461_v34 = vadd.f32 %v8460_v41, %v19347_v6  ;;  %v8462_v25 = vpop.f32.mrb[155].mxu0  ;;  %v19509_v17 = vadd.f32 %v19302_v47, %v8458_v3  ;;  %v15616_v47 = vld [vmem:[%s20644_s14 + $0x3a4] ss:$8 sps:$4 sm:$0xff]  }
0x1d7b   : > { %v20833_v25 = vld [vmem:[#allocation27_spill] sm:$0xff] }
0x1d7c   : > { %9872 = vmatmul.mubr.bf16.gmra.mrb[52].mxu1 %v15608_v61  ;;  %v19512_v2 = vadd.f32 %v19306_v1, %v8461_v34 }
0x1d7d   : > { %13083 = vmatprep.mubr.msk.bf16.mxu1 %vm931_vm3, %v15613_v26 }
0x1d7f   : > { %v8465_v49 = vpop.f32.mrb[156].mxu0 }
0x1d80   : > { %v8466_v9 = vadd.f32 %v8465_v49, %v19351_v14  ;;  %v8467_v56 = vpop.f32.mrb[157].mxu0  ;;  %v20834_v49 = vld [vmem:[#allocation30_spill] sm:$0xff] }
0x1d81   : > { %v8468_v0 = vpop.f32.mrb[158].mxu0 }
0x1d82   : > { %v8469_v6 = vadd.f32 %v8468_v0, %v19353_v59  ;;  %v8470_v29 = vpop.f32.mrb[159].mxu0  ;;  %v19524_v1 = vadd.f32 %v19312_v10, %v8466_v9  ;;  %v15619_v10 = vld [vmem:[%s20644_s14 + $0x3b4] ss:$8 sps:$4 sm:$0xff]  }
0x1d83   : > { %v20835_v29 = vld [vmem:[#allocation29_spill] sm:$0xff] }
0x1d84   : > { %9880 = vmatmul.mubr.bf16.gmra.mrb[56].mxu1 %v15611_v4  ;;  %v19527_v31 = vadd.f32 %v19316_v12, %v8469_v6 }
0x1d85   : > { %13084 = vmatprep.mubr.msk.bf16.mxu1 %vm931_vm3, %v15616_v47 }
0x1d87   : > { %v8473_v14 = vpop.f32.mrb[160].mxu0 }
0x1d88   : > { %v8474_v22 = vadd.f32 %v8473_v14, %v19357_v54  ;;  %v8475_v52 = vpop.f32.mrb[161].mxu0  ;;  %v20836_v14 = vld [vmem:[#allocation32_spill] sm:$0xff] }
0x1d89   : > { %v8476_v38 = vpop.f32.mrb[162].mxu0 }
0x1d8a   : > { %v8477_v59 = vadd.f32 %v8476_v38, %v19359_v62  ;;  %v8478_v58 = vpop.f32.mrb[163].mxu0  ;;  %v19539_v12 = vadd.f32 %v19320_v21, %v8474_v22 }
0x1d8b   : > { %v20837_v58 = vld [vmem:[#allocation31_spill] sm:$0xff] }
0x1d8c   : > { %9888 = vmatmul.mubr.bf16.gmra.mrb[60].mxu1 %v15614_v46  ;;  %v19542_v50 = vadd.f32 %v19324_v60, %v8477_v59 }
0x1d8d   : > { %13085 = vmatprep.mubr.msk.bf16.mxu1 %vm931_vm3, %v15619_v10 }
0x1d8f   : > { %v8481_v54 = vpop.f32.mrb[164].mxu0 }
0x1d90   : > { %v8482_v7 = vadd.f32 %v8481_v54, %v19363_v13  ;;  %v8483_v19 = vpop.f32.mrb[165].mxu0  ;;  %v20838_v54 = vld [vmem:[#allocation34_spill] sm:$0xff] }
0x1d91   : > { %v8484_v15 = vpop.f32.mrb[166].mxu0 }
0x1d92   : > { %v8485_v62 = vadd.f32 %v8484_v15, %v19365_v43  ;;  %v8486_v51 = vpop.f32.mrb[167].mxu0  ;;  %v19551_v21 = vadd.f32 %v19328_v37, %v8482_v7  ;;  %v20832_v43 = vld [vmem:[#allocation28_spill] sm:$0xff] }
0x1d94   : > { %9896 = vmatmul.mubr.bf16.gmra.mrb[64].mxu1 %v15617_v16  ;;  %v19554_v60 = vadd.f32 %v19332_v63, %v8485_v62 }
0x1d95   : > { %14898 = vmatprep.mubr.msk.bf16.mxu1 %vm929_vm2, %v18643_v8 }
0x1d97   : > { %v14816_v13 = vpop.f32.mrb[184].mxu0 }
0x1d98   : > { %v9019_v57 = vpop.f32.mrb[185].mxu0 }
0x1d99   : > { %v14817_v44 = vpop.f32.mrb[186].mxu0 }
0x1d9a   : > { %v9140_v48 = vpack.c.bf16 %v14817_v44, %v14816_v13  ;;  %v9022_v3 = vpop.f32.mrb[187].mxu0  ;;  %v20839_v13 = vld [vmem:[#allocation33_spill] sm:$0xff] }
0x1d9b   : > { %v9139_v36 = vpack.c.bf16 %v9022_v3, %v9019_v57  ;;  %v20840_v57 = vld [vmem:[#allocation36_spill] sm:$0xff] }
0x1d9c   : > { %14899 = vmatmul.mubr.msk.bf16.vlgmr.msra.gmra.mrb[68].mxu1 %vm929_vm2, %v18640_v40 }
0x1d9d   : > { %9296 = vmatpush1.bf16.msra.mxu0 %v9139_v36  ;;  %14902 = vmatprep.mubr.msk.bf16.mxu1 %vm929_vm2, %v20832_v43 }
0x1d9e   : > { %9297 = vmatprep.subr.bf16.mxu0 %v20831_v5 }
0x1d9f   : > { %v14820_v37 = vpop.f32.mrb[188].mxu0 }
0x1da0   : > { %v9035_v63 = vpop.f32.mrb[189].mxu0 }
0x1da1   : > { %v14821_v61 = vpop.f32.mrb[190].mxu0  ;;  %9298 = vmatpush1.bf16.msra.mxu0 %v9140_v48 }
0x1da2   : > { %v9142_v41 = vpack.c.bf16 %v14821_v61, %v14820_v37  ;;  %v9038_v26 = vpop.f32.mrb[191].mxu0  ;;  %9299 = vmatprep.subr.bf16.mxu0 %v20831_v5  ;;  %v20841_v61 = vld [vmem:[#allocation35_spill] sm:$0xff] }
0x1da3   : > { %v9141_v34 = vpack.c.bf16 %v9038_v26, %v9035_v63  ;;  %v15622_v26 = vld [vmem:[%s20644_s14 + $0x240] ss:$8 sps:$4 sm:$0xff]  }
0x1da4   : > { %14903 = vmatmul.mubr.msk.bf16.gmra.mrb[72].mxu1 %vm929_vm2, %v20833_v25 }
0x1da5   : > { %9300 = vmatpush1.bf16.msra.mxu0 %v9141_v34  ;;  %14906 = vmatprep.mubr.msk.bf16.mxu1 %vm929_vm2, %v20834_v49  ;;  %v15628_v34 = vld [vmem:[%s20644_s14 + $0x254] ss:$8 sps:$4 sm:$0xff]  }
0x1da6   : > { %9301 = vmatprep.subr.bf16.mxu0 %v20831_v5 }
0x1da7   : > { %v14824_v9 = vpop.f32.mrb[168].mxu0 }
0x1da8   : > { %v9051_v56 = vpop.f32.mrb[169].mxu0 }
0x1da9   : > { %v14825_v4 = vpop.f32.mrb[170].mxu0  ;;  %9302 = vmatpush1.bf16.msra.mxu0 %v9142_v41  ;;  %v15625_v41 = vld [vmem:[%s20647_s17 + $0x50] sm:$0xff]  }
0x1daa   : > { %v9144_v0 = vpack.c.bf16 %v14825_v4, %v14824_v9  ;;  %v9054_v47 = vpop.f32.mrb[171].mxu0  ;;  %9303 = vmatprep.subr.bf16.mxu0 %v20831_v5  ;;  %v15644_v9 = vld [vmem:[%s20647_s17 + $0x58] sm:$0xff]   ;;  %v15631_v4 = vld [vmem:[%s20644_s14 + $0x264] ss:$8 sps:$4 sm:$0xff]  }
0x1dab   : > { %v9143_v6 = vpack.c.bf16 %v9054_v47, %v9051_v56  ;;  %v15626_v56 = vld [vmem:[%s20644_s14 + $0x250] ss:$8 sps:$4 sm:$0xff]   ;;  %v15634_v47 = vld [vmem:[%s20644_s14 + $0x274] ss:$8 sps:$4 sm:$0xff]  }
0x1dac   : > { %14907 = vmatmul.mubr.msk.bf16.gmra.mrb[76].mxu1 %vm929_vm2, %v20835_v29 }
0x1dad   : > { %9304 = vmatpush1.bf16.msra.mxu0 %v9143_v6  ;;  %14910 = vmatprep.mubr.msk.bf16.mxu1 %vm929_vm2, %v20836_v14  ;;  %v15632_v6 = vld [vmem:[%s20644_s14 + $0x270] ss:$8 sps:$4 sm:$0xff]  }
0x1dae   : > { %9305 = vmatprep.subr.bf16.mxu0 %v20831_v5 }
0x1daf   : > { %v14828_v22 = vpop.f32.mrb[192].mxu0 }
0x1db0   : > { %v9067_v52 = vpop.f32.mrb[193].mxu0 }
0x1db1   : > { %v14829_v46 = vpop.f32.mrb[194].mxu0  ;;  %9306 = vmatpush1.bf16.msra.mxu0 %v9144_v0  ;;  %v15629_v0 = vld [vmem:[%s20644_s14 + $0x260] ss:$8 sps:$4 sm:$0xff]  }
0x1db2   : > { %v9146_v38 = vpack.c.bf16 %v14829_v46, %v14828_v22  ;;  %v9070_v10 = vpop.f32.mrb[195].mxu0  ;;  %9307 = vmatprep.subr.bf16.mxu0 %v20831_v5  ;;  %v15637_v22 = vld [vmem:[%s20644_s14 + $0x284] ss:$8 sps:$4 sm:$0xff]   ;;  %v15640_v46 = vld [vmem:[%s20644_s14 + $0x294] ss:$8 sps:$4 sm:$0xff]  }
0x1db3   : > { %v9145_v59 = vpack.c.bf16 %v9070_v10, %v9067_v52  ;;  %v15635_v52 = vld [vmem:[%s20644_s14 + $0x280] ss:$8 sps:$4 sm:$0xff]   ;;  %v15643_v10 = vld [vmem:[%s20644_s14 + $0x2a4] ss:$8 sps:$4 sm:$0xff]  }
0x1db4   : > { %14911 = vmatmul.mubr.msk.bf16.gmra.mrb[80].mxu1 %vm929_vm2, %v20837_v58 }
0x1db5   : > { %9308 = vmatpush1.bf16.msra.mxu0 %v9145_v59  ;;  %14914 = vmatprep.mubr.msk.bf16.mxu1 %vm929_vm2, %v20838_v54  ;;  %v15641_v59 = vld [vmem:[%s20644_s14 + $0x2a0] ss:$8 sps:$4 sm:$0xff]  }
0x1db6   : > { %9309 = vmatprep.subr.bf16.mxu0 %v20831_v5 }
0x1db7   : > { %v14832_v7 = vpop.f32.mrb[172].mxu0 }
0x1db8   : > { %v9083_v19 = vpop.f32.mrb[173].mxu0 }
0x1db9   : > { %v14833_v16 = vpop.f32.mrb[174].mxu0  ;;  %9310 = vmatpush1.bf16.msra.mxu0 %v9146_v38  ;;  %v15638_v38 = vld [vmem:[%s20644_s14 + $0x290] ss:$8 sps:$4 sm:$0xff]  }
0x1dba   : > { %v9148_v15 = vpack.c.bf16 %v14833_v16, %v14832_v7  ;;  %v9086_v62 = vpop.f32.mrb[175].mxu0  ;;  %9311 = vmatprep.subr.bf16.mxu0 %v20831_v5  ;;  %v15647_v7 = vld [vmem:[%s20644_s14 + $0x2b4] ss:$8 sps:$4 sm:$0xff]   ;;  %v15650_v16 = vld [vmem:[%s20644_s14 + $0x2c4] ss:$8 sps:$4 sm:$0xff]  }
0x1dbb   : > { %v9147_v51 = vpack.c.bf16 %v9086_v62, %v9083_v19  ;;  %v15645_v19 = vld [vmem:[%s20644_s14 + $0x2b0] ss:$8 sps:$4 sm:$0xff]   ;;  %v15653_v62 = vld [vmem:[%s20644_s14 + $0x2d4] ss:$8 sps:$4 sm:$0xff]  }
0x1dbc   : > { %14915 = vmatmul.mubr.msk.bf16.gmra.mrb[84].mxu1 %vm929_vm2, %v20839_v13 }
0x1dbd   : > { %9312 = vmatpush1.bf16.msra.mxu0 %v9147_v51  ;;  %14918 = vmatprep.mubr.msk.bf16.mxu1 %vm929_vm2, %v20840_v57 }
0x1dbe   : > { %9313 = vmatprep.subr.bf16.mxu0 %v20831_v5 }
0x1dbf   : > { %v14836_v44 = vpop.f32.mrb[176].mxu0 }
0x1dc0   : > { %v9099_v48 = vpop.f32.mrb[177].mxu0 }
0x1dc1   : > { %v14837_v3 = vpop.f32.mrb[178].mxu0  ;;  %9314 = vmatpush1.bf16.msra.mxu0 %v9148_v15  ;;  %v15648_v15 = vld [vmem:[%s20644_s14 + $0x2c0] ss:$8 sps:$4 sm:$0xff]  }
0x1dc2   : > { %v9150_v36 = vpack.c.bf16 %v14837_v3, %v14836_v44  ;;  %v9102_v37 = vpop.f32.mrb[179].mxu0  ;;  %9315 = vmatprep.subr.bf16.mxu0 %v20831_v5  ;;  %v15651_v44 = vld [vmem:[%s20644_s14 + $0x2d0] ss:$8 sps:$4 sm:$0xff]   ;;  %v15656_v3 = vld [vmem:[%s20644_s14 + $0x2e4] ss:$8 sps:$4 sm:$0xff]  }
0x1dc3   : > { %v9149_v63 = vpack.c.bf16 %v9102_v37, %v9099_v48 }
0x1dc4   : > { %14919 = vmatmul.mubr.msk.bf16.gmra.mrb[88].mxu1 %vm929_vm2, %v20841_v61 }
0x1dc5   : > { %9316 = vmatpush1.bf16.msra.mxu0 %v9149_v63 }
0x1dc6   : > { %9317 = vmatprep.subr.bf16.mxu0 %v20831_v5 }
0x1dc9   : > { %9318 = vmatpush1.bf16.msra.mxu0 %v9150_v36 }
0x1dca   : > { %14866 = vmatprep.subr.bf16.mxu0 %v15625_v41 }
0x1dcc   : > { %9328 = vmatmul.mubr.bf16.vlgmr.msra.gmra.mrb[180].mxu0 %v15622_v26 }
0x1dcd   : > { %14867 = vmatpush3.bf16.msra.mxu0 %v15625_v41  ;;  %12997 = vmatprep.mubr.msk.bf16.mxu0 %vm931_vm3, %v15628_v34  ;;  %v15654_v41 = vld [vmem:[%s20644_s14 + $0x2e0] ss:$8 sps:$4 sm:$0xff]   ;;  %v15659_v34 = vld [vmem:[%s20644_s14 + $0x2f4] ss:$8 sps:$4 sm:$0xff]  }
0x1dce   : > { %14868 = vmatprep.subr.bf16.mxu0 %v15644_v9 }
0x1dd1   : > { %14869 = vmatpush3.bf16.msra.mxu0 %v15644_v9 }
0x1dd2   : > { %10255 = vmatprep.subr.bf16.mxu0 %v20831_v5 }
0x1dd4   : > { %9336 = vmatmul.mubr.bf16.gmra.mrb[196].mxu0 %v15626_v56 }
0x1dd5   : > { %12998 = vmatprep.mubr.msk.bf16.mxu0 %vm931_vm3, %v15631_v4 }
0x1ddc   : > { %9344 = vmatmul.mubr.bf16.gmra.mrb[200].mxu0 %v15629_v0  ;;  %v15657_v0 = vld [vmem:[%s20644_s14 + $0x2f0] ss:$8 sps:$4 sm:$0xff]  }
0x1ddd   : > { %12999 = vmatprep.mubr.msk.bf16.mxu0 %vm931_vm3, %v15634_v47 }
0x1de4   : > { %9352 = vmatmul.mubr.bf16.gmra.mrb[204].mxu0 %v15632_v6 }
0x1de5   : > { %13000 = vmatprep.mubr.msk.bf16.mxu0 %vm931_vm3, %v15637_v22 }
0x1dec   : > { %9360 = vmatmul.mubr.bf16.gmra.mrb[208].mxu0 %v15635_v52  ;;  %v15662_v52 = vld [vmem:[%s20644_s14 + $0x484] ss:$8 sps:$4 sm:$0xff]  }
0x1ded   : > { %13001 = vmatprep.mubr.msk.bf16.mxu0 %vm931_vm3, %v15640_v46  ;;  %13230 = vmatprep.mubr.msk.bf16.mxu1 %vm931_vm3, %v15662_v52 }
0x1df4   : > { %9368 = vmatmul.mubr.bf16.gmra.mrb[212].mxu0 %v15638_v38 }
0x1df5   : > { %13002 = vmatprep.mubr.msk.bf16.mxu0 %vm931_vm3, %v15643_v10 }
0x1dfc   : > { %9376 = vmatmul.mubr.bf16.gmra.mrb[216].mxu0 %v15641_v59 }
0x1dfd   : > { %13003 = vmatprep.mubr.msk.bf16.mxu0 %vm931_vm3, %v15647_v7 }
0x1e04   : > { %9384 = vmatmul.mubr.bf16.gmra.mrb[220].mxu0 %v15645_v19 }
0x1e05   : > { %13004 = vmatprep.mubr.msk.bf16.mxu0 %vm931_vm3, %v15650_v16 }
0x1e0c   : > { %9392 = vmatmul.mubr.bf16.gmra.mrb[224].mxu0 %v15648_v15 }
0x1e0d   : > { %13005 = vmatprep.mubr.msk.bf16.mxu0 %vm931_vm3, %v15653_v62 }
0x1e0f   : > { %v19661_v51 = vpop.f32.mrb[20].mxu1 }
0x1e10   : > { %v9811_v48 = vpop.f32.mrb[21].mxu1 }
0x1e11   : > { %v19669_v36 = vpop.f32.mrb[22].mxu1 }
0x1e12   : > { %v9814_v37 = vpop.f32.mrb[23].mxu1 }
0x1e14   : > { %9400 = vmatmul.mubr.bf16.gmra.mrb[228].mxu0 %v15651_v44 }
0x1e15   : > { %13006 = vmatprep.mubr.msk.bf16.mxu0 %vm931_vm3, %v15656_v3 }
0x1e17   : > { %v19672_v63 = vpop.f32.mrb[24].mxu1 }
0x1e18   : > { %v9819_v26 = vpop.f32.mrb[25].mxu1 }
0x1e19   : > { %v19680_v9 = vpop.f32.mrb[26].mxu1 }
0x1e1a   : > { %v9822_v56 = vpop.f32.mrb[27].mxu1 }
0x1e1c   : > { %9408 = vmatmul.mubr.bf16.gmra.mrb[232].mxu0 %v15654_v41 }
0x1e1d   : > { %13007 = vmatprep.mubr.msk.bf16.mxu0 %vm931_vm3, %v15659_v34 }
0x1e1f   : > { %v19683_v4 = vpop.f32.mrb[28].mxu1 }
0x1e20   : > { %v9827_v47 = vpop.f32.mrb[29].mxu1 }
0x1e21   : > { %v19688_v6 = vpop.f32.mrb[30].mxu1 }
0x1e22   : > { %v9830_v22 = vpop.f32.mrb[31].mxu1 }
0x1e24   : > { %9416 = vmatmul.mubr.bf16.gmra.mrb[236].mxu0 %v15657_v0 }
0x1e25   : > { %14870 = vmatprep.mubr.msk.bf16.mxu0 %vm929_vm2, %v18643_v8 }
0x1e27   : > { %v19696_v46 = vpop.f32.mrb[32].mxu1 }
0x1e28   : > { %v9835_v38 = vpop.f32.mrb[33].mxu1 }
0x1e29   : > { %v19698_v10 = vpop.f32.mrb[34].mxu1 }
0x1e2a   : > { %v9838_v59 = vpop.f32.mrb[35].mxu1 }
0x1e2c   : > { %14871 = vmatmul.mubr.msk.bf16.vlgmr.msra.gmra.mrb[240].mxu0 %vm929_vm2, %v18640_v40 }
0x1e2d   : > { %14874 = vmatprep.mubr.msk.bf16.mxu0 %vm929_vm2, %v20832_v43 }
0x1e2f   : > { %v19704_v7 = vpop.f32.mrb[36].mxu1 }
0x1e30   : > { %v9843_v19 = vpop.f32.mrb[37].mxu1 }
0x1e31   : > { %v19706_v16 = vpop.f32.mrb[38].mxu1 }
0x1e32   : > { %v9846_v15 = vpop.f32.mrb[39].mxu1 }
0x1e34   : > { %14875 = vmatmul.mubr.msk.bf16.gmra.mrb[244].mxu0 %vm929_vm2, %v20833_v25 }
0x1e35   : > { %14878 = vmatprep.mubr.msk.bf16.mxu0 %vm929_vm2, %v20834_v49 }
0x1e37   : > { %v19712_v62 = vpop.f32.mrb[40].mxu1 }
0x1e38   : > { %v9851_v44 = vpop.f32.mrb[41].mxu1 }
0x1e39   : > { %v19714_v48 = vpop.f32.mrb[42].mxu1 }
0x1e3a   : > { %v9854_v3 = vpop.f32.mrb[43].mxu1 }
0x1e3c   : > { %14879 = vmatmul.mubr.msk.bf16.gmra.mrb[248].mxu0 %vm929_vm2, %v20835_v29 }
0x1e3d   : > { %14882 = vmatprep.mubr.msk.bf16.mxu0 %vm929_vm2, %v20836_v14 }
0x1e3f   : > { %v19720_v37 = vpop.f32.mrb[44].mxu1 }
0x1e40   : > { %v9859_v41 = vpop.f32.mrb[45].mxu1 }
0x1e41   : > { %v19722_v26 = vpop.f32.mrb[46].mxu1 }
0x1e42   : > { %v9862_v34 = vpop.f32.mrb[47].mxu1 }
0x1e44   : > { %14883 = vmatmul.mubr.msk.bf16.gmra.mrb[252].mxu0 %vm929_vm2, %v20837_v58 }
0x1e45   : > { %14886 = vmatprep.mubr.msk.bf16.mxu0 %vm929_vm2, %v20838_v54 }
0x1e47   : > { %v19728_v56 = vpop.f32.mrb[48].mxu1 }
0x1e48   : > { %v9867_v0 = vpop.f32.mrb[49].mxu1 }
0x1e49   : > { %v19730_v47 = vpop.f32.mrb[50].mxu1 }
0x1e4a   : > { %v9870_v22 = vpop.f32.mrb[51].mxu1 }
0x1e4c   : > { %14887 = vmatmul.mubr.msk.bf16.gmra.mrb[0].mxu0 %vm929_vm2, %v20839_v13 }
0x1e4d   : > { %14890 = vmatprep.mubr.msk.bf16.mxu0 %vm929_vm2, %v20840_v57 }
0x1e4f   : > { %v19736_v52 = vpop.f32.mrb[52].mxu1 }
0x1e50   : > { %v9875_v38 = vpop.f32.mrb[53].mxu1 }
0x1e51   : > { %v19738_v59 = vpop.f32.mrb[54].mxu1 }
0x1e52   : > { %v9878_v19 = vpop.f32.mrb[55].mxu1 }
0x1e54   : > { %14891 = vmatmul.mubr.msk.bf16.gmra.mrb[4].mxu0 %vm929_vm2, %v20841_v61 }
0x1e57   : > { %v19742_v15 = vpop.f32.mrb[56].mxu1 }
0x1e58   : > { %v9883_v44 = vpop.f32.mrb[57].mxu1 }
0x1e59   : > { %v19744_v3 = vpop.f32.mrb[58].mxu1 }
0x1e5a   : > { %v9886_v41 = vpop.f32.mrb[59].mxu1 }
0x1e5f   : > { %v19746_v34 = vpop.f32.mrb[60].mxu1 }
0x1e60   : > { %v9891_v0 = vpop.f32.mrb[61].mxu1 }
0x1e61   : > { %v19748_v22 = vpop.f32.mrb[62].mxu1 }
0x1e62   : > { %v9894_v57 = vpop.f32.mrb[63].mxu1 }
0x1e67   : > { %v19750_v13 = vpop.f32.mrb[64].mxu1 }
0x1e68   : > { %v9899_v38 = vpop.f32.mrb[65].mxu1 }
0x1e69   : > { %v19752_v54 = vpop.f32.mrb[66].mxu1 }
0x1e6a   : > { %v9902_v19 = vpop.f32.mrb[67].mxu1 }
0x1e6f   : > { %v14900_v58 = vpop.f32.mrb[68].mxu1 }
0x1e70   : > { %v10459_v61 = vpop.f32.mrb[69].mxu1 }
0x1e71   : > { %v14901_v14 = vpop.f32.mrb[70].mxu1 }
0x1e72   : > { %v10580_v29 = vpack.c.bf16 %v14901_v14, %v14900_v58  ;;  %v10462_v44 = vpop.f32.mrb[71].mxu1 }
0x1e73   : > { %v10579_v49 = vpack.c.bf16 %v10462_v44, %v10459_v61 }
0x1e75   : > { %10736 = vmatpush1.bf16.msra.mxu1 %v10579_v49 }
0x1e76   : > { %10737 = vmatprep.subr.bf16.mxu1 %v20831_v5 }
0x1e77   : > { %v14904_v41 = vpop.f32.mrb[72].mxu1 }
0x1e78   : > { %v10475_v0 = vpop.f32.mrb[73].mxu1 }
0x1e79   : > { %v14905_v25 = vpop.f32.mrb[74].mxu1  ;;  %10738 = vmatpush1.bf16.msra.mxu1 %v10580_v29 }
0x1e7a   : > { %v10582_v57 = vpack.c.bf16 %v14905_v25, %v14904_v41  ;;  %v10478_v43 = vpop.f32.mrb[75].mxu1  ;;  %10739 = vmatprep.subr.bf16.mxu1 %v20831_v5 }
0x1e7b   : > { %v10581_v38 = vpack.c.bf16 %v10478_v43, %v10475_v0 }
0x1e7d   : > { %10740 = vmatpush1.bf16.msra.mxu1 %v10581_v38 }
0x1e7e   : > { %10741 = vmatprep.subr.bf16.mxu1 %v20831_v5 }
0x1e7f   : > { %v14908_v19 = vpop.f32.mrb[76].mxu1 }
0x1e80   : > { %v10491_v40 = vpop.f32.mrb[77].mxu1 }
0x1e81   : > { %v14909_v14 = vpop.f32.mrb[78].mxu1  ;;  %10742 = vmatpush1.bf16.msra.mxu1 %v10582_v57 }
0x1e82   : > { %v10584_v58 = vpack.c.bf16 %v14909_v14, %v14908_v19  ;;  %v10494_v49 = vpop.f32.mrb[79].mxu1  ;;  %10743 = vmatprep.subr.bf16.mxu1 %v20831_v5 }
0x1e83   : > { %v10583_v61 = vpack.c.bf16 %v10494_v49, %v10491_v40 }
0x1e85   : > { %10744 = vmatpush1.bf16.msra.mxu1 %v10583_v61 }
0x1e86   : > { %10745 = vmatprep.subr.bf16.mxu1 %v20831_v5 }
0x1e87   : > { %v14912_v25 = vpop.f32.mrb[80].mxu1 }
0x1e88   : > { %v10507_v29 = vpop.f32.mrb[81].mxu1 }
0x1e89   : > { %v14913_v44 = vpop.f32.mrb[82].mxu1  ;;  %10746 = vmatpush1.bf16.msra.mxu1 %v10584_v58 }
0x1e8a   : > { %v10586_v43 = vpack.c.bf16 %v14913_v44, %v14912_v25  ;;  %v10510_v41 = vpop.f32.mrb[83].mxu1  ;;  %10747 = vmatprep.subr.bf16.mxu1 %v20831_v5 }
0x1e8b   : > { %v10585_v0 = vpack.c.bf16 %v10510_v41, %v10507_v29 }
0x1e8d   : > { %10748 = vmatpush1.bf16.msra.mxu1 %v10585_v0 }
0x1e8e   : > { %10749 = vmatprep.subr.bf16.mxu1 %v20831_v5 }
0x1e8f   : > { %v14916_v57 = vpop.f32.mrb[84].mxu1 }
0x1e90   : > { %v10523_v38 = vpop.f32.mrb[85].mxu1 }
0x1e91   : > { %v14917_v19 = vpop.f32.mrb[86].mxu1  ;;  %10750 = vmatpush1.bf16.msra.mxu1 %v10586_v43  ;;  %v15696_v43 = vld [vmem:[%s20647_s17 + $0x80] sm:$0xff]  }
0x1e92   : > { %v10588_v40 = vpack.c.bf16 %v14917_v19, %v14916_v57  ;;  %v10526_v14 = vpop.f32.mrb[87].mxu1  ;;  %10751 = vmatprep.subr.bf16.mxu1 %v20831_v5  ;;  %v15660_v19 = vld [vmem:[%s20644_s14 + $0x480] ss:$8 sps:$4 sm:$0xff]  }
0x1e93   : > { %v10587_v49 = vpack.c.bf16 %v10526_v14, %v10523_v38  ;;  %v15665_v14 = vld [vmem:[%s20644_s14 + $0x494] ss:$8 sps:$4 sm:$0xff]  }
0x1e95   : > { %10752 = vmatpush1.bf16.msra.mxu1 %v10587_v49 }
0x1e96   : > { %10753 = vmatprep.subr.bf16.mxu1 %v20831_v5 }
0x1e97   : > { %v14920_v58 = vpop.f32.mrb[88].mxu1 }
0x1e98   : > { %v10539_v61 = vpop.f32.mrb[89].mxu1 }
0x1e99   : > { %v14921_v25 = vpop.f32.mrb[90].mxu1  ;;  %10754 = vmatpush1.bf16.msra.mxu1 %v10588_v40 }
0x1e9a   : > { %v10590_v29 = vpack.c.bf16 %v14921_v25, %v14920_v58  ;;  %v10542_v44 = vpop.f32.mrb[91].mxu1  ;;  %10755 = vmatprep.subr.bf16.mxu1 %v20831_v5 }
0x1e9b   : > { %v10589_v41 = vpack.c.bf16 %v10542_v44, %v10539_v61  ;;  %v15697_v61 = vld [vmem:[%s20647_s17 + $0x88] sm:$0xff]  }
0x1e9d   : > { %10756 = vmatpush1.bf16.msra.mxu1 %v10589_v41  ;;  %v15663_v41 = vld [vmem:[%s20644_s14 + $0x490] ss:$8 sps:$4 sm:$0xff]  }
0x1e9e   : > { %10757 = vmatprep.subr.bf16.mxu1 %v20831_v5 }
0x1e9f   : > { %v9329_v0 = vpop.f32.mrb[180].mxu0 }
0x1ea0   : > { %v9424_v57 = vadd.f32 %v9329_v0, %v19384_v18  ;;  %v9331_v38 = vpop.f32.mrb[181].mxu0 }
0x1ea1   : > { %v9332_v40 = vpop.f32.mrb[182].mxu0  ;;  %10758 = vmatpush1.bf16.msra.mxu1 %v10590_v29 }
0x1ea2   : > { %v9425_v49 = vadd.f32 %v9332_v40, %v19387_v30  ;;  %v9334_v58 = vpop.f32.mrb[183].mxu0  ;;  %14950 = vmatprep.subr.bf16.mxu1 %v15696_v43  ;;  %v19780_v18 = vadd.f32 %v19661_v51, %v9424_v57  ;;  %v15668_v51 = vld [vmem:[%s20644_s14 + $0x4a4] ss:$8 sps:$4 sm:$0xff]  }
0x1ea4   : > { %10768 = vmatmul.mubr.bf16.vlgmr.msra.gmra.mrb[92].mxu1 %v15660_v19  ;;  %v19783_v25 = vadd.f32 %v19669_v36, %v9425_v49 }
0x1ea5   : > { %13231 = vmatprep.mubr.msk.bf16.mxu1 %vm931_vm3, %v15665_v14  ;;  %14951 = vmatpush3.bf16.msra.mxu1 %v15696_v43 }
0x1ea6   : > { %14952 = vmatprep.subr.bf16.mxu1 %v15697_v61 }
0x1ea7   : > { %v9337_v29 = vpop.f32.mrb[196].mxu0 }
0x1ea8   : > { %v9426_v30 = vadd.f32 %v9337_v29, %v19400_v55  ;;  %v9339_v44 = vpop.f32.mrb[197].mxu0 }
0x1ea9   : > { %v9340_v0 = vpop.f32.mrb[198].mxu0  ;;  %14953 = vmatpush3.bf16.msra.mxu1 %v15697_v61 }
0x1eaa   : > { %v9427_v36 = vadd.f32 %v9340_v0, %v19403_v32  ;;  %v9342_v57 = vpop.f32.mrb[199].mxu0  ;;  %11695 = vmatprep.subr.bf16.mxu1 %v20831_v5  ;;  %v19796_v43 = vadd.f32 %v19672_v63, %v9426_v30  ;;  %v15666_v32 = vld [vmem:[%s20644_s14 + $0x4a0] ss:$8 sps:$4 sm:$0xff]   ;;  %v15671_v63 = vld [vmem:[%s20644_s14 + $0x4b4] ss:$8 sps:$4 sm:$0xff]  }
0x1eac   : > { %10776 = vmatmul.mubr.bf16.gmra.mrb[96].mxu1 %v15663_v41  ;;  %v19799_v55 = vadd.f32 %v19680_v9, %v9427_v36  ;;  %v15700_v9 = vld [vmem:[%s20644_s14 + $0x3c4] ss:$8 sps:$4 sm:$0xff]  }
0x1ead   : > { %13232 = vmatprep.mubr.msk.bf16.mxu1 %vm931_vm3, %v15668_v51  ;;  %13152 = vmatprep.mubr.msk.bf16.mxu0 %vm931_vm3, %v15700_v9 }
0x1eaf   : > { %v9345_v38 = vpop.f32.mrb[200].mxu0 }
0x1eb0   : > { %v9428_v19 = vadd.f32 %v9345_v38, %v19418_v53  ;;  %v9347_v40 = vpop.f32.mrb[201].mxu0 }
0x1eb1   : > { %v9348_v14 = vpop.f32.mrb[202].mxu0 }
0x1eb2   : > { %v9429_v49 = vadd.f32 %v9348_v14, %v19422_v20  ;;  %v9350_v58 = vpop.f32.mrb[203].mxu0  ;;  %v19814_v61 = vadd.f32 %v19683_v4, %v9428_v19  ;;  %v15669_v20 = vld [vmem:[%s20644_s14 + $0x4b0] ss:$8 sps:$4 sm:$0xff]   ;;  %v15674_v4 = vld [vmem:[%s20644_s14 + $0x4c4] ss:$8 sps:$4 sm:$0xff]  }
0x1eb3   : > { %v15672_v19 = vld [vmem:[%s20644_s14 + $0x4c0] ss:$8 sps:$4 sm:$0xff]  }
0x1eb4   : > { %10784 = vmatmul.mubr.bf16.gmra.mrb[100].mxu1 %v15666_v32  ;;  %v19818_v53 = vadd.f32 %v19688_v6, %v9429_v49  ;;  %v15675_v49 = vld [vmem:[%s20644_s14 + $0x4d0] ss:$8 sps:$4 sm:$0xff]  }
0x1eb5   : > { %13233 = vmatprep.mubr.msk.bf16.mxu1 %vm931_vm3, %v15671_v63 }
0x1eb7   : > { %v9353_v29 = vpop.f32.mrb[204].mxu0 }
0x1eb8   : > { %v9430_v30 = vadd.f32 %v9353_v29, %v19434_v35  ;;  %v9355_v44 = vpop.f32.mrb[205].mxu0 }
0x1eb9   : > { %v9356_v41 = vpop.f32.mrb[206].mxu0 }
0x1eba   : > { %v9431_v0 = vadd.f32 %v9356_v41, %v19437_v11  ;;  %v9358_v51 = vpop.f32.mrb[207].mxu0  ;;  %v19830_v6 = vadd.f32 %v19696_v46, %v9430_v30  ;;  %v15677_v11 = vld [vmem:[%s20644_s14 + $0x4d4] ss:$8 sps:$4 sm:$0xff]   ;;  %v15678_v41 = vld [vmem:[%s20644_s14 + $0x4e0] ss:$8 sps:$4 sm:$0xff]  }
0x1ebc   : > { %10792 = vmatmul.mubr.bf16.gmra.mrb[104].mxu1 %v15669_v20  ;;  %v19833_v36 = vadd.f32 %v19698_v10, %v9431_v0 }
0x1ebd   : > { %13234 = vmatprep.mubr.msk.bf16.mxu1 %vm931_vm3, %v15674_v4 }
0x1ebf   : > { %v9361_v35 = vpop.f32.mrb[208].mxu0 }
0x1ec0   : > { %v9432_v57 = vadd.f32 %v9361_v35, %v19449_v45  ;;  %v9363_v38 = vpop.f32.mrb[209].mxu0 }
0x1ec1   : > { %v9364_v40 = vpop.f32.mrb[210].mxu0  ;;  %v15681_v38 = vld [vmem:[%s20644_s14 + $0x4f0] ss:$8 sps:$4 sm:$0xff]  }
0x1ec2   : > { %v9433_v46 = vadd.f32 %v9364_v40, %v19452_v33  ;;  %v9366_v32 = vpop.f32.mrb[211].mxu0  ;;  %v19845_v10 = vadd.f32 %v19704_v7, %v9432_v57  ;;  %v15680_v33 = vld [vmem:[%s20644_s14 + $0x4e4] ss:$8 sps:$4 sm:$0xff]  }
0x1ec4   : > { %10800 = vmatmul.mubr.bf16.gmra.mrb[108].mxu1 %v15672_v19  ;;  %v19848_v14 = vadd.f32 %v19706_v16, %v9433_v46 }
0x1ec5   : > { %13235 = vmatprep.mubr.msk.bf16.mxu1 %vm931_vm3, %v15677_v11 }
0x1ec7   : > { %v9369_v45 = vpop.f32.mrb[212].mxu0 }
0x1ec8   : > { %v9434_v63 = vadd.f32 %v9369_v45, %v19464_v24  ;;  %v9371_v9 = vpop.f32.mrb[213].mxu0  ;;  %v15684_v45 = vld [vmem:[%s20644_s14 + $0x500] ss:$8 sps:$4 sm:$0xff]  }
0x1ec9   : > { %v9372_v58 = vpop.f32.mrb[214].mxu0 }
0x1eca   : > { %v9435_v7 = vadd.f32 %v9372_v58, %v19467_v42  ;;  %v9374_v29 = vpop.f32.mrb[215].mxu0  ;;  %v19860_v16 = vadd.f32 %v19712_v62, %v9434_v63  ;;  %v15683_v42 = vld [vmem:[%s20644_s14 + $0x4f4] ss:$8 sps:$4 sm:$0xff]  }
0x1ecc   : > { %10808 = vmatmul.mubr.bf16.gmra.mrb[112].mxu1 %v15675_v49  ;;  %v19863_v30 = vadd.f32 %v19714_v48, %v9435_v7  ;;  %v15687_v7 = vld [vmem:[%s20644_s14 + $0x510] ss:$8 sps:$4 sm:$0xff]  }
0x1ecd   : > { %13236 = vmatprep.mubr.msk.bf16.mxu1 %vm931_vm3, %v15680_v33 }
0x1ecf   : > { %v9377_v24 = vpop.f32.mrb[216].mxu0 }
0x1ed0   : > { %v9436_v44 = vadd.f32 %v9377_v24, %v19479_v27  ;;  %v9379_v20 = vpop.f32.mrb[217].mxu0 }
0x1ed1   : > { %v9380_v4 = vpop.f32.mrb[218].mxu0 }
0x1ed2   : > { %v9437_v62 = vadd.f32 %v9380_v4, %v19482_v39  ;;  %v9382_v0 = vpop.f32.mrb[219].mxu0  ;;  %v19875_v48 = vadd.f32 %v19720_v37, %v9436_v44  ;;  %v15686_v39 = vld [vmem:[%s20644_s14 + $0x504] ss:$8 sps:$4 sm:$0xff]   ;;  %v15690_v4 = vld [vmem:[%s20644_s14 + $0x520] ss:$8 sps:$4 sm:$0xff]  }
0x1ed4   : > { %10816 = vmatmul.mubr.bf16.gmra.mrb[116].mxu1 %v15678_v41  ;;  %v19878_v51 = vadd.f32 %v19722_v26, %v9437_v62 }
0x1ed5   : > { %13237 = vmatprep.mubr.msk.bf16.mxu1 %vm931_vm3, %v15683_v42 }
0x1ed7   : > { %v9385_v27 = vpop.f32.mrb[220].mxu0 }
0x1ed8   : > { %v9438_v35 = vadd.f32 %v9385_v27, %v19494_v23  ;;  %v9387_v57 = vpop.f32.mrb[221].mxu0 }
0x1ed9   : > { %v9388_v19 = vpop.f32.mrb[222].mxu0  ;;  %v15693_v57 = vld [vmem:[%s20644_s14 + $0x530] ss:$8 sps:$4 sm:$0xff]  }
0x1eda   : > { %v9439_v37 = vadd.f32 %v9388_v19, %v19497_v28  ;;  %v9390_v40 = vpop.f32.mrb[223].mxu0  ;;  %v19890_v26 = vadd.f32 %v19728_v56, %v9438_v35  ;;  %v15689_v28 = vld [vmem:[%s20644_s14 + $0x514] ss:$8 sps:$4 sm:$0xff]  }
0x1edc   : > { %10824 = vmatmul.mubr.bf16.gmra.mrb[120].mxu1 %v15681_v38  ;;  %v19893_v11 = vadd.f32 %v19730_v47, %v9439_v37 }
0x1edd   : > { %13238 = vmatprep.mubr.msk.bf16.mxu1 %vm931_vm3, %v15686_v39 }
0x1edf   : > { %v9393_v23 = vpop.f32.mrb[224].mxu0 }
0x1ee0   : > { %v9440_v46 = vadd.f32 %v9393_v23, %v19509_v17  ;;  %v9395_v32 = vpop.f32.mrb[225].mxu0 }
0x1ee1   : > { %v9396_v63 = vpop.f32.mrb[226].mxu0  ;;  %v20842_v32 = vld [vmem:[#allocation26_spill] sm:$0xff] }
0x1ee2   : > { %v9441_v56 = vadd.f32 %v9396_v63, %v19512_v2  ;;  %v9398_v9 = vpop.f32.mrb[227].mxu0  ;;  %v19905_v47 = vadd.f32 %v19736_v52, %v9440_v46  ;;  %v15692_v2 = vld [vmem:[%s20644_s14 + $0x524] ss:$8 sps:$4 sm:$0xff]  }
0x1ee3   : > { %v20844_v9 = vld [vmem:[#allocation27_spill] sm:$0xff] }
0x1ee4   : > { %10832 = vmatmul.mubr.bf16.gmra.mrb[124].mxu1 %v15684_v45  ;;  %v19908_v49 = vadd.f32 %v19738_v59, %v9441_v56 }
0x1ee5   : > { %13239 = vmatprep.mubr.msk.bf16.mxu1 %vm931_vm3, %v15689_v28 }
0x1ee7   : > { %v9401_v17 = vpop.f32.mrb[228].mxu0 }
0x1ee8   : > { %v9442_v58 = vadd.f32 %v9401_v17, %v19524_v1  ;;  %v9403_v33 = vpop.f32.mrb[229].mxu0  ;;  %v20845_v17 = vld [vmem:[#allocation30_spill] sm:$0xff] }
0x1ee9   : > { %v9404_v29 = vpop.f32.mrb[230].mxu0 }
0x1eea   : > { %v9443_v52 = vadd.f32 %v9404_v29, %v19527_v31  ;;  %v9406_v24 = vpop.f32.mrb[231].mxu0  ;;  %v19920_v59 = vadd.f32 %v19742_v15, %v9442_v58  ;;  %v15695_v31 = vld [vmem:[%s20644_s14 + $0x534] ss:$8 sps:$4 sm:$0xff]  }
0x1eeb   : > { %v20846_v24 = vld [vmem:[#allocation29_spill] sm:$0xff] }
0x1eec   : > { %10840 = vmatmul.mubr.bf16.gmra.mrb[128].mxu1 %v15687_v7  ;;  %v19923_v44 = vadd.f32 %v19744_v3, %v9443_v52 }
0x1eed   : > { %13240 = vmatprep.mubr.msk.bf16.mxu1 %vm931_vm3, %v15692_v2 }
0x1eef   : > { %v9409_v1 = vpop.f32.mrb[232].mxu0 }
0x1ef0   : > { %v9444_v20 = vadd.f32 %v9409_v1, %v19539_v12  ;;  %v9411_v41 = vpop.f32.mrb[233].mxu0  ;;  %v20847_v1 = vld [vmem:[#allocation32_spill] sm:$0xff] }
0x1ef1   : > { %v9412_v42 = vpop.f32.mrb[234].mxu0 }
0x1ef2   : > { %v9445_v15 = vadd.f32 %v9412_v42, %v19542_v50  ;;  %v9414_v62 = vpop.f32.mrb[235].mxu0  ;;  %v19935_v3 = vadd.f32 %v19746_v34, %v9444_v20 }
0x1ef3   : > { %v20848_v62 = vld [vmem:[#allocation31_spill] sm:$0xff] }
0x1ef4   : > { %10848 = vmatmul.mubr.bf16.gmra.mrb[132].mxu1 %v15690_v4  ;;  %v19938_v0 = vadd.f32 %v19748_v22, %v9445_v15 }
0x1ef5   : > { %13241 = vmatprep.mubr.msk.bf16.mxu1 %vm931_vm3, %v15695_v31 }
0x1ef7   : > { %v9417_v12 = vpop.f32.mrb[236].mxu0 }
0x1ef8   : > { %v9446_v27 = vadd.f32 %v9417_v12, %v19551_v21  ;;  %v9419_v35 = vpop.f32.mrb[237].mxu0  ;;  %v20849_v12 = vld [vmem:[#allocation34_spill] sm:$0xff] }
0x1ef9   : > { %v9420_v38 = vpop.f32.mrb[238].mxu0 }
0x1efa   : > { %v9447_v50 = vadd.f32 %v9420_v38, %v19554_v60  ;;  %v9422_v19 = vpop.f32.mrb[239].mxu0  ;;  %v19947_v34 = vadd.f32 %v19750_v13, %v9446_v27  ;;  %v20843_v60 = vld [vmem:[#allocation28_spill] sm:$0xff] }
0x1efc   : > { %10856 = vmatmul.mubr.bf16.gmra.mrb[136].mxu1 %v15693_v57  ;;  %v19950_v22 = vadd.f32 %v19752_v54, %v9447_v50 }
0x1efd   : > { %14954 = vmatprep.mubr.msk.bf16.mxu1 %vm929_vm2, %v18643_v8 }
0x1eff   : > { %v14872_v21 = vpop.f32.mrb[240].mxu0 }
0x1f00   : > { %v9979_v39 = vpop.f32.mrb[241].mxu0 }
0x1f01   : > { %v14873_v37 = vpop.f32.mrb[242].mxu0 }
0x1f02   : > { %v10100_v40 = vpack.c.bf16 %v14873_v37, %v14872_v21  ;;  %v9982_v23 = vpop.f32.mrb[243].mxu0  ;;  %v20850_v21 = vld [vmem:[#allocation33_spill] sm:$0xff] }
0x1f03   : > { %v10099_v46 = vpack.c.bf16 %v9982_v23, %v9979_v39  ;;  %v20851_v39 = vld [vmem:[#allocation36_spill] sm:$0xff] }
0x1f04   : > { %14955 = vmatmul.mubr.msk.bf16.vlgmr.msra.gmra.mrb[140].mxu1 %vm929_vm2, %v20842_v32 }
0x1f05   : > { %10256 = vmatpush1.bf16.msra.mxu0 %v10099_v46  ;;  %14958 = vmatprep.mubr.msk.bf16.mxu1 %vm929_vm2, %v20843_v60 }
0x1f06   : > { %10257 = vmatprep.subr.bf16.mxu0 %v20831_v5 }
0x1f07   : > { %v14876_v54 = vpop.f32.mrb[244].mxu0 }
0x1f08   : > { %v9995_v13 = vpop.f32.mrb[245].mxu0 }
0x1f09   : > { %v14877_v45 = vpop.f32.mrb[246].mxu0  ;;  %10258 = vmatpush1.bf16.msra.mxu0 %v10100_v40 }
0x1f0a   : > { %v10102_v63 = vpack.c.bf16 %v14877_v45, %v14876_v54  ;;  %v9998_v28 = vpop.f32.mrb[247].mxu0  ;;  %10259 = vmatprep.subr.bf16.mxu0 %v20831_v5  ;;  %v20852_v45 = vld [vmem:[#allocation35_spill] sm:$0xff] }
0x1f0b   : > { %v10101_v56 = vpack.c.bf16 %v9998_v28, %v9995_v13  ;;  %v15698_v28 = vld [vmem:[%s20644_s14 + $0x3c0] ss:$8 sps:$4 sm:$0xff]  }
0x1f0c   : > { %14959 = vmatmul.mubr.msk.bf16.gmra.mrb[144].mxu1 %vm929_vm2, %v20844_v9 }
0x1f0d   : > { %10260 = vmatpush1.bf16.msra.mxu0 %v10101_v56  ;;  %14962 = vmatprep.mubr.msk.bf16.mxu1 %vm929_vm2, %v20845_v17  ;;  %v15704_v56 = vld [vmem:[%s20644_s14 + $0x3d4] ss:$8 sps:$4 sm:$0xff]  }
0x1f0e   : > { %10261 = vmatprep.subr.bf16.mxu0 %v20831_v5 }
0x1f0f   : > { %v14880_v58 = vpop.f32.mrb[248].mxu0 }
0x1f10   : > { %v10011_v33 = vpop.f32.mrb[249].mxu0 }
0x1f11   : > { %v14881_v7 = vpop.f32.mrb[250].mxu0  ;;  %10262 = vmatpush1.bf16.msra.mxu0 %v10102_v63  ;;  %v15701_v63 = vld [vmem:[%s20647_s17 + $0x70] sm:$0xff]  }
0x1f12   : > { %v10104_v29 = vpack.c.bf16 %v14881_v7, %v14880_v58  ;;  %v10014_v2 = vpop.f32.mrb[251].mxu0  ;;  %10263 = vmatprep.subr.bf16.mxu0 %v20831_v5  ;;  %v15720_v58 = vld [vmem:[%s20647_s17 + $0x78] sm:$0xff]   ;;  %v15707_v7 = vld [vmem:[%s20644_s14 + $0x3e4] ss:$8 sps:$4 sm:$0xff]  }
0x1f13   : > { %v10103_v52 = vpack.c.bf16 %v10014_v2, %v10011_v33  ;;  %v15702_v33 = vld [vmem:[%s20644_s14 + $0x3d0] ss:$8 sps:$4 sm:$0xff]   ;;  %v15710_v2 = vld [vmem:[%s20644_s14 + $0x3f4] ss:$8 sps:$4 sm:$0xff]  }
0x1f14   : > { %14963 = vmatmul.mubr.msk.bf16.gmra.mrb[148].mxu1 %vm929_vm2, %v20846_v24 }
0x1f15   : > { %10264 = vmatpush1.bf16.msra.mxu0 %v10103_v52  ;;  %14966 = vmatprep.mubr.msk.bf16.mxu1 %vm929_vm2, %v20847_v1  ;;  %v15708_v52 = vld [vmem:[%s20644_s14 + $0x3f0] ss:$8 sps:$4 sm:$0xff]  }
0x1f16   : > { %10265 = vmatprep.subr.bf16.mxu0 %v20831_v5 }
0x1f17   : > { %v14884_v20 = vpop.f32.mrb[252].mxu0 }
0x1f18   : > { %v10027_v41 = vpop.f32.mrb[253].mxu0 }
0x1f19   : > { %v14885_v4 = vpop.f32.mrb[254].mxu0  ;;  %10266 = vmatpush1.bf16.msra.mxu0 %v10104_v29  ;;  %v15705_v29 = vld [vmem:[%s20644_s14 + $0x3e0] ss:$8 sps:$4 sm:$0xff]  }
0x1f1a   : > { %v10106_v42 = vpack.c.bf16 %v14885_v4, %v14884_v20  ;;  %v10030_v31 = vpop.f32.mrb[255].mxu0  ;;  %10267 = vmatprep.subr.bf16.mxu0 %v20831_v5  ;;  %v15713_v20 = vld [vmem:[%s20644_s14 + $0x404] ss:$8 sps:$4 sm:$0xff]   ;;  %v15716_v4 = vld [vmem:[%s20644_s14 + $0x414] ss:$8 sps:$4 sm:$0xff]  }
0x1f1b   : > { %v10105_v15 = vpack.c.bf16 %v10030_v31, %v10027_v41  ;;  %v15711_v41 = vld [vmem:[%s20644_s14 + $0x400] ss:$8 sps:$4 sm:$0xff]   ;;  %v15719_v31 = vld [vmem:[%s20644_s14 + $0x424] ss:$8 sps:$4 sm:$0xff]  }
0x1f1c   : > { %14967 = vmatmul.mubr.msk.bf16.gmra.mrb[152].mxu1 %vm929_vm2, %v20848_v62 }
0x1f1d   : > { %10268 = vmatpush1.bf16.msra.mxu0 %v10105_v15  ;;  %14970 = vmatprep.mubr.msk.bf16.mxu1 %vm929_vm2, %v20849_v12  ;;  %v15717_v15 = vld [vmem:[%s20644_s14 + $0x420] ss:$8 sps:$4 sm:$0xff]  }
0x1f1e   : > { %10269 = vmatprep.subr.bf16.mxu0 %v20831_v5 }
0x1f1f   : > { %v14888_v27 = vpop.f32.mrb[0].mxu0 }
0x1f20   : > { %v10043_v35 = vpop.f32.mrb[1].mxu0 }
0x1f21   : > { %v14889_v57 = vpop.f32.mrb[2].mxu0  ;;  %10270 = vmatpush1.bf16.msra.mxu0 %v10106_v42  ;;  %v15714_v42 = vld [vmem:[%s20644_s14 + $0x410] ss:$8 sps:$4 sm:$0xff]  }
0x1f22   : > { %v10108_v38 = vpack.c.bf16 %v14889_v57, %v14888_v27  ;;  %v10046_v50 = vpop.f32.mrb[3].mxu0  ;;  %10271 = vmatprep.subr.bf16.mxu0 %v20831_v5  ;;  %v15723_v27 = vld [vmem:[%s20644_s14 + $0x434] ss:$8 sps:$4 sm:$0xff]   ;;  %v15726_v57 = vld [vmem:[%s20644_s14 + $0x444] ss:$8 sps:$4 sm:$0xff]  }
0x1f23   : > { %v10107_v19 = vpack.c.bf16 %v10046_v50, %v10043_v35  ;;  %v15721_v35 = vld [vmem:[%s20644_s14 + $0x430] ss:$8 sps:$4 sm:$0xff]   ;;  %v15729_v50 = vld [vmem:[%s20644_s14 + $0x454] ss:$8 sps:$4 sm:$0xff]  }
0x1f24   : > { %14971 = vmatmul.mubr.msk.bf16.gmra.mrb[164].mxu1 %vm929_vm2, %v20850_v21 }
0x1f25   : > { %10272 = vmatpush1.bf16.msra.mxu0 %v10107_v19  ;;  %14974 = vmatprep.mubr.msk.bf16.mxu1 %vm929_vm2, %v20851_v39 }
0x1f26   : > { %10273 = vmatprep.subr.bf16.mxu0 %v20831_v5 }
0x1f27   : > { %v14892_v37 = vpop.f32.mrb[4].mxu0 }
0x1f28   : > { %v10059_v40 = vpop.f32.mrb[5].mxu0 }
0x1f29   : > { %v14893_v23 = vpop.f32.mrb[6].mxu0  ;;  %10274 = vmatpush1.bf16.msra.mxu0 %v10108_v38  ;;  %v15724_v38 = vld [vmem:[%s20644_s14 + $0x440] ss:$8 sps:$4 sm:$0xff]  }
0x1f2a   : > { %v10110_v46 = vpack.c.bf16 %v14893_v23, %v14892_v37  ;;  %v10062_v54 = vpop.f32.mrb[7].mxu0  ;;  %10275 = vmatprep.subr.bf16.mxu0 %v20831_v5  ;;  %v15727_v37 = vld [vmem:[%s20644_s14 + $0x450] ss:$8 sps:$4 sm:$0xff]   ;;  %v15732_v23 = vld [vmem:[%s20644_s14 + $0x464] ss:$8 sps:$4 sm:$0xff]  }
0x1f2b   : > { %v10109_v13 = vpack.c.bf16 %v10062_v54, %v10059_v40 }
0x1f2c   : > { %14975 = vmatmul.mubr.msk.bf16.gmra.mrb[168].mxu1 %vm929_vm2, %v20852_v45 }
0x1f2d   : > { %10276 = vmatpush1.bf16.msra.mxu0 %v10109_v13 }
0x1f2e   : > { %10277 = vmatprep.subr.bf16.mxu0 %v20831_v5 }
0x1f31   : > { %10278 = vmatpush1.bf16.msra.mxu0 %v10110_v46 }
0x1f32   : > { %14922 = vmatprep.subr.bf16.mxu0 %v15701_v63 }
0x1f34   : > { %10288 = vmatmul.mubr.bf16.vlgmr.msra.gmra.mrb[8].mxu0 %v15698_v28 }
0x1f35   : > { %14923 = vmatpush3.bf16.msra.mxu0 %v15701_v63  ;;  %13153 = vmatprep.mubr.msk.bf16.mxu0 %vm931_vm3, %v15704_v56  ;;  %v15730_v63 = vld [vmem:[%s20644_s14 + $0x460] ss:$8 sps:$4 sm:$0xff]   ;;  %v15735_v56 = vld [vmem:[%s20644_s14 + $0x474] ss:$8 sps:$4 sm:$0xff]  }
0x1f36   : > { %14924 = vmatprep.subr.bf16.mxu0 %v15720_v58 }
0x1f39   : > { %14925 = vmatpush3.bf16.msra.mxu0 %v15720_v58 }
0x1f3a   : > { %11215 = vmatprep.subr.bf16.mxu0 %v20831_v5 }
0x1f3c   : > { %10296 = vmatmul.mubr.bf16.gmra.mrb[12].mxu0 %v15702_v33 }
0x1f3d   : > { %13154 = vmatprep.mubr.msk.bf16.mxu0 %vm931_vm3, %v15707_v7 }
0x1f44   : > { %10304 = vmatmul.mubr.bf16.gmra.mrb[16].mxu0 %v15705_v29  ;;  %v15733_v29 = vld [vmem:[%s20644_s14 + $0x470] ss:$8 sps:$4 sm:$0xff]  }
0x1f45   : > { %13155 = vmatprep.mubr.msk.bf16.mxu0 %vm931_vm3, %v15710_v2 }
0x1f4c   : > { %10312 = vmatmul.mubr.bf16.gmra.mrb[20].mxu0 %v15708_v52 }
0x1f4d   : > { %13156 = vmatprep.mubr.msk.bf16.mxu0 %vm931_vm3, %v15713_v20 }
0x1f54   : > { %10320 = vmatmul.mubr.bf16.gmra.mrb[24].mxu0 %v15711_v41 }
0x1f55   : > { %13157 = vmatprep.mubr.msk.bf16.mxu0 %vm931_vm3, %v15716_v4 }
0x1f5c   : > { %10328 = vmatmul.mubr.bf16.gmra.mrb[28].mxu0 %v15714_v42 }
0x1f5d   : > { %13158 = vmatprep.mubr.msk.bf16.mxu0 %vm931_vm3, %v15719_v31 }
0x1f64   : > { %10336 = vmatmul.mubr.bf16.gmra.mrb[32].mxu0 %v15717_v15 }
0x1f65   : > { %13159 = vmatprep.mubr.msk.bf16.mxu0 %vm931_vm3, %v15723_v27 }
0x1f6c   : > { %10344 = vmatmul.mubr.bf16.gmra.mrb[36].mxu0 %v15721_v35 }
0x1f6d   : > { %13160 = vmatprep.mubr.msk.bf16.mxu0 %vm931_vm3, %v15726_v57 }
0x1f74   : > { %10352 = vmatmul.mubr.bf16.gmra.mrb[40].mxu0 %v15724_v38 }
0x1f75   : > { %13161 = vmatprep.mubr.msk.bf16.mxu0 %vm931_vm3, %v15729_v50 }
0x1f77   : > { %v20057_v19 = vpop.f32.mrb[92].mxu1 }
0x1f78   : > { %v10771_v40 = vpop.f32.mrb[93].mxu1 }
0x1f79   : > { %v20065_v46 = vpop.f32.mrb[94].mxu1 }
0x1f7a   : > { %v10774_v54 = vpop.f32.mrb[95].mxu1 }
0x1f7c   : > { %10360 = vmatmul.mubr.bf16.gmra.mrb[44].mxu0 %v15727_v37 }
0x1f7d   : > { %13162 = vmatprep.mubr.msk.bf16.mxu0 %vm931_vm3, %v15732_v23 }
0x1f7f   : > { %v20068_v13 = vpop.f32.mrb[96].mxu1 }
0x1f80   : > { %v10779_v28 = vpop.f32.mrb[97].mxu1 }
0x1f81   : > { %v20076_v58 = vpop.f32.mrb[98].mxu1 }
0x1f82   : > { %v10782_v33 = vpop.f32.mrb[99].mxu1 }
0x1f84   : > { %10368 = vmatmul.mubr.bf16.gmra.mrb[48].mxu0 %v15730_v63 }
0x1f85   : > { %13163 = vmatprep.mubr.msk.bf16.mxu0 %vm931_vm3, %v15735_v56 }
0x1f87   : > { %v20079_v7 = vpop.f32.mrb[100].mxu1 }
0x1f88   : > { %v10787_v2 = vpop.f32.mrb[101].mxu1 }
0x1f89   : > { %v20084_v52 = vpop.f32.mrb[102].mxu1 }
0x1f8a   : > { %v10790_v20 = vpop.f32.mrb[103].mxu1 }
0x1f8c   : > { %10376 = vmatmul.mubr.bf16.gmra.mrb[52].mxu0 %v15733_v29 }
0x1f8d   : > { %14926 = vmatprep.mubr.msk.bf16.mxu0 %vm929_vm2, %v18643_v8 }
0x1f8f   : > { %v20088_v41 = vpop.f32.mrb[104].mxu1 }
0x1f90   : > { %v10795_v4 = vpop.f32.mrb[105].mxu1 }
0x1f91   : > { %v20090_v42 = vpop.f32.mrb[106].mxu1 }
0x1f92   : > { %v10798_v31 = vpop.f32.mrb[107].mxu1 }
0x1f94   : > { %14927 = vmatmul.mubr.msk.bf16.vlgmr.msra.gmra.mrb[56].mxu0 %vm929_vm2, %v20842_v32 }
0x1f95   : > { %14930 = vmatprep.mubr.msk.bf16.mxu0 %vm929_vm2, %v20843_v60 }
0x1f97   : > { %v20096_v15 = vpop.f32.mrb[108].mxu1 }
0x1f98   : > { %v10803_v27 = vpop.f32.mrb[109].mxu1 }
0x1f99   : > { %v20098_v35 = vpop.f32.mrb[110].mxu1 }
0x1f9a   : > { %v10806_v57 = vpop.f32.mrb[111].mxu1 }
0x1f9c   : > { %14931 = vmatmul.mubr.msk.bf16.gmra.mrb[60].mxu0 %vm929_vm2, %v20844_v9 }
0x1f9d   : > { %14934 = vmatprep.mubr.msk.bf16.mxu0 %vm929_vm2, %v20845_v17 }
0x1f9f   : > { %v20104_v8 = vpop.f32.mrb[112].mxu1 }
0x1fa0   : > { %v10811_v38 = vpop.f32.mrb[113].mxu1 }
0x1fa1   : > { %v20106_v50 = vpop.f32.mrb[114].mxu1 }
0x1fa2   : > { %v10814_v32 = vpop.f32.mrb[115].mxu1 }
0x1fa4   : > { %14935 = vmatmul.mubr.msk.bf16.gmra.mrb[64].mxu0 %vm929_vm2, %v20846_v24 }
0x1fa5   : > { %14938 = vmatprep.mubr.msk.bf16.mxu0 %vm929_vm2, %v20847_v1 }
0x1fa7   : > { %v20112_v60 = vpop.f32.mrb[116].mxu1 }
0x1fa8   : > { %v10819_v37 = vpop.f32.mrb[117].mxu1 }
0x1fa9   : > { %v20114_v40 = vpop.f32.mrb[118].mxu1 }
0x1faa   : > { %v10822_v9 = vpop.f32.mrb[119].mxu1 }
0x1fac   : > { %14939 = vmatmul.mubr.msk.bf16.gmra.mrb[68].mxu0 %vm929_vm2, %v20848_v62 }
0x1fad   : > { %14942 = vmatprep.mubr.msk.bf16.mxu0 %vm929_vm2, %v20849_v12 }
0x1faf   : > { %v20120_v17 = vpop.f32.mrb[120].mxu1 }
0x1fb0   : > { %v10827_v23 = vpop.f32.mrb[121].mxu1 }
0x1fb1   : > { %v20122_v54 = vpop.f32.mrb[122].mxu1 }
0x1fb2   : > { %v10830_v24 = vpop.f32.mrb[123].mxu1 }
0x1fb4   : > { %14943 = vmatmul.mubr.msk.bf16.gmra.mrb[72].mxu0 %vm929_vm2, %v20850_v21 }
0x1fb5   : > { %14946 = vmatprep.mubr.msk.bf16.mxu0 %vm929_vm2, %v20851_v39 }
0x1fb7   : > { %v20128_v1 = vpop.f32.mrb[124].mxu1 }
0x1fb8   : > { %v10835_v63 = vpop.f32.mrb[125].mxu1 }
0x1fb9   : > { %v20130_v28 = vpop.f32.mrb[126].mxu1 }
0x1fba   : > { %v10838_v62 = vpop.f32.mrb[127].mxu1 }
0x1fbc   : > { %14947 = vmatmul.mubr.msk.bf16.gmra.mrb[76].mxu0 %vm929_vm2, %v20852_v45 }
0x1fbf   : > { %v20134_v12 = vpop.f32.mrb[128].mxu1 }
0x1fc0   : > { %v10843_v56 = vpop.f32.mrb[129].mxu1 }
0x1fc1   : > { %v20136_v33 = vpop.f32.mrb[130].mxu1 }
0x1fc2   : > { %v10846_v29 = vpop.f32.mrb[131].mxu1 }
0x1fc7   : > { %v20138_v2 = vpop.f32.mrb[132].mxu1 }
0x1fc8   : > { %v10851_v21 = vpop.f32.mrb[133].mxu1 }
0x1fc9   : > { %v20140_v20 = vpop.f32.mrb[134].mxu1 }
0x1fca   : > { %v10854_v39 = vpop.f32.mrb[135].mxu1 }
0x1fcf   : > { %v20142_v4 = vpop.f32.mrb[136].mxu1 }
0x1fd0   : > { %v10859_v31 = vpop.f32.mrb[137].mxu1 }
0x1fd1   : > { %v20144_v27 = vpop.f32.mrb[138].mxu1 }
0x1fd2   : > { %v10862_v57 = vpop.f32.mrb[139].mxu1 }
0x1fd7   : > { %v14956_v38 = vpop.f32.mrb[140].mxu1 }
0x1fd8   : > { %v11419_v45 = vpop.f32.mrb[141].mxu1 }
0x1fd9   : > { %v14957_v32 = vpop.f32.mrb[142].mxu1 }
0x1fda   : > { %v11540_v37 = vpack.c.bf16 %v14957_v32, %v14956_v38  ;;  %v11422_v9 = vpop.f32.mrb[143].mxu1 }
0x1fdb   : > { %v11539_v23 = vpack.c.bf16 %v11422_v9, %v11419_v45 }
0x1fdd   : > { %11696 = vmatpush1.bf16.msra.mxu1 %v11539_v23 }
0x1fde   : > { %11697 = vmatprep.subr.bf16.mxu1 %v20831_v5 }
0x1fdf   : > { %v14960_v24 = vpop.f32.mrb[144].mxu1 }
0x1fe0   : > { %v11435_v63 = vpop.f32.mrb[145].mxu1 }
0x1fe1   : > { %v14961_v62 = vpop.f32.mrb[146].mxu1  ;;  %11698 = vmatpush1.bf16.msra.mxu1 %v11540_v37 }
0x1fe2   : > { %v11542_v56 = vpack.c.bf16 %v14961_v62, %v14960_v24  ;;  %v11438_v29 = vpop.f32.mrb[147].mxu1  ;;  %11699 = vmatprep.subr.bf16.mxu1 %v20831_v5 }
0x1fe3   : > { %v11541_v21 = vpack.c.bf16 %v11438_v29, %v11435_v63 }
0x1fe5   : > { %11700 = vmatpush1.bf16.msra.mxu1 %v11541_v21 }
0x1fe6   : > { %11701 = vmatprep.subr.bf16.mxu1 %v20831_v5 }
0x1fe7   : > { %v14964_v39 = vpop.f32.mrb[148].mxu1 }
0x1fe8   : > { %v11451_v31 = vpop.f32.mrb[149].mxu1 }
0x1fe9   : > { %v14965_v57 = vpop.f32.mrb[150].mxu1  ;;  %11702 = vmatpush1.bf16.msra.mxu1 %v11542_v56 }
0x1fea   : > { %v11544_v38 = vpack.c.bf16 %v14965_v57, %v14964_v39  ;;  %v11454_v45 = vpop.f32.mrb[151].mxu1  ;;  %11703 = vmatprep.subr.bf16.mxu1 %v20831_v5 }
0x1feb   : > { %v11543_v32 = vpack.c.bf16 %v11454_v45, %v11451_v31 }
0x1fed   : > { %11704 = vmatpush1.bf16.msra.mxu1 %v11543_v32 }
0x1fee   : > { %11705 = vmatprep.subr.bf16.mxu1 %v20831_v5 }
0x1fef   : > { %v14968_v37 = vpop.f32.mrb[152].mxu1 }
0x1ff0   : > { %v11467_v9 = vpop.f32.mrb[153].mxu1 }
0x1ff1   : > { %v14969_v23 = vpop.f32.mrb[154].mxu1  ;;  %11706 = vmatpush1.bf16.msra.mxu1 %v11544_v38 }
0x1ff2   : > { %v11546_v24 = vpack.c.bf16 %v14969_v23, %v14968_v37  ;;  %v11470_v63 = vpop.f32.mrb[155].mxu1  ;;  %11707 = vmatprep.subr.bf16.mxu1 %v20831_v5 }
0x1ff3   : > { %v11545_v62 = vpack.c.bf16 %v11470_v63, %v11467_v9 }
0x1ff5   : > { %11708 = vmatpush1.bf16.msra.mxu1 %v11545_v62 }
0x1ff6   : > { %11709 = vmatprep.subr.bf16.mxu1 %v20831_v5 }
0x1ff7   : > { %v14972_v56 = vpop.f32.mrb[164].mxu1 }
0x1ff8   : > { %v11483_v29 = vpop.f32.mrb[165].mxu1 }
0x1ff9   : > { %v14973_v21 = vpop.f32.mrb[166].mxu1  ;;  %11710 = vmatpush1.bf16.msra.mxu1 %v11546_v24 }
0x1ffa   : > { %v11548_v39 = vpack.c.bf16 %v14973_v21, %v14972_v56  ;;  %v11486_v31 = vpop.f32.mrb[167].mxu1  ;;  %11711 = vmatprep.subr.bf16.mxu1 %v20831_v5 }
0x1ffb   : > { %v11547_v57 = vpack.c.bf16 %v11486_v31, %v11483_v29 }
0x1ffd   : > { %11712 = vmatpush1.bf16.msra.mxu1 %v11547_v57 }
0x1ffe   : > { %11713 = vmatprep.subr.bf16.mxu1 %v20831_v5 }
0x1fff   : > { %v14976_v38 = vpop.f32.mrb[168].mxu1 }
0x2000   : > { %v11499_v45 = vpop.f32.mrb[169].mxu1 }
0x2001   : > { %v14977_v32 = vpop.f32.mrb[170].mxu1  ;;  %11714 = vmatpush1.bf16.msra.mxu1 %v11548_v39 }
0x2002   : > { %v11550_v37 = vpack.c.bf16 %v14977_v32, %v14976_v38  ;;  %v11502_v9 = vpop.f32.mrb[171].mxu1  ;;  %11715 = vmatprep.subr.bf16.mxu1 %v20831_v5 }
0x2003   : > { %v11549_v23 = vpack.c.bf16 %v11502_v9, %v11499_v45 }
0x2005   : > { %11716 = vmatpush1.bf16.msra.mxu1 %v11549_v23 }
0x2006   : > { %11717 = vmatprep.subr.bf16.mxu1 %v20831_v5 }
0x2007   : > { %v10289_v24 = vpop.f32.mrb[8].mxu0 }
0x2008   : > { %v10384_v63 = vadd.f32 %v10289_v24, %v19780_v18  ;;  %v10291_v62 = vpop.f32.mrb[9].mxu0 }
0x2009   : > { %v10292_v56 = vpop.f32.mrb[10].mxu0  ;;  %11718 = vmatpush1.bf16.msra.mxu1 %v11550_v37 }
0x200a   : > { %v10385_v29 = vadd.f32 %v10292_v56, %v19783_v25  ;;  %v10294_v21 = vpop.f32.mrb[11].mxu0  ;;  %v20160_v31 = vadd.f32 %v20057_v19, %v10384_v63 }
0x200c   : > { %v20163_v39 = vadd.f32 %v20065_v46, %v10385_v29 }
0x200f   : > { %v10297_v57 = vpop.f32.mrb[12].mxu0 }
0x2010   : > { %v10386_v38 = vadd.f32 %v10297_v57, %v19796_v43  ;;  %v10299_v45 = vpop.f32.mrb[13].mxu0  ;;  %v15738_v43 = vld [vmem:[%s20644_s14 + $0x544] ss:$8 sps:$4 sm:$0xff]   ;;  %v15747_v57 = vld [vmem:[%s20644_s14 + $0x614] ss:$8 sps:$4 sm:$0xff]  }
0x2011   : > { %v10300_v32 = vpop.f32.mrb[14].mxu0  ;;  %13308 = vmatprep.mubr.msk.bf16.mxu0 %vm931_vm3, %v15738_v43  ;;  %v15745_v45 = vld [vmem:[%s20644_s14 + $0x610] ss:$8 sps:$4 sm:$0xff]  }
0x2012   : > { %v10387_v9 = vadd.f32 %v10300_v32, %v19799_v55  ;;  %v10302_v18 = vpop.f32.mrb[15].mxu0  ;;  %v20168_v23 = vadd.f32 %v20068_v13, %v10386_v38  ;;  %v15739_v55 = vld [vmem:[%s20644_s14 + $0x600] ss:$8 sps:$4 sm:$0xff]   ;;  %v15741_v13 = vld [vmem:[%s20644_s14 + $0x604] ss:$8 sps:$4 sm:$0xff]  }
0x2013   : > { %13386 = vmatprep.mubr.msk.bf16.mxu1 %vm931_vm3, %v15741_v13 }
0x2014   : > { %v20171_v25 = vadd.f32 %v20076_v58, %v10387_v9  ;;  %11728 = vmatmul.mubr.bf16.vlgmr.msra.gmra.mrb[172].mxu1 %v15739_v55 }
0x2015   : > { %13387 = vmatprep.mubr.msk.bf16.mxu1 %vm931_vm3, %v15747_v57 }
0x2017   : > { %v10305_v37 = vpop.f32.mrb[16].mxu0 }
0x2018   : > { %v10388_v19 = vadd.f32 %v10305_v37, %v19814_v61  ;;  %v10307_v24 = vpop.f32.mrb[17].mxu0 }
0x2019   : > { %v10308_v46 = vpop.f32.mrb[18].mxu0 }
0x201a   : > { %v10389_v63 = vadd.f32 %v10308_v46, %v19818_v53  ;;  %v10310_v62 = vpop.f32.mrb[19].mxu0  ;;  %v20185_v58 = vadd.f32 %v20079_v7, %v10388_v19 }
0x201c   : > { %v20190_v61 = vadd.f32 %v20084_v52, %v10389_v63  ;;  %11736 = vmatmul.mubr.bf16.gmra.mrb[176].mxu1 %v15745_v45 }
0x201f   : > { %v10313_v53 = vpop.f32.mrb[20].mxu0 }
0x2020   : > { %v10390_v56 = vadd.f32 %v10313_v53, %v19830_v6  ;;  %v10315_v29 = vpop.f32.mrb[21].mxu0 }
0x2021   : > { %v10316_v21 = vpop.f32.mrb[22].mxu0 }
0x2022   : > { %v10391_v7 = vadd.f32 %v10316_v21, %v19833_v36  ;;  %v10318_v38 = vpop.f32.mrb[23].mxu0  ;;  %v20201_v52 = vadd.f32 %v20088_v41, %v10390_v56  ;;  %v15753_v36 = vld [vmem:[%s20644_s14 + $0x624] ss:$8 sps:$4 sm:$0xff]   ;;  %v15751_v41 = vld [vmem:[%s20644_s14 + $0x620] ss:$8 sps:$4 sm:$0xff]  }
0x2023   : > { %13388 = vmatprep.mubr.msk.bf16.mxu1 %vm931_vm3, %v15753_v36 }
0x2024   : > { %v20205_v6 = vadd.f32 %v20090_v42, %v10391_v7  ;;  %11744 = vmatmul.mubr.bf16.gmra.mrb[156].mxu1 %v15751_v41 }
0x2027   : > { %v10321_v32 = vpop.f32.mrb[24].mxu0 }
0x2028   : > { %v10392_v9 = vadd.f32 %v10321_v32, %v19845_v10  ;;  %v10323_v18 = vpop.f32.mrb[25].mxu0 }
0x2029   : > { %v10324_v37 = vpop.f32.mrb[26].mxu0 }
0x202a   : > { %v10393_v19 = vadd.f32 %v10324_v37, %v19848_v14  ;;  %v10326_v24 = vpop.f32.mrb[27].mxu0  ;;  %v20216_v42 = vadd.f32 %v20096_v15, %v10392_v9  ;;  %v15759_v14 = vld [vmem:[%s20644_s14 + $0x634] ss:$8 sps:$4 sm:$0xff]   ;;  %v15757_v15 = vld [vmem:[%s20644_s14 + $0x630] ss:$8 sps:$4 sm:$0xff]  }
0x202b   : > { %13389 = vmatprep.mubr.msk.bf16.mxu1 %vm931_vm3, %v15759_v14 }
0x202c   : > { %v20220_v10 = vadd.f32 %v20098_v35, %v10393_v19  ;;  %11752 = vmatmul.mubr.bf16.gmra.mrb[160].mxu1 %v15757_v15 }
0x202f   : > { %v10329_v46 = vpop.f32.mrb[28].mxu0 }
0x2030   : > { %v10394_v43 = vadd.f32 %v10329_v46, %v19860_v16  ;;  %v10331_v63 = vpop.f32.mrb[29].mxu0 }
0x2031   : > { %v10332_v62 = vpop.f32.mrb[30].mxu0 }
0x2032   : > { %v10395_v55 = vadd.f32 %v10332_v62, %v19863_v30  ;;  %v10334_v13 = vpop.f32.mrb[31].mxu0  ;;  %v20231_v35 = vadd.f32 %v20104_v8, %v10394_v43  ;;  %v15765_v30 = vld [vmem:[%s20644_s14 + $0x644] ss:$8 sps:$4 sm:$0xff]   ;;  %v15763_v8 = vld [vmem:[%s20644_s14 + $0x640] ss:$8 sps:$4 sm:$0xff]  }
0x2033   : > { %13390 = vmatprep.mubr.msk.bf16.mxu1 %vm931_vm3, %v15765_v30 }
0x2034   : > { %v20235_v16 = vadd.f32 %v20106_v50, %v10395_v55  ;;  %11760 = vmatmul.mubr.bf16.gmra.mrb[180].mxu1 %v15763_v8 }
0x2037   : > { %v10337_v53 = vpop.f32.mrb[32].mxu0 }
0x2038   : > { %v10396_v56 = vadd.f32 %v10337_v53, %v19875_v48  ;;  %v10339_v29 = vpop.f32.mrb[33].mxu0 }
0x2039   : > { %v10340_v21 = vpop.f32.mrb[34].mxu0 }
0x203a   : > { %v10397_v57 = vadd.f32 %v10340_v21, %v19878_v51  ;;  %v10342_v7 = vpop.f32.mrb[35].mxu0  ;;  %v20246_v50 = vadd.f32 %v20112_v60, %v10396_v56  ;;  %v15771_v51 = vld [vmem:[%s20644_s14 + $0x654] ss:$8 sps:$4 sm:$0xff]   ;;  %v15769_v60 = vld [vmem:[%s20644_s14 + $0x650] ss:$8 sps:$4 sm:$0xff]  }
0x203b   : > { %13391 = vmatprep.mubr.msk.bf16.mxu1 %vm931_vm3, %v15771_v51 }
0x203c   : > { %v20250_v48 = vadd.f32 %v20114_v40, %v10397_v57  ;;  %11768 = vmatmul.mubr.bf16.gmra.mrb[184].mxu1 %v15769_v60 }
0x203f   : > { %v10345_v38 = vpop.f32.mrb[36].mxu0 }
0x2040   : > { %v10398_v45 = vadd.f32 %v10345_v38, %v19890_v26  ;;  %v10347_v32 = vpop.f32.mrb[37].mxu0 }
0x2041   : > { %v10348_v9 = vpop.f32.mrb[38].mxu0 }
0x2042   : > { %v10399_v18 = vadd.f32 %v10348_v9, %v19893_v11  ;;  %v10350_v37 = vpop.f32.mrb[39].mxu0  ;;  %v20261_v40 = vadd.f32 %v20120_v17, %v10398_v45  ;;  %v15777_v11 = vld [vmem:[%s20644_s14 + $0x664] ss:$8 sps:$4 sm:$0xff]   ;;  %v15775_v17 = vld [vmem:[%s20644_s14 + $0x660] ss:$8 sps:$4 sm:$0xff]  }
0x2043   : > { %13392 = vmatprep.mubr.msk.bf16.mxu1 %vm931_vm3, %v15777_v11  ;;  %v15807_v11 = vld [vmem:[%s20644_s14 + $0x6b4] ss:$8 sps:$4 sm:$0xff]  }
0x2044   : > { %v20265_v26 = vadd.f32 %v20122_v54, %v10399_v18  ;;  %11776 = vmatmul.mubr.bf16.gmra.mrb[188].mxu1 %v15775_v17  ;;  %v15805_v17 = vld [vmem:[%s20644_s14 + $0x6b0] ss:$8 sps:$4 sm:$0xff]  }
0x2047   : > { %v10353_v36 = vpop.f32.mrb[40].mxu0 }
0x2048   : > { %v10400_v19 = vadd.f32 %v10353_v36, %v19905_v47  ;;  %v10355_v24 = vpop.f32.mrb[41].mxu0 }
0x2049   : > { %v10356_v41 = vpop.f32.mrb[42].mxu0 }
0x204a   : > { %v10401_v46 = vadd.f32 %v10356_v41, %v19908_v49  ;;  %v10358_v43 = vpop.f32.mrb[43].mxu0  ;;  %v20276_v54 = vadd.f32 %v20128_v1, %v10400_v19  ;;  %v15783_v49 = vld [vmem:[%s20644_s14 + $0x674] ss:$8 sps:$4 sm:$0xff]   ;;  %v15781_v1 = vld [vmem:[%s20644_s14 + $0x670] ss:$8 sps:$4 sm:$0xff]  }
0x204b   : > { %13393 = vmatprep.mubr.msk.bf16.mxu1 %vm931_vm3, %v15783_v49 }
0x204c   : > { %v20280_v47 = vadd.f32 %v20130_v28, %v10401_v46  ;;  %11784 = vmatmul.mubr.bf16.gmra.mrb[192].mxu1 %v15781_v1 }
0x204f   : > { %v10361_v63 = vpop.f32.mrb[44].mxu0 }
0x2050   : > { %v10402_v62 = vadd.f32 %v10361_v63, %v19920_v59  ;;  %v10363_v14 = vpop.f32.mrb[45].mxu0 }
0x2051   : > { %v10364_v55 = vpop.f32.mrb[46].mxu0 }
0x2052   : > { %v10403_v13 = vadd.f32 %v10364_v55, %v19923_v44  ;;  %v10366_v15 = vpop.f32.mrb[47].mxu0  ;;  %v20291_v28 = vadd.f32 %v20134_v12, %v10402_v62  ;;  %v15789_v44 = vld [vmem:[%s20644_s14 + $0x684] ss:$8 sps:$4 sm:$0xff]   ;;  %v15787_v12 = vld [vmem:[%s20644_s14 + $0x680] ss:$8 sps:$4 sm:$0xff]  }
0x2053   : > { %13394 = vmatprep.mubr.msk.bf16.mxu1 %vm931_vm3, %v15789_v44 }
0x2054   : > { %v20295_v59 = vadd.f32 %v20136_v33, %v10403_v13  ;;  %11792 = vmatmul.mubr.bf16.gmra.mrb[196].mxu1 %v15787_v12 }
0x2057   : > { %v10369_v53 = vpop.f32.mrb[48].mxu0 }
0x2058   : > { %v10404_v56 = vadd.f32 %v10369_v53, %v19935_v3  ;;  %v10371_v29 = vpop.f32.mrb[49].mxu0 }
0x2059   : > { %v10372_v21 = vpop.f32.mrb[50].mxu0 }
0x205a   : > { %v10405_v30 = vadd.f32 %v10372_v21, %v19938_v0  ;;  %v10374_v57 = vpop.f32.mrb[51].mxu0  ;;  %v20306_v33 = vadd.f32 %v20138_v2, %v10404_v56  ;;  %v15795_v0 = vld [vmem:[%s20644_s14 + $0x694] ss:$8 sps:$4 sm:$0xff]   ;;  %v15793_v2 = vld [vmem:[%s20644_s14 + $0x690] ss:$8 sps:$4 sm:$0xff]  }
0x205b   : > { %13395 = vmatprep.mubr.msk.bf16.mxu1 %vm931_vm3, %v15795_v0 }
0x205c   : > { %v20310_v3 = vadd.f32 %v20140_v20, %v10405_v30  ;;  %11800 = vmatmul.mubr.bf16.gmra.mrb[200].mxu1 %v15793_v2 }
0x205f   : > { %v10377_v7 = vpop.f32.mrb[52].mxu0 }
0x2060   : > { %v10406_v8 = vadd.f32 %v10377_v7, %v19947_v34  ;;  %v10379_v38 = vpop.f32.mrb[53].mxu0 }
0x2061   : > { %v10380_v45 = vpop.f32.mrb[54].mxu0 }
0x2062   : > { %v10407_v32 = vadd.f32 %v10380_v45, %v19950_v22  ;;  %v10382_v9 = vpop.f32.mrb[55].mxu0  ;;  %v20321_v20 = vadd.f32 %v20142_v4, %v10406_v8  ;;  %v15801_v22 = vld [vmem:[%s20644_s14 + $0x6a4] ss:$8 sps:$4 sm:$0xff]   ;;  %v15799_v4 = vld [vmem:[%s20644_s14 + $0x6a0] ss:$8 sps:$4 sm:$0xff]  }
0x2063   : > { %13396 = vmatprep.mubr.msk.bf16.mxu1 %vm931_vm3, %v15801_v22  ;;  %v15742_v22 = vld [vmem:[%s20644_s14 + $0x550] ss:$8 sps:$4 sm:$0xff]  }
0x2064   : > { %20853 = vst [vmem:[#allocation26_spill] sm:$0xff] %v20321_v20  ;;  %v20325_v34 = vadd.f32 %v20144_v27, %v10407_v32  ;;  %11808 = vmatmul.mubr.bf16.gmra.mrb[204].mxu1 %v15799_v4  ;;  %v15756_v4 = vld [vmem:[%s20644_s14 + $0x574] ss:$8 sps:$4 sm:$0xff]  }
0x2065   : > { %13397 = vmatprep.mubr.msk.bf16.mxu1 %vm931_vm3, %v15807_v11  ;;  %v15766_v11 = vld [vmem:[%s20644_s14 + $0x590] ss:$8 sps:$4 sm:$0xff]  }
0x2066   : > { %20854 = vst [vmem:[#allocation28_spill] sm:$0xff] %v20325_v34  ;;  %v20859_v34 = vld [vmem:[#allocation4_spill] sm:$0xff] }
0x2067   : > { %v14928_v51 = vpop.f32.mrb[56].mxu0 }
0x2068   : > { %v10939_v18 = vpop.f32.mrb[57].mxu0 }
0x2069   : > { %v14929_v37 = vpop.f32.mrb[58].mxu0 }
0x206a   : > { %v11060_v60 = vpack.c.bf16 %v14929_v37, %v14928_v51  ;;  %v10942_v36 = vpop.f32.mrb[59].mxu0  ;;  %v15744_v37 = vld [vmem:[%s20644_s14 + $0x554] ss:$8 sps:$4 sm:$0xff]  }
0x206b   : > { %v11059_v19 = vpack.c.bf16 %v10942_v36, %v10939_v18  ;;  %v15736_v18 = vld [vmem:[%s20644_s14 + $0x540] ss:$8 sps:$4 sm:$0xff]  }
0x206c   : > { %11816 = vmatmul.mubr.bf16.gmra.mrb[208].mxu1 %v15805_v17  ;;  %v15748_v36 = vld [vmem:[%s20644_s14 + $0x560] ss:$8 sps:$4 sm:$0xff]   ;;  %v15780_v17 = vld [vmem:[%s20644_s14 + $0x5b4] ss:$8 sps:$4 sm:$0xff]  }
0x206d   : > { %11216 = vmatpush1.bf16.msra.mxu0 %v11059_v19  ;;  %v15754_v19 = vld [vmem:[%s20644_s14 + $0x570] ss:$8 sps:$4 sm:$0xff]  }
0x206e   : > { %11217 = vmatprep.subr.bf16.mxu0 %v20831_v5 }
0x206f   : > { %v14932_v27 = vpop.f32.mrb[60].mxu0 }
0x2070   : > { %v10955_v24 = vpop.f32.mrb[61].mxu0 }
0x2071   : > { %v14933_v41 = vpop.f32.mrb[62].mxu0  ;;  %11218 = vmatpush1.bf16.msra.mxu0 %v11060_v60  ;;  %v15750_v60 = vld [vmem:[%s20644_s14 + $0x564] ss:$8 sps:$4 sm:$0xff]  }
0x2072   : > { %v11062_v46 = vpack.c.bf16 %v14933_v41, %v14932_v27  ;;  %v10958_v43 = vpop.f32.mrb[63].mxu0  ;;  %11219 = vmatprep.subr.bf16.mxu0 %v20831_v5  ;;  %v15762_v27 = vld [vmem:[%s20644_s14 + $0x584] ss:$8 sps:$4 sm:$0xff]   ;;  %v15768_v41 = vld [vmem:[%s20644_s14 + $0x594] ss:$8 sps:$4 sm:$0xff]  }
0x2073   : > { %v11061_v63 = vpack.c.bf16 %v10958_v43, %v10955_v24  ;;  %v15760_v24 = vld [vmem:[%s20644_s14 + $0x580] ss:$8 sps:$4 sm:$0xff]  }
0x2074   : > { %v15772_v43 = vld [vmem:[%s20644_s14 + $0x5a0] ss:$8 sps:$4 sm:$0xff]  }
0x2075   : > { %11220 = vmatpush1.bf16.msra.mxu0 %v11061_v63  ;;  %v15778_v63 = vld [vmem:[%s20644_s14 + $0x5b0] ss:$8 sps:$4 sm:$0xff]  }
0x2076   : > { %11221 = vmatprep.subr.bf16.mxu0 %v20831_v5 }
0x2077   : > { %v14936_v62 = vpop.f32.mrb[64].mxu0 }
0x2078   : > { %v10971_v14 = vpop.f32.mrb[65].mxu0 }
0x2079   : > { %v14937_v55 = vpop.f32.mrb[66].mxu0  ;;  %11222 = vmatpush1.bf16.msra.mxu0 %v11062_v46  ;;  %v15774_v46 = vld [vmem:[%s20644_s14 + $0x5a4] ss:$8 sps:$4 sm:$0xff]  }
0x207a   : > { %v11064_v49 = vpack.c.bf16 %v14937_v55, %v14936_v62  ;;  %v10974_v13 = vpop.f32.mrb[67].mxu0  ;;  %11223 = vmatprep.subr.bf16.mxu0 %v20831_v5  ;;  %v15786_v62 = vld [vmem:[%s20644_s14 + $0x5c4] ss:$8 sps:$4 sm:$0xff]   ;;  %v15792_v55 = vld [vmem:[%s20644_s14 + $0x5d4] ss:$8 sps:$4 sm:$0xff]  }
0x207b   : > { %v11063_v15 = vpack.c.bf16 %v10974_v13, %v10971_v14  ;;  %v15784_v14 = vld [vmem:[%s20644_s14 + $0x5c0] ss:$8 sps:$4 sm:$0xff]   ;;  %v15798_v13 = vld [vmem:[%s20644_s14 + $0x5e4] ss:$8 sps:$4 sm:$0xff]  }
0x207d   : > { %11224 = vmatpush1.bf16.msra.mxu0 %v11063_v15  ;;  %v15796_v15 = vld [vmem:[%s20644_s14 + $0x5e0] ss:$8 sps:$4 sm:$0xff]  }
0x207e   : > { %11225 = vmatprep.subr.bf16.mxu0 %v20831_v5 }
0x207f   : > { %v14940_v1 = vpop.f32.mrb[68].mxu0 }
0x2080   : > { %v10987_v53 = vpop.f32.mrb[69].mxu0 }
0x2081   : > { %v14941_v56 = vpop.f32.mrb[70].mxu0  ;;  %11226 = vmatpush1.bf16.msra.mxu0 %v11064_v49  ;;  %v15790_v49 = vld [vmem:[%s20644_s14 + $0x5d0] ss:$8 sps:$4 sm:$0xff]  }
0x2082   : > { %v11066_v29 = vpack.c.bf16 %v14941_v56, %v14940_v1  ;;  %v10990_v21 = vpop.f32.mrb[71].mxu0  ;;  %11227 = vmatprep.subr.bf16.mxu0 %v20831_v5  ;;  %v15804_v1 = vld [vmem:[%s20644_s14 + $0x5f4] ss:$8 sps:$4 sm:$0xff]  }
0x2083   : > { %v11065_v44 = vpack.c.bf16 %v10990_v21, %v10987_v53  ;;  %v15802_v53 = vld [vmem:[%s20644_s14 + $0x5f0] ss:$8 sps:$4 sm:$0xff]  }
0x2085   : > { %11228 = vmatpush1.bf16.msra.mxu0 %v11065_v44 }
0x2086   : > { %11229 = vmatprep.subr.bf16.mxu0 %v20831_v5 }
0x2087   : > { %v14944_v30 = vpop.f32.mrb[72].mxu0 }
0x2088   : > { %v11003_v57 = vpop.f32.mrb[73].mxu0 }
0x2089   : > { %v14945_v12 = vpop.f32.mrb[74].mxu0  ;;  %11230 = vmatpush1.bf16.msra.mxu0 %v11066_v29 }
0x208a   : > { %v11068_v7 = vpack.c.bf16 %v14945_v12, %v14944_v30  ;;  %v11006_v8 = vpop.f32.mrb[75].mxu0  ;;  %11231 = vmatprep.subr.bf16.mxu0 %v20831_v5 }
0x208b   : > { %v11067_v38 = vpack.c.bf16 %v11006_v8, %v11003_v57 }
0x208d   : > { %11232 = vmatpush1.bf16.msra.mxu0 %v11067_v38 }
0x208e   : > { %11233 = vmatprep.subr.bf16.mxu0 %v20831_v5 }
0x208f   : > { %v14948_v45 = vpop.f32.mrb[76].mxu0 }
0x2090   : > { %v11019_v0 = vpop.f32.mrb[77].mxu0 }
0x2091   : > { %v14949_v32 = vpop.f32.mrb[78].mxu0  ;;  %11234 = vmatpush1.bf16.msra.mxu0 %v11068_v7 }
0x2092   : > { %v11070_v9 = vpack.c.bf16 %v14949_v32, %v14948_v45  ;;  %v11022_v2 = vpop.f32.mrb[79].mxu0  ;;  %11235 = vmatprep.subr.bf16.mxu0 %v20831_v5 }
0x2093   : > { %v11069_v51 = vpack.c.bf16 %v11022_v2, %v11019_v0 }
0x2095   : > { %11236 = vmatpush1.bf16.msra.mxu0 %v11069_v51 }
0x2096   : > { %11237 = vmatprep.subr.bf16.mxu0 %v20831_v5 }
0x2099   : > { %11238 = vmatpush1.bf16.msra.mxu0 %v11070_v9 }
0x209a   : > { %11985 = vmatprep.subr.bf16.mxu0 %v20831_v5 }
0x209c   : > { %11248 = vmatmul.mubr.bf16.vlgmr.msra.gmra.mrb[80].mxu0 %v15736_v18 }
0x209d   : > { %13309 = vmatprep.mubr.msk.bf16.mxu0 %vm931_vm3, %v15744_v37 }
0x20a4   : > { %11256 = vmatmul.mubr.bf16.gmra.mrb[84].mxu0 %v15742_v22 }
0x20a5   : > { %13310 = vmatprep.mubr.msk.bf16.mxu0 %vm931_vm3, %v15750_v60 }
0x20ac   : > { %11264 = vmatmul.mubr.bf16.gmra.mrb[88].mxu0 %v15748_v36 }
0x20ad   : > { %13311 = vmatprep.mubr.msk.bf16.mxu0 %vm931_vm3, %v15756_v4 }
0x20b4   : > { %11272 = vmatmul.mubr.bf16.gmra.mrb[92].mxu0 %v15754_v19 }
0x20b5   : > { %13312 = vmatprep.mubr.msk.bf16.mxu0 %vm931_vm3, %v15762_v27 }
0x20bc   : > { %11280 = vmatmul.mubr.bf16.gmra.mrb[96].mxu0 %v15760_v24 }
0x20bd   : > { %13313 = vmatprep.mubr.msk.bf16.mxu0 %vm931_vm3, %v15768_v41 }
0x20c4   : > { %11288 = vmatmul.mubr.bf16.gmra.mrb[100].mxu0 %v15766_v11 }
0x20c5   : > { %13314 = vmatprep.mubr.msk.bf16.mxu0 %vm931_vm3, %v15774_v46 }
0x20cc   : > { %11296 = vmatmul.mubr.bf16.gmra.mrb[104].mxu0 %v15772_v43 }
0x20cd   : > { %13315 = vmatprep.mubr.msk.bf16.mxu0 %vm931_vm3, %v15780_v17 }
0x20d4   : > { %11304 = vmatmul.mubr.bf16.gmra.mrb[108].mxu0 %v15778_v63 }
0x20d5   : > { %13316 = vmatprep.mubr.msk.bf16.mxu0 %vm931_vm3, %v15786_v62 }
0x20dc   : > { %11312 = vmatmul.mubr.bf16.gmra.mrb[112].mxu0 %v15784_v14 }
0x20dd   : > { %13317 = vmatprep.mubr.msk.bf16.mxu0 %vm931_vm3, %v15792_v55 }
0x20e4   : > { %11320 = vmatmul.mubr.bf16.gmra.mrb[116].mxu0 %v15790_v49 }
0x20e5   : > { %13318 = vmatprep.mubr.msk.bf16.mxu0 %vm931_vm3, %v15798_v13 }
0x20e7   : > { %v11729_v56 = vpop.f32.mrb[172].mxu1 }
0x20e8   : > { %v11731_v29 = vpop.f32.mrb[173].mxu1 }
0x20e9   : > { %v11732_v21 = vpop.f32.mrb[174].mxu1 }
0x20ea   : > { %v11734_v44 = vpop.f32.mrb[175].mxu1 }
0x20ec   : > { %11328 = vmatmul.mubr.bf16.gmra.mrb[120].mxu0 %v15796_v15 }
0x20ed   : > { %13319 = vmatprep.mubr.msk.bf16.mxu0 %vm931_vm3, %v15804_v1 }
0x20ef   : > { %v20434_v30 = vpop.f32.mrb[176].mxu1 }
0x20f0   : > { %v11739_v57 = vpop.f32.mrb[177].mxu1 }
0x20f1   : > { %v20436_v12 = vpop.f32.mrb[178].mxu1 }
0x20f2   : > { %v11742_v7 = vpop.f32.mrb[179].mxu1 }
0x20f4   : > { %11336 = vmatmul.mubr.bf16.gmra.mrb[124].mxu0 %v15802_v53 }
0x20f5   : > { %12017 = vmatprep.mubr.bf16.mxu0 %v20831_v5 }
0x20f7   : > { %v20438_v8 = vpop.f32.mrb[156].mxu1 }
0x20f8   : > { %v11747_v38 = vpop.f32.mrb[157].mxu1 }
0x20f9   : > { %v20440_v45 = vpop.f32.mrb[158].mxu1 }
0x20fa   : > { %v11750_v0 = vpop.f32.mrb[159].mxu1 }
0x20ff   : > { %v20442_v32 = vpop.f32.mrb[160].mxu1 }
0x2100   : > { %v11755_v9 = vpop.f32.mrb[161].mxu1 }
0x2101   : > { %v20444_v2 = vpop.f32.mrb[162].mxu1 }
0x2102   : > { %v11758_v51 = vpop.f32.mrb[163].mxu1 }
0x2107   : > { %v20446_v18 = vpop.f32.mrb[180].mxu1 }
0x2108   : > { %v11763_v37 = vpop.f32.mrb[181].mxu1 }
0x2109   : > { %v20448_v22 = vpop.f32.mrb[182].mxu1 }
0x210a   : > { %v11766_v60 = vpop.f32.mrb[183].mxu1 }
0x210b   : > { %v11940_v60 = vld [vmem:[%s20650_s20] sm:$0xff] }
0x210c   : > { %11943 = vperm.xlu1 %15318, %v11940_v60  }
0x210f   : > { %v20450_v36 = vpop.f32.mrb[184].mxu1 }
0x2110   : > { %v11771_v4 = vpop.f32.mrb[185].mxu1 }
0x2111   : > { %v20452_v19 = vpop.f32.mrb[186].mxu1 }
0x2112   : > { %v11774_v27 = vpop.f32.mrb[187].mxu1 }
0x2117   : > { %v20454_v24 = vpop.f32.mrb[188].mxu1 }
0x2118   : > { %v11779_v41 = vpop.f32.mrb[189].mxu1 }
0x2119   : > { %v20456_v11 = vpop.f32.mrb[190].mxu1 }
0x211a   : > { %v11782_v46 = vpop.f32.mrb[191].mxu1 }
0x211f   : > { %v20458_v43 = vpop.f32.mrb[192].mxu1 }
0x2120   : > { %v11787_v17 = vpop.f32.mrb[193].mxu1 }
0x2121   : > { %v20460_v63 = vpop.f32.mrb[194].mxu1  ;;  %v20485_v17 = vld [vmem:[%s20648_s18] ss:$0 sm:$0xff] }
0x2122   : > { %v11790_v62 = vpop.f32.mrb[195].mxu1 }
0x2127   : > { %v20462_v14 = vpop.f32.mrb[196].mxu1 }
0x2128   : > { %v11795_v55 = vpop.f32.mrb[197].mxu1 }
0x2129   : > { %v20464_v49 = vpop.f32.mrb[198].mxu1 }
0x212a   : > { %v11798_v13 = vpop.f32.mrb[199].mxu1 }
0x212f   : > { %v20466_v15 = vpop.f32.mrb[200].mxu1 }
0x2130   : > { %v11803_v1 = vpop.f32.mrb[201].mxu1 }
0x2131   : > { %v20468_v53 = vpop.f32.mrb[202].mxu1 }
0x2132   : > { %v11806_v29 = vpop.f32.mrb[203].mxu1 }
0x2137   : > { %v20470_v44 = vpop.f32.mrb[204].mxu1 }
0x2138   : > { %v11811_v57 = vpop.f32.mrb[205].mxu1 }
0x2139   : > { %v20472_v7 = vpop.f32.mrb[206].mxu1 }
0x213a   : > { %v11814_v38 = vpop.f32.mrb[207].mxu1 }
0x213f   : > { %v20474_v0 = vpop.f32.mrb[208].mxu1 }
0x2140   : > { %20855 = vst [vmem:[#allocation27_spill] sm:$0xff] %v20474_v0  ;;  %v11819_v9 = vpop.f32.mrb[209].mxu1 }
0x2141   : > { %v20476_v51 = vpop.f32.mrb[210].mxu1 }
0x2142   : > { %20856 = vst [vmem:[#allocation30_spill] sm:$0xff] %v20476_v51  ;;  %v11822_v37 = vpop.f32.mrb[211].mxu1 }
0x216f   : > { %v11249_v4 = vpop.f32.mrb[80].mxu0 }
0x2170   : > { %v11344_v27 = vadd.f32 %v11249_v4, %v20160_v31  ;;  %v11251_v41 = vpop.f32.mrb[81].mxu0 }
0x2171   : > { %v11252_v46 = vpop.f32.mrb[82].mxu0  ;;  %v20857_v41 = vld [vmem:[#allocation3_spill] sm:$0xff] }
0x2172   : > { %v11345_v62 = vadd.f32 %v11252_v46, %v20163_v39  ;;  %v11824_v55 = vadd.f32 %v11729_v56, %v11344_v27  ;;  %v11254_v13 = vpop.f32.mrb[83].mxu0  ;;  %v20858_v51 = vmax.f32 %v20857_v41, 0.0 }
0x2174   : > { %v11855_v1 = vadd.f32 %v20485_v17, %v11824_v55  ;;  %v11825_v29 = vadd.f32 %v11732_v21, %v11345_v62 }
0x2176   : > { %v11879_v57 = vmax.f32 %v11855_v1, 0.0  ;;  %v11856_v38 = vadd.f32 %v20485_v17, %v11825_v29 }
0x2177   : > { %v11257_v9 = vpop.f32.mrb[84].mxu0 }
0x2178   : > { %v11880_v37 = vmax.f32 %v11856_v38, 0.0  ;;  %v11346_v31 = vadd.f32 %v11257_v9, %v20168_v23  ;;  %v11259_v60 = vpop.f32.mrb[85].mxu0  ;;  %v11903_v0 = vadd.f32 %v11879_v57, %v20858_v51  ;;  %v20862_v9 = vld [vmem:[#allocation5_spill] sm:$0xff] }
0x2179   : > { %v11260_v4 = vpop.f32.mrb[86].mxu0 }
0x217a   : > { %v11904_v20 = vadd.f32 %v11880_v37, %v20859_v34  ;;  %v11347_v39 = vadd.f32 %v11260_v4, %v20171_v25  ;;  %v11826_v56 = vadd.f32 %v20434_v30, %v11346_v31  ;;  %v11262_v27 = vpop.f32.mrb[87].mxu0  ;;  %v20860_v30 = vld [vmem:[#allocation2_spill] sm:$0xff] }
0x217b   : > { %v20861_v57 = vmax.f32 %v20860_v30, 0.0 }
0x217c   : > { %v11857_v21 = vadd.f32 %v20485_v17, %v11826_v56  ;;  %v11827_v46 = vadd.f32 %v20436_v12, %v11347_v39  ;;  %v11928_v62 = vpack.c.bf16 %v11904_v20, %v11903_v0 }
0x217e   : > { %v11881_v55 = vmax.f32 %v11857_v21, 0.0  ;;  %v11858_v23 = vadd.f32 %v20485_v17, %v11827_v46  ;;  %v11950_v13 = vsel %vm929_vm2, %v11928_v62, 0 }
0x217f   : > { %v11265_v1 = vpop.f32.mrb[88].mxu0  ;;  %11986 = vmatpush1.bf16.xpose.msra.mxu0 %v11950_v13 }
0x2180   : > { %v11882_v51 = vmax.f32 %v11858_v23, 0.0  ;;  %v11348_v34 = vadd.f32 %v11265_v1, %v20185_v58  ;;  %v11267_v29 = vpop.f32.mrb[89].mxu0  ;;  %11987 = vmatprep.subr.bf16.mxu0 %v20831_v5  ;;  %v11905_v38 = vadd.f32 %v11881_v55, %v20861_v57  ;;  %v20865_v23 = vld [vmem:[#allocation9_spill] sm:$0xff] }
0x2181   : > { %v11268_v25 = vpop.f32.mrb[90].mxu0 }
0x2182   : > { %v11906_v12 = vadd.f32 %v11882_v51, %v20862_v9  ;;  %v11349_v20 = vadd.f32 %v11268_v25, %v20190_v61  ;;  %v11828_v0 = vadd.f32 %v20438_v8, %v11348_v34  ;;  %v11270_v37 = vpop.f32.mrb[91].mxu0  ;;  %v20863_v8 = vld [vmem:[#allocation7_spill] sm:$0xff] }
0x2183   : > { %v20864_v62 = vmax.f32 %v20863_v8, 0.0 }
0x2184   : > { %v11859_v31 = vadd.f32 %v20485_v17, %v11828_v0  ;;  %v11829_v60 = vadd.f32 %v20440_v45, %v11349_v20  ;;  %v11929_v4 = vpack.c.bf16 %v11906_v12, %v11905_v38 }
0x2186   : > { %v11883_v58 = vmax.f32 %v11859_v31, 0.0  ;;  %v11860_v41 = vadd.f32 %v20485_v17, %v11829_v60  ;;  %v11953_v39 = vsel %vm929_vm2, %v11929_v4, 0  ;;  %v20868_v31 = vld [vmem:[#allocation8_spill] sm:$0xff] }
0x2187   : > { %v11273_v56 = vpop.f32.mrb[92].mxu0  ;;  %11988 = vmatpush1.bf16.xpose.msra.mxu0 %v11953_v39 }
0x2188   : > { %v11884_v27 = vmax.f32 %v11860_v41, 0.0  ;;  %v11350_v21 = vadd.f32 %v11273_v56, %v20201_v52  ;;  %v11275_v46 = vpop.f32.mrb[93].mxu0  ;;  %11989 = vmatprep.subr.bf16.mxu0 %v20831_v5  ;;  %v11907_v55 = vadd.f32 %v11883_v58, %v20864_v62 }
0x2189   : > { %v11276_v61 = vpop.f32.mrb[94].mxu0 }
0x218a   : > { %v11908_v45 = vadd.f32 %v11884_v27, %v20865_v23  ;;  %v11351_v13 = vadd.f32 %v11276_v61, %v20205_v6  ;;  %v11830_v1 = vadd.f32 %v20442_v32, %v11350_v21  ;;  %v11278_v51 = vpop.f32.mrb[95].mxu0  ;;  %v20866_v32 = vld [vmem:[#allocation6_spill] sm:$0xff] }
0x218b   : > { %v20867_v0 = vmax.f32 %v20866_v32, 0.0 }
0x218c   : > { %v11861_v34 = vadd.f32 %v20485_v17, %v11830_v1  ;;  %v11831_v29 = vadd.f32 %v20444_v2, %v11351_v13  ;;  %v11930_v25 = vpack.c.bf16 %v11908_v45, %v11907_v55  ;;  %v20869_v2 = vmax.f32 %v20868_v31, 0.0  ;;  %v20872_v13 = vld [vmem:[#allocation12_spill] sm:$0xff] }
0x218e   : > { %v11885_v52 = vmax.f32 %v11861_v34, 0.0  ;;  %v11862_v30 = vadd.f32 %v20485_v17, %v11831_v29  ;;  %v11956_v57 = vsel %vm929_vm2, %v11930_v25, 0 }
0x218f   : > { %v11281_v38 = vpop.f32.mrb[96].mxu0  ;;  %11990 = vmatpush1.bf16.xpose.msra.mxu0 %v11956_v57 }
0x2190   : > { %v11886_v9 = vmax.f32 %v11862_v30, 0.0  ;;  %v11352_v12 = vadd.f32 %v11281_v38, %v20216_v42  ;;  %v11283_v20 = vpop.f32.mrb[97].mxu0  ;;  %11991 = vmatprep.subr.bf16.mxu0 %v20831_v5  ;;  %v11909_v37 = vadd.f32 %v11885_v52, %v20867_v0  ;;  %v20875_v0 = vld [vmem:[#allocation13_spill] sm:$0xff] }
0x2191   : > { %v11284_v6 = vpop.f32.mrb[98].mxu0 }
0x2192   : > { %v11910_v60 = vadd.f32 %v11886_v9, %v20869_v2  ;;  %v11353_v4 = vadd.f32 %v11284_v6, %v20220_v10  ;;  %v11832_v58 = vadd.f32 %v20446_v18, %v11352_v12  ;;  %v11286_v41 = vpop.f32.mrb[99].mxu0  ;;  %v20870_v18 = vld [vmem:[#allocation11_spill] sm:$0xff] }
0x2193   : > { %v20871_v23 = vmax.f32 %v20870_v18, 0.0 }
0x2194   : > { %v11863_v39 = vadd.f32 %v20485_v17, %v11832_v58  ;;  %v11833_v56 = vadd.f32 %v20448_v22, %v11353_v4  ;;  %v11931_v42 = vpack.c.bf16 %v11910_v60, %v11909_v37 }
0x2196   : > { %v11887_v27 = vmax.f32 %v11863_v39, 0.0  ;;  %v11864_v21 = vadd.f32 %v20485_v17, %v11833_v56  ;;  %v11959_v46 = vsel %vm929_vm2, %v11931_v42, 0 }
0x2197   : > { %v11289_v61 = vpop.f32.mrb[100].mxu0  ;;  %11992 = vmatpush1.bf16.xpose.msra.mxu0 %v11959_v46 }
0x2198   : > { %v11888_v8 = vmax.f32 %v11864_v21, 0.0  ;;  %v11354_v62 = vadd.f32 %v11289_v61, %v20231_v35  ;;  %v11291_v55 = vpop.f32.mrb[101].mxu0  ;;  %11993 = vmatprep.subr.bf16.mxu0 %v20831_v5  ;;  %v11911_v45 = vadd.f32 %v11887_v27, %v20871_v23 }
0x2199   : > { %v11292_v10 = vpop.f32.mrb[102].mxu0 }
0x219a   : > { %v11912_v22 = vadd.f32 %v11888_v8, %v20872_v13  ;;  %v11355_v1 = vadd.f32 %v11292_v10, %v20235_v16  ;;  %v11834_v51 = vadd.f32 %v20450_v36, %v11354_v62  ;;  %v11294_v34 = vpop.f32.mrb[103].mxu0  ;;  %v20873_v36 = vld [vmem:[#allocation10_spill] sm:$0xff]  ;;  %v20878_v8 = vld [vmem:[#allocation17_spill] sm:$0xff] }
0x219b   : > { %v20874_v6 = vmax.f32 %v20873_v36, 0.0 }
0x219c   : > { %v11865_v29 = vadd.f32 %v20485_v17, %v11834_v51  ;;  %v11835_v25 = vadd.f32 %v20452_v19, %v11355_v1  ;;  %v11932_v52 = vpack.c.bf16 %v11912_v22, %v11911_v45 }
0x219e   : > { %v11889_v35 = vmax.f32 %v11865_v29, 0.0  ;;  %v11866_v30 = vadd.f32 %v20485_v17, %v11835_v25  ;;  %v11962_v57 = vsel %vm929_vm2, %v11932_v52, 0 }
0x219f   : > { %v11297_v38 = vpop.f32.mrb[104].mxu0  ;;  %11994 = vmatpush1.bf16.xpose.msra.mxu0 %v11962_v57 }
0x21a0   : > { %v11890_v9 = vmax.f32 %v11866_v30, 0.0  ;;  %v11356_v12 = vadd.f32 %v11297_v38, %v20246_v50  ;;  %v11299_v20 = vpop.f32.mrb[105].mxu0  ;;  %11995 = vmatprep.subr.bf16.mxu0 %v20831_v5  ;;  %v11913_v32 = vadd.f32 %v11889_v35, %v20874_v6  ;;  %v20881_v35 = vld [vmem:[#allocation16_spill] sm:$0xff] }
0x21a1   : > { %v11300_v16 = vpop.f32.mrb[106].mxu0 }
0x21a2   : > { %v11914_v19 = vadd.f32 %v11890_v9, %v20875_v0  ;;  %v11357_v37 = vadd.f32 %v11300_v16, %v20250_v48  ;;  %v11836_v31 = vadd.f32 %v20454_v24, %v11356_v12  ;;  %v11302_v2 = vpop.f32.mrb[107].mxu0  ;;  %v20876_v24 = vld [vmem:[#allocation15_spill] sm:$0xff] }
0x21a3   : > { %v20877_v46 = vmax.f32 %v20876_v24, 0.0 }
0x21a4   : > { %v11867_v60 = vadd.f32 %v20485_v17, %v11836_v31  ;;  %v11837_v4 = vadd.f32 %v20456_v11, %v11357_v37  ;;  %v11933_v58 = vpack.c.bf16 %v11914_v19, %v11913_v32 }
0x21a6   : > { %v11891_v50 = vmax.f32 %v11867_v60, 0.0  ;;  %v11868_v41 = vadd.f32 %v20485_v17, %v11837_v4  ;;  %v11965_v39 = vsel %vm929_vm2, %v11933_v58, 0  ;;  %v20885_v60 = vld [vmem:[#allocation20_spill] sm:$0xff] }
0x21a7   : > { %v11305_v56 = vpop.f32.mrb[108].mxu0  ;;  %11996 = vmatpush1.bf16.xpose.msra.mxu0 %v11965_v39 }
0x21a8   : > { %v11892_v42 = vmax.f32 %v11868_v41, 0.0  ;;  %v11358_v27 = vadd.f32 %v11305_v56, %v20261_v40  ;;  %v11307_v21 = vpop.f32.mrb[109].mxu0  ;;  %11997 = vmatprep.subr.bf16.mxu0 %v20831_v5  ;;  %v11915_v61 = vadd.f32 %v11891_v50, %v20877_v46 }
0x21a9   : > { %v11308_v48 = vpop.f32.mrb[110].mxu0 }
0x21aa   : > { %v11916_v11 = vadd.f32 %v11892_v42, %v20878_v8  ;;  %v11359_v62 = vadd.f32 %v11308_v48, %v20265_v26  ;;  %v11838_v55 = vadd.f32 %v20458_v43, %v11358_v27  ;;  %v11310_v10 = vpop.f32.mrb[111].mxu0  ;;  %v20879_v43 = vld [vmem:[#allocation14_spill] sm:$0xff] }
0x21ab   : > { %v20880_v25 = vmax.f32 %v20879_v43, 0.0 }
0x21ac   : > { %v11869_v18 = vadd.f32 %v20485_v17, %v11838_v55  ;;  %v11839_v23 = vadd.f32 %v20460_v63, %v11359_v62  ;;  %v11934_v45 = vpack.c.bf16 %v11916_v11, %v11915_v61  ;;  %v20882_v63 = vmax.f32 %v20881_v35, 0.0  ;;  %v20888_v11 = vld [vmem:[#allocation21_spill] sm:$0xff] }
0x21ae   : > { %v11893_v40 = vmax.f32 %v11869_v18, 0.0  ;;  %v11870_v13 = vadd.f32 %v20485_v17, %v11839_v23  ;;  %v11968_v22 = vsel %vm929_vm2, %v11934_v45, 0 }
0x21af   : > { %v11313_v1 = vpop.f32.mrb[112].mxu0  ;;  %11998 = vmatpush1.bf16.xpose.msra.mxu0 %v11968_v22 }
0x21b0   : > { %v11894_v51 = vmax.f32 %v11870_v13, 0.0  ;;  %v11360_v34 = vadd.f32 %v11313_v1, %v20276_v54  ;;  %v11315_v29 = vpop.f32.mrb[113].mxu0  ;;  %11999 = vmatprep.subr.bf16.mxu0 %v20831_v5  ;;  %v11917_v52 = vadd.f32 %v11893_v40, %v20880_v25  ;;  %v20892_v25 = vld [vmem:[#allocation25_spill] sm:$0xff] }
0x21b1   : > { %v11316_v26 = vpop.f32.mrb[114].mxu0 }
0x21b2   : > { %v11918_v30 = vadd.f32 %v11894_v51, %v20882_v63  ;;  %v11361_v57 = vadd.f32 %v11316_v26, %v20280_v47  ;;  %v11840_v38 = vadd.f32 %v20462_v14, %v11360_v34  ;;  %v11318_v9 = vpop.f32.mrb[115].mxu0  ;;  %v20883_v14 = vld [vmem:[#allocation19_spill] sm:$0xff]  ;;  %v20889_v51 = vld [vmem:[#allocation26_spill] sm:$0xff] }
0x21b3   : > { %v20884_v31 = vmax.f32 %v20883_v14, 0.0  ;;  %v20894_v63 = vld [vmem:[#allocation27_spill] sm:$0xff]  ;;  %v20895_v9 = vld [vmem:[#allocation30_spill] sm:$0xff] }
0x21b4   : > { %v11871_v12 = vadd.f32 %v20485_v17, %v11840_v38  ;;  %v11841_v20 = vadd.f32 %v20464_v49, %v11361_v57  ;;  %v11935_v54 = vpack.c.bf16 %v11918_v30, %v11917_v52  ;;  %v20893_v52 = vld [vmem:[#allocation28_spill] sm:$0xff] }
0x21b6   : > { %v11895_v16 = vmax.f32 %v11871_v12, 0.0  ;;  %v11872_v36 = vadd.f32 %v20485_v17, %v11841_v20  ;;  %v11971_v6 = vsel %vm929_vm2, %v11935_v54, 0 }
0x21b7   : > { %v11321_v32 = vpop.f32.mrb[116].mxu0  ;;  %12000 = vmatpush1.bf16.xpose.msra.mxu0 %v11971_v6 }
0x21b8   : > { %v11896_v0 = vmax.f32 %v11872_v36, 0.0  ;;  %v11362_v19 = vadd.f32 %v11321_v32, %v20291_v28  ;;  %v11323_v37 = vpop.f32.mrb[117].mxu0  ;;  %12001 = vmatprep.subr.bf16.mxu0 %v20831_v5  ;;  %v11919_v2 = vadd.f32 %v11895_v16, %v20884_v31  ;;  %v20896_v32 = vld [vmem:[#allocation22_spill] sm:$0xff] }
0x21b9   : > { %v11324_v47 = vpop.f32.mrb[118].mxu0  ;;  %v20898_v37 = vld [vmem:[#allocation24_spill] sm:$0xff] }
0x21ba   : > { %v11920_v49 = vadd.f32 %v11896_v0, %v20885_v60  ;;  %v11363_v4 = vadd.f32 %v11324_v47, %v20295_v59  ;;  %v11842_v58 = vadd.f32 %v20466_v15, %v11362_v19  ;;  %v11326_v50 = vpop.f32.mrb[119].mxu0  ;;  %v20886_v15 = vld [vmem:[#allocation18_spill] sm:$0xff]  ;;  %v20897_v0 = vmax.f32 %v20896_v32, 0.0  ;;  %v11944_v60 = vpop.permute.xlu1 %11943 }
0x21bb   : > { %v20887_v61 = vmax.f32 %v20886_v15, 0.0  ;;  %v20899_v47 = vmax.f32 %v20898_v37, 0.0 }
0x21bc   : > { %v11873_v41 = vadd.f32 %v20485_v17, %v11842_v58  ;;  %v11843_v39 = vadd.f32 %v20468_v53, %v11363_v4  ;;  %v11936_v56 = vpack.c.bf16 %v11920_v49, %v11919_v2 }
0x21be   : > { %v11897_v28 = vmax.f32 %v11873_v41, 0.0  ;;  %v11874_v42 = vadd.f32 %v20485_v17, %v11843_v39  ;;  %v11974_v27 = vsel %vm929_vm2, %v11936_v56, 0 }
0x21bf   : > { %v11329_v21 = vpop.f32.mrb[120].mxu0  ;;  %12002 = vmatpush1.bf16.xpose.msra.mxu0 %v11974_v27 }
0x21c0   : > { %v11898_v48 = vmax.f32 %v11874_v42, 0.0  ;;  %v11364_v24 = vadd.f32 %v11329_v21, %v20306_v33  ;;  %v11331_v46 = vpop.f32.mrb[121].mxu0  ;;  %12003 = vmatprep.subr.bf16.mxu0 %v20831_v5  ;;  %v11921_v8 = vadd.f32 %v11897_v28, %v20887_v61 }
0x21c1   : > { %v11332_v59 = vpop.f32.mrb[122].mxu0 }
0x21c2   : > { %v11922_v53 = vadd.f32 %v11898_v48, %v20888_v11  ;;  %v11365_v62 = vadd.f32 %v11332_v59, %v20310_v3  ;;  %v11844_v55 = vadd.f32 %v20470_v44, %v11364_v24  ;;  %v11334_v10 = vpop.f32.mrb[123].mxu0  ;;  %v20890_v44 = vld [vmem:[#allocation23_spill] sm:$0xff] }
0x21c3   : > { %v20891_v26 = vmax.f32 %v20890_v44, 0.0 }
0x21c4   : > { %v11875_v18 = vadd.f32 %v20485_v17, %v11844_v55  ;;  %v11845_v23 = vadd.f32 %v20472_v7, %v11365_v62  ;;  %v11937_v45 = vpack.c.bf16 %v11922_v53, %v11921_v8 }
0x21c6   : > { %v11899_v33 = vmax.f32 %v11875_v18, 0.0  ;;  %v11876_v40 = vadd.f32 %v20485_v17, %v11845_v23  ;;  %v11977_v13 = vsel %vm929_vm2, %v11937_v45, 0 }
0x21c7   : > { %v11337_v22 = vpop.f32.mrb[124].mxu0  ;;  %12004 = vmatpush1.bf16.xpose.msra.mxu0 %v11977_v13 }
0x21c8   : > { %v11900_v1 = vmax.f32 %v11876_v40, 0.0  ;;  %v11366_v34 = vadd.f32 %v11337_v22, %v20889_v51  ;;  %v11339_v29 = vpop.f32.mrb[125].mxu0  ;;  %12005 = vmatprep.subr.bf16.mxu0 %v20831_v5  ;;  %v11923_v43 = vadd.f32 %v11899_v33, %v20891_v26 }
0x21c9   : > { %v11340_v3 = vpop.f32.mrb[126].mxu0 }
0x21ca   : > { %v11924_v7 = vadd.f32 %v11900_v1, %v20892_v25  ;;  %v11367_v35 = vadd.f32 %v11340_v3, %v20893_v52  ;;  %v11846_v30 = vadd.f32 %v20894_v63, %v11366_v34  ;;  %v11342_v57 = vpop.f32.mrb[127].mxu0 }
0x21cc   : > { %v11877_v38 = vadd.f32 %v20485_v17, %v11846_v30  ;;  %v11847_v12 = vadd.f32 %v20895_v9, %v11367_v35  ;;  %v11938_v20 = vpack.c.bf16 %v11924_v7, %v11923_v43 }
0x21ce   : > { %v11901_v54 = vmax.f32 %v11877_v38, 0.0  ;;  %v11878_v16 = vadd.f32 %v20485_v17, %v11847_v12  ;;  %v11980_v36 = vsel %vm929_vm2, %v11938_v20, 0  ;;  %v11927_v17 = vld [vmem:[%s20649_s19] sm:$0xf] }
0x21cf   : > { %12006 = vmatpush1.bf16.xpose.msra.mxu0 %v11980_v36 }
0x21d0   : > { %v11902_v6 = vmax.f32 %v11878_v16, 0.0  ;;  %12007 = vmatprep.subr.bf16.mxu0 %v20831_v5  ;;  %v11925_v19 = vadd.f32 %v11901_v54, %v20897_v0 }
0x21d2   : > { %v11926_v14 = vadd.f32 %v11902_v6, %v20899_v47 }
0x21d4   : > { %v11939_v31 = vpack.c.bf16 %v11926_v14, %v11925_v19 }
0x21d6   : > { %v11983_v2 = vsel %vm929_vm2, %v11939_v31, 0 }
0x21d7   : > { %12008 = vmatpush1.bf16.xpose.msra.mxu0 %v11983_v2 }
0x21de   : > { %13399 = vmatmul.mubr.msk.bf16.vlgmr.msra.gmra.mrb[128].mxu0 %vm929_vm2, %v11927_v17 }
0x22b1   : > { %v12019_v49 = vpop.f32.mrb[128].mxu0 }
0x22b2   : > { %v12021_v5 = vpop.f32.mrb[129].mxu0  ;;  %v12020_v4 = vadd.f32 %v12019_v49, %v11944_v60 }
0x22b3   : > { %v12023_v58 = vpop.f32.mrb[130].mxu0  ;;  %v12022_v50 = vadd.f32 %v12021_v5, %v11944_v60 }
0x22b4   : > { %12026 = vst [vmem:[%s670_s24] sm:$0xff] %v12020_v4  ;;  %v12024_v41 = vpop.f32.mrb[131].mxu0 }
0x22b5   : > { %12027 = vst.msk [vmem:[%s670_s24 + $0x8] sm:$0xff] %vm931_vm3, %v12022_v50 }
0x22b6 PF: > { %s31_s2 = sadd.s32 1, %s16055_s2  }
0x22b7   : > { %p28_p4 = scmp.ge.s32.totalorder %s31_s2, 4  }
0x22b9   :  { %30 = sbr.rel (!%p28_p4) target bundleno = 7 (0x7), region = 178 }

</bundles_post_ra>
